<compile_context>
chip_gen: v7x
topology: tpu7x:2x2x1
jax: 0.10.0
libtpu: 0.0.40
codegen_flags: <defaults>
</compile_context>

<pallas_src>
import functools

import numpy as np
import jax
import jax.numpy as jnp
from jax import lax
from jax.experimental import pallas as pl
from jax.experimental.pallas import tpu as pltpu


def _round_up(v, m):
    return (v + m - 1) // m * m


def _gin_kernel(xk_ref, xq_ref, idx_ref, w_ref, b_ref, eps_ref,
                o_ref, sel_ref, acc_ref, *, precision):
    # xk_ref:  (1, C_pad, TK)    f32  key-chunk columns of x
    # xq_ref:  (1, C_pad, TN)    f32  query-tile columns of x (self term)
    # idx_ref: (1, K,     TN)    i32  neighbor ids for this query tile
    # w_ref:   (Cout_pad, C_pad) f32  1x1 conv weight
    # b_ref:   (Cout_pad, 1)     f32  conv bias
    # eps_ref: (1, 1)            f32  GIN epsilon (SMEM, scalar path)
    # o_ref:   (1, Cout_pad, TN) f32
    # sel_ref: (TK, TN)          f32  VMEM scratch - selector chunk
    # acc_ref: (C_pad, TN)       f32  VMEM scratch - aggregation accumulator
    kc = pl.program_id(2)

    # Init accumulator with the (1 + eps) self term on the first key chunk.
    @pl.when(kc == 0)
    def _():
        acc_ref[...] = (1.0 + eps_ref[0, 0]) * xq_ref[0]

    # Build the selector chunk strip-by-strip into VMEM scratch:
    #   sel[m, q] = #{k : idx[q, k] == kc*TK + m}
    # Strips of 32 key rows keep the live vreg set small (no spills) for any TK.
    idx = idx_ref[0]                                # (K, TN) i32
    k_nbr = idx.shape[0]
    tk, tn = sel_ref.shape
    ts = 32                                         # strip height (divides TK)
    key_base = kc * tk
    for s in range(tk // ts):
        key_ids = key_base + s * ts + lax.broadcasted_iota(jnp.int32, (ts, tn), 0)
        counts = jnp.zeros((ts, tn), jnp.int32)
        for k in range(k_nbr):                      # small static K -> unrolled
            counts = counts + (idx[k:k + 1, :] == key_ids).astype(jnp.int32)
        sel_ref[s * ts:(s + 1) * ts, :] = counts.astype(jnp.float32)

    # Gather + neighbor-sum aggregation: one MXU matmul per key chunk.
    acc_ref[...] += jnp.dot(xk_ref[0], sel_ref[...],
                            preferred_element_type=jnp.float32,
                            precision=precision)

    # Finalize on the last key chunk: 1x1 conv + bias + ReLU, lane-dense store.
    @pl.when(kc == pl.num_programs(2) - 1)
    def _():
        out = jnp.dot(w_ref[...], acc_ref[...],
                      preferred_element_type=jnp.float32,
                      precision=precision) + b_ref[...]
        o_ref[0] = jnp.maximum(out, 0.0).astype(o_ref.dtype)


def ginconv2d_forward(x, edge_index, w, bias, eps,
                      precision=lax.Precision.HIGHEST):
    """x: (B, C, N, 1) f32; edge_index: (2, B, N, K) int32;
       w: (Cout, C, 1, 1) f32; bias: (Cout,) f32; eps: scalar -> (B, Cout, N, 1)."""
    B, C, N, _ = x.shape
    K = edge_index.shape[-1]
    Cout = w.shape[0]

    TN = 256   # query tile (lane axis of selector / agg / output)
    TK = 256   # key chunk  (reduction axis of the selector matmul)
    C_pad = _round_up(C, 128)
    Cout_pad = _round_up(Cout, 128)
    N_pad = _round_up(N, max(TN, TK))   # never let the lane width drop below 128
    NQ = N_pad // TN
    NKC = N_pad // TK

    # Channels-first, zero-padded keys (padded key columns contribute 0).
    x_cn = x[..., 0].astype(jnp.float32)                               # (B, C, N)
    x_p = jnp.pad(x_cn, ((0, 0), (0, C_pad - C), (0, N_pad - N)))      # (B, C_pad, N_pad)

    # Neighbor ids, queries on the lane axis; padded queries point out of range
    # (== N_pad) so they never match any key and count zero.
    idx = edge_index[0].astype(jnp.int32)                              # (B, N, K)
    idx_t = jnp.transpose(idx, (0, 2, 1))                              # (B, K, N)
    idx_t = jnp.pad(idx_t, ((0, 0), (0, 0), (0, N_pad - N)),
                    constant_values=N_pad)                             # (B, K, N_pad)

    w_p = jnp.pad(w[:, :, 0, 0].astype(jnp.float32),
                  ((0, Cout_pad - Cout), (0, C_pad - C)))              # (Cout_pad, C_pad)
    b_p = jnp.pad(bias.astype(jnp.float32),
                  (0, Cout_pad - Cout)).reshape(Cout_pad, 1)           # (Cout_pad, 1)
    eps_arr = jnp.asarray(eps, jnp.float32).reshape(1, 1)              # (1, 1) -> SMEM

    flops = int(B * (2 * C_pad * N_pad * N_pad          # selector matmuls
                     + 2 * K * N_pad * N_pad            # selector build (cmp+add)
                     + 2 * Cout_pad * C_pad * N_pad     # 1x1 conv matmuls
                     + 2 * C_pad * N_pad))              # self term
    bytes_accessed = int(4 * (B * NQ * C_pad * N_pad    # x key chunks (re-read per q tile)
                              + B * C_pad * N_pad       # x self tiles (once per q tile)
                              + B * K * N_pad           # neighbor ids
                              + Cout_pad * C_pad + Cout_pad
                              + B * Cout_pad * N_pad))  # output

    kernel = functools.partial(_gin_kernel, precision=precision)

    out_p = pl.pallas_call(
        kernel,
        out_shape=jax.ShapeDtypeStruct((B, Cout_pad, N_pad), jnp.float32),
        grid=(B, NQ, NKC),
        in_specs=[
            pl.BlockSpec((1, C_pad, TK), lambda b, q, kc: (b, 0, kc)),   # x (keys)
            pl.BlockSpec((1, C_pad, TN), lambda b, q, kc: (b, 0, q)),    # x (self)
            pl.BlockSpec((1, K, TN), lambda b, q, kc: (b, 0, q)),        # neighbor ids
            pl.BlockSpec((Cout_pad, C_pad), lambda b, q, kc: (0, 0)),    # conv weight
            pl.BlockSpec((Cout_pad, 1), lambda b, q, kc: (0, 0)),        # conv bias
            pl.BlockSpec(memory_space=pltpu.MemorySpace.SMEM),           # eps (scalar)
        ],
        out_specs=pl.BlockSpec((1, Cout_pad, TN), lambda b, q, kc: (b, 0, q)),
        scratch_shapes=[
            pltpu.VMEM((TK, TN), jnp.float32),      # selector chunk
            pltpu.VMEM((C_pad, TN), jnp.float32),   # aggregation accumulator
        ],
        compiler_params=pltpu.CompilerParams(
            dimension_semantics=("parallel", "parallel", "arbitrary"),
            vmem_limit_bytes=32 * 1024 * 1024,   # load-bearing on v5e (16 MiB default)
        ),
        cost_estimate=pl.CostEstimate(flops=flops, transcendentals=0,
                                      bytes_accessed=bytes_accessed),
    )(x_p, x_p, idx_t, w_p, b_p, eps_arr)

    return out_p[:, :Cout, :N][..., None]        # (B, Cout, N, 1)


# --------------------- pure-JAX reference (for verification) ---------------
def _gather(xs, idx):
    # xs: (B, C, N), idx: (B, N, K) -> out[b,c,n,k] = xs[b,c,idx[b,n,k]]
    B, C, N = xs.shape
    K = idx.shape[-1]
    idx_flat = jnp.broadcast_to(idx.reshape(B, 1, N * K), (B, C, N * K))
    return jnp.take_along_axis(xs, idx_flat, axis=2).reshape(B, C, N, K)


def ginconv2d_reference(x, edge_index, w, bias, eps):
    xs = x[..., 0]                                       # (B, C, N)
    x_j = _gather(xs, edge_index[0])                     # (B, C, N, K)
    agg = (1.0 + eps) * xs + jnp.sum(x_j, axis=-1)       # (B, C, N)
    out = jnp.einsum('oc,bcn->bon', w[:, :, 0, 0], agg,
                     precision=lax.Precision.HIGHEST) + bias[None, :, None]
    return jnp.maximum(out, 0.0)[..., None]              # (B, Cout, N, 1)


if __name__ == "__main__":
    key = jax.random.PRNGKey(0)
    B, C, N, K, Cout = 2, 4, 16, 8, 8

    k1, k2, k3, k4 = jax.random.split(key, 4)
    x = jax.random.normal(k1, (B, C, N, 1), dtype=jnp.float32)
    edge_index = jax.random.randint(k2, (2, B, N, K), 0, N, dtype=jnp.int32)
    # Conv2d(C -> Cout, kernel 1x1, bias=True) parameters
    w = jax.random.normal(k3, (Cout, C, 1, 1), dtype=jnp.float32) * 0.1
    bias = jax.random.normal(k4, (Cout,), dtype=jnp.float32) * 0.1
    eps = jnp.float32(0.25)   # learnable GIN epsilon (module init is 0.0)

    out = jax.block_until_ready(ginconv2d_forward(x, edge_index, w, bias, eps))
    ref = jax.block_until_ready(ginconv2d_reference(x, edge_index, w, bias, eps))

    np.testing.assert_allclose(np.asarray(out), np.asarray(ref),
                               rtol=1e-5, atol=1e-5)
    print("KERNEL_OK")
</pallas_src>

<mosaic_0001>
module attributes {stable_mosaic.version = 11 : i64} {
  func.func @_gin_kernel(%arg0: i32, %arg1: i32, %arg2: i32, %arg3: memref<1x128x256xf32, #tpu.memory_space<vmem>>, %arg4: memref<1x128x256xf32, #tpu.memory_space<vmem>>, %arg5: memref<1x8x256xi32, #tpu.memory_space<vmem>>, %arg6: memref<128x128xf32, #tpu.memory_space<vmem>>, %arg7: memref<128x1xf32, #tpu.memory_space<vmem>>, %arg8: memref<1x1xf32, #tpu.memory_space<smem>>, %arg9: memref<1x128x256xf32, #tpu.memory_space<vmem>>, %arg10: memref<256x256xf32, #tpu.memory_space<vmem>>, %arg11: memref<128x256xf32, #tpu.memory_space<vmem>>) attributes {dimension_semantics = [#tpu.dimension_semantics<parallel>, #tpu.dimension_semantics<parallel>, #tpu.dimension_semantics<arbitrary>], iteration_bounds = array<i64: 2, 1, 1>, scalar_prefetch = 0 : i64, scratch_operands = 2 : i64, tpu.core_type = #tpu.core_type<tc>, window_params = [{transform_indices = @transform_0, window_bounds = array<i64: 1, 128, 256>}, {transform_indices = @transform_1, window_bounds = array<i64: 1, 128, 256>}, {transform_indices = @transform_2, window_bounds = array<i64: 1, 8, 256>}, {pipeline_mode = #tpu.pipeline_mode<synchronous>, transform_indices = @transform_3, window_bounds = array<i64: 128, 128>}, {pipeline_mode = #tpu.pipeline_mode<synchronous>, transform_indices = @transform_4, window_bounds = array<i64: 128, 1>}, {transform_indices = @transform_5, window_bounds = array<i64: 1, 1>}, {transform_indices = @transform_6, window_bounds = array<i64: 1, 128, 256>}]} {
    %c0_i32 = arith.constant 0 : i32
    %0 = arith.cmpi eq, %arg2, %c0_i32 : i32
    %1 = arith.extui %0 : i1 to i32
    %c0_i32_0 = arith.constant 0 : i32
    %2 = arith.cmpi ne, %1, %c0_i32_0 : i32
    scf.if %2 {
      %c0_32 = arith.constant 0 : index
      %c0_33 = arith.constant 0 : index
      %392 = memref.load %arg8[%c0_32, %c0_33] : memref<1x1xf32, #tpu.memory_space<smem>>
      %cst_34 = arith.constant 1.000000e+00 : f32
      %393 = arith.addf %cst_34, %392 : f32
      %c0_35 = arith.constant 0 : index
      %c0_36 = arith.constant 0 : index
      %c0_37 = arith.constant 0 : index
      %394 = vector.load %arg4[%c0_35, %c0_36, %c0_37] : memref<1x128x256xf32, #tpu.memory_space<vmem>>, vector<1x128x256xf32>
      %395 = vector.shape_cast %394 : vector<1x128x256xf32> to vector<128x256xf32>
      %396 = vector.broadcast %393 : f32 to vector<128x256xf32>
      %397 = arith.mulf %396, %395 : vector<128x256xf32>
      %c0_38 = arith.constant 0 : index
      %c0_39 = arith.constant 0 : index
      %398 = vector.load %arg11[%c0_38, %c0_39] : memref<128x256xf32, #tpu.memory_space<vmem>>, vector<128x256xf32>
      tpu.vector_store %arg11[%c0_38, %c0_39], %397 {strides = array<i32>} : memref<128x256xf32, #tpu.memory_space<vmem>>, vector<128x256xf32>,
    } else {
    }
    %c0 = arith.constant 0 : index
    %c0_1 = arith.constant 0 : index
    %c0_2 = arith.constant 0 : index
    %3 = vector.load %arg5[%c0, %c0_1, %c0_2] : memref<1x8x256xi32, #tpu.memory_space<vmem>>, vector<1x8x256xi32>
    %4 = vector.shape_cast %3 : vector<1x8x256xi32> to vector<8x256xi32>
    %c256_i32 = arith.constant 256 : i32
    %5 = arith.muli %arg2, %c256_i32 : i32
    %c0_i32_3 = arith.constant 0 : i32
    %6 = arith.addi %5, %c0_i32_3 : i32
    %7 = tpu.iota {dimensions = array<i32: 0>} : vector<32x256xi32>
    %8 = vector.broadcast %6 : i32 to vector<32x256xi32>
    %9 = arith.addi %8, %7 : vector<32x256xi32>
    %c0_i32_4 = arith.constant 0 : i32
    %10 = vector.broadcast %c0_i32_4 : i32 to vector<32x256xi32>
    %11 = vector.extract_strided_slice %4 {offsets = [0, 0], sizes = [1, 256], strides = [1, 1]} : vector<8x256xi32> to vector<1x256xi32>
    %12 = vector.broadcast %11 : vector<1x256xi32> to vector<32x256xi32>
    %13 = arith.cmpi eq, %12, %9 : vector<32x256xi32>
    %14 = arith.extui %13 : vector<32x256xi1> to vector<32x256xi32>
    %15 = arith.addi %10, %14 : vector<32x256xi32>
    %16 = vector.extract_strided_slice %4 {offsets = [1, 0], sizes = [1, 256], strides = [1, 1]} : vector<8x256xi32> to vector<1x256xi32>
    %17 = vector.broadcast %16 : vector<1x256xi32> to vector<32x256xi32>
    %18 = arith.cmpi eq, %17, %9 : vector<32x256xi32>
    %19 = arith.extui %18 : vector<32x256xi1> to vector<32x256xi32>
    %20 = arith.addi %15, %19 : vector<32x256xi32>
    %21 = vector.extract_strided_slice %4 {offsets = [2, 0], sizes = [1, 256], strides = [1, 1]} : vector<8x256xi32> to vector<1x256xi32>
    %22 = vector.broadcast %21 : vector<1x256xi32> to vector<32x256xi32>
    %23 = arith.cmpi eq, %22, %9 : vector<32x256xi32>
    %24 = arith.extui %23 : vector<32x256xi1> to vector<32x256xi32>
    %25 = arith.addi %20, %24 : vector<32x256xi32>
    %26 = vector.extract_strided_slice %4 {offsets = [3, 0], sizes = [1, 256], strides = [1, 1]} : vector<8x256xi32> to vector<1x256xi32>
    %27 = vector.broadcast %26 : vector<1x256xi32> to vector<32x256xi32>
    %28 = arith.cmpi eq, %27, %9 : vector<32x256xi32>
    %29 = arith.extui %28 : vector<32x256xi1> to vector<32x256xi32>
    %30 = arith.addi %25, %29 : vector<32x256xi32>
    %31 = vector.extract_strided_slice %4 {offsets = [4, 0], sizes = [1, 256], strides = [1, 1]} : vector<8x256xi32> to vector<1x256xi32>
    %32 = vector.broadcast %31 : vector<1x256xi32> to vector<32x256xi32>
    %33 = arith.cmpi eq, %32, %9 : vector<32x256xi32>
    %34 = arith.extui %33 : vector<32x256xi1> to vector<32x256xi32>
    %35 = arith.addi %30, %34 : vector<32x256xi32>
    %36 = vector.extract_strided_slice %4 {offsets = [5, 0], sizes = [1, 256], strides = [1, 1]} : vector<8x256xi32> to vector<1x256xi32>
    %37 = vector.broadcast %36 : vector<1x256xi32> to vector<32x256xi32>
    %38 = arith.cmpi eq, %37, %9 : vector<32x256xi32>
    %39 = arith.extui %38 : vector<32x256xi1> to vector<32x256xi32>
    %40 = arith.addi %35, %39 : vector<32x256xi32>
    %41 = vector.extract_strided_slice %4 {offsets = [6, 0], sizes = [1, 256], strides = [1, 1]} : vector<8x256xi32> to vector<1x256xi32>
    %42 = vector.broadcast %41 : vector<1x256xi32> to vector<32x256xi32>
    %43 = arith.cmpi eq, %42, %9 : vector<32x256xi32>
    %44 = arith.extui %43 : vector<32x256xi1> to vector<32x256xi32>
    %45 = arith.addi %40, %44 : vector<32x256xi32>
    %46 = vector.extract_strided_slice %4 {offsets = [7, 0], sizes = [1, 256], strides = [1, 1]} : vector<8x256xi32> to vector<1x256xi32>
    %47 = vector.broadcast %46 : vector<1x256xi32> to vector<32x256xi32>
    %48 = arith.cmpi eq, %47, %9 : vector<32x256xi32>
    %49 = arith.extui %48 : vector<32x256xi1> to vector<32x256xi32>
    %50 = arith.addi %45, %49 : vector<32x256xi32>
    %51 = arith.sitofp %50 : vector<32x256xi32> to vector<32x256xf32>
    %c0_5 = arith.constant 0 : index
    %c0_6 = arith.constant 0 : index
    %52 = vector.load %arg10[%c0_5, %c0_6] : memref<256x256xf32, #tpu.memory_space<vmem>>, vector<32x256xf32>
    tpu.vector_store %arg10[%c0_5, %c0_6], %51 {strides = array<i32>} : memref<256x256xf32, #tpu.memory_space<vmem>>, vector<32x256xf32>,
    %c32_i32 = arith.constant 32 : i32
    %53 = arith.addi %5, %c32_i32 : i32
    %54 = tpu.iota {dimensions = array<i32: 0>} : vector<32x256xi32>
    %55 = vector.broadcast %53 : i32 to vector<32x256xi32>
    %56 = arith.addi %55, %54 : vector<32x256xi32>
    %c0_i32_7 = arith.constant 0 : i32
    %57 = vector.broadcast %c0_i32_7 : i32 to vector<32x256xi32>
    %58 = vector.extract_strided_slice %4 {offsets = [0, 0], sizes = [1, 256], strides = [1, 1]} : vector<8x256xi32> to vector<1x256xi32>
    %59 = vector.broadcast %58 : vector<1x256xi32> to vector<32x256xi32>
    %60 = arith.cmpi eq, %59, %56 : vector<32x256xi32>
    %61 = arith.extui %60 : vector<32x256xi1> to vector<32x256xi32>
    %62 = arith.addi %57, %61 : vector<32x256xi32>
    %63 = vector.extract_strided_slice %4 {offsets = [1, 0], sizes = [1, 256], strides = [1, 1]} : vector<8x256xi32> to vector<1x256xi32>
    %64 = vector.broadcast %63 : vector<1x256xi32> to vector<32x256xi32>
    %65 = arith.cmpi eq, %64, %56 : vector<32x256xi32>
    %66 = arith.extui %65 : vector<32x256xi1> to vector<32x256xi32>
    %67 = arith.addi %62, %66 : vector<32x256xi32>
    %68 = vector.extract_strided_slice %4 {offsets = [2, 0], sizes = [1, 256], strides = [1, 1]} : vector<8x256xi32> to vector<1x256xi32>
    %69 = vector.broadcast %68 : vector<1x256xi32> to vector<32x256xi32>
    %70 = arith.cmpi eq, %69, %56 : vector<32x256xi32>
    %71 = arith.extui %70 : vector<32x256xi1> to vector<32x256xi32>
    %72 = arith.addi %67, %71 : vector<32x256xi32>
    %73 = vector.extract_strided_slice %4 {offsets = [3, 0], sizes = [1, 256], strides = [1, 1]} : vector<8x256xi32> to vector<1x256xi32>
    %74 = vector.broadcast %73 : vector<1x256xi32> to vector<32x256xi32>
    %75 = arith.cmpi eq, %74, %56 : vector<32x256xi32>
    %76 = arith.extui %75 : vector<32x256xi1> to vector<32x256xi32>
    %77 = arith.addi %72, %76 : vector<32x256xi32>
    %78 = vector.extract_strided_slice %4 {offsets = [4, 0], sizes = [1, 256], strides = [1, 1]} : vector<8x256xi32> to vector<1x256xi32>
    %79 = vector.broadcast %78 : vector<1x256xi32> to vector<32x256xi32>
    %80 = arith.cmpi eq, %79, %56 : vector<32x256xi32>
    %81 = arith.extui %80 : vector<32x256xi1> to vector<32x256xi32>
    %82 = arith.addi %77, %81 : vector<32x256xi32>
    %83 = vector.extract_strided_slice %4 {offsets = [5, 0], sizes = [1, 256], strides = [1, 1]} : vector<8x256xi32> to vector<1x256xi32>
    %84 = vector.broadcast %83 : vector<1x256xi32> to vector<32x256xi32>
    %85 = arith.cmpi eq, %84, %56 : vector<32x256xi32>
    %86 = arith.extui %85 : vector<32x256xi1> to vector<32x256xi32>
    %87 = arith.addi %82, %86 : vector<32x256xi32>
    %88 = vector.extract_strided_slice %4 {offsets = [6, 0], sizes = [1, 256], strides = [1, 1]} : vector<8x256xi32> to vector<1x256xi32>
    %89 = vector.broadcast %88 : vector<1x256xi32> to vector<32x256xi32>
    %90 = arith.cmpi eq, %89, %56 : vector<32x256xi32>
    %91 = arith.extui %90 : vector<32x256xi1> to vector<32x256xi32>
    %92 = arith.addi %87, %91 : vector<32x256xi32>
    %93 = vector.extract_strided_slice %4 {offsets = [7, 0], sizes = [1, 256], strides = [1, 1]} : vector<8x256xi32> to vector<1x256xi32>
    %94 = vector.broadcast %93 : vector<1x256xi32> to vector<32x256xi32>
    %95 = arith.cmpi eq, %94, %56 : vector<32x256xi32>
    %96 = arith.extui %95 : vector<32x256xi1> to vector<32x256xi32>
    %97 = arith.addi %92, %96 : vector<32x256xi32>
    %98 = arith.sitofp %97 : vector<32x256xi32> to vector<32x256xf32>
    %c32 = arith.constant 32 : index
    %c0_8 = arith.constant 0 : index
    %99 = vector.load %arg10[%c32, %c0_8] : memref<256x256xf32, #tpu.memory_space<vmem>>, vector<32x256xf32>
    tpu.vector_store %arg10[%c32, %c0_8], %98 {strides = array<i32>} : memref<256x256xf32, #tpu.memory_space<vmem>>, vector<32x256xf32>,
    %c64_i32 = arith.constant 64 : i32
    %100 = arith.addi %5, %c64_i32 : i32
    %101 = tpu.iota {dimensions = array<i32: 0>} : vector<32x256xi32>
    %102 = vector.broadcast %100 : i32 to vector<32x256xi32>
    %103 = arith.addi %102, %101 : vector<32x256xi32>
    %c0_i32_9 = arith.constant 0 : i32
    %104 = vector.broadcast %c0_i32_9 : i32 to vector<32x256xi32>
    %105 = vector.extract_strided_slice %4 {offsets = [0, 0], sizes = [1, 256], strides = [1, 1]} : vector<8x256xi32> to vector<1x256xi32>
    %106 = vector.broadcast %105 : vector<1x256xi32> to vector<32x256xi32>
    %107 = arith.cmpi eq, %106, %103 : vector<32x256xi32>
    %108 = arith.extui %107 : vector<32x256xi1> to vector<32x256xi32>
    %109 = arith.addi %104, %108 : vector<32x256xi32>
    %110 = vector.extract_strided_slice %4 {offsets = [1, 0], sizes = [1, 256], strides = [1, 1]} : vector<8x256xi32> to vector<1x256xi32>
    %111 = vector.broadcast %110 : vector<1x256xi32> to vector<32x256xi32>
    %112 = arith.cmpi eq, %111, %103 : vector<32x256xi32>
    %113 = arith.extui %112 : vector<32x256xi1> to vector<32x256xi32>
    %114 = arith.addi %109, %113 : vector<32x256xi32>
    %115 = vector.extract_strided_slice %4 {offsets = [2, 0], sizes = [1, 256], strides = [1, 1]} : vector<8x256xi32> to vector<1x256xi32>
    %116 = vector.broadcast %115 : vector<1x256xi32> to vector<32x256xi32>
    %117 = arith.cmpi eq, %116, %103 : vector<32x256xi32>
    %118 = arith.extui %117 : vector<32x256xi1> to vector<32x256xi32>
    %119 = arith.addi %114, %118 : vector<32x256xi32>
    %120 = vector.extract_strided_slice %4 {offsets = [3, 0], sizes = [1, 256], strides = [1, 1]} : vector<8x256xi32> to vector<1x256xi32>
    %121 = vector.broadcast %120 : vector<1x256xi32> to vector<32x256xi32>
    %122 = arith.cmpi eq, %121, %103 : vector<32x256xi32>
    %123 = arith.extui %122 : vector<32x256xi1> to vector<32x256xi32>
    %124 = arith.addi %119, %123 : vector<32x256xi32>
    %125 = vector.extract_strided_slice %4 {offsets = [4, 0], sizes = [1, 256], strides = [1, 1]} : vector<8x256xi32> to vector<1x256xi32>
    %126 = vector.broadcast %125 : vector<1x256xi32> to vector<32x256xi32>
    %127 = arith.cmpi eq, %126, %103 : vector<32x256xi32>
    %128 = arith.extui %127 : vector<32x256xi1> to vector<32x256xi32>
    %129 = arith.addi %124, %128 : vector<32x256xi32>
    %130 = vector.extract_strided_slice %4 {offsets = [5, 0], sizes = [1, 256], strides = [1, 1]} : vector<8x256xi32> to vector<1x256xi32>
    %131 = vector.broadcast %130 : vector<1x256xi32> to vector<32x256xi32>
    %132 = arith.cmpi eq, %131, %103 : vector<32x256xi32>
    %133 = arith.extui %132 : vector<32x256xi1> to vector<32x256xi32>
    %134 = arith.addi %129, %133 : vector<32x256xi32>
    %135 = vector.extract_strided_slice %4 {offsets = [6, 0], sizes = [1, 256], strides = [1, 1]} : vector<8x256xi32> to vector<1x256xi32>
    %136 = vector.broadcast %135 : vector<1x256xi32> to vector<32x256xi32>
    %137 = arith.cmpi eq, %136, %103 : vector<32x256xi32>
    %138 = arith.extui %137 : vector<32x256xi1> to vector<32x256xi32>
    %139 = arith.addi %134, %138 : vector<32x256xi32>
    %140 = vector.extract_strided_slice %4 {offsets = [7, 0], sizes = [1, 256], strides = [1, 1]} : vector<8x256xi32> to vector<1x256xi32>
    %141 = vector.broadcast %140 : vector<1x256xi32> to vector<32x256xi32>
    %142 = arith.cmpi eq, %141, %103 : vector<32x256xi32>
    %143 = arith.extui %142 : vector<32x256xi1> to vector<32x256xi32>
    %144 = arith.addi %139, %143 : vector<32x256xi32>
    %145 = arith.sitofp %144 : vector<32x256xi32> to vector<32x256xf32>
    %c64 = arith.constant 64 : index
    %c0_10 = arith.constant 0 : index
    %146 = vector.load %arg10[%c64, %c0_10] : memref<256x256xf32, #tpu.memory_space<vmem>>, vector<32x256xf32>
    tpu.vector_store %arg10[%c64, %c0_10], %145 {strides = array<i32>} : memref<256x256xf32, #tpu.memory_space<vmem>>, vector<32x256xf32>,
    %c96_i32 = arith.constant 96 : i32
    %147 = arith.addi %5, %c96_i32 : i32
    %148 = tpu.iota {dimensions = array<i32: 0>} : vector<32x256xi32>
    %149 = vector.broadcast %147 : i32 to vector<32x256xi32>
    %150 = arith.addi %149, %148 : vector<32x256xi32>
    %c0_i32_11 = arith.constant 0 : i32
    %151 = vector.broadcast %c0_i32_11 : i32 to vector<32x256xi32>
    %152 = vector.extract_strided_slice %4 {offsets = [0, 0], sizes = [1, 256], strides = [1, 1]} : vector<8x256xi32> to vector<1x256xi32>
    %153 = vector.broadcast %152 : vector<1x256xi32> to vector<32x256xi32>
    %154 = arith.cmpi eq, %153, %150 : vector<32x256xi32>
    %155 = arith.extui %154 : vector<32x256xi1> to vector<32x256xi32>
    %156 = arith.addi %151, %155 : vector<32x256xi32>
    %157 = vector.extract_strided_slice %4 {offsets = [1, 0], sizes = [1, 256], strides = [1, 1]} : vector<8x256xi32> to vector<1x256xi32>
    %158 = vector.broadcast %157 : vector<1x256xi32> to vector<32x256xi32>
    %159 = arith.cmpi eq, %158, %150 : vector<32x256xi32>
    %160 = arith.extui %159 : vector<32x256xi1> to vector<32x256xi32>
    %161 = arith.addi %156, %160 : vector<32x256xi32>
    %162 = vector.extract_strided_slice %4 {offsets = [2, 0], sizes = [1, 256], strides = [1, 1]} : vector<8x256xi32> to vector<1x256xi32>
    %163 = vector.broadcast %162 : vector<1x256xi32> to vector<32x256xi32>
    %164 = arith.cmpi eq, %163, %150 : vector<32x256xi32>
    %165 = arith.extui %164 : vector<32x256xi1> to vector<32x256xi32>
    %166 = arith.addi %161, %165 : vector<32x256xi32>
    %167 = vector.extract_strided_slice %4 {offsets = [3, 0], sizes = [1, 256], strides = [1, 1]} : vector<8x256xi32> to vector<1x256xi32>
    %168 = vector.broadcast %167 : vector<1x256xi32> to vector<32x256xi32>
    %169 = arith.cmpi eq, %168, %150 : vector<32x256xi32>
    %170 = arith.extui %169 : vector<32x256xi1> to vector<32x256xi32>
    %171 = arith.addi %166, %170 : vector<32x256xi32>
    %172 = vector.extract_strided_slice %4 {offsets = [4, 0], sizes = [1, 256], strides = [1, 1]} : vector<8x256xi32> to vector<1x256xi32>
    %173 = vector.broadcast %172 : vector<1x256xi32> to vector<32x256xi32>
    %174 = arith.cmpi eq, %173, %150 : vector<32x256xi32>
    %175 = arith.extui %174 : vector<32x256xi1> to vector<32x256xi32>
    %176 = arith.addi %171, %175 : vector<32x256xi32>
    %177 = vector.extract_strided_slice %4 {offsets = [5, 0], sizes = [1, 256], strides = [1, 1]} : vector<8x256xi32> to vector<1x256xi32>
    %178 = vector.broadcast %177 : vector<1x256xi32> to vector<32x256xi32>
    %179 = arith.cmpi eq, %178, %150 : vector<32x256xi32>
    %180 = arith.extui %179 : vector<32x256xi1> to vector<32x256xi32>
    %181 = arith.addi %176, %180 : vector<32x256xi32>
    %182 = vector.extract_strided_slice %4 {offsets = [6, 0], sizes = [1, 256], strides = [1, 1]} : vector<8x256xi32> to vector<1x256xi32>
    %183 = vector.broadcast %182 : vector<1x256xi32> to vector<32x256xi32>
    %184 = arith.cmpi eq, %183, %150 : vector<32x256xi32>
    %185 = arith.extui %184 : vector<32x256xi1> to vector<32x256xi32>
    %186 = arith.addi %181, %185 : vector<32x256xi32>
    %187 = vector.extract_strided_slice %4 {offsets = [7, 0], sizes = [1, 256], strides = [1, 1]} : vector<8x256xi32> to vector<1x256xi32>
    %188 = vector.broadcast %187 : vector<1x256xi32> to vector<32x256xi32>
    %189 = arith.cmpi eq, %188, %150 : vector<32x256xi32>
    %190 = arith.extui %189 : vector<32x256xi1> to vector<32x256xi32>
    %191 = arith.addi %186, %190 : vector<32x256xi32>
    %192 = arith.sitofp %191 : vector<32x256xi32> to vector<32x256xf32>
    %c96 = arith.constant 96 : index
    %c0_12 = arith.constant 0 : index
    %193 = vector.load %arg10[%c96, %c0_12] : memref<256x256xf32, #tpu.memory_space<vmem>>, vector<32x256xf32>
    tpu.vector_store %arg10[%c96, %c0_12], %192 {strides = array<i32>} : memref<256x256xf32, #tpu.memory_space<vmem>>, vector<32x256xf32>,
    %c128_i32 = arith.constant 128 : i32
    %194 = arith.addi %5, %c128_i32 : i32
    %195 = tpu.iota {dimensions = array<i32: 0>} : vector<32x256xi32>
    %196 = vector.broadcast %194 : i32 to vector<32x256xi32>
    %197 = arith.addi %196, %195 : vector<32x256xi32>
    %c0_i32_13 = arith.constant 0 : i32
    %198 = vector.broadcast %c0_i32_13 : i32 to vector<32x256xi32>
    %199 = vector.extract_strided_slice %4 {offsets = [0, 0], sizes = [1, 256], strides = [1, 1]} : vector<8x256xi32> to vector<1x256xi32>
    %200 = vector.broadcast %199 : vector<1x256xi32> to vector<32x256xi32>
    %201 = arith.cmpi eq, %200, %197 : vector<32x256xi32>
    %202 = arith.extui %201 : vector<32x256xi1> to vector<32x256xi32>
    %203 = arith.addi %198, %202 : vector<32x256xi32>
    %204 = vector.extract_strided_slice %4 {offsets = [1, 0], sizes = [1, 256], strides = [1, 1]} : vector<8x256xi32> to vector<1x256xi32>
    %205 = vector.broadcast %204 : vector<1x256xi32> to vector<32x256xi32>
    %206 = arith.cmpi eq, %205, %197 : vector<32x256xi32>
    %207 = arith.extui %206 : vector<32x256xi1> to vector<32x256xi32>
    %208 = arith.addi %203, %207 : vector<32x256xi32>
    %209 = vector.extract_strided_slice %4 {offsets = [2, 0], sizes = [1, 256], strides = [1, 1]} : vector<8x256xi32> to vector<1x256xi32>
    %210 = vector.broadcast %209 : vector<1x256xi32> to vector<32x256xi32>
    %211 = arith.cmpi eq, %210, %197 : vector<32x256xi32>
    %212 = arith.extui %211 : vector<32x256xi1> to vector<32x256xi32>
    %213 = arith.addi %208, %212 : vector<32x256xi32>
    %214 = vector.extract_strided_slice %4 {offsets = [3, 0], sizes = [1, 256], strides = [1, 1]} : vector<8x256xi32> to vector<1x256xi32>
    %215 = vector.broadcast %214 : vector<1x256xi32> to vector<32x256xi32>
    %216 = arith.cmpi eq, %215, %197 : vector<32x256xi32>
    %217 = arith.extui %216 : vector<32x256xi1> to vector<32x256xi32>
    %218 = arith.addi %213, %217 : vector<32x256xi32>
    %219 = vector.extract_strided_slice %4 {offsets = [4, 0], sizes = [1, 256], strides = [1, 1]} : vector<8x256xi32> to vector<1x256xi32>
    %220 = vector.broadcast %219 : vector<1x256xi32> to vector<32x256xi32>
    %221 = arith.cmpi eq, %220, %197 : vector<32x256xi32>
    %222 = arith.extui %221 : vector<32x256xi1> to vector<32x256xi32>
    %223 = arith.addi %218, %222 : vector<32x256xi32>
    %224 = vector.extract_strided_slice %4 {offsets = [5, 0], sizes = [1, 256], strides = [1, 1]} : vector<8x256xi32> to vector<1x256xi32>
    %225 = vector.broadcast %224 : vector<1x256xi32> to vector<32x256xi32>
    %226 = arith.cmpi eq, %225, %197 : vector<32x256xi32>
    %227 = arith.extui %226 : vector<32x256xi1> to vector<32x256xi32>
    %228 = arith.addi %223, %227 : vector<32x256xi32>
    %229 = vector.extract_strided_slice %4 {offsets = [6, 0], sizes = [1, 256], strides = [1, 1]} : vector<8x256xi32> to vector<1x256xi32>
    %230 = vector.broadcast %229 : vector<1x256xi32> to vector<32x256xi32>
    %231 = arith.cmpi eq, %230, %197 : vector<32x256xi32>
    %232 = arith.extui %231 : vector<32x256xi1> to vector<32x256xi32>
    %233 = arith.addi %228, %232 : vector<32x256xi32>
    %234 = vector.extract_strided_slice %4 {offsets = [7, 0], sizes = [1, 256], strides = [1, 1]} : vector<8x256xi32> to vector<1x256xi32>
    %235 = vector.broadcast %234 : vector<1x256xi32> to vector<32x256xi32>
    %236 = arith.cmpi eq, %235, %197 : vector<32x256xi32>
    %237 = arith.extui %236 : vector<32x256xi1> to vector<32x256xi32>
    %238 = arith.addi %233, %237 : vector<32x256xi32>
    %239 = arith.sitofp %238 : vector<32x256xi32> to vector<32x256xf32>
    %c128 = arith.constant 128 : index
    %c0_14 = arith.constant 0 : index
    %240 = vector.load %arg10[%c128, %c0_14] : memref<256x256xf32, #tpu.memory_space<vmem>>, vector<32x256xf32>
    tpu.vector_store %arg10[%c128, %c0_14], %239 {strides = array<i32>} : memref<256x256xf32, #tpu.memory_space<vmem>>, vector<32x256xf32>,
    %c160_i32 = arith.constant 160 : i32
    %241 = arith.addi %5, %c160_i32 : i32
    %242 = tpu.iota {dimensions = array<i32: 0>} : vector<32x256xi32>
    %243 = vector.broadcast %241 : i32 to vector<32x256xi32>
    %244 = arith.addi %243, %242 : vector<32x256xi32>
    %c0_i32_15 = arith.constant 0 : i32
    %245 = vector.broadcast %c0_i32_15 : i32 to vector<32x256xi32>
    %246 = vector.extract_strided_slice %4 {offsets = [0, 0], sizes = [1, 256], strides = [1, 1]} : vector<8x256xi32> to vector<1x256xi32>
    %247 = vector.broadcast %246 : vector<1x256xi32> to vector<32x256xi32>
    %248 = arith.cmpi eq, %247, %244 : vector<32x256xi32>
    %249 = arith.extui %248 : vector<32x256xi1> to vector<32x256xi32>
    %250 = arith.addi %245, %249 : vector<32x256xi32>
    %251 = vector.extract_strided_slice %4 {offsets = [1, 0], sizes = [1, 256], strides = [1, 1]} : vector<8x256xi32> to vector<1x256xi32>
    %252 = vector.broadcast %251 : vector<1x256xi32> to vector<32x256xi32>
    %253 = arith.cmpi eq, %252, %244 : vector<32x256xi32>
    %254 = arith.extui %253 : vector<32x256xi1> to vector<32x256xi32>
    %255 = arith.addi %250, %254 : vector<32x256xi32>
    %256 = vector.extract_strided_slice %4 {offsets = [2, 0], sizes = [1, 256], strides = [1, 1]} : vector<8x256xi32> to vector<1x256xi32>
    %257 = vector.broadcast %256 : vector<1x256xi32> to vector<32x256xi32>
    %258 = arith.cmpi eq, %257, %244 : vector<32x256xi32>
    %259 = arith.extui %258 : vector<32x256xi1> to vector<32x256xi32>
    %260 = arith.addi %255, %259 : vector<32x256xi32>
    %261 = vector.extract_strided_slice %4 {offsets = [3, 0], sizes = [1, 256], strides = [1, 1]} : vector<8x256xi32> to vector<1x256xi32>
    %262 = vector.broadcast %261 : vector<1x256xi32> to vector<32x256xi32>
    %263 = arith.cmpi eq, %262, %244 : vector<32x256xi32>
    %264 = arith.extui %263 : vector<32x256xi1> to vector<32x256xi32>
    %265 = arith.addi %260, %264 : vector<32x256xi32>
    %266 = vector.extract_strided_slice %4 {offsets = [4, 0], sizes = [1, 256], strides = [1, 1]} : vector<8x256xi32> to vector<1x256xi32>
    %267 = vector.broadcast %266 : vector<1x256xi32> to vector<32x256xi32>
    %268 = arith.cmpi eq, %267, %244 : vector<32x256xi32>
    %269 = arith.extui %268 : vector<32x256xi1> to vector<32x256xi32>
    %270 = arith.addi %265, %269 : vector<32x256xi32>
    %271 = vector.extract_strided_slice %4 {offsets = [5, 0], sizes = [1, 256], strides = [1, 1]} : vector<8x256xi32> to vector<1x256xi32>
    %272 = vector.broadcast %271 : vector<1x256xi32> to vector<32x256xi32>
    %273 = arith.cmpi eq, %272, %244 : vector<32x256xi32>
    %274 = arith.extui %273 : vector<32x256xi1> to vector<32x256xi32>
    %275 = arith.addi %270, %274 : vector<32x256xi32>
    %276 = vector.extract_strided_slice %4 {offsets = [6, 0], sizes = [1, 256], strides = [1, 1]} : vector<8x256xi32> to vector<1x256xi32>
    %277 = vector.broadcast %276 : vector<1x256xi32> to vector<32x256xi32>
    %278 = arith.cmpi eq, %277, %244 : vector<32x256xi32>
    %279 = arith.extui %278 : vector<32x256xi1> to vector<32x256xi32>
    %280 = arith.addi %275, %279 : vector<32x256xi32>
    %281 = vector.extract_strided_slice %4 {offsets = [7, 0], sizes = [1, 256], strides = [1, 1]} : vector<8x256xi32> to vector<1x256xi32>
    %282 = vector.broadcast %281 : vector<1x256xi32> to vector<32x256xi32>
    %283 = arith.cmpi eq, %282, %244 : vector<32x256xi32>
    %284 = arith.extui %283 : vector<32x256xi1> to vector<32x256xi32>
    %285 = arith.addi %280, %284 : vector<32x256xi32>
    %286 = arith.sitofp %285 : vector<32x256xi32> to vector<32x256xf32>
    %c160 = arith.constant 160 : index
    %c0_16 = arith.constant 0 : index
    %287 = vector.load %arg10[%c160, %c0_16] : memref<256x256xf32, #tpu.memory_space<vmem>>, vector<32x256xf32>
    tpu.vector_store %arg10[%c160, %c0_16], %286 {strides = array<i32>} : memref<256x256xf32, #tpu.memory_space<vmem>>, vector<32x256xf32>,
    %c192_i32 = arith.constant 192 : i32
    %288 = arith.addi %5, %c192_i32 : i32
    %289 = tpu.iota {dimensions = array<i32: 0>} : vector<32x256xi32>
    %290 = vector.broadcast %288 : i32 to vector<32x256xi32>
    %291 = arith.addi %290, %289 : vector<32x256xi32>
    %c0_i32_17 = arith.constant 0 : i32
    %292 = vector.broadcast %c0_i32_17 : i32 to vector<32x256xi32>
    %293 = vector.extract_strided_slice %4 {offsets = [0, 0], sizes = [1, 256], strides = [1, 1]} : vector<8x256xi32> to vector<1x256xi32>
    %294 = vector.broadcast %293 : vector<1x256xi32> to vector<32x256xi32>
    %295 = arith.cmpi eq, %294, %291 : vector<32x256xi32>
    %296 = arith.extui %295 : vector<32x256xi1> to vector<32x256xi32>
    %297 = arith.addi %292, %296 : vector<32x256xi32>
    %298 = vector.extract_strided_slice %4 {offsets = [1, 0], sizes = [1, 256], strides = [1, 1]} : vector<8x256xi32> to vector<1x256xi32>
    %299 = vector.broadcast %298 : vector<1x256xi32> to vector<32x256xi32>
    %300 = arith.cmpi eq, %299, %291 : vector<32x256xi32>
    %301 = arith.extui %300 : vector<32x256xi1> to vector<32x256xi32>
    %302 = arith.addi %297, %301 : vector<32x256xi32>
    %303 = vector.extract_strided_slice %4 {offsets = [2, 0], sizes = [1, 256], strides = [1, 1]} : vector<8x256xi32> to vector<1x256xi32>
    %304 = vector.broadcast %303 : vector<1x256xi32> to vector<32x256xi32>
    %305 = arith.cmpi eq, %304, %291 : vector<32x256xi32>
    %306 = arith.extui %305 : vector<32x256xi1> to vector<32x256xi32>
    %307 = arith.addi %302, %306 : vector<32x256xi32>
    %308 = vector.extract_strided_slice %4 {offsets = [3, 0], sizes = [1, 256], strides = [1, 1]} : vector<8x256xi32> to vector<1x256xi32>
    %309 = vector.broadcast %308 : vector<1x256xi32> to vector<32x256xi32>
    %310 = arith.cmpi eq, %309, %291 : vector<32x256xi32>
    %311 = arith.extui %310 : vector<32x256xi1> to vector<32x256xi32>
    %312 = arith.addi %307, %311 : vector<32x256xi32>
    %313 = vector.extract_strided_slice %4 {offsets = [4, 0], sizes = [1, 256], strides = [1, 1]} : vector<8x256xi32> to vector<1x256xi32>
    %314 = vector.broadcast %313 : vector<1x256xi32> to vector<32x256xi32>
    %315 = arith.cmpi eq, %314, %291 : vector<32x256xi32>
    %316 = arith.extui %315 : vector<32x256xi1> to vector<32x256xi32>
    %317 = arith.addi %312, %316 : vector<32x256xi32>
    %318 = vector.extract_strided_slice %4 {offsets = [5, 0], sizes = [1, 256], strides = [1, 1]} : vector<8x256xi32> to vector<1x256xi32>
    %319 = vector.broadcast %318 : vector<1x256xi32> to vector<32x256xi32>
    %320 = arith.cmpi eq, %319, %291 : vector<32x256xi32>
    %321 = arith.extui %320 : vector<32x256xi1> to vector<32x256xi32>
    %322 = arith.addi %317, %321 : vector<32x256xi32>
    %323 = vector.extract_strided_slice %4 {offsets = [6, 0], sizes = [1, 256], strides = [1, 1]} : vector<8x256xi32> to vector<1x256xi32>
    %324 = vector.broadcast %323 : vector<1x256xi32> to vector<32x256xi32>
    %325 = arith.cmpi eq, %324, %291 : vector<32x256xi32>
    %326 = arith.extui %325 : vector<32x256xi1> to vector<32x256xi32>
    %327 = arith.addi %322, %326 : vector<32x256xi32>
    %328 = vector.extract_strided_slice %4 {offsets = [7, 0], sizes = [1, 256], strides = [1, 1]} : vector<8x256xi32> to vector<1x256xi32>
    %329 = vector.broadcast %328 : vector<1x256xi32> to vector<32x256xi32>
    %330 = arith.cmpi eq, %329, %291 : vector<32x256xi32>
    %331 = arith.extui %330 : vector<32x256xi1> to vector<32x256xi32>
    %332 = arith.addi %327, %331 : vector<32x256xi32>
    %333 = arith.sitofp %332 : vector<32x256xi32> to vector<32x256xf32>
    %c192 = arith.constant 192 : index
    %c0_18 = arith.constant 0 : index
    %334 = vector.load %arg10[%c192, %c0_18] : memref<256x256xf32, #tpu.memory_space<vmem>>, vector<32x256xf32>
    tpu.vector_store %arg10[%c192, %c0_18], %333 {strides = array<i32>} : memref<256x256xf32, #tpu.memory_space<vmem>>, vector<32x256xf32>,
    %c224_i32 = arith.constant 224 : i32
    %335 = arith.addi %5, %c224_i32 : i32
    %336 = tpu.iota {dimensions = array<i32: 0>} : vector<32x256xi32>
    %337 = vector.broadcast %335 : i32 to vector<32x256xi32>
    %338 = arith.addi %337, %336 : vector<32x256xi32>
    %c0_i32_19 = arith.constant 0 : i32
    %339 = vector.broadcast %c0_i32_19 : i32 to vector<32x256xi32>
    %340 = vector.extract_strided_slice %4 {offsets = [0, 0], sizes = [1, 256], strides = [1, 1]} : vector<8x256xi32> to vector<1x256xi32>
    %341 = vector.broadcast %340 : vector<1x256xi32> to vector<32x256xi32>
    %342 = arith.cmpi eq, %341, %338 : vector<32x256xi32>
    %343 = arith.extui %342 : vector<32x256xi1> to vector<32x256xi32>
    %344 = arith.addi %339, %343 : vector<32x256xi32>
    %345 = vector.extract_strided_slice %4 {offsets = [1, 0], sizes = [1, 256], strides = [1, 1]} : vector<8x256xi32> to vector<1x256xi32>
    %346 = vector.broadcast %345 : vector<1x256xi32> to vector<32x256xi32>
    %347 = arith.cmpi eq, %346, %338 : vector<32x256xi32>
    %348 = arith.extui %347 : vector<32x256xi1> to vector<32x256xi32>
    %349 = arith.addi %344, %348 : vector<32x256xi32>
    %350 = vector.extract_strided_slice %4 {offsets = [2, 0], sizes = [1, 256], strides = [1, 1]} : vector<8x256xi32> to vector<1x256xi32>
    %351 = vector.broadcast %350 : vector<1x256xi32> to vector<32x256xi32>
    %352 = arith.cmpi eq, %351, %338 : vector<32x256xi32>
    %353 = arith.extui %352 : vector<32x256xi1> to vector<32x256xi32>
    %354 = arith.addi %349, %353 : vector<32x256xi32>
    %355 = vector.extract_strided_slice %4 {offsets = [3, 0], sizes = [1, 256], strides = [1, 1]} : vector<8x256xi32> to vector<1x256xi32>
    %356 = vector.broadcast %355 : vector<1x256xi32> to vector<32x256xi32>
    %357 = arith.cmpi eq, %356, %338 : vector<32x256xi32>
    %358 = arith.extui %357 : vector<32x256xi1> to vector<32x256xi32>
    %359 = arith.addi %354, %358 : vector<32x256xi32>
    %360 = vector.extract_strided_slice %4 {offsets = [4, 0], sizes = [1, 256], strides = [1, 1]} : vector<8x256xi32> to vector<1x256xi32>
    %361 = vector.broadcast %360 : vector<1x256xi32> to vector<32x256xi32>
    %362 = arith.cmpi eq, %361, %338 : vector<32x256xi32>
    %363 = arith.extui %362 : vector<32x256xi1> to vector<32x256xi32>
    %364 = arith.addi %359, %363 : vector<32x256xi32>
    %365 = vector.extract_strided_slice %4 {offsets = [5, 0], sizes = [1, 256], strides = [1, 1]} : vector<8x256xi32> to vector<1x256xi32>
    %366 = vector.broadcast %365 : vector<1x256xi32> to vector<32x256xi32>
    %367 = arith.cmpi eq, %366, %338 : vector<32x256xi32>
    %368 = arith.extui %367 : vector<32x256xi1> to vector<32x256xi32>
    %369 = arith.addi %364, %368 : vector<32x256xi32>
    %370 = vector.extract_strided_slice %4 {offsets = [6, 0], sizes = [1, 256], strides = [1, 1]} : vector<8x256xi32> to vector<1x256xi32>
    %371 = vector.broadcast %370 : vector<1x256xi32> to vector<32x256xi32>
    %372 = arith.cmpi eq, %371, %338 : vector<32x256xi32>
    %373 = arith.extui %372 : vector<32x256xi1> to vector<32x256xi32>
    %374 = arith.addi %369, %373 : vector<32x256xi32>
    %375 = vector.extract_strided_slice %4 {offsets = [7, 0], sizes = [1, 256], strides = [1, 1]} : vector<8x256xi32> to vector<1x256xi32>
    %376 = vector.broadcast %375 : vector<1x256xi32> to vector<32x256xi32>
    %377 = arith.cmpi eq, %376, %338 : vector<32x256xi32>
    %378 = arith.extui %377 : vector<32x256xi1> to vector<32x256xi32>
    %379 = arith.addi %374, %378 : vector<32x256xi32>
    %380 = arith.sitofp %379 : vector<32x256xi32> to vector<32x256xf32>
    %c224 = arith.constant 224 : index
    %c0_20 = arith.constant 0 : index
    %381 = vector.load %arg10[%c224, %c0_20] : memref<256x256xf32, #tpu.memory_space<vmem>>, vector<32x256xf32>
    tpu.vector_store %arg10[%c224, %c0_20], %380 {strides = array<i32>} : memref<256x256xf32, #tpu.memory_space<vmem>>, vector<32x256xf32>,
    %c0_21 = arith.constant 0 : index
    %c0_22 = arith.constant 0 : index
    %382 = vector.load %arg11[%c0_21, %c0_22] : memref<128x256xf32, #tpu.memory_space<vmem>>, vector<128x256xf32>
    %c0_23 = arith.constant 0 : index
    %c0_24 = arith.constant 0 : index
    %c0_25 = arith.constant 0 : index
    %383 = vector.load %arg3[%c0_23, %c0_24, %c0_25] : memref<1x128x256xf32, #tpu.memory_space<vmem>>, vector<1x128x256xf32>
    %384 = vector.shape_cast %383 : vector<1x128x256xf32> to vector<128x256xf32>
    %c0_26 = arith.constant 0 : index
    %c0_27 = arith.constant 0 : index
    %385 = vector.load %arg10[%c0_26, %c0_27] : memref<256x256xf32, #tpu.memory_space<vmem>>, vector<256x256xf32>
    %cst = arith.constant dense<0.000000e+00> : vector<128x256xf32>
    %386 = tpu.matmul %384, %385, %cst {dimension_numbers = #tpu.dot_dimension_numbers<[1], [0], [0], [1], [0, 0, 1, 1], [], []>, precision = #tpu.contract_precision<fp32>} : vector<128x256xf32>, vector<256x256xf32>, vector<128x256xf32> -> vector<128x256xf32>
    %387 = arith.addf %382, %386 : vector<128x256xf32>
    %c0_28 = arith.constant 0 : index
    %c0_29 = arith.constant 0 : index
    %388 = vector.load %arg11[%c0_28, %c0_29] : memref<128x256xf32, #tpu.memory_space<vmem>>, vector<128x256xf32>
    tpu.vector_store %arg11[%c0_28, %c0_29], %387 {strides = array<i32>} : memref<128x256xf32, #tpu.memory_space<vmem>>, vector<128x256xf32>,
    %c0_i32_30 = arith.constant 0 : i32
    %389 = arith.cmpi eq, %arg2, %c0_i32_30 : i32
    %390 = arith.extui %389 : i1 to i32
    %c0_i32_31 = arith.constant 0 : i32
    %391 = arith.cmpi ne, %390, %c0_i32_31 : i32
    scf.if %391 {
      %c0_32 = arith.constant 0 : index
      %c0_33 = arith.constant 0 : index
      %392 = vector.load %arg6[%c0_32, %c0_33] : memref<128x128xf32, #tpu.memory_space<vmem>>, vector<128x128xf32>
      %c0_34 = arith.constant 0 : index
      %c0_35 = arith.constant 0 : index
      %393 = vector.load %arg11[%c0_34, %c0_35] : memref<128x256xf32, #tpu.memory_space<vmem>>, vector<128x256xf32>
      %cst_36 = arith.constant dense<0.000000e+00> : vector<128x256xf32>
      %394 = tpu.matmul %392, %393, %cst_36 {dimension_numbers = #tpu.dot_dimension_numbers<[1], [0], [0], [1], [0, 0, 1, 1], [], []>, precision = #tpu.contract_precision<fp32>} : vector<128x128xf32>, vector<128x256xf32>, vector<128x256xf32> -> vector<128x256xf32>
      %c0_37 = arith.constant 0 : index
      %c0_38 = arith.constant 0 : index
      %395 = vector.load %arg7[%c0_37, %c0_38] : memref<128x1xf32, #tpu.memory_space<vmem>>, vector<128x1xf32>
      %396 = vector.broadcast %395 : vector<128x1xf32> to vector<128x256xf32>
      %397 = arith.addf %394, %396 : vector<128x256xf32>
      %cst_39 = arith.constant 0.000000e+00 : f32
      %398 = vector.broadcast %cst_39 : f32 to vector<128x256xf32>
      %399 = arith.maximumf %397, %398 : vector<128x256xf32>
      %c0_40 = arith.constant 0 : index
      %c0_41 = arith.constant 0 : index
      %c0_42 = arith.constant 0 : index
      %400 = vector.load %arg9[%c0_40, %c0_41, %c0_42] : memref<1x128x256xf32, #tpu.memory_space<vmem>>, vector<1x128x256xf32>
      %401 = vector.shape_cast %400 : vector<1x128x256xf32> to vector<128x256xf32>
      %402 = vector.shape_cast %399 : vector<128x256xf32> to vector<1x128x256xf32>
      tpu.vector_store %arg9[%c0_40, %c0_41, %c0_42], %402 {strides = array<i32>} : memref<1x128x256xf32, #tpu.memory_space<vmem>>, vector<1x128x256xf32>,
    } else {
    }
    return
  }
  func.func @transform_0(%arg0: i32, %arg1: i32, %arg2: i32) -> (i32, i32, i32) {
    %c0_i32 = arith.constant 0 : i32
    %c0_i32_0 = arith.constant 0 : i32
    return %arg0, %c0_i32, %arg2 : i32, i32, i32
  }
  func.func @transform_1(%arg0: i32, %arg1: i32, %arg2: i32) -> (i32, i32, i32) {
    %c0_i32 = arith.constant 0 : i32
    %c0_i32_0 = arith.constant 0 : i32
    return %arg0, %c0_i32, %arg1 : i32, i32, i32
  }
  func.func @transform_2(%arg0: i32, %arg1: i32, %arg2: i32) -> (i32, i32, i32) {
    %c0_i32 = arith.constant 0 : i32
    %c0_i32_0 = arith.constant 0 : i32
    return %arg0, %c0_i32, %arg1 : i32, i32, i32
  }
  func.func @transform_3(%arg0: i32, %arg1: i32, %arg2: i32) -> (i32, i32) {
    %c0_i32 = arith.constant 0 : i32
    %c0_i32_0 = arith.constant 0 : i32
    %c0_i32_1 = arith.constant 0 : i32
    return %c0_i32, %c0_i32_0 : i32, i32
  }
  func.func @transform_4(%arg0: i32, %arg1: i32, %arg2: i32) -> (i32, i32) {
    %c0_i32 = arith.constant 0 : i32
    %c0_i32_0 = arith.constant 0 : i32
    %c0_i32_1 = arith.constant 0 : i32
    return %c0_i32, %c0_i32_0 : i32, i32
  }
  func.func @transform_5(%arg0: i32, %arg1: i32, %arg2: i32) -> (i32, i32) {
    %c0_i32 = arith.constant 0 : i32
    %c0_i32_0 = arith.constant 0 : i32
    %c0_i32_1 = arith.constant 0 : i32
    return %c0_i32, %c0_i32_0 : i32, i32
  }
  func.func @transform_6(%arg0: i32, %arg1: i32, %arg2: i32) -> (i32, i32, i32) {
    %c0_i32 = arith.constant 0 : i32
    %c0_i32_0 = arith.constant 0 : i32
    return %arg0, %c0_i32, %arg1 : i32, i32, i32
  }
}

</mosaic_0001>

<bundles_post_ra>
// kernel: tpu_custom_call.1
= control target key start
LH: loop header
LB: loop body
LE: loop exit
PB: predicated region body
PF: predicated region fallthrough
CT: control target
= control target key end

     0   :  { %s12088_s0 = inlined_call_operand.hbm [shape: f32[2,128,256], index: 0, kind: input, shape index: {}]   ;;  %s12089_s1 = inlined_call_operand.hbm [shape: f32[2,128,256], index: 1, kind: input, shape index: {}]   ;;  %s12090_s2 = inlined_call_operand.hbm [shape: s32[2,8,256], index: 2, kind: input, shape index: {}]   ;;  %s12091_s3 = inlined_call_operand.vmem [shape: f32[128,128], index: 3, kind: input, shape index: {}]   ;;  %s12092_s4 = inlined_call_operand.vmem [shape: f32[128,1], index: 4, kind: input, shape index: {}]   ;;  %s12093_s5 = inlined_call_operand.<no memory space> [shape: f32[1,1], index: 5, kind: input, shape index: {}]   ;;  %s12094_s6 = inlined_call_operand.hbm [shape: f32[2,128,256], index: 6, kind: output, shape index: {}]  }
   0x1   :  { %12557 = sst [smem:[#allocation174_spill]] %s12088_s0 }
   0x2   :  { %12558 = sst [smem:[#allocation175_spill]] %s12089_s1 }
   0x3   :  { %12559 = sst [smem:[#allocation176_spill]] %s12094_s6 }
   0x4   :  { %11 = sst [smem:[#allocation4]] %s12093_s5 }
   0x5   :  { %12 = vsyncpa [#allocation6], 0 }
   0x6   :  { %14 = vsyncpa [#allocation6 + $0x1], 0 }
   0x7   :  { %15 = vsyncpa [#allocation9], 0 }
   0x8   :  { %17 = vsyncpa [#allocation9 + $0x1], 0 }
   0x9   :  { %18 = vsyncpa [#allocation7], 0 }
   0xa   :  { %20 = vsyncpa [#allocation7 + $0x1], 0  ;;  %s7828_s23 = smov 0   ;;  %s7830_s24 = smov 0  }
   0xb   :  { %s7832_s25 = smov 0   ;;  %s7834_s26 = smov 0  }
   0xc   :  { %s7836_s27 = smov 0   ;;  %s7838_s28 = smov 0  }
   0xd LB: > { %12560 = sst [smem:[#allocation15_spill]] %s7758_s23  ;;  %s7859_s5 = sadd.s32 4294967295, %s7778_s28   ;;  %s7778_s28 = sphi %s7838_s28, %s26_s28   ;;  %s7774_s27 = sphi %s7836_s27, %s13220_s27   ;;  %s7770_s26 = sphi %s7834_s26, %s13219_s26   ;;  %s7766_s25 = sphi %s7832_s25, %s13215_s25   ;;  %s7762_s24 = sphi %s7830_s24, %s13218_s24   ;;  %s7758_s23 = sphi %s7828_s23, %s13217_s23  }
   0xe   : > { %12561 = sst [smem:[#allocation16_spill]] %s7766_s25  ;;  %s6568_s29 = sadd.s32 4294967294, %s7778_s28  }
   0xf   : > { %12562 = sst [smem:[#allocation17_spill]] %s7778_s28  ;;  %s45_s30 = sadd.s32 1, %s7774_s27 }
  0x10   : > { %s54_s7 = sadd.s32 1, %s7766_s25  ;;  %p47_p0 = scmp.ge.s32.totalorder %s45_s30, 2 }
  0x11   : > { %p61_p1 = scmp.ne.s32.totalorder %s7766_s25, %s7762_s24  ;;  %p62_p2 = scmp.eq.s32.totalorder %s7778_s28, 0 }
  0x12   : > { %p67_p3 = scmp.ne.s32.totalorder %s7762_s24, %s7758_s23  ;;  %s13222_s30 = smov (%p47_p0, %s45_s30), 0 }
  0x13   : > { %12563 = sst [smem:[#allocation18_spill]] %s13222_s30  ;;  %p7871_p4 = por %p62_p2, %p61_p1 }
  0x14   : > { %p68_p5 = scmp.eq.s32.totalorder %s7859_s5, 0  ;;  %s49_s9 = ssub.s32 %s7774_s27, %s13222_s30 }
  0x15   : > { %p212_p6 = scmp.eq.s32.totalorder %s7859_s5, 1  ;;  %p52_p7 = scmp.eq.s32.totalorder %s49_s9, 0 }
  0x16   : > { %p7879_p8 = por %p68_p5, %p67_p3  ;;  %p218_p10 = scmp.eq.s32.totalorder %s6568_s29, 1 }
  0x17   : > { %p7883_p9 = por %p212_p6, %p61_p1  ;;  %p7544_p13 = scmp.lt.s32.totalorder %s7778_s28, 2 }
  0x18   : > { %s12565_s10 = scalar_select %p7879_p8, 1, 0 }
  0x19   : > { %s12566_s11 = scalar_select %p7883_p9, 1, 0 }
  0x1a   : > { %s7888_s12 = scalar_select %p52_p7, %s7766_s25, %s54_s7  }
  0x1b   : > { %p7890_p11 = por %p218_p10, %p67_p3  ;;  %s7897_s14 = sand.u32 1, %s7766_s25  }
  0x1c   : > { %12567 = sst [smem:[#allocation19_spill]] %s7888_s12  ;;  %s12095_s15 = sshll.u32 %s7897_s14, 8 }
  0x1d   : > { %s12568_s13 = scalar_select %p7890_p11, 1, 0 }
  0x1e   : > { %s12096_s16 = sshll.u32 %s7774_s27, 12  ;;  %p7903_p0 = pnand %p7544_p13, %p7871_p4 }
  0x1f   : > { %12569 = sst [smem:[#allocation20_spill]] %s12568_s13  ;;  %s270_s18 = sand.u32 1, %s7778_s28  }
  0x20   : > { %s12570_s17 = scalar_select %p7903_p0, 1, 0 }
  0x21   : > { %s12571_s1 = sld [smem:[#allocation175_spill]]  ;;  %s274_s22 = scalar_lea.vmem [#allocation8], %s12095_s15 }
  0x22   : > { %s283_s29 = sshll.u32 %s274_s22, 4  ;;  %s7921_s7 = scalar_lea.sflag [#allocation9], %s270_s18  ;;  %s7918_s29 = int_to_ptr.vmem [resolvable:$true] %s283_s29 }
  0x23   : > { %p7927_p4 = pneg %p7903_p0 }
  0x27   : > { %s7913_s21 = scalar_lea.hbm %s12571_s1, %s12096_s16  ;;  %s7607_s22 = scalar_lea.hbm %s12571_s1, 8192 }
  0x28   : > { %s7602_s8 = scalar_lea.hbm %s7913_s21, 4096  ;;  %p7608_p7 = scmp.lt.u32.totalorder %s7913_s21, %s12571_s1 }
  0x29   : > { %p7603_p3 = scmp.ne.s32.totalorder %s7913_s21, %s7602_s8  ;;  %p7609_p10 = scmp.lt.u32.totalorder %s7607_s22, %s7602_s8 }
  0x2a   : > { %p7611_p12 = scmp.lt.u32.totalorder %s7602_s8, %s7913_s21 }
  0x2b   : > { %p7605_p5 = pnand %p7927_p4, %p7603_p3  ;;  %p7610_p13 = por %p7609_p10, %p7608_p7 }
  0x2d   : > { %p7606_p6 = pneg %p7605_p5  ;;  %p7612_p1 = por %p7611_p12, %p7610_p13 }
  0x2f   : > { %p7613_p2 = pnand %p7612_p1, %p7606_p6 }
  0x31   : > { %7616 = shalt.err (!%p7613_p2)
}
  0x32   : > { %s7617_s18 = scalar_lea.vmem %s7918_s29, 4096  ;;  %s7780_s19 = smov [#allocation8]  }
  0x33   : > { %p7618_p3 = scmp.ne.s32.totalorder %s7918_s29, %s7617_s18  ;;  %s7622_s20 = sshll.u32 %s7780_s19, 4  ;;  %s7623_s20 = int_to_ptr.vmem [resolvable:$false] %s7622_s20 }
  0x34   : > { %s7624_s15 = scalar_lea.vmem %s7623_s20, 8192  ;;  %p7625_p9 = scmp.lt.s32.totalorder %s7918_s29, %s7623_s20 }
  0x35   : > { %p7620_p5 = pnand %p7618_p3, %p7927_p4  ;;  %p7626_p8 = scmp.lt.s32.totalorder %s7624_s15, %s7617_s18 }
  0x37   : > { %p7621_p11 = pneg %p7620_p5  ;;  %p7627_p7 = por %p7626_p8, %p7625_p9 }
  0x39   : > { %p7628_p10 = pnand %p7627_p7, %p7621_p11 }
  0x3b   : > { %7631 = shalt.err (!%p7628_p10)
}
  0x3c   : > { %s12100_s16 = smov 256   ;;  %s12101_s8 = smov 16  }
  0x3d   : > { %7536 = dma.hbm_to_vmem [thread:$0]  (!%p7903_p0), %s7913_s21, 4096, %s7918_s29, %s7921_s7, %s12100_s16, %s12100_s16, %s12101_s8  }
  0x3e   : > { %p12573_p8 = scmp.lt.s32.totalorder %s7778_s28, 3  ;;  %p12574_p9 = scmp.ge.s32.totalorder %s7778_s28, 1 }
  0x3f   : > { %s12576_s18 = sshll.u32 %s7774_s27, 12  ;;  %s12577_s0 = sld [smem:[#allocation174_spill]] }
  0x40   : > { %p7958_p11 = pnand %p12574_p9, %p12573_p8  ;;  %s12578_s1 = sshll.u32 %s7897_s14, 8 }
  0x41   : > { %s251_s30 = scalar_lea.vmem [#allocation5], %s12578_s1  ;;  %s6577_s21 = sshll.u32 %s7897_s14, 4 }
  0x42   : > { %s12575_s22 = scalar_select %p7958_p11, 1, 0 }
  0x43   : > { %s260_s12 = sshll.u32 %s251_s30, 4  ;;  %s248_s29 = scalar_lea.sflag [#allocation6], %s7897_s14  ;;  %s7972_s12 = int_to_ptr.vmem [resolvable:$true] %s260_s12 }
  0x45   : > { %s7967_s15 = scalar_lea.hbm %s12577_s0, %s12576_s18  ;;  %s7637_s18 = scalar_lea.hbm %s12577_s0, 8192 }
  0x46   : > { %s7632_s16 = scalar_lea.hbm %s7967_s15, 4096  ;;  %p7638_p6 = scmp.lt.u32.totalorder %s7967_s15, %s12577_s0 }
  0x47   : > { %p7633_p12 = scmp.ne.s32.totalorder %s7967_s15, %s7632_s16  ;;  %p7639_p13 = scmp.lt.u32.totalorder %s7637_s18, %s7632_s16 }
  0x48   : > { %p7641_p5 = scmp.lt.u32.totalorder %s7632_s16, %s7967_s15 }
  0x49   : > { %p7635_p1 = pnand %p7633_p12, %p7927_p4  ;;  %p7640_p3 = por %p7639_p13, %p7638_p6 }
  0x4b   : > { %p7636_p2 = pneg %p7635_p1  ;;  %p7642_p7 = por %p7641_p5, %p7640_p3 }
  0x4d   : > { %p7643_p10 = pnand %p7642_p7, %p7636_p2 }
  0x4f   : > { %7646 = shalt.err (!%p7643_p10)
}
  0x50   : > { %s7647_s1 = scalar_lea.vmem %s7972_s12, 4096  ;;  %s7783_s30 = smov [#allocation5]  }
  0x51   : > { %p7648_p8 = scmp.ne.s32.totalorder %s7972_s12, %s7647_s1  ;;  %s7652_s8 = sshll.u32 %s7783_s30, 4  ;;  %s7653_s8 = int_to_ptr.vmem [resolvable:$false] %s7652_s8 }
  0x52   : > { %s7654_s25 = scalar_lea.vmem %s7653_s8, 8192  ;;  %p7655_p1 = scmp.lt.s32.totalorder %s7972_s12, %s7653_s8 }
  0x53   : > { %p7650_p9 = pnand %p7648_p8, %p7927_p4  ;;  %p7656_p11 = scmp.lt.s32.totalorder %s7654_s25, %s7647_s1 }
  0x55   : > { %p7651_p12 = pneg %p7650_p9  ;;  %p7657_p6 = por %p7656_p11, %p7655_p1 }
  0x57   : > { %p7658_p13 = pnand %p7657_p6, %p7651_p12 }
  0x59   : > { %7661 = shalt.err (!%p7658_p13)
}
  0x5a   : > { %s12579_s16 = smov 16   ;;  %s12580_s19 = smov 256  }
  0x5b   : > { %7533 = dma.hbm_to_vmem [thread:$0]  (!%p7903_p0), %s7967_s15, 4096, %s7972_s12, %s248_s29, %s12580_s19, %s12580_s19, %s12579_s16  }
  0x5c   : > { %s6592_s18 = sshll.u32 %s7774_s27, 8  ;;  %s297_s20 = scalar_lea.vmem [#allocation10], %s6577_s21 }
  0x5d   : > { %s307_s1 = sshll.u32 %s297_s20, 4  ;;  %s305_s25 = scalar_lea.hbm %s12090_s2, %s6592_s18  ;;  %s308_s1 = int_to_ptr.vmem [resolvable:$true] %s307_s1 }
  0x5e   : > { %s7662_s0 = scalar_lea.hbm %s305_s25, 256  ;;  %s7667_s23 = scalar_lea.hbm %s12090_s2, 512 }
  0x5f   : > { %p7663_p11 = scmp.ne.s32.totalorder %s305_s25, %s7662_s0  ;;  %p7668_p5 = scmp.lt.u32.totalorder %s305_s25, %s12090_s2 }
  0x60   : > { %p7669_p7 = scmp.lt.u32.totalorder %s7667_s23, %s7662_s0  ;;  %p7671_p8 = scmp.lt.u32.totalorder %s7662_s0, %s305_s25 }
  0x61   : > { %p7665_p2 = pnand %p7663_p11, %p7927_p4 }
  0x62   : > { %p7670_p10 = por %p7669_p7, %p7668_p5 }
  0x63   : > { %p7666_p3 = pneg %p7665_p2 }
  0x64   : > { %p7672_p9 = por %p7671_p8, %p7670_p10 }
  0x66   : > { %p7673_p12 = pnand %p7672_p9, %p7666_p3 }
  0x68   : > { %7676 = shalt.err (!%p7673_p12)
}
  0x69   : > { %s7677_s14 = scalar_lea.vmem %s308_s1, 256  ;;  %s7784_s15 = smov [#allocation10]  }
  0x6a   : > { %p7678_p1 = scmp.ne.s32.totalorder %s308_s1, %s7677_s14  ;;  %s7682_s21 = sshll.u32 %s7784_s15, 4  ;;  %s7683_s21 = int_to_ptr.vmem [resolvable:$false] %s7682_s21 }
  0x6b   : > { %s7684_s28 = scalar_lea.vmem %s7683_s21, 512  ;;  %p7685_p11 = scmp.lt.s32.totalorder %s308_s1, %s7683_s21 }
  0x6c   : > { %p7680_p6 = pnand %p7678_p1, %p7927_p4  ;;  %p7686_p2 = scmp.lt.s32.totalorder %s7684_s28, %s7677_s14 }
  0x6e   : > { %p7681_p13 = pneg %p7680_p6  ;;  %p7687_p0 = por %p7686_p2, %p7685_p11 }
  0x70   : > { %p7688_p5 = pnand %p7687_p0, %p7681_p13 }
  0x72   : > { %7691 = shalt.err (!%p7688_p5)
}
  0x73   : > { %p12581_p7 = scmp.ne.s32.totalorder %s12570_s17, 0  ;;  %p12582_p3 = scmp.ne.s32.totalorder %s12575_s22, 0 }
  0x75   : > { %7539 = dma.hbm_to_vmem [thread:$0]  (!%p12581_p7), %s305_s25, 256, %s308_s1, %s7921_s7  }
  0x76   : > { %316 = sbr.rel (%p12582_p3) target bundleno = 1829 (0x725), region = 44 }
  0x7d   : > { %s8023_s0 = sand.u32 1, %s7762_s24   ;;  %p12583_p0 = scmp.ne.s32.totalorder %s12565_s10, 0 }
  0x7e   : > { %s8026_s6 = sshll.u32 %s8023_s0, 8  ;;  %s319_s23 = scalar_lea.sflag [#allocation6], %s8023_s0 }
  0x7f   : > { %s8030_s13 = scalar_lea.vmem [#allocation5], %s8026_s6 }
  0x80   : > { %7745 = dma.done.wait (%p12583_p0), %s319_s23, 4096  }
  0x81   : > { %7747 = vsyncadd (%p12583_p0), %s319_s23, 4294963200  ;;  %s327_s17 = sand.u32 1, %s7859_s5   ;;  %s8038_s9 = scalar_lea.vmem [#allocation8], %s8026_s6 }
  0x82   : > { %s328_s7 = scalar_lea.sflag [#allocation9], %s327_s17 }
  0x83   : > { %7749 = dma.done.wait (%p12583_p0), %s328_s7, 4352  }
  0x84   : > { %7751 = vsyncadd (%p12583_p0), %s328_s7, 4294962944  ;;  %v489_v0 = vlaneseq  ;;  %s6583_s22 = sshll.u32 %s8023_s0, 4  ;;  %v7785_v1 = vmov 0   ;;  %s387_s10 = sld [smem:[#allocation4]] }
  0x85   : > { %7600 = vset.pattern.permute.xlu0 %v7785_v1  ;;  %7601 = vset.pattern.permute.xlu1 %v7785_v1  ;;  %s8063_s5 = scalar_lea.vmem [#allocation10], %s6583_s22  ;;  %s13207_s18 = sld [smem:[#allocation176_spill]] }
  0x86   : > { %v8047_v2 = vshrl.u32 %v489_v0, 7  ;;  %v487_v13 = vld [vmem:[%s8063_s5 + $0x8] sm:$0xff]  ;;  %v486_v42 = vld [vmem:[%s8063_s5] sm:$0xff]  ;;  %p13208_p10 = scmp.ne.s32.totalorder %s12566_s11, 0  ;;  %s7787_s30 = smov [#allocation11]  }
  0x87   : > { %s7696_s8 = sshll.u32 %s7787_s30, 4  ;;  %s7697_s8 = int_to_ptr.vmem [resolvable:$false] %s7696_s8 }
  0x88   : > { %v8050_v3 = vadd.s32 8, %v8047_v2  ;;  %v501_v4 = vsub.s32 0, %v8047_v2  ;;  %v525_v5 = vsub.s32 1, %v8047_v2  ;;  %v557_v6 = vsub.s32 2, %v8047_v2  ;;  %s7698_s25 = scalar_lea.vmem %s7697_s8, 8192 }
  0x89   : > { %v589_v7 = vsub.s32 3, %v8047_v2  ;;  %v621_v8 = vsub.s32 4, %v8047_v2  ;;  %v653_v9 = vsub.s32 5, %v8047_v2  ;;  %v685_v10 = vsub.s32 6, %v8047_v2 }
  0x8a   : > { %v717_v11 = vsub.s32 7, %v8047_v2  ;;  %v8061_v12 = vadd.s32 16, %v8047_v2  ;;  %v8067_v14 = vadd.s32 24, %v8047_v2  ;;  %v8070_v15 = vadd.s32 32, %v8047_v2  ;;  %s388_s29 = sadd.f32 1.0, %s387_s10  ;;  %s11998_s10 = scalar_lea.vmem [#allocation11], %s8026_s6 }
  0x8b   : > { %v8073_v16 = vadd.s32 32, %v8050_v3  ;;  %v8076_v17 = vadd.s32 64, %v8047_v2  ;;  %v8078_v18 = vrot.slane %v487_v13, %v501_v4  ;;  %v8080_v19 = vrot.slane %v487_v13, %v525_v5  ;;  %s6593_s6 = sshll.u32 %s7770_s26, 12  ;;  %s6413_s26 = scalar_lea.sflag [#allocation7], %s8023_s0 }
  0x8c   : > { %v8084_v20 = vrot.slane %v487_v13, %v557_v6  ;;  %v8088_v21 = vrot.slane %v487_v13, %v589_v7  ;;  %v8092_v22 = vrot.slane %v487_v13, %v621_v8  ;;  %v8096_v23 = vrot.slane %v487_v13, %v653_v9  ;;  %s12035_s20 = scalar_lea.hbm %s13207_s18, %s6593_s6 }
  0x8d   : > { %v8100_v24 = vrot.slane %v487_v13, %v685_v10  ;;  %v8104_v25 = vrot.slane %v487_v13, %v717_v11  ;;  %vm508_vm0 = vcmp.eq.s32.totalorder %v8078_v18, %v8047_v2  ;;  %vm510_vm1 = vcmp.eq.s32.totalorder %v8078_v18, %v8050_v3 }
  0x8e   : > { %vm532_vm2 = vcmp.eq.s32.totalorder %v8080_v19, %v8047_v2  ;;  %vm534_vm3 = vcmp.eq.s32.totalorder %v8080_v19, %v8050_v3  ;;  %v516_v26 = vsel %vm508_vm0, 1, %v7785_v1  ;;  %v518_v27 = vsel %vm510_vm1, 1, %v7785_v1 }
  0x8f   : > { %v540_v28 = vsel %vm532_vm2, 1, %v7785_v1  ;;  %v542_v29 = vsel %vm534_vm3, 1, %v7785_v1  ;;  %vm564_vm4 = vcmp.eq.s32.totalorder %v8084_v20, %v8047_v2  ;;  %vm566_vm5 = vcmp.eq.s32.totalorder %v8084_v20, %v8050_v3 }
  0x90   : > { %v548_v30 = vadd.s32 %v540_v28, %v516_v26  ;;  %v550_v31 = vadd.s32 %v542_v29, %v518_v27  ;;  %v572_v32 = vsel %vm564_vm4, 1, %v7785_v1  ;;  %v574_v33 = vsel %vm566_vm5, 1, %v7785_v1 }
  0x91   : > { %vm596_vm6 = vcmp.eq.s32.totalorder %v8088_v21, %v8047_v2  ;;  %vm598_vm7 = vcmp.eq.s32.totalorder %v8088_v21, %v8050_v3  ;;  %vm628_vm8 = vcmp.eq.s32.totalorder %v8092_v22, %v8047_v2  ;;  %vm630_vm9 = vcmp.eq.s32.totalorder %v8092_v22, %v8050_v3 }
  0x92   : > { %v580_v34 = vadd.s32 %v572_v32, %v548_v30  ;;  %v582_v35 = vadd.s32 %v574_v33, %v550_v31  ;;  %v604_v36 = vsel %vm596_vm6, 1, %v7785_v1  ;;  %v606_v37 = vsel %vm598_vm7, 1, %v7785_v1 }
  0x93   : > { %vm660_vm10 = vcmp.eq.s32.totalorder %v8096_v23, %v8047_v2  ;;  %vm662_vm11 = vcmp.eq.s32.totalorder %v8096_v23, %v8050_v3  ;;  %v636_v40 = vsel %vm628_vm8, 1, %v7785_v1  ;;  %v638_v41 = vsel %vm630_vm9, 1, %v7785_v1 }
  0x94   : > { %v612_v38 = vadd.s32 %v604_v36, %v580_v34  ;;  %v614_v39 = vadd.s32 %v606_v37, %v582_v35  ;;  %v668_v43 = vsel %vm660_vm10, 1, %v7785_v1  ;;  %v670_v44 = vsel %vm662_vm11, 1, %v7785_v1 }
  0x95   : > { %vm692_vm12 = vcmp.eq.s32.totalorder %v8100_v24, %v8047_v2  ;;  %vm694_vm13 = vcmp.eq.s32.totalorder %v8100_v24, %v8050_v3  ;;  %vm724_vm14 = vcmp.eq.s32.totalorder %v8104_v25, %v8047_v2  ;;  %vm726_vm15 = vcmp.eq.s32.totalorder %v8104_v25, %v8050_v3 }
  0x96   : > { %v644_v45 = vadd.s32 %v636_v40, %v612_v38  ;;  %v646_v46 = vadd.s32 %v638_v41, %v614_v39  ;;  %v700_v47 = vsel %vm692_vm12, 1, %v7785_v1  ;;  %v702_v48 = vsel %vm694_vm13, 1, %v7785_v1 }
  0x97   : > { %v8153_v49 = vrot.slane %v486_v42, %v501_v4  ;;  %v8155_v50 = vrot.slane %v486_v42, %v525_v5  ;;  %v732_v53 = vsel %vm724_vm14, 1, %v7785_v1  ;;  %v734_v54 = vsel %vm726_vm15, 1, %v7785_v1 }
  0x98   : > { %v676_v51 = vadd.s32 %v668_v43, %v644_v45  ;;  %v678_v52 = vadd.s32 %v670_v44, %v646_v46  ;;  %v8173_v61 = vrot.slane %v486_v42, %v557_v6  ;;  %v8177_v62 = vrot.slane %v486_v42, %v589_v7 }
  0x99   : > { %vm507_vm0 = vcmp.eq.s32.totalorder %v8153_v49, %v8047_v2  ;;  %vm509_vm1 = vcmp.eq.s32.totalorder %v8153_v49, %v8050_v3  ;;  %vm531_vm2 = vcmp.eq.s32.totalorder %v8155_v50, %v8047_v2  ;;  %vm533_vm3 = vcmp.eq.s32.totalorder %v8155_v50, %v8050_v3 }
  0x9a   : > { %v708_v55 = vadd.s32 %v700_v47, %v676_v51  ;;  %v710_v56 = vadd.s32 %v702_v48, %v678_v52  ;;  %v515_v57 = vsel %vm507_vm0, 1, %v7785_v1  ;;  %v517_v58 = vsel %vm509_vm1, 1, %v7785_v1 }
  0x9b   : > { %v539_v59 = vsel %vm531_vm2, 1, %v7785_v1  ;;  %v541_v60 = vsel %vm533_vm3, 1, %v7785_v1  ;;  %vm563_vm4 = vcmp.eq.s32.totalorder %v8173_v61, %v8047_v2  ;;  %vm565_vm5 = vcmp.eq.s32.totalorder %v8173_v61, %v8050_v3 }
  0x9c   : > { %v740_v63 = vadd.s32 %v732_v53, %v708_v55  ;;  %v742_v0 = vadd.s32 %v734_v54, %v710_v56  ;;  %v547_v4 = vadd.s32 %v539_v59, %v515_v57  ;;  %v549_v5 = vadd.s32 %v541_v60, %v517_v58 }
  0x9d   : > { %vm595_vm6 = vcmp.eq.s32.totalorder %v8177_v62, %v8047_v2  ;;  %vm597_vm7 = vcmp.eq.s32.totalorder %v8177_v62, %v8050_v3  ;;  %v571_v7 = vsel %vm563_vm4, 1, %v7785_v1  ;;  %v573_v26 = vsel %vm565_vm5, 1, %v7785_v1 }
  0x9e   : > { %v748_v6 = vcvt.s32.f32 %v740_v63  ;;  %v750_v13 = vcvt.s32.f32 %v742_v0  ;;  %v579_v27 = vadd.s32 %v571_v7, %v547_v4  ;;  %v581_v28 = vadd.s32 %v573_v26, %v549_v5 }
  0x9f   : > { %v603_v29 = vsel %vm595_vm6, 1, %v7785_v1  ;;  %v605_v30 = vsel %vm597_vm7, 1, %v7785_v1  ;;  %v8193_v33 = vrot.slane %v486_v42, %v621_v8  ;;  %v8197_v34 = vrot.slane %v486_v42, %v653_v9 }
  0xa0   : > { %v2333_v31 = vand.u32 4294901760, %v748_v6  ;;  %v2337_v32 = vand.u32 4294901760, %v750_v13  ;;  %v611_v35 = vadd.s32 %v603_v29, %v579_v27  ;;  %v613_v36 = vadd.s32 %v605_v30, %v581_v28 }
  0xa1   : > { %v8201_v37 = vrot.slane %v486_v42, %v685_v10  ;;  %v8205_v38 = vrot.slane %v486_v42, %v717_v11  ;;  %vm627_vm8 = vcmp.eq.s32.totalorder %v8193_v33, %v8047_v2  ;;  %vm629_vm9 = vcmp.eq.s32.totalorder %v8193_v33, %v8050_v3 }
  0xa2   : > { %v8207_v39 = vpack.c.bf16 %v2337_v32, %v2333_v31  ;;  %v8209_v40 = vsub.f32 %v748_v6, %v2333_v31  ;;  %v8211_v8 = vsub.f32 %v750_v13, %v2337_v32  ;;  %v635_v9 = vsel %vm627_vm8, 1, %v7785_v1 }
  0xa3   : > { %vm659_vm10 = vcmp.eq.s32.totalorder %v8197_v34, %v8047_v2  ;;  %vm661_vm11 = vcmp.eq.s32.totalorder %v8197_v34, %v8050_v3  ;;  %v637_v10 = vsel %vm629_vm9, 1, %v7785_v1  ;;  %v643_v11 = vadd.s32 %v635_v9, %v611_v35 }
  0xa4   : > { %12584 = vst [vmem:[#allocation21_spill] sm:$0xff] %v8207_v39  ;;  %6595 = vmatprep.subr.bf16.mxu0 %v8207_v39  ;;  %v667_v41 = vsel %vm659_vm10, 1, %v7785_v1  ;;  %v669_v42 = vsel %vm661_vm11, 1, %v7785_v1  ;;  %v645_v43 = vadd.s32 %v637_v10, %v613_v36  ;;  %vm691_vm12 = vcmp.eq.s32.totalorder %v8201_v37, %v8047_v2 }
  0xa5   : > { %vm693_vm13 = vcmp.eq.s32.totalorder %v8201_v37, %v8050_v3  ;;  %vm723_vm14 = vcmp.eq.s32.totalorder %v8205_v38, %v8047_v2  ;;  %v675_v44 = vadd.s32 %v667_v41, %v643_v11  ;;  %v699_v45 = vsel %vm691_vm12, 1, %v7785_v1 }
  0xa6   : > { %v701_v46 = vsel %vm693_vm13, 1, %v7785_v1  ;;  %vm725_vm15 = vcmp.eq.s32.totalorder %v8205_v38, %v8050_v3  ;;  %v677_v47 = vadd.s32 %v669_v42, %v645_v43  ;;  %v731_v48 = vsel %vm723_vm14, 1, %v7785_v1 }
  0xa7   : > { %v733_v51 = vsel %vm725_vm15, 1, %v7785_v1  ;;  %vm512_vm0 = vcmp.eq.s32.totalorder %v8078_v18, %v8061_v12  ;;  %v707_v52 = vadd.s32 %v699_v45, %v675_v44  ;;  %vm514_vm1 = vcmp.eq.s32.totalorder %v8078_v18, %v8067_v14 }
  0xa8   : > { %v520_v53 = vsel %vm512_vm0, 1, %v7785_v1  ;;  %vm536_vm2 = vcmp.eq.s32.totalorder %v8080_v19, %v8061_v12  ;;  %v709_v54 = vadd.s32 %v701_v46, %v677_v47  ;;  %v522_v55 = vsel %vm514_vm1, 1, %v7785_v1 }
  0xa9   : > { %vm538_vm3 = vcmp.eq.s32.totalorder %v8080_v19, %v8067_v14  ;;  %v544_v56 = vsel %vm536_vm2, 1, %v7785_v1  ;;  %v739_v57 = vadd.s32 %v731_v48, %v707_v52  ;;  %vm568_vm4 = vcmp.eq.s32.totalorder %v8084_v20, %v8061_v12 }
  0xaa   : > { %v546_v58 = vsel %vm538_vm3, 1, %v7785_v1  ;;  %v552_v59 = vadd.s32 %v544_v56, %v520_v53  ;;  %v741_v60 = vadd.s32 %v733_v51, %v709_v54  ;;  %vm570_vm5 = vcmp.eq.s32.totalorder %v8084_v20, %v8067_v14 }
  0xab   : > { %v554_v63 = vadd.s32 %v546_v58, %v522_v55  ;;  %v576_v0 = vsel %vm568_vm4, 1, %v7785_v1  ;;  %v747_v4 = vcvt.s32.f32 %v739_v57  ;;  %v578_v5 = vsel %vm570_vm5, 1, %v7785_v1 }
  0xac   : > { %v584_v6 = vadd.s32 %v576_v0, %v552_v59  ;;  %vm600_vm6 = vcmp.eq.s32.totalorder %v8088_v21, %v8061_v12  ;;  %v749_v13 = vcvt.s32.f32 %v741_v60  ;;  %vm602_vm7 = vcmp.eq.s32.totalorder %v8088_v21, %v8067_v14 }
  0xad   : > { %v586_v7 = vadd.s32 %v578_v5, %v554_v63  ;;  %v608_v26 = vsel %vm600_vm6, 1, %v7785_v1  ;;  %v2335_v27 = vand.u32 4294901760, %v747_v4  ;;  %v610_v28 = vsel %vm602_vm7, 1, %v7785_v1 }
  0xae   : > { %v616_v29 = vadd.s32 %v608_v26, %v584_v6  ;;  %vm632_vm8 = vcmp.eq.s32.totalorder %v8092_v22, %v8061_v12  ;;  %v2339_v30 = vand.u32 4294901760, %v749_v13  ;;  %vm634_vm9 = vcmp.eq.s32.totalorder %v8092_v22, %v8067_v14 }
  0xaf   : > { %v618_v31 = vadd.s32 %v610_v28, %v586_v7  ;;  %v640_v32 = vsel %vm632_vm8, 1, %v7785_v1  ;;  %v8267_v35 = vsub.f32 %v747_v4, %v2335_v27  ;;  %v642_v36 = vsel %vm634_vm9, 1, %v7785_v1 }
  0xb0   : > { %v648_v9 = vadd.s32 %v640_v32, %v616_v29  ;;  %vm664_vm10 = vcmp.eq.s32.totalorder %v8096_v23, %v8061_v12  ;;  %v8272_v10 = vpack.c.bf16 %v2339_v30, %v2335_v27  ;;  %v8274_v11 = vsub.f32 %v749_v13, %v2339_v30 }
  0xb1   : > { %v650_v41 = vadd.s32 %v642_v36, %v618_v31  ;;  %vm666_vm11 = vcmp.eq.s32.totalorder %v8096_v23, %v8067_v14  ;;  %v672_v42 = vsel %vm664_vm10, 1, %v7785_v1  ;;  %vm696_vm12 = vcmp.eq.s32.totalorder %v8100_v24, %v8061_v12 }
  0xb2   : > { %12585 = vst [vmem:[#allocation22_spill] sm:$0xff] %v8272_v10  ;;  %v674_v43 = vsel %vm666_vm11, 1, %v7785_v1  ;;  %vm698_vm13 = vcmp.eq.s32.totalorder %v8100_v24, %v8067_v14  ;;  %6597 = vmatpush1.bf16.msra.mxu0 %v8272_v10  ;;  %v680_v44 = vadd.s32 %v672_v42, %v648_v9  ;;  %v704_v46 = vsel %vm696_vm12, 1, %v7785_v1 }
  0xb3   : > { %v682_v45 = vadd.s32 %v674_v43, %v650_v41  ;;  %v706_v47 = vsel %vm698_vm13, 1, %v7785_v1  ;;  %vm728_vm14 = vcmp.eq.s32.totalorder %v8104_v25, %v8061_v12  ;;  %vm730_vm15 = vcmp.eq.s32.totalorder %v8104_v25, %v8067_v14 }
  0xb4   : > { %vm511_vm0 = vcmp.eq.s32.totalorder %v8153_v49, %v8061_v12  ;;  %vm513_vm1 = vcmp.eq.s32.totalorder %v8153_v49, %v8067_v14  ;;  %v712_v48 = vadd.s32 %v704_v46, %v680_v44  ;;  %v736_v52 = vsel %vm728_vm14, 1, %v7785_v1 }
  0xb5   : > { %v714_v51 = vadd.s32 %v706_v47, %v682_v45  ;;  %v738_v53 = vsel %vm730_vm15, 1, %v7785_v1  ;;  %v519_v54 = vsel %vm511_vm0, 1, %v7785_v1  ;;  %v521_v55 = vsel %vm513_vm1, 1, %v7785_v1 }
  0xb6   : > { %vm535_vm2 = vcmp.eq.s32.totalorder %v8155_v50, %v8061_v12  ;;  %vm537_vm3 = vcmp.eq.s32.totalorder %v8155_v50, %v8067_v14  ;;  %v744_v56 = vadd.s32 %v736_v52, %v712_v48  ;;  %vm567_vm4 = vcmp.eq.s32.totalorder %v8173_v61, %v8061_v12 }
  0xb7   : > { %v746_v57 = vadd.s32 %v738_v53, %v714_v51  ;;  %v543_v58 = vsel %vm535_vm2, 1, %v7785_v1  ;;  %v545_v59 = vsel %vm537_vm3, 1, %v7785_v1  ;;  %vm569_vm5 = vcmp.eq.s32.totalorder %v8173_v61, %v8067_v14 }
  0xb8   : > { %v551_v60 = vadd.s32 %v543_v58, %v519_v54  ;;  %v553_v63 = vadd.s32 %v545_v59, %v521_v55  ;;  %v752_v0 = vcvt.s32.f32 %v744_v56  ;;  %v575_v5 = vsel %vm567_vm4, 1, %v7785_v1 }
  0xb9   : > { %v754_v4 = vcvt.s32.f32 %v746_v57  ;;  %v577_v6 = vsel %vm569_vm5, 1, %v7785_v1  ;;  %vm599_vm6 = vcmp.eq.s32.totalorder %v8177_v62, %v8061_v12  ;;  %vm601_vm7 = vcmp.eq.s32.totalorder %v8177_v62, %v8067_v14 }
  0xba   : > { %v583_v13 = vadd.s32 %v575_v5, %v551_v60  ;;  %v585_v7 = vadd.s32 %v577_v6, %v553_v63  ;;  %v2341_v26 = vand.u32 4294901760, %v752_v0  ;;  %v607_v28 = vsel %vm599_vm6, 1, %v7785_v1 }
  0xbb   : > { %v2345_v27 = vand.u32 4294901760, %v754_v4  ;;  %v609_v29 = vsel %vm601_vm7, 1, %v7785_v1  ;;  %vm631_vm8 = vcmp.eq.s32.totalorder %v8193_v33, %v8061_v12  ;;  %vm633_vm9 = vcmp.eq.s32.totalorder %v8193_v33, %v8067_v14 }
  0xbc   : > { %v615_v30 = vadd.s32 %v607_v28, %v583_v13  ;;  %v617_v31 = vadd.s32 %v609_v29, %v585_v7  ;;  %v8323_v36 = vsub.f32 %v752_v0, %v2341_v26  ;;  %v639_v41 = vsel %vm631_vm8, 1, %v7785_v1 }
  0xbd   : > { %v8321_v32 = vpack.c.bf16 %v2345_v27, %v2341_v26  ;;  %v8325_v9 = vsub.f32 %v754_v4, %v2345_v27  ;;  %v641_v42 = vsel %vm633_vm9, 1, %v7785_v1  ;;  %vm663_vm10 = vcmp.eq.s32.totalorder %v8197_v34, %v8061_v12 }
  0xbe   : > { %v647_v43 = vadd.s32 %v639_v41, %v615_v30  ;;  %vm665_vm11 = vcmp.eq.s32.totalorder %v8197_v34, %v8067_v14  ;;  %v649_v44 = vadd.s32 %v641_v42, %v617_v31  ;;  %v671_v45 = vsel %vm663_vm10, 1, %v7785_v1 }
  0xbf   : > { %12586 = vst [vmem:[#allocation23_spill] sm:$0xff] %v8321_v32  ;;  %6599 = vmatprep.subr.bf16.mxu0 %v8321_v32  ;;  %v673_v46 = vsel %vm665_vm11, 1, %v7785_v1  ;;  %vm695_vm12 = vcmp.eq.s32.totalorder %v8201_v37, %v8061_v12  ;;  %vm697_vm13 = vcmp.eq.s32.totalorder %v8201_v37, %v8067_v14  ;;  %vm727_vm14 = vcmp.eq.s32.totalorder %v8205_v38, %v8061_v12 }
  0xc0   : > { %v679_v47 = vadd.s32 %v671_v45, %v647_v43  ;;  %v703_v48 = vsel %vm695_vm12, 1, %v7785_v1  ;;  %v681_v51 = vadd.s32 %v673_v46, %v649_v44  ;;  %v705_v52 = vsel %vm697_vm13, 1, %v7785_v1 }
  0xc1   : > { %vm729_vm15 = vcmp.eq.s32.totalorder %v8205_v38, %v8067_v14  ;;  %v735_v53 = vsel %vm727_vm14, 1, %v7785_v1  ;;  %vm770_vm0 = vcmp.eq.s32.totalorder %v8078_v18, %v8070_v15  ;;  %vm772_vm1 = vcmp.eq.s32.totalorder %v8078_v18, %v8073_v16 }
  0xc2   : > { %v711_v54 = vadd.s32 %v703_v48, %v679_v47  ;;  %v737_v55 = vsel %vm729_vm15, 1, %v7785_v1  ;;  %v713_v56 = vadd.s32 %v705_v52, %v681_v51  ;;  %v778_v57 = vsel %vm770_vm0, 1, %v7785_v1 }
  0xc3   : > { %v780_v58 = vsel %vm772_vm1, 1, %v7785_v1  ;;  %vm786_vm2 = vcmp.eq.s32.totalorder %v8080_v19, %v8070_v15  ;;  %vm788_vm3 = vcmp.eq.s32.totalorder %v8080_v19, %v8073_v16  ;;  %vm810_vm4 = vcmp.eq.s32.totalorder %v8084_v20, %v8070_v15 }
  0xc4   : > { %v743_v59 = vadd.s32 %v735_v53, %v711_v54  ;;  %v794_v60 = vsel %vm786_vm2, 1, %v7785_v1  ;;  %v745_v63 = vadd.s32 %v737_v55, %v713_v56  ;;  %v796_v0 = vsel %vm788_vm3, 1, %v7785_v1 }
  0xc5   : > { %v802_v4 = vadd.s32 %v794_v60, %v778_v57  ;;  %vm812_vm5 = vcmp.eq.s32.totalorder %v8084_v20, %v8073_v16  ;;  %v804_v6 = vadd.s32 %v796_v0, %v780_v58  ;;  %v818_v13 = vsel %vm810_vm4, 1, %v7785_v1 }
  0xc6   : > { %v751_v5 = vcvt.s32.f32 %v743_v59  ;;  %v820_v7 = vsel %vm812_vm5, 1, %v7785_v1  ;;  %v753_v26 = vcvt.s32.f32 %v745_v63  ;;  %vm834_vm6 = vcmp.eq.s32.totalorder %v8088_v21, %v8070_v15 }
  0xc7   : > { %v826_v27 = vadd.s32 %v818_v13, %v802_v4  ;;  %vm836_vm7 = vcmp.eq.s32.totalorder %v8088_v21, %v8073_v16  ;;  %v828_v29 = vadd.s32 %v820_v7, %v804_v6  ;;  %v842_v30 = vsel %vm834_vm6, 1, %v7785_v1 }
  0xc8   : > { %v2343_v28 = vand.u32 4294901760, %v751_v5  ;;  %v844_v31 = vsel %vm836_vm7, 1, %v7785_v1  ;;  %v2347_v41 = vand.u32 4294901760, %v753_v26  ;;  %vm858_vm8 = vcmp.eq.s32.totalorder %v8092_v22, %v8070_v15 }
  0xc9   : > { %v850_v42 = vadd.s32 %v842_v30, %v826_v27  ;;  %vm860_vm9 = vcmp.eq.s32.totalorder %v8092_v22, %v8073_v16  ;;  %v852_v44 = vadd.s32 %v844_v31, %v828_v29  ;;  %v866_v45 = vsel %vm858_vm8, 1, %v7785_v1 }
  0xca   : > { %v8376_v43 = vsub.f32 %v751_v5, %v2343_v28  ;;  %v868_v46 = vsel %vm860_vm9, 1, %v7785_v1  ;;  %v8380_v47 = vpack.c.bf16 %v2347_v41, %v2343_v28  ;;  %v8382_v48 = vsub.f32 %v753_v26, %v2347_v41 }
  0xcb   : > { %v874_v51 = vadd.s32 %v866_v45, %v850_v42  ;;  %vm882_vm10 = vcmp.eq.s32.totalorder %v8096_v23, %v8070_v15  ;;  %v876_v52 = vadd.s32 %v868_v46, %v852_v44  ;;  %vm884_vm11 = vcmp.eq.s32.totalorder %v8096_v23, %v8073_v16 }
  0xcc   : > { %12587 = vst [vmem:[#allocation24_spill] sm:$0xff] %v8376_v43  ;;  %12588 = vst [vmem:[#allocation25_spill] sm:$0xff] %v8380_v47  ;;  %v890_v53 = vsel %vm882_vm10, 1, %v7785_v1  ;;  %vm906_vm12 = vcmp.eq.s32.totalorder %v8100_v24, %v8070_v15  ;;  %6601 = vmatpush1.bf16.msra.mxu0 %v8380_v47  ;;  %v892_v54 = vsel %vm884_vm11, 1, %v7785_v1  ;;  %vm908_vm13 = vcmp.eq.s32.totalorder %v8100_v24, %v8073_v16 }
  0xcd   : > { %12589 = vst [vmem:[#allocation26_spill] sm:$0xff] %v8382_v48  ;;  %v898_v55 = vadd.s32 %v890_v53, %v874_v51  ;;  %v914_v56 = vsel %vm906_vm12, 1, %v7785_v1  ;;  %v900_v57 = vadd.s32 %v892_v54, %v876_v52  ;;  %v916_v58 = vsel %vm908_vm13, 1, %v7785_v1 }
  0xce   : > { %vm930_vm14 = vcmp.eq.s32.totalorder %v8104_v25, %v8070_v15  ;;  %vm932_vm15 = vcmp.eq.s32.totalorder %v8104_v25, %v8073_v16  ;;  %vm769_vm0 = vcmp.eq.s32.totalorder %v8153_v49, %v8070_v15  ;;  %vm771_vm1 = vcmp.eq.s32.totalorder %v8153_v49, %v8073_v16 }
  0xcf   : > { %v922_v59 = vadd.s32 %v914_v56, %v898_v55  ;;  %v938_v60 = vsel %vm930_vm14, 1, %v7785_v1  ;;  %v940_v63 = vsel %vm932_vm15, 1, %v7785_v1  ;;  %v924_v0 = vadd.s32 %v916_v58, %v900_v57 }
  0xd0   : > { %v777_v4 = vsel %vm769_vm0, 1, %v7785_v1  ;;  %vm785_vm2 = vcmp.eq.s32.totalorder %v8155_v50, %v8070_v15  ;;  %v779_v6 = vsel %vm771_vm1, 1, %v7785_v1  ;;  %vm787_vm3 = vcmp.eq.s32.totalorder %v8155_v50, %v8073_v16 }
  0xd1   : > { %v946_v5 = vadd.s32 %v938_v60, %v922_v59  ;;  %v793_v13 = vsel %vm785_vm2, 1, %v7785_v1  ;;  %v948_v7 = vadd.s32 %v940_v63, %v924_v0  ;;  %v795_v26 = vsel %vm787_vm3, 1, %v7785_v1 }
  0xd2   : > { %v801_v27 = vadd.s32 %v793_v13, %v777_v4  ;;  %vm809_vm4 = vcmp.eq.s32.totalorder %v8173_v61, %v8070_v15  ;;  %v803_v29 = vadd.s32 %v795_v26, %v779_v6  ;;  %vm811_vm5 = vcmp.eq.s32.totalorder %v8173_v61, %v8073_v16 }
  0xd3   : > { %v954_v28 = vcvt.s32.f32 %v946_v5  ;;  %v817_v30 = vsel %vm809_vm4, 1, %v7785_v1  ;;  %v956_v31 = vcvt.s32.f32 %v948_v7  ;;  %v819_v41 = vsel %vm811_vm5, 1, %v7785_v1 }
  0xd4   : > { %v825_v42 = vadd.s32 %v817_v30, %v801_v27  ;;  %vm833_vm6 = vcmp.eq.s32.totalorder %v8177_v62, %v8070_v15  ;;  %v827_v45 = vadd.s32 %v819_v41, %v803_v29  ;;  %vm835_vm7 = vcmp.eq.s32.totalorder %v8177_v62, %v8073_v16 }
  0xd5   : > { %v2349_v44 = vand.u32 4294901760, %v954_v28  ;;  %v841_v46 = vsel %vm833_vm6, 1, %v7785_v1  ;;  %v2353_v51 = vand.u32 4294901760, %v956_v31  ;;  %v843_v52 = vsel %vm835_vm7, 1, %v7785_v1 }
  0xd6   : > { %v849_v53 = vadd.s32 %v841_v46, %v825_v42  ;;  %vm857_vm8 = vcmp.eq.s32.totalorder %v8193_v33, %v8070_v15  ;;  %v851_v55 = vadd.s32 %v843_v52, %v827_v45  ;;  %vm859_vm9 = vcmp.eq.s32.totalorder %v8193_v33, %v8073_v16 }
  0xd7   : > { %v8429_v54 = vsub.f32 %v954_v28, %v2349_v44  ;;  %v865_v56 = vsel %vm857_vm8, 1, %v7785_v1  ;;  %v8434_v57 = vpack.c.bf16 %v2353_v51, %v2349_v44  ;;  %v8436_v58 = vsub.f32 %v956_v31, %v2353_v51 }
  0xd8   : > { %v867_v59 = vsel %vm859_vm9, 1, %v7785_v1  ;;  %v873_v60 = vadd.s32 %v865_v56, %v849_v53  ;;  %vm881_vm10 = vcmp.eq.s32.totalorder %v8197_v34, %v8070_v15  ;;  %vm883_vm11 = vcmp.eq.s32.totalorder %v8197_v34, %v8073_v16 }
  0xd9   : > { %12590 = vst [vmem:[#allocation27_spill] sm:$0xff] %v8429_v54  ;;  %12591 = vst [vmem:[#allocation28_spill] sm:$0xff] %v8434_v57  ;;  %v875_v63 = vadd.s32 %v867_v59, %v851_v55  ;;  %vm905_vm12 = vcmp.eq.s32.totalorder %v8201_v37, %v8070_v15  ;;  %6603 = vmatprep.subr.bf16.mxu0 %v8434_v57  ;;  %v889_v0 = vsel %vm881_vm10, 1, %v7785_v1  ;;  %v891_v4 = vsel %vm883_vm11, 1, %v7785_v1 }
  0xda   : > { %12592 = vst [vmem:[#allocation29_spill] sm:$0xff] %v8436_v58  ;;  %vm907_vm13 = vcmp.eq.s32.totalorder %v8201_v37, %v8073_v16  ;;  %v913_v5 = vsel %vm905_vm12, 1, %v7785_v1  ;;  %v897_v6 = vadd.s32 %v889_v0, %v873_v60  ;;  %vm929_vm14 = vcmp.eq.s32.totalorder %v8205_v38, %v8070_v15 }
  0xdb   : > { %v899_v13 = vadd.s32 %v891_v4, %v875_v63  ;;  %v915_v7 = vsel %vm907_vm13, 1, %v7785_v1  ;;  %vm931_vm15 = vcmp.eq.s32.totalorder %v8205_v38, %v8073_v16  ;;  %v937_v26 = vsel %vm929_vm14, 1, %v7785_v1 }
  0xdc   : > { %v8458_v27 = vadd.s32 32, %v8061_v12  ;;  %v8461_v28 = vadd.s32 32, %v8067_v14  ;;  %v921_v29 = vadd.s32 %v913_v5, %v897_v6  ;;  %v939_v31 = vsel %vm931_vm15, 1, %v7785_v1 }
  0xdd   : > { %v923_v30 = vadd.s32 %v915_v7, %v899_v13  ;;  %v8465_v41 = vadd.s32 64, %v8050_v3 }
  0xde   : > { %vm774_vm0 = vcmp.eq.s32.totalorder %v8078_v18, %v8458_v27  ;;  %vm776_vm1 = vcmp.eq.s32.totalorder %v8078_v18, %v8461_v28  ;;  %vm790_vm2 = vcmp.eq.s32.totalorder %v8080_v19, %v8458_v27  ;;  %vm792_vm3 = vcmp.eq.s32.totalorder %v8080_v19, %v8461_v28 }
  0xdf   : > { %v945_v15 = vadd.s32 %v937_v26, %v921_v29  ;;  %v947_v16 = vadd.s32 %v939_v31, %v923_v30  ;;  %v782_v42 = vsel %vm774_vm0, 1, %v7785_v1  ;;  %v784_v44 = vsel %vm776_vm1, 1, %v7785_v1 }
  0xe0   : > { %v798_v45 = vsel %vm790_vm2, 1, %v7785_v1  ;;  %v800_v46 = vsel %vm792_vm3, 1, %v7785_v1  ;;  %vm814_vm4 = vcmp.eq.s32.totalorder %v8084_v20, %v8458_v27  ;;  %vm816_vm5 = vcmp.eq.s32.totalorder %v8084_v20, %v8461_v28 }
  0xe1   : > { %v953_v51 = vcvt.s32.f32 %v945_v15  ;;  %v955_v52 = vcvt.s32.f32 %v947_v16  ;;  %v806_v53 = vadd.s32 %v798_v45, %v782_v42  ;;  %v808_v55 = vadd.s32 %v800_v46, %v784_v44 }
  0xe2   : > { %v822_v56 = vsel %vm814_vm4, 1, %v7785_v1  ;;  %v824_v59 = vsel %vm816_vm5, 1, %v7785_v1  ;;  %vm838_vm6 = vcmp.eq.s32.totalorder %v8088_v21, %v8458_v27  ;;  %vm840_vm7 = vcmp.eq.s32.totalorder %v8088_v21, %v8461_v28 }
  0xe3   : > { %v2351_v60 = vand.u32 4294901760, %v953_v51  ;;  %v2355_v63 = vand.u32 4294901760, %v955_v52  ;;  %v830_v0 = vadd.s32 %v822_v56, %v806_v53  ;;  %v832_v4 = vadd.s32 %v824_v59, %v808_v55 }
  0xe4   : > { %v846_v5 = vsel %vm838_vm6, 1, %v7785_v1  ;;  %v848_v6 = vsel %vm840_vm7, 1, %v7785_v1  ;;  %vm862_vm8 = vcmp.eq.s32.totalorder %v8092_v22, %v8458_v27  ;;  %vm864_vm9 = vcmp.eq.s32.totalorder %v8092_v22, %v8461_v28 }
  0xe5   : > { %v8495_v13 = vpack.c.bf16 %v2355_v63, %v2351_v60  ;;  %v8497_v7 = vsub.f32 %v953_v51, %v2351_v60  ;;  %v8499_v26 = vsub.f32 %v955_v52, %v2355_v63  ;;  %v854_v29 = vadd.s32 %v846_v5, %v830_v0 }
  0xe6   : > { %v856_v30 = vadd.s32 %v848_v6, %v832_v4  ;;  %v870_v31 = vsel %vm862_vm8, 1, %v7785_v1  ;;  %v872_v15 = vsel %vm864_vm9, 1, %v7785_v1  ;;  %vm886_vm10 = vcmp.eq.s32.totalorder %v8096_v23, %v8458_v27 }
  0xe7   : > { %12593 = vst [vmem:[#allocation30_spill] sm:$0xff] %v8495_v13  ;;  %12594 = vst [vmem:[#allocation31_spill] sm:$0xff] %v8497_v7  ;;  %6605 = vmatpush1.bf16.msra.mxu0 %v8495_v13  ;;  %v878_v16 = vadd.s32 %v870_v31, %v854_v29  ;;  %vm888_vm11 = vcmp.eq.s32.totalorder %v8096_v23, %v8461_v28  ;;  %v894_v42 = vsel %vm886_vm10, 1, %v7785_v1 }
  0xe8   : > { %12595 = vst [vmem:[#allocation32_spill] sm:$0xff] %v8499_v26  ;;  %vm910_vm12 = vcmp.eq.s32.totalorder %v8100_v24, %v8458_v27  ;;  %v880_v44 = vadd.s32 %v872_v15, %v856_v30  ;;  %v896_v45 = vsel %vm888_vm11, 1, %v7785_v1  ;;  %vm912_vm13 = vcmp.eq.s32.totalorder %v8100_v24, %v8461_v28 }
  0xe9   : > { %v918_v46 = vsel %vm910_vm12, 1, %v7785_v1  ;;  %v902_v51 = vadd.s32 %v894_v42, %v878_v16  ;;  %v920_v52 = vsel %vm912_vm13, 1, %v7785_v1  ;;  %vm934_vm14 = vcmp.eq.s32.totalorder %v8104_v25, %v8458_v27 }
  0xea   : > { %vm936_vm15 = vcmp.eq.s32.totalorder %v8104_v25, %v8461_v28  ;;  %v904_v53 = vadd.s32 %v896_v45, %v880_v44  ;;  %v942_v55 = vsel %vm934_vm14, 1, %v7785_v1  ;;  %vm773_vm0 = vcmp.eq.s32.totalorder %v8153_v49, %v8458_v27 }
  0xeb   : > { %v944_v56 = vsel %vm936_vm15, 1, %v7785_v1  ;;  %v926_v59 = vadd.s32 %v918_v46, %v902_v51  ;;  %vm775_vm1 = vcmp.eq.s32.totalorder %v8153_v49, %v8461_v28  ;;  %v781_v60 = vsel %vm773_vm0, 1, %v7785_v1 }
  0xec   : > { %vm789_vm2 = vcmp.eq.s32.totalorder %v8155_v50, %v8458_v27  ;;  %v928_v63 = vadd.s32 %v920_v52, %v904_v53  ;;  %v783_v0 = vsel %vm775_vm1, 1, %v7785_v1  ;;  %vm791_vm3 = vcmp.eq.s32.totalorder %v8155_v50, %v8461_v28 }
  0xed   : > { %v797_v4 = vsel %vm789_vm2, 1, %v7785_v1  ;;  %vm976_vm4 = vcmp.eq.s32.totalorder %v8078_v18, %v8076_v17  ;;  %v950_v5 = vadd.s32 %v942_v55, %v926_v59  ;;  %v799_v6 = vsel %vm791_vm3, 1, %v7785_v1 }
  0xee   : > { %v805_v29 = vadd.s32 %v797_v4, %v781_v60  ;;  %vm813_vm5 = vcmp.eq.s32.totalorder %v8173_v61, %v8458_v27  ;;  %v952_v30 = vadd.s32 %v944_v56, %v928_v63  ;;  %v807_v31 = vadd.s32 %v799_v6, %v783_v0 }
  0xef   : > { %vm815_vm6 = vcmp.eq.s32.totalorder %v8173_v61, %v8461_v28  ;;  %v821_v15 = vsel %vm813_vm5, 1, %v7785_v1  ;;  %v958_v16 = vcvt.s32.f32 %v950_v5  ;;  %vm837_vm7 = vcmp.eq.s32.totalorder %v8177_v62, %v8458_v27 }
  0xf0   : > { %v823_v42 = vsel %vm815_vm6, 1, %v7785_v1  ;;  %v829_v44 = vadd.s32 %v821_v15, %v805_v29  ;;  %v960_v45 = vcvt.s32.f32 %v952_v30  ;;  %vm839_vm8 = vcmp.eq.s32.totalorder %v8177_v62, %v8461_v28 }
  0xf1   : > { %v831_v46 = vadd.s32 %v823_v42, %v807_v31  ;;  %v845_v51 = vsel %vm837_vm7, 1, %v7785_v1  ;;  %v2357_v52 = vand.u32 4294901760, %v958_v16  ;;  %v847_v53 = vsel %vm839_vm8, 1, %v7785_v1 }
  0xf2   : > { %v853_v55 = vadd.s32 %v845_v51, %v829_v44  ;;  %vm861_vm9 = vcmp.eq.s32.totalorder %v8193_v33, %v8458_v27  ;;  %v2361_v56 = vand.u32 4294901760, %v960_v45  ;;  %vm863_vm10 = vcmp.eq.s32.totalorder %v8193_v33, %v8461_v28 }
  0xf3   : > { %v855_v59 = vadd.s32 %v847_v53, %v831_v46  ;;  %v869_v60 = vsel %vm861_vm9, 1, %v7785_v1  ;;  %v8553_v63 = vsub.f32 %v958_v16, %v2357_v52  ;;  %v871_v0 = vsel %vm863_vm10, 1, %v7785_v1 }
  0xf4   : > { %v877_v4 = vadd.s32 %v869_v60, %v853_v55  ;;  %vm885_vm11 = vcmp.eq.s32.totalorder %v8197_v34, %v8458_v27  ;;  %v8558_v5 = vpack.c.bf16 %v2361_v56, %v2357_v52  ;;  %v8560_v6 = vsub.f32 %v960_v45, %v2361_v56 }
  0xf5   : > { %12596 = vst [vmem:[#allocation33_spill] sm:$0xff] %v8553_v63  ;;  %v879_v29 = vadd.s32 %v871_v0, %v855_v59  ;;  %vm887_vm12 = vcmp.eq.s32.totalorder %v8197_v34, %v8461_v28  ;;  %v893_v30 = vsel %vm885_vm11, 1, %v7785_v1  ;;  %vm909_vm13 = vcmp.eq.s32.totalorder %v8201_v37, %v8458_v27 }
  0xf6   : > { %12597 = vst [vmem:[#allocation34_spill] sm:$0xff] %v8558_v5  ;;  %12598 = vst [vmem:[#allocation35_spill] sm:$0xff] %v8560_v6  ;;  %v895_v31 = vsel %vm887_vm12, 1, %v7785_v1  ;;  %vm911_vm14 = vcmp.eq.s32.totalorder %v8201_v37, %v8461_v28  ;;  %6607 = vmatprep.subr.bf16.mxu0 %v8558_v5  ;;  %v901_v15 = vadd.s32 %v893_v30, %v877_v4  ;;  %v917_v42 = vsel %vm909_vm13, 1, %v7785_v1 }
  0xf7   : > { %v903_v16 = vadd.s32 %v895_v31, %v879_v29  ;;  %v919_v44 = vsel %vm911_vm14, 1, %v7785_v1  ;;  %vm933_vm15 = vcmp.eq.s32.totalorder %v8205_v38, %v8458_v27  ;;  %vm935_vm0 = vcmp.eq.s32.totalorder %v8205_v38, %v8461_v28 }
  0xf8   : > { %vm978_vm1 = vcmp.eq.s32.totalorder %v8078_v18, %v8465_v41  ;;  %v984_v45 = vsel %vm976_vm4, 1, %v7785_v1  ;;  %v925_v46 = vadd.s32 %v917_v42, %v901_v15  ;;  %v941_v52 = vsel %vm933_vm15, 1, %v7785_v1 }
  0xf9   : > { %v927_v51 = vadd.s32 %v919_v44, %v903_v16  ;;  %v943_v53 = vsel %vm935_vm0, 1, %v7785_v1  ;;  %v986_v55 = vsel %vm978_vm1, 1, %v7785_v1  ;;  %vm992_vm2 = vcmp.eq.s32.totalorder %v8080_v19, %v8076_v17 }
  0xfa   : > { %vm994_vm3 = vcmp.eq.s32.totalorder %v8080_v19, %v8465_v41  ;;  %vm1016_vm5 = vcmp.eq.s32.totalorder %v8084_v20, %v8076_v17  ;;  %v949_v27 = vadd.s32 %v941_v52, %v925_v46  ;;  %v1000_v56 = vsel %vm992_vm2, 1, %v7785_v1 }
  0xfb   : > { %v951_v28 = vadd.s32 %v943_v53, %v927_v51  ;;  %v1002_v59 = vsel %vm994_vm3, 1, %v7785_v1  ;;  %v1008_v60 = vadd.s32 %v1000_v56, %v984_v45  ;;  %vm1018_vm4 = vcmp.eq.s32.totalorder %v8084_v20, %v8465_v41 }
  0xfc   : > { %v1010_v0 = vadd.s32 %v1002_v59, %v986_v55  ;;  %v1024_v4 = vsel %vm1016_vm5, 1, %v7785_v1  ;;  %v957_v29 = vcvt.s32.f32 %v949_v27  ;;  %v1026_v31 = vsel %vm1018_vm4, 1, %v7785_v1 }
  0xfd   : > { %v959_v30 = vcvt.s32.f32 %v951_v28  ;;  %vm1040_vm6 = vcmp.eq.s32.totalorder %v8088_v21, %v8076_v17  ;;  %v1032_v15 = vadd.s32 %v1024_v4, %v1008_v60  ;;  %vm1042_vm7 = vcmp.eq.s32.totalorder %v8088_v21, %v8465_v41 }
  0xfe   : > { %v1034_v16 = vadd.s32 %v1026_v31, %v1010_v0  ;;  %v1048_v42 = vsel %vm1040_vm6, 1, %v7785_v1  ;;  %v2359_v44 = vand.u32 4294901760, %v957_v29  ;;  %v1050_v46 = vsel %vm1042_vm7, 1, %v7785_v1 }
  0xff   : > { %v2363_v45 = vand.u32 4294901760, %v959_v30  ;;  %vm1064_vm8 = vcmp.eq.s32.totalorder %v8092_v22, %v8076_v17  ;;  %v1056_v51 = vadd.s32 %v1048_v42, %v1032_v15  ;;  %vm1066_vm9 = vcmp.eq.s32.totalorder %v8092_v22, %v8465_v41 }
 0x100   : > { %v1058_v52 = vadd.s32 %v1050_v46, %v1034_v16  ;;  %v1072_v53 = vsel %vm1064_vm8, 1, %v7785_v1  ;;  %v8611_v27 = vsub.f32 %v957_v29, %v2359_v44  ;;  %v1074_v56 = vsel %vm1066_vm9, 1, %v7785_v1 }
 0x101   : > { %v8609_v55 = vpack.c.bf16 %v2363_v45, %v2359_v44  ;;  %v8613_v28 = vsub.f32 %v959_v30, %v2363_v45  ;;  %v1080_v59 = vadd.s32 %v1072_v53, %v1056_v51  ;;  %vm1088_vm10 = vcmp.eq.s32.totalorder %v8096_v23, %v8076_v17 }
 0x102   : > { %12600 = vst [vmem:[#allocation37_spill] sm:$0xff] %v8611_v27  ;;  %v1082_v60 = vadd.s32 %v1074_v56, %v1058_v52  ;;  %vm1090_vm11 = vcmp.eq.s32.totalorder %v8096_v23, %v8465_v41  ;;  %v1096_v0 = vsel %vm1088_vm10, 1, %v7785_v1  ;;  %vm1112_vm12 = vcmp.eq.s32.totalorder %v8100_v24, %v8076_v17 }
 0x103   : > { %12599 = vst [vmem:[#allocation36_spill] sm:$0xff] %v8609_v55  ;;  %12601 = vst [vmem:[#allocation38_spill] sm:$0xff] %v8613_v28  ;;  %6609 = vmatpush1.bf16.msra.mxu0 %v8609_v55  ;;  %v1098_v4 = vsel %vm1090_vm11, 1, %v7785_v1  ;;  %vm1114_vm13 = vcmp.eq.s32.totalorder %v8100_v24, %v8465_v41  ;;  %v1104_v29 = vadd.s32 %v1096_v0, %v1080_v59  ;;  %v1120_v31 = vsel %vm1112_vm12, 1, %v7785_v1 }
 0x104   : > { %v1106_v30 = vadd.s32 %v1098_v4, %v1082_v60  ;;  %v1122_v15 = vsel %vm1114_vm13, 1, %v7785_v1  ;;  %vm1136_vm14 = vcmp.eq.s32.totalorder %v8104_v25, %v8076_v17  ;;  %vm1138_vm15 = vcmp.eq.s32.totalorder %v8104_v25, %v8465_v41 }
 0x105   : > { %vm975_vm0 = vcmp.eq.s32.totalorder %v8153_v49, %v8076_v17  ;;  %vm977_vm1 = vcmp.eq.s32.totalorder %v8153_v49, %v8465_v41  ;;  %v1128_v16 = vadd.s32 %v1120_v31, %v1104_v29  ;;  %v1144_v44 = vsel %vm1136_vm14, 1, %v7785_v1 }
 0x106   : > { %v1130_v42 = vadd.s32 %v1122_v15, %v1106_v30  ;;  %v1146_v45 = vsel %vm1138_vm15, 1, %v7785_v1  ;;  %v983_v46 = vsel %vm975_vm0, 1, %v7785_v1  ;;  %v985_v51 = vsel %vm977_vm1, 1, %v7785_v1 }
 0x107   : > { %vm991_vm2 = vcmp.eq.s32.totalorder %v8155_v50, %v8076_v17  ;;  %vm993_vm3 = vcmp.eq.s32.totalorder %v8155_v50, %v8465_v41  ;;  %v1152_v52 = vadd.s32 %v1144_v44, %v1128_v16  ;;  %vm1015_vm5 = vcmp.eq.s32.totalorder %v8173_v61, %v8076_v17 }
 0x108   : > { %v1154_v53 = vadd.s32 %v1146_v45, %v1130_v42  ;;  %v999_v56 = vsel %vm991_vm2, 1, %v7785_v1  ;;  %v1001_v59 = vsel %vm993_vm3, 1, %v7785_v1  ;;  %vm1017_vm4 = vcmp.eq.s32.totalorder %v8173_v61, %v8465_v41 }
 0x109   : > { %v1007_v60 = vadd.s32 %v999_v56, %v983_v46  ;;  %v1009_v0 = vadd.s32 %v1001_v59, %v985_v51  ;;  %v1160_v4 = vcvt.s32.f32 %v1152_v52  ;;  %v1023_v30 = vsel %vm1015_vm5, 1, %v7785_v1 }
 0x10a   : > { %v1162_v29 = vcvt.s32.f32 %v1154_v53  ;;  %v1025_v31 = vsel %vm1017_vm4, 1, %v7785_v1  ;;  %vm1039_vm6 = vcmp.eq.s32.totalorder %v8177_v62, %v8076_v17  ;;  %vm1041_vm7 = vcmp.eq.s32.totalorder %v8177_v62, %v8465_v41 }
 0x10b   : > { %v1031_v15 = vadd.s32 %v1023_v30, %v1007_v60  ;;  %v1033_v16 = vadd.s32 %v1025_v31, %v1009_v0  ;;  %v2365_v42 = vand.u32 4294901760, %v1160_v4  ;;  %v1047_v45 = vsel %vm1039_vm6, 1, %v7785_v1 }
 0x10c   : > { %v2369_v44 = vand.u32 4294901760, %v1162_v29  ;;  %v1049_v46 = vsel %vm1041_vm7, 1, %v7785_v1  ;;  %vm1063_vm8 = vcmp.eq.s32.totalorder %v8193_v33, %v8076_v17  ;;  %vm1065_vm9 = vcmp.eq.s32.totalorder %v8193_v33, %v8465_v41 }
 0x10d   : > { %v1055_v51 = vadd.s32 %v1047_v45, %v1031_v15  ;;  %v1057_v52 = vadd.s32 %v1049_v46, %v1033_v16  ;;  %v8665_v56 = vsub.f32 %v1160_v4, %v2365_v42  ;;  %v1071_v60 = vsel %vm1063_vm8, 1, %v7785_v1 }
 0x10e   : > { %v8663_v53 = vpack.c.bf16 %v2369_v44, %v2365_v42  ;;  %v8667_v59 = vsub.f32 %v1162_v29, %v2369_v44  ;;  %v1073_v0 = vsel %vm1065_vm9, 1, %v7785_v1  ;;  %vm1087_vm10 = vcmp.eq.s32.totalorder %v8197_v34, %v8076_v17 }
 0x10f   : > { %12603 = vst [vmem:[#allocation40_spill] sm:$0xff] %v8665_v56  ;;  %v1079_v30 = vadd.s32 %v1071_v60, %v1055_v51  ;;  %vm1089_vm11 = vcmp.eq.s32.totalorder %v8197_v34, %v8465_v41  ;;  %v1081_v31 = vadd.s32 %v1073_v0, %v1057_v52  ;;  %v1095_v15 = vsel %vm1087_vm10, 1, %v7785_v1 }
 0x110   : > { %12602 = vst [vmem:[#allocation39_spill] sm:$0xff] %v8663_v53  ;;  %12604 = vst [vmem:[#allocation41_spill] sm:$0xff] %v8667_v59  ;;  %6611 = vmatprep.subr.bf16.mxu0 %v8663_v53  ;;  %v1097_v4 = vsel %vm1089_vm11, 1, %v7785_v1  ;;  %vm1111_vm12 = vcmp.eq.s32.totalorder %v8201_v37, %v8076_v17  ;;  %vm1113_vm13 = vcmp.eq.s32.totalorder %v8201_v37, %v8465_v41  ;;  %v8691_v52 = vadd.s32 64, %v8061_v12 }
 0x111   : > { %v1103_v29 = vadd.s32 %v1095_v15, %v1079_v30  ;;  %v1119_v16 = vsel %vm1111_vm12, 1, %v7785_v1  ;;  %vm1135_vm14 = vcmp.eq.s32.totalorder %v8205_v38, %v8076_v17  ;;  %v1105_v42 = vadd.s32 %v1097_v4, %v1081_v31 }
 0x112   : > { %v1121_v44 = vsel %vm1113_vm13, 1, %v7785_v1  ;;  %vm1137_vm15 = vcmp.eq.s32.totalorder %v8205_v38, %v8465_v41  ;;  %v1143_v45 = vsel %vm1135_vm14, 1, %v7785_v1  ;;  %v8694_v60 = vadd.s32 64, %v8067_v14 }
 0x113   : > { %v1127_v46 = vadd.s32 %v1119_v16, %v1103_v29  ;;  %v1145_v51 = vsel %vm1137_vm15, 1, %v7785_v1  ;;  %v1129_v0 = vadd.s32 %v1121_v44, %v1105_v42  ;;  %v8697_v17 = vadd.s32 96, %v8047_v2 }
 0x114   : > { %v8700_v30 = vadd.s32 96, %v8050_v3  ;;  %v8703_v41 = vadd.s32 96, %v8061_v12  ;;  %vm980_vm0 = vcmp.eq.s32.totalorder %v8078_v18, %v8691_v52  ;;  %vm982_vm1 = vcmp.eq.s32.totalorder %v8078_v18, %v8694_v60 }
 0x115   : > { %v1151_v31 = vadd.s32 %v1143_v45, %v1127_v46  ;;  %vm996_vm2 = vcmp.eq.s32.totalorder %v8080_v19, %v8691_v52  ;;  %v1153_v15 = vadd.s32 %v1145_v51, %v1129_v0  ;;  %v988_v4 = vsel %vm980_vm0, 1, %v7785_v1 }
 0x116   : > { %v990_v29 = vsel %vm982_vm1, 1, %v7785_v1  ;;  %vm998_vm3 = vcmp.eq.s32.totalorder %v8080_v19, %v8694_v60  ;;  %v1004_v42 = vsel %vm996_vm2, 1, %v7785_v1  ;;  %vm1020_vm5 = vcmp.eq.s32.totalorder %v8084_v20, %v8691_v52 }
 0x117   : > { %v1159_v16 = vcvt.s32.f32 %v1151_v31  ;;  %v1006_v44 = vsel %vm998_vm3, 1, %v7785_v1  ;;  %v1161_v45 = vcvt.s32.f32 %v1153_v15  ;;  %v1012_v46 = vadd.s32 %v1004_v42, %v988_v4 }
 0x118   : > { %v1014_v53 = vadd.s32 %v1006_v44, %v990_v29  ;;  %vm1022_vm4 = vcmp.eq.s32.totalorder %v8084_v20, %v8694_v60  ;;  %v1028_v0 = vsel %vm1020_vm5, 1, %v7785_v1  ;;  %vm1044_vm6 = vcmp.eq.s32.totalorder %v8088_v21, %v8691_v52 }
 0x119   : > { %v2367_v51 = vand.u32 4294901760, %v1159_v16  ;;  %v1030_v55 = vsel %vm1022_vm4, 1, %v7785_v1  ;;  %v2371_v31 = vand.u32 4294901760, %v1161_v45  ;;  %v1036_v5 = vadd.s32 %v1028_v0, %v1012_v46 }
 0x11a   : > { %v1038_v13 = vadd.s32 %v1030_v55, %v1014_v53  ;;  %vm1046_vm7 = vcmp.eq.s32.totalorder %v8088_v21, %v8694_v60  ;;  %v1052_v4 = vsel %vm1044_vm6, 1, %v7785_v1  ;;  %vm1068_vm8 = vcmp.eq.s32.totalorder %v8092_v22, %v8691_v52 }
 0x11b   : > { %v8727_v15 = vsub.f32 %v1159_v16, %v2367_v51  ;;  %v1054_v29 = vsel %vm1046_vm7, 1, %v7785_v1  ;;  %v8733_v42 = vpack.c.bf16 %v2371_v31, %v2367_v51  ;;  %v8735_v44 = vsub.f32 %v1161_v45, %v2371_v31 }
 0x11c   : > { %v1060_v57 = vadd.s32 %v1052_v4, %v1036_v5  ;;  %v1062_v47 = vadd.s32 %v1054_v29, %v1038_v13  ;;  %vm1070_vm9 = vcmp.eq.s32.totalorder %v8092_v22, %v8694_v60  ;;  %v1076_v55 = vsel %vm1068_vm8, 1, %v7785_v1 }
 0x11d   : > { %12605 = vst [vmem:[#allocation42_spill] sm:$0xff] %v8727_v15  ;;  %12606 = vst [vmem:[#allocation43_spill] sm:$0xff] %v8733_v42  ;;  %vm1092_vm10 = vcmp.eq.s32.totalorder %v8096_v23, %v8691_v52  ;;  %vm1094_vm11 = vcmp.eq.s32.totalorder %v8096_v23, %v8694_v60  ;;  %6613 = vmatpush1.bf16.msra.mxu0 %v8733_v42  ;;  %v1078_v53 = vsel %vm1070_vm9, 1, %v7785_v1 }
 0x11e   : > { %12607 = vst [vmem:[#allocation44_spill] sm:$0xff] %v8735_v44  ;;  %v1084_v16 = vadd.s32 %v1076_v55, %v1060_v57  ;;  %v1100_v45 = vsel %vm1092_vm10, 1, %v7785_v1  ;;  %v1102_v13 = vsel %vm1094_vm11, 1, %v7785_v1  ;;  %v1086_v5 = vadd.s32 %v1078_v53, %v1062_v47 }
 0x11f   : > { %vm1116_vm12 = vcmp.eq.s32.totalorder %v8100_v24, %v8691_v52  ;;  %vm1118_vm13 = vcmp.eq.s32.totalorder %v8100_v24, %v8694_v60  ;;  %vm1140_vm14 = vcmp.eq.s32.totalorder %v8104_v25, %v8691_v52  ;;  %vm1142_vm15 = vcmp.eq.s32.totalorder %v8104_v25, %v8694_v60 }
 0x120   : > { %v1108_v46 = vadd.s32 %v1100_v45, %v1084_v16  ;;  %v1124_v51 = vsel %vm1116_vm12, 1, %v7785_v1  ;;  %v1126_v0 = vsel %vm1118_vm13, 1, %v7785_v1  ;;  %v1110_v57 = vadd.s32 %v1102_v13, %v1086_v5 }
 0x121   : > { %v1148_v47 = vsel %vm1140_vm14, 1, %v7785_v1  ;;  %v1150_v31 = vsel %vm1142_vm15, 1, %v7785_v1  ;;  %vm979_vm0 = vcmp.eq.s32.totalorder %v8153_v49, %v8691_v52  ;;  %vm981_vm1 = vcmp.eq.s32.totalorder %v8153_v49, %v8694_v60 }
 0x122   : > { %v1132_v4 = vadd.s32 %v1124_v51, %v1108_v46  ;;  %v987_v29 = vsel %vm979_vm0, 1, %v7785_v1  ;;  %vm995_vm2 = vcmp.eq.s32.totalorder %v8155_v50, %v8691_v52  ;;  %v1134_v55 = vadd.s32 %v1126_v0, %v1110_v57 }
 0x123   : > { %v989_v53 = vsel %vm981_vm1, 1, %v7785_v1  ;;  %vm997_vm3 = vcmp.eq.s32.totalorder %v8155_v50, %v8694_v60  ;;  %v1003_v16 = vsel %vm995_vm2, 1, %v7785_v1  ;;  %vm1019_vm5 = vcmp.eq.s32.totalorder %v8173_v61, %v8691_v52 }
 0x124   : > { %v1156_v45 = vadd.s32 %v1148_v47, %v1132_v4  ;;  %v1005_v13 = vsel %vm997_vm3, 1, %v7785_v1  ;;  %v1011_v5 = vadd.s32 %v1003_v16, %v987_v29  ;;  %v1158_v46 = vadd.s32 %v1150_v31, %v1134_v55 }
 0x125   : > { %v1013_v51 = vadd.s32 %v1005_v13, %v989_v53  ;;  %vm1021_vm4 = vcmp.eq.s32.totalorder %v8173_v61, %v8694_v60  ;;  %v1027_v0 = vsel %vm1019_vm5, 1, %v7785_v1  ;;  %vm1043_vm6 = vcmp.eq.s32.totalorder %v8177_v62, %v8691_v52 }
 0x126   : > { %v1164_v57 = vcvt.s32.f32 %v1156_v45  ;;  %v1029_v42 = vsel %vm1021_vm4, 1, %v7785_v1  ;;  %v1035_v32 = vadd.s32 %v1027_v0, %v1011_v5  ;;  %v1166_v47 = vcvt.s32.f32 %v1158_v46 }
 0x127   : > { %v1037_v4 = vadd.s32 %v1029_v42, %v1013_v51  ;;  %vm1045_vm7 = vcmp.eq.s32.totalorder %v8177_v62, %v8694_v60  ;;  %v1051_v31 = vsel %vm1043_vm6, 1, %v7785_v1  ;;  %vm1067_vm8 = vcmp.eq.s32.totalorder %v8193_v33, %v8691_v52 }
 0x128   : > { %v2373_v29 = vand.u32 4294901760, %v1164_v57  ;;  %v1053_v55 = vsel %vm1045_vm7, 1, %v7785_v1  ;;  %v1059_v53 = vadd.s32 %v1051_v31, %v1035_v32  ;;  %v2377_v16 = vand.u32 4294901760, %v1166_v47 }
 0x129   : > { %v1061_v45 = vadd.s32 %v1053_v55, %v1037_v4  ;;  %vm1069_vm9 = vcmp.eq.s32.totalorder %v8193_v33, %v8694_v60  ;;  %v1075_v13 = vsel %vm1067_vm8, 1, %v7785_v1  ;;  %vm1091_vm10 = vcmp.eq.s32.totalorder %v8197_v34, %v8691_v52 }
 0x12a   : > { %v8789_v42 = vsub.f32 %v1164_v57, %v2373_v29  ;;  %v1077_v5 = vsel %vm1069_vm9, 1, %v7785_v1  ;;  %v1083_v46 = vadd.s32 %v1075_v13, %v1059_v53  ;;  %v8794_v51 = vpack.c.bf16 %v2377_v16, %v2373_v29 }
 0x12b   : > { %v8796_v32 = vsub.f32 %v1166_v47, %v2377_v16  ;;  %v1085_v0 = vadd.s32 %v1077_v5, %v1061_v45  ;;  %vm1093_vm11 = vcmp.eq.s32.totalorder %v8197_v34, %v8694_v60  ;;  %v1099_v4 = vsel %vm1091_vm10, 1, %v7785_v1 }
 0x12c   : > { %12608 = vst [vmem:[#allocation45_spill] sm:$0xff] %v8789_v42  ;;  %12609 = vst [vmem:[#allocation46_spill] sm:$0xff] %v8794_v51  ;;  %v1101_v31 = vsel %vm1093_vm11, 1, %v7785_v1  ;;  %vm1115_vm12 = vcmp.eq.s32.totalorder %v8201_v37, %v8691_v52  ;;  %vm1117_vm13 = vcmp.eq.s32.totalorder %v8201_v37, %v8694_v60  ;;  %6615 = vmatprep.subr.bf16.mxu0 %v8794_v51 }
 0x12d   : > { %12610 = vst [vmem:[#allocation47_spill] sm:$0xff] %v8796_v32  ;;  %v1107_v57 = vadd.s32 %v1099_v4, %v1083_v46  ;;  %v1109_v29 = vadd.s32 %v1101_v31, %v1085_v0  ;;  %v1123_v47 = vsel %vm1115_vm12, 1, %v7785_v1  ;;  %v1125_v55 = vsel %vm1117_vm13, 1, %v7785_v1 }
 0x12e   : > { %vm1139_vm14 = vcmp.eq.s32.totalorder %v8205_v38, %v8691_v52  ;;  %vm1141_vm15 = vcmp.eq.s32.totalorder %v8205_v38, %v8694_v60  ;;  %vm1182_vm0 = vcmp.eq.s32.totalorder %v8078_v18, %v8697_v17  ;;  %vm1184_vm1 = vcmp.eq.s32.totalorder %v8078_v18, %v8700_v30 }
 0x12f   : > { %v1131_v53 = vadd.s32 %v1123_v47, %v1107_v57  ;;  %v1133_v16 = vadd.s32 %v1125_v55, %v1109_v29  ;;  %v1147_v45 = vsel %vm1139_vm14, 1, %v7785_v1  ;;  %v1149_v13 = vsel %vm1141_vm15, 1, %v7785_v1 }
 0x130   : > { %v1190_v5 = vsel %vm1182_vm0, 1, %v7785_v1  ;;  %v1192_v46 = vsel %vm1184_vm1, 1, %v7785_v1  ;;  %vm1198_vm2 = vcmp.eq.s32.totalorder %v8080_v19, %v8697_v17  ;;  %vm1200_vm3 = vcmp.eq.s32.totalorder %v8080_v19, %v8700_v30 }
 0x131   : > { %v1155_v52 = vadd.s32 %v1147_v45, %v1131_v53  ;;  %v1157_v60 = vadd.s32 %v1149_v13, %v1133_v16  ;;  %v1206_v0 = vsel %vm1198_vm2, 1, %v7785_v1  ;;  %v1208_v4 = vsel %vm1200_vm3, 1, %v7785_v1 }
 0x132   : > { %v1214_v31 = vadd.s32 %v1206_v0, %v1190_v5  ;;  %v1216_v57 = vadd.s32 %v1208_v4, %v1192_v46  ;;  %vm1222_vm5 = vcmp.eq.s32.totalorder %v8084_v20, %v8697_v17  ;;  %vm1224_vm4 = vcmp.eq.s32.totalorder %v8084_v20, %v8700_v30 }
 0x133   : > { %v1163_v29 = vcvt.s32.f32 %v1155_v52  ;;  %v1165_v47 = vcvt.s32.f32 %v1157_v60  ;;  %v1230_v55 = vsel %vm1222_vm5, 1, %v7785_v1  ;;  %v1232_v51 = vsel %vm1224_vm4, 1, %v7785_v1 }
 0x134   : > { %v1238_v53 = vadd.s32 %v1230_v55, %v1214_v31  ;;  %v1240_v16 = vadd.s32 %v1232_v51, %v1216_v57  ;;  %vm1246_vm6 = vcmp.eq.s32.totalorder %v8088_v21, %v8697_v17  ;;  %vm1248_vm7 = vcmp.eq.s32.totalorder %v8088_v21, %v8700_v30 }
 0x135   : > { %v2375_v45 = vand.u32 4294901760, %v1163_v29  ;;  %v2379_v13 = vand.u32 4294901760, %v1165_v47  ;;  %v1254_v5 = vsel %vm1246_vm6, 1, %v7785_v1  ;;  %v1256_v46 = vsel %vm1248_vm7, 1, %v7785_v1 }
 0x136   : > { %v1262_v52 = vadd.s32 %v1254_v5, %v1238_v53  ;;  %v1264_v60 = vadd.s32 %v1256_v46, %v1240_v16  ;;  %vm1270_vm8 = vcmp.eq.s32.totalorder %v8092_v22, %v8697_v17  ;;  %vm1272_vm9 = vcmp.eq.s32.totalorder %v8092_v22, %v8700_v30 }
 0x137   : > { %v8843_v51 = vpack.c.bf16 %v2379_v13, %v2375_v45  ;;  %v8845_v0 = vsub.f32 %v1163_v29, %v2375_v45  ;;  %v8847_v4 = vsub.f32 %v1165_v47, %v2379_v13  ;;  %v1278_v31 = vsel %vm1270_vm8, 1, %v7785_v1 }
 0x138   : > { %v1280_v57 = vsel %vm1272_vm9, 1, %v7785_v1  ;;  %v1286_v55 = vadd.s32 %v1278_v31, %v1262_v52  ;;  %vm1294_vm10 = vcmp.eq.s32.totalorder %v8096_v23, %v8697_v17  ;;  %vm1296_vm11 = vcmp.eq.s32.totalorder %v8096_v23, %v8700_v30 }
 0x139   : > { %12611 = vst [vmem:[#allocation48_spill] sm:$0xff] %v8843_v51  ;;  %12612 = vst [vmem:[#allocation49_spill] sm:$0xff] %v8845_v0  ;;  %6617 = vmatpush1.bf16.msra.mxu0 %v8843_v51  ;;  %v1288_v53 = vadd.s32 %v1280_v57, %v1264_v60  ;;  %v1302_v16 = vsel %vm1294_vm10, 1, %v7785_v1  ;;  %v1304_v29 = vsel %vm1296_vm11, 1, %v7785_v1  ;;  %vm1318_vm12 = vcmp.eq.s32.totalorder %v8100_v24, %v8697_v17 }
 0x13a   : > { %12613 = vst [vmem:[#allocation50_spill] sm:$0xff] %v8847_v4  ;;  %v1310_v47 = vadd.s32 %v1302_v16, %v1286_v55  ;;  %vm1320_vm13 = vcmp.eq.s32.totalorder %v8100_v24, %v8700_v30  ;;  %v1326_v45 = vsel %vm1318_vm12, 1, %v7785_v1  ;;  %vm1342_vm14 = vcmp.eq.s32.totalorder %v8104_v25, %v8697_v17 }
 0x13b   : > { %v1312_v13 = vadd.s32 %v1304_v29, %v1288_v53  ;;  %v1328_v5 = vsel %vm1320_vm13, 1, %v7785_v1  ;;  %vm1344_vm15 = vcmp.eq.s32.totalorder %v8104_v25, %v8700_v30  ;;  %v1350_v46 = vsel %vm1342_vm14, 1, %v7785_v1 }
 0x13c   : > { %v1334_v52 = vadd.s32 %v1326_v45, %v1310_v47  ;;  %v1352_v60 = vsel %vm1344_vm15, 1, %v7785_v1  ;;  %vm1181_vm0 = vcmp.eq.s32.totalorder %v8153_v49, %v8697_v17  ;;  %vm1183_vm1 = vcmp.eq.s32.totalorder %v8153_v49, %v8700_v30 }
 0x13d   : > { %v1336_v31 = vadd.s32 %v1328_v5, %v1312_v13  ;;  %v1189_v57 = vsel %vm1181_vm0, 1, %v7785_v1  ;;  %v1191_v55 = vsel %vm1183_vm1, 1, %v7785_v1  ;;  %vm1197_vm2 = vcmp.eq.s32.totalorder %v8155_v50, %v8697_v17 }
 0x13e   : > { %v1358_v53 = vadd.s32 %v1350_v46, %v1334_v52  ;;  %vm1199_vm3 = vcmp.eq.s32.totalorder %v8155_v50, %v8700_v30  ;;  %v1205_v16 = vsel %vm1197_vm2, 1, %v7785_v1  ;;  %vm1221_vm5 = vcmp.eq.s32.totalorder %v8173_v61, %v8697_v17 }
 0x13f   : > { %v1360_v29 = vadd.s32 %v1352_v60, %v1336_v31  ;;  %v1207_v47 = vsel %vm1199_vm3, 1, %v7785_v1  ;;  %v1213_v45 = vadd.s32 %v1205_v16, %v1189_v57  ;;  %vm1223_vm4 = vcmp.eq.s32.totalorder %v8173_v61, %v8700_v30 }
 0x140   : > { %v1366_v13 = vcvt.s32.f32 %v1358_v53  ;;  %v1215_v5 = vadd.s32 %v1207_v47, %v1191_v55  ;;  %v1229_v51 = vsel %vm1221_vm5, 1, %v7785_v1  ;;  %v1231_v46 = vsel %vm1223_vm4, 1, %v7785_v1 }
 0x141   : > { %v1368_v52 = vcvt.s32.f32 %v1360_v29  ;;  %v1237_v10 = vadd.s32 %v1229_v51, %v1213_v45  ;;  %vm1245_vm6 = vcmp.eq.s32.totalorder %v8177_v62, %v8697_v17  ;;  %vm1247_vm7 = vcmp.eq.s32.totalorder %v8177_v62, %v8700_v30 }
 0x142   : > { %v2381_v60 = vand.u32 4294901760, %v1366_v13  ;;  %v1239_v31 = vadd.s32 %v1231_v46, %v1215_v5  ;;  %v1253_v57 = vsel %vm1245_vm6, 1, %v7785_v1  ;;  %v1255_v16 = vsel %vm1247_vm7, 1, %v7785_v1 }
 0x143   : > { %v2385_v53 = vand.u32 4294901760, %v1368_v52  ;;  %v1261_v55 = vadd.s32 %v1253_v57, %v1237_v10  ;;  %vm1269_vm8 = vcmp.eq.s32.totalorder %v8193_v33, %v8697_v17  ;;  %vm1271_vm9 = vcmp.eq.s32.totalorder %v8193_v33, %v8700_v30 }
 0x144   : > { %v8898_v51 = vsub.f32 %v1366_v13, %v2381_v60  ;;  %v1263_v29 = vadd.s32 %v1255_v16, %v1239_v31  ;;  %v1277_v47 = vsel %vm1269_vm8, 1, %v7785_v1  ;;  %v1279_v45 = vsel %vm1271_vm9, 1, %v7785_v1 }
 0x145   : > { %v8902_v5 = vpack.c.bf16 %v2385_v53, %v2381_v60  ;;  %v8904_v46 = vsub.f32 %v1368_v52, %v2385_v53  ;;  %v1285_v39 = vadd.s32 %v1277_v47, %v1261_v55  ;;  %vm1293_vm10 = vcmp.eq.s32.totalorder %v8197_v34, %v8697_v17 }
 0x146   : > { %12614 = vst [vmem:[#allocation51_spill] sm:$0xff] %v8898_v51  ;;  %v1287_v10 = vadd.s32 %v1279_v45, %v1263_v29  ;;  %vm1295_vm11 = vcmp.eq.s32.totalorder %v8197_v34, %v8700_v30  ;;  %v1301_v13 = vsel %vm1293_vm10, 1, %v7785_v1  ;;  %vm1317_vm12 = vcmp.eq.s32.totalorder %v8201_v37, %v8697_v17 }
 0x147   : > { %12615 = vst [vmem:[#allocation52_spill] sm:$0xff] %v8902_v5  ;;  %12616 = vst [vmem:[#allocation53_spill] sm:$0xff] %v8904_v46  ;;  %6619 = vmatprep.subr.bf16.mxu0 %v8902_v5  ;;  %v1303_v60 = vsel %vm1295_vm11, 1, %v7785_v1  ;;  %v1309_v31 = vadd.s32 %v1301_v13, %v1285_v39  ;;  %vm1319_vm13 = vcmp.eq.s32.totalorder %v8201_v37, %v8700_v30  ;;  %v1325_v52 = vsel %vm1317_vm12, 1, %v7785_v1 }
 0x148   : > { %v1311_v57 = vadd.s32 %v1303_v60, %v1287_v10  ;;  %v1327_v16 = vsel %vm1319_vm13, 1, %v7785_v1  ;;  %vm1341_vm14 = vcmp.eq.s32.totalorder %v8205_v38, %v8697_v17  ;;  %vm1343_vm15 = vcmp.eq.s32.totalorder %v8205_v38, %v8700_v30 }
 0x149   : > { %v1333_v53 = vadd.s32 %v1325_v52, %v1309_v31  ;;  %v1349_v55 = vsel %vm1341_vm14, 1, %v7785_v1  ;;  %v1351_v29 = vsel %vm1343_vm15, 1, %v7785_v1  ;;  %v8926_v39 = vadd.s32 96, %v8067_v14 }
 0x14a   : > { %v1335_v47 = vadd.s32 %v1327_v16, %v1311_v57  ;;  %vm1186_vm0 = vcmp.eq.s32.totalorder %v8078_v18, %v8703_v41  ;;  %vm1202_vm1 = vcmp.eq.s32.totalorder %v8080_v19, %v8703_v41  ;;  %vm1226_vm2 = vcmp.eq.s32.totalorder %v8084_v20, %v8703_v41 }
 0x14b   : > { %v1357_v17 = vadd.s32 %v1349_v55, %v1333_v53  ;;  %vm1188_vm3 = vcmp.eq.s32.totalorder %v8078_v18, %v8926_v39  ;;  %v1194_v30 = vsel %vm1186_vm0, 1, %v7785_v1  ;;  %vm1204_vm5 = vcmp.eq.s32.totalorder %v8080_v19, %v8926_v39 }
 0x14c   : > { %v1359_v45 = vadd.s32 %v1351_v29, %v1335_v47  ;;  %v1196_v10 = vsel %vm1188_vm3, 1, %v7785_v1  ;;  %v1210_v13 = vsel %vm1202_vm1, 1, %v7785_v1  ;;  %v1212_v60 = vsel %vm1204_vm5, 1, %v7785_v1 }
 0x14d   : > { %v1365_v31 = vcvt.s32.f32 %v1357_v17  ;;  %v1218_v52 = vadd.s32 %v1210_v13, %v1194_v30  ;;  %v1220_v57 = vadd.s32 %v1212_v60, %v1196_v10  ;;  %vm1228_vm4 = vcmp.eq.s32.totalorder %v8084_v20, %v8926_v39 }
 0x14e   : > { %v1367_v16 = vcvt.s32.f32 %v1359_v45  ;;  %v1234_v53 = vsel %vm1226_vm2, 1, %v7785_v1  ;;  %v1236_v55 = vsel %vm1228_vm4, 1, %v7785_v1  ;;  %vm1250_vm6 = vcmp.eq.s32.totalorder %v8088_v21, %v8703_v41 }
 0x14f   : > { %v2383_v29 = vand.u32 4294901760, %v1365_v31  ;;  %v1242_v47 = vadd.s32 %v1234_v53, %v1218_v52  ;;  %v1244_v5 = vadd.s32 %v1236_v55, %v1220_v57  ;;  %vm1252_vm7 = vcmp.eq.s32.totalorder %v8088_v21, %v8926_v39 }
 0x150   : > { %v2387_v17 = vand.u32 4294901760, %v1367_v16  ;;  %v1258_v30 = vsel %vm1250_vm6, 1, %v7785_v1  ;;  %v1260_v10 = vsel %vm1252_vm7, 1, %v7785_v1  ;;  %vm1274_vm8 = vcmp.eq.s32.totalorder %v8092_v22, %v8703_v41 }
 0x151   : > { %v8954_v45 = vsub.f32 %v1365_v31, %v2383_v29  ;;  %v1266_v13 = vadd.s32 %v1258_v30, %v1242_v47  ;;  %v1268_v60 = vadd.s32 %v1260_v10, %v1244_v5  ;;  %vm1276_vm9 = vcmp.eq.s32.totalorder %v8092_v22, %v8926_v39 }
 0x152   : > { %v8958_v52 = vpack.c.bf16 %v2387_v17, %v2383_v29  ;;  %v8960_v57 = vsub.f32 %v1367_v16, %v2387_v17  ;;  %v1282_v53 = vsel %vm1274_vm8, 1, %v7785_v1  ;;  %v1284_v55 = vsel %vm1276_vm9, 1, %v7785_v1 }
 0x153   : > { %12617 = vst [vmem:[#allocation54_spill] sm:$0xff] %v8954_v45  ;;  %v1290_v46 = vadd.s32 %v1282_v53, %v1266_v13  ;;  %v1292_v51 = vadd.s32 %v1284_v55, %v1268_v60  ;;  %vm1298_vm10 = vcmp.eq.s32.totalorder %v8096_v23, %v8703_v41  ;;  %vm1300_vm11 = vcmp.eq.s32.totalorder %v8096_v23, %v8926_v39 }
 0x154   : > { %12618 = vst [vmem:[#allocation55_spill] sm:$0xff] %v8958_v52  ;;  %12619 = vst [vmem:[#allocation56_spill] sm:$0xff] %v8960_v57  ;;  %6621 = vmatpush1.bf16.msra.mxu0 %v8958_v52  ;;  %v1306_v5 = vsel %vm1298_vm10, 1, %v7785_v1  ;;  %v1308_v31 = vsel %vm1300_vm11, 1, %v7785_v1  ;;  %vm1322_vm12 = vcmp.eq.s32.totalorder %v8100_v24, %v8703_v41  ;;  %vm1324_vm13 = vcmp.eq.s32.totalorder %v8100_v24, %v8926_v39 }
 0x155   : > { %v1314_v16 = vadd.s32 %v1306_v5, %v1290_v46  ;;  %v1316_v29 = vadd.s32 %v1308_v31, %v1292_v51  ;;  %v1330_v47 = vsel %vm1322_vm12, 1, %v7785_v1  ;;  %v1332_v17 = vsel %vm1324_vm13, 1, %v7785_v1 }
 0x156   : > { %vm1346_vm14 = vcmp.eq.s32.totalorder %v8104_v25, %v8703_v41  ;;  %vm1348_vm15 = vcmp.eq.s32.totalorder %v8104_v25, %v8926_v39  ;;  %vm1185_vm0 = vcmp.eq.s32.totalorder %v8153_v49, %v8703_v41  ;;  %vm1187_vm1 = vcmp.eq.s32.totalorder %v8153_v49, %v8926_v39 }
 0x157   : > { %v1338_v30 = vadd.s32 %v1330_v47, %v1314_v16  ;;  %v1340_v10 = vadd.s32 %v1332_v17, %v1316_v29  ;;  %v1354_v51 = vsel %vm1346_vm14, 1, %v7785_v1  ;;  %v1356_v46 = vsel %vm1348_vm15, 1, %v7785_v1 }
 0x158   : > { %v1193_v13 = vsel %vm1185_vm0, 1, %v7785_v1  ;;  %v1195_v60 = vsel %vm1187_vm1, 1, %v7785_v1  ;;  %vm1201_vm2 = vcmp.eq.s32.totalorder %v8155_v50, %v8703_v41  ;;  %vm1203_vm3 = vcmp.eq.s32.totalorder %v8155_v50, %v8926_v39 }
 0x159   : > { %v1362_v53 = vadd.s32 %v1354_v51, %v1338_v30  ;;  %v1364_v55 = vadd.s32 %v1356_v46, %v1340_v10  ;;  %v1209_v5 = vsel %vm1201_vm2, 1, %v7785_v1  ;;  %v1211_v31 = vsel %vm1203_vm3, 1, %v7785_v1 }
 0x15a   : > { %v1217_v16 = vadd.s32 %v1209_v5, %v1193_v13  ;;  %v1219_v29 = vadd.s32 %v1211_v31, %v1195_v60  ;;  %vm1225_vm5 = vcmp.eq.s32.totalorder %v8173_v61, %v8703_v41  ;;  %vm1227_vm4 = vcmp.eq.s32.totalorder %v8173_v61, %v8926_v39 }
 0x15b   : > { %v1370_v47 = vcvt.s32.f32 %v1362_v53  ;;  %v1372_v17 = vcvt.s32.f32 %v1364_v55  ;;  %v1233_v52 = vsel %vm1225_vm5, 1, %v7785_v1  ;;  %v1235_v57 = vsel %vm1227_vm4, 1, %v7785_v1 }
 0x15c   : > { %v1241_v30 = vadd.s32 %v1233_v52, %v1217_v16  ;;  %v1243_v10 = vadd.s32 %v1235_v57, %v1219_v29  ;;  %vm1249_vm6 = vcmp.eq.s32.totalorder %v8177_v62, %v8703_v41  ;;  %vm1251_vm7 = vcmp.eq.s32.totalorder %v8177_v62, %v8926_v39 }
 0x15d   : > { %v2389_v51 = vand.u32 4294901760, %v1370_v47  ;;  %v2393_v46 = vand.u32 4294901760, %v1372_v17  ;;  %v1257_v13 = vsel %vm1249_vm6, 1, %v7785_v1  ;;  %v1259_v60 = vsel %vm1251_vm7, 1, %v7785_v1 }
 0x15e   : > { %v1265_v53 = vadd.s32 %v1257_v13, %v1241_v30  ;;  %v1267_v55 = vadd.s32 %v1259_v60, %v1243_v10  ;;  %vm1273_vm8 = vcmp.eq.s32.totalorder %v8193_v33, %v8703_v41  ;;  %vm1275_vm9 = vcmp.eq.s32.totalorder %v8193_v33, %v8926_v39 }
 0x15f   : > { %v9011_v52 = vpack.c.bf16 %v2393_v46, %v2389_v51  ;;  %v9013_v57 = vsub.f32 %v1370_v47, %v2389_v51  ;;  %v9015_v5 = vsub.f32 %v1372_v17, %v2393_v46  ;;  %v1281_v31 = vsel %vm1273_vm8, 1, %v7785_v1 }
 0x160   : > { %v1283_v16 = vsel %vm1275_vm9, 1, %v7785_v1  ;;  %v1289_v29 = vadd.s32 %v1281_v31, %v1265_v53  ;;  %vm1297_vm10 = vcmp.eq.s32.totalorder %v8197_v34, %v8703_v41  ;;  %vm1299_vm11 = vcmp.eq.s32.totalorder %v8197_v34, %v8926_v39 }
 0x161   : > { %12620 = vst [vmem:[#allocation57_spill] sm:$0xff] %v9011_v52  ;;  %12621 = vst [vmem:[#allocation58_spill] sm:$0xff] %v9013_v57  ;;  %6623 = vmatprep.subr.bf16.mxu0 %v9011_v52  ;;  %v1291_v30 = vadd.s32 %v1283_v16, %v1267_v55  ;;  %v1305_v10 = vsel %vm1297_vm10, 1, %v7785_v1  ;;  %v1307_v47 = vsel %vm1299_vm11, 1, %v7785_v1  ;;  %vm1321_vm12 = vcmp.eq.s32.totalorder %v8201_v37, %v8703_v41 }
 0x162   : > { %12622 = vst [vmem:[#allocation59_spill] sm:$0xff] %v9015_v5  ;;  %v1313_v17 = vadd.s32 %v1305_v10, %v1289_v29  ;;  %vm1323_vm13 = vcmp.eq.s32.totalorder %v8201_v37, %v8926_v39  ;;  %v1329_v51 = vsel %vm1321_vm12, 1, %v7785_v1  ;;  %vm1345_vm14 = vcmp.eq.s32.totalorder %v8205_v38, %v8703_v41 }
 0x163   : > { %v1315_v46 = vadd.s32 %v1307_v47, %v1291_v30  ;;  %v1331_v13 = vsel %vm1323_vm13, 1, %v7785_v1  ;;  %vm1347_vm15 = vcmp.eq.s32.totalorder %v8205_v38, %v8926_v39  ;;  %v1353_v60 = vsel %vm1345_vm14, 1, %v7785_v1 }
 0x164   : > { %v1337_v53 = vadd.s32 %v1329_v51, %v1313_v17  ;;  %v1355_v55 = vsel %vm1347_vm15, 1, %v7785_v1  ;;  %v9039_v31 = vadd.s32 128, %v8047_v2  ;;  %v9042_v16 = vadd.s32 128, %v8050_v3 }
 0x165   : > { %v1339_v29 = vadd.s32 %v1331_v13, %v1315_v46  ;;  %v9045_v41 = vadd.s32 128, %v8061_v12  ;;  %v9048_v30 = vadd.s32 128, %v8067_v14  ;;  %v9051_v39 = vadd.s32 160, %v8047_v2 }
 0x166   : > { %v1361_v10 = vadd.s32 %v1353_v60, %v1337_v53  ;;  %vm1388_vm0 = vcmp.eq.s32.totalorder %v8078_v18, %v9039_v31  ;;  %vm1390_vm1 = vcmp.eq.s32.totalorder %v8078_v18, %v9042_v16  ;;  %vm1404_vm2 = vcmp.eq.s32.totalorder %v8080_v19, %v9039_v31 }
 0x167   : > { %v1363_v47 = vadd.s32 %v1355_v55, %v1339_v29  ;;  %v1396_v17 = vsel %vm1388_vm0, 1, %v7785_v1  ;;  %v1398_v51 = vsel %vm1390_vm1, 1, %v7785_v1  ;;  %vm1406_vm3 = vcmp.eq.s32.totalorder %v8080_v19, %v9042_v16 }
 0x168   : > { %v1369_v46 = vcvt.s32.f32 %v1361_v10  ;;  %v1412_v13 = vsel %vm1404_vm2, 1, %v7785_v1  ;;  %v1414_v60 = vsel %vm1406_vm3, 1, %v7785_v1  ;;  %vm1428_vm5 = vcmp.eq.s32.totalorder %v8084_v20, %v9039_v31 }
 0x169   : > { %v1371_v53 = vcvt.s32.f32 %v1363_v47  ;;  %v1420_v52 = vadd.s32 %v1412_v13, %v1396_v17  ;;  %v1422_v5 = vadd.s32 %v1414_v60, %v1398_v51  ;;  %vm1430_vm4 = vcmp.eq.s32.totalorder %v8084_v20, %v9042_v16 }
 0x16a   : > { %v2391_v55 = vand.u32 4294901760, %v1369_v46  ;;  %v1436_v29 = vsel %vm1428_vm5, 1, %v7785_v1  ;;  %v1438_v57 = vsel %vm1430_vm4, 1, %v7785_v1  ;;  %vm1452_vm6 = vcmp.eq.s32.totalorder %v8088_v21, %v9039_v31 }
 0x16b   : > { %v2395_v10 = vand.u32 4294901760, %v1371_v53  ;;  %v1444_v45 = vadd.s32 %v1436_v29, %v1420_v52  ;;  %v1446_v4 = vadd.s32 %v1438_v57, %v1422_v5  ;;  %vm1454_vm7 = vcmp.eq.s32.totalorder %v8088_v21, %v9042_v16 }
 0x16c   : > { %v9075_v47 = vsub.f32 %v1369_v46, %v2391_v55  ;;  %v1460_v17 = vsel %vm1452_vm6, 1, %v7785_v1  ;;  %v1462_v51 = vsel %vm1454_vm7, 1, %v7785_v1  ;;  %vm1476_vm8 = vcmp.eq.s32.totalorder %v8092_v22, %v9039_v31 }
 0x16d   : > { %v9081_v13 = vpack.c.bf16 %v2395_v10, %v2391_v55  ;;  %v9083_v60 = vsub.f32 %v1371_v53, %v2395_v10  ;;  %v1468_v0 = vadd.s32 %v1460_v17, %v1444_v45  ;;  %v1470_v32 = vadd.s32 %v1462_v51, %v1446_v4 }
 0x16e   : > { %12623 = vst [vmem:[#allocation60_spill] sm:$0xff] %v9075_v47  ;;  %vm1478_vm9 = vcmp.eq.s32.totalorder %v8092_v22, %v9042_v16  ;;  %v1484_v52 = vsel %vm1476_vm8, 1, %v7785_v1  ;;  %vm1500_vm10 = vcmp.eq.s32.totalorder %v8096_v23, %v9039_v31  ;;  %vm1502_vm11 = vcmp.eq.s32.totalorder %v8096_v23, %v9042_v16 }
 0x16f   : > { %12624 = vst [vmem:[#allocation61_spill] sm:$0xff] %v9081_v13  ;;  %12625 = vst [vmem:[#allocation62_spill] sm:$0xff] %v9083_v60  ;;  %6625 = vmatpush1.bf16.msra.mxu0 %v9081_v13  ;;  %v1486_v57 = vsel %vm1478_vm9, 1, %v7785_v1  ;;  %v1492_v5 = vadd.s32 %v1484_v52, %v1468_v0  ;;  %v1508_v46 = vsel %vm1500_vm10, 1, %v7785_v1  ;;  %v1510_v4 = vsel %vm1502_vm11, 1, %v7785_v1 }
 0x170   : > { %v1494_v45 = vadd.s32 %v1486_v57, %v1470_v32  ;;  %vm1524_vm12 = vcmp.eq.s32.totalorder %v8100_v24, %v9039_v31  ;;  %vm1526_vm13 = vcmp.eq.s32.totalorder %v8100_v24, %v9042_v16  ;;  %vm1548_vm14 = vcmp.eq.s32.totalorder %v8104_v25, %v9039_v31 }
 0x171   : > { %v1516_v53 = vadd.s32 %v1508_v46, %v1492_v5  ;;  %v1532_v55 = vsel %vm1524_vm12, 1, %v7785_v1  ;;  %v1534_v29 = vsel %vm1526_vm13, 1, %v7785_v1  ;;  %vm1550_vm15 = vcmp.eq.s32.totalorder %v8104_v25, %v9042_v16 }
 0x172   : > { %v1518_v0 = vadd.s32 %v1510_v4, %v1494_v45  ;;  %v1556_v32 = vsel %vm1548_vm14, 1, %v7785_v1  ;;  %v1558_v10 = vsel %vm1550_vm15, 1, %v7785_v1  ;;  %vm1387_vm0 = vcmp.eq.s32.totalorder %v8153_v49, %v9039_v31 }
 0x173   : > { %v1540_v17 = vadd.s32 %v1532_v55, %v1516_v53  ;;  %vm1389_vm1 = vcmp.eq.s32.totalorder %v8153_v49, %v9042_v16  ;;  %v1395_v51 = vsel %vm1387_vm0, 1, %v7785_v1  ;;  %vm1403_vm2 = vcmp.eq.s32.totalorder %v8155_v50, %v9039_v31 }
 0x174   : > { %v1542_v52 = vadd.s32 %v1534_v29, %v1518_v0  ;;  %v1397_v57 = vsel %vm1389_vm1, 1, %v7785_v1  ;;  %vm1405_vm3 = vcmp.eq.s32.totalorder %v8155_v50, %v9042_v16  ;;  %v1411_v5 = vsel %vm1403_vm2, 1, %v7785_v1 }
 0x175   : > { %v1564_v46 = vadd.s32 %v1556_v32, %v1540_v17  ;;  %v1413_v4 = vsel %vm1405_vm3, 1, %v7785_v1  ;;  %v1419_v45 = vadd.s32 %v1411_v5, %v1395_v51  ;;  %vm1427_vm5 = vcmp.eq.s32.totalorder %v8173_v61, %v9039_v31 }
 0x176   : > { %v1566_v53 = vadd.s32 %v1558_v10, %v1542_v52  ;;  %v1421_v55 = vadd.s32 %v1413_v4, %v1397_v57  ;;  %vm1429_vm4 = vcmp.eq.s32.totalorder %v8173_v61, %v9042_v16  ;;  %v1435_v29 = vsel %vm1427_vm5, 1, %v7785_v1 }
 0x177   : > { %v1572_v0 = vcvt.s32.f32 %v1564_v46  ;;  %v1437_v13 = vsel %vm1429_vm4, 1, %v7785_v1  ;;  %v1443_v60 = vadd.s32 %v1435_v29, %v1419_v45  ;;  %vm1451_vm6 = vcmp.eq.s32.totalorder %v8177_v62, %v9039_v31 }
 0x178   : > { %v1574_v32 = vcvt.s32.f32 %v1566_v53  ;;  %v1445_v17 = vadd.s32 %v1437_v13, %v1421_v55  ;;  %vm1453_vm7 = vcmp.eq.s32.totalorder %v8177_v62, %v9042_v16  ;;  %v1459_v10 = vsel %vm1451_vm6, 1, %v7785_v1 }
 0x179   : > { %v2397_v51 = vand.u32 4294901760, %v1572_v0  ;;  %v1461_v52 = vsel %vm1453_vm7, 1, %v7785_v1  ;;  %v1467_v57 = vadd.s32 %v1459_v10, %v1443_v60  ;;  %vm1475_vm8 = vcmp.eq.s32.totalorder %v8193_v33, %v9039_v31 }
 0x17a   : > { %v2401_v5 = vand.u32 4294901760, %v1574_v32  ;;  %v1469_v46 = vadd.s32 %v1461_v52, %v1445_v17  ;;  %vm1477_vm9 = vcmp.eq.s32.totalorder %v8193_v33, %v9042_v16  ;;  %v1483_v4 = vsel %vm1475_vm8, 1, %v7785_v1 }
 0x17b   : > { %v9137_v13 = vsub.f32 %v1572_v0, %v2397_v51  ;;  %v1485_v45 = vsel %vm1477_vm9, 1, %v7785_v1  ;;  %v1491_v53 = vadd.s32 %v1483_v4, %v1467_v57  ;;  %vm1499_vm10 = vcmp.eq.s32.totalorder %v8197_v34, %v9039_v31 }
 0x17c   : > { %v9142_v55 = vpack.c.bf16 %v2401_v5, %v2397_v51  ;;  %v9144_v60 = vsub.f32 %v1574_v32, %v2401_v5  ;;  %v1493_v29 = vadd.s32 %v1485_v45, %v1469_v46  ;;  %vm1501_vm11 = vcmp.eq.s32.totalorder %v8197_v34, %v9042_v16 }
 0x17d   : > { %12626 = vst [vmem:[#allocation63_spill] sm:$0xff] %v9137_v13  ;;  %v1507_v17 = vsel %vm1499_vm10, 1, %v7785_v1  ;;  %v1509_v10 = vsel %vm1501_vm11, 1, %v7785_v1  ;;  %vm1523_vm12 = vcmp.eq.s32.totalorder %v8201_v37, %v9039_v31  ;;  %vm1525_vm13 = vcmp.eq.s32.totalorder %v8201_v37, %v9042_v16 }
 0x17e   : > { %12627 = vst [vmem:[#allocation64_spill] sm:$0xff] %v9142_v55  ;;  %12628 = vst [vmem:[#allocation65_spill] sm:$0xff] %v9144_v60  ;;  %6627 = vmatprep.subr.bf16.mxu0 %v9142_v55  ;;  %v1515_v0 = vadd.s32 %v1507_v17, %v1491_v53  ;;  %v1517_v51 = vadd.s32 %v1509_v10, %v1493_v29  ;;  %v1531_v32 = vsel %vm1523_vm12, 1, %v7785_v1  ;;  %v1533_v52 = vsel %vm1525_vm13, 1, %v7785_v1 }
 0x17f   : > { %vm1547_vm14 = vcmp.eq.s32.totalorder %v8205_v38, %v9039_v31  ;;  %vm1549_vm15 = vcmp.eq.s32.totalorder %v8205_v38, %v9042_v16  ;;  %vm1392_vm0 = vcmp.eq.s32.totalorder %v8078_v18, %v9045_v41  ;;  %vm1394_vm1 = vcmp.eq.s32.totalorder %v8078_v18, %v9048_v30 }
 0x180   : > { %v1539_v57 = vadd.s32 %v1531_v32, %v1515_v0  ;;  %v1541_v5 = vadd.s32 %v1533_v52, %v1517_v51  ;;  %v1555_v46 = vsel %vm1547_vm14, 1, %v7785_v1  ;;  %v1557_v4 = vsel %vm1549_vm15, 1, %v7785_v1 }
 0x181   : > { %v1400_v45 = vsel %vm1392_vm0, 1, %v7785_v1  ;;  %v1402_v53 = vsel %vm1394_vm1, 1, %v7785_v1  ;;  %vm1408_vm2 = vcmp.eq.s32.totalorder %v8080_v19, %v9045_v41  ;;  %vm1410_vm3 = vcmp.eq.s32.totalorder %v8080_v19, %v9048_v30 }
 0x182   : > { %v1563_v31 = vadd.s32 %v1555_v46, %v1539_v57  ;;  %v1565_v16 = vadd.s32 %v1557_v4, %v1541_v5  ;;  %v1416_v29 = vsel %vm1408_vm2, 1, %v7785_v1  ;;  %v1418_v17 = vsel %vm1410_vm3, 1, %v7785_v1 }
 0x183   : > { %v1424_v10 = vadd.s32 %v1416_v29, %v1400_v45  ;;  %v1426_v0 = vadd.s32 %v1418_v17, %v1402_v53  ;;  %vm1432_vm5 = vcmp.eq.s32.totalorder %v8084_v20, %v9045_v41  ;;  %vm1434_vm4 = vcmp.eq.s32.totalorder %v8084_v20, %v9048_v30 }
 0x184   : > { %v1571_v51 = vcvt.s32.f32 %v1563_v31  ;;  %v1573_v32 = vcvt.s32.f32 %v1565_v16  ;;  %v1440_v52 = vsel %vm1432_vm5, 1, %v7785_v1  ;;  %v1442_v55 = vsel %vm1434_vm4, 1, %v7785_v1 }
 0x185   : > { %v1448_v57 = vadd.s32 %v1440_v52, %v1424_v10  ;;  %v1450_v5 = vadd.s32 %v1442_v55, %v1426_v0  ;;  %vm1456_vm6 = vcmp.eq.s32.totalorder %v8088_v21, %v9045_v41  ;;  %vm1458_vm7 = vcmp.eq.s32.totalorder %v8088_v21, %v9048_v30 }
 0x186   : > { %v2399_v46 = vand.u32 4294901760, %v1571_v51  ;;  %v2403_v4 = vand.u32 4294901760, %v1573_v32  ;;  %v1464_v45 = vsel %vm1456_vm6, 1, %v7785_v1  ;;  %v1466_v53 = vsel %vm1458_vm7, 1, %v7785_v1 }
 0x187   : > { %v1472_v31 = vadd.s32 %v1464_v45, %v1448_v57  ;;  %v1474_v16 = vadd.s32 %v1466_v53, %v1450_v5  ;;  %vm1480_vm8 = vcmp.eq.s32.totalorder %v8092_v22, %v9045_v41  ;;  %vm1482_vm9 = vcmp.eq.s32.totalorder %v8092_v22, %v9048_v30 }
 0x188   : > { %v9191_v55 = vpack.c.bf16 %v2403_v4, %v2399_v46  ;;  %v9193_v29 = vsub.f32 %v1571_v51, %v2399_v46  ;;  %v9195_v17 = vsub.f32 %v1573_v32, %v2403_v4  ;;  %v1488_v10 = vsel %vm1480_vm8, 1, %v7785_v1 }
 0x189   : > { %v1490_v0 = vsel %vm1482_vm9, 1, %v7785_v1  ;;  %v1496_v52 = vadd.s32 %v1488_v10, %v1472_v31  ;;  %vm1504_vm10 = vcmp.eq.s32.totalorder %v8096_v23, %v9045_v41  ;;  %vm1506_vm11 = vcmp.eq.s32.totalorder %v8096_v23, %v9048_v30 }
 0x18a   : > { %12629 = vst [vmem:[#allocation66_spill] sm:$0xff] %v9191_v55  ;;  %12630 = vst [vmem:[#allocation67_spill] sm:$0xff] %v9193_v29  ;;  %6629 = vmatpush1.bf16.msra.mxu0 %v9191_v55  ;;  %v1498_v57 = vadd.s32 %v1490_v0, %v1474_v16  ;;  %v1512_v5 = vsel %vm1504_vm10, 1, %v7785_v1  ;;  %v1514_v51 = vsel %vm1506_vm11, 1, %v7785_v1  ;;  %vm1528_vm12 = vcmp.eq.s32.totalorder %v8100_v24, %v9045_v41 }
 0x18b   : > { %12631 = vst [vmem:[#allocation68_spill] sm:$0xff] %v9195_v17  ;;  %v1520_v32 = vadd.s32 %v1512_v5, %v1496_v52  ;;  %vm1530_vm13 = vcmp.eq.s32.totalorder %v8100_v24, %v9048_v30  ;;  %v1536_v46 = vsel %vm1528_vm12, 1, %v7785_v1  ;;  %vm1552_vm14 = vcmp.eq.s32.totalorder %v8104_v25, %v9045_v41 }
 0x18c   : > { %v1522_v4 = vadd.s32 %v1514_v51, %v1498_v57  ;;  %v1538_v45 = vsel %vm1530_vm13, 1, %v7785_v1  ;;  %vm1554_vm15 = vcmp.eq.s32.totalorder %v8104_v25, %v9048_v30  ;;  %v1560_v53 = vsel %vm1552_vm14, 1, %v7785_v1 }
 0x18d   : > { %v1544_v31 = vadd.s32 %v1536_v46, %v1520_v32  ;;  %v1562_v16 = vsel %vm1554_vm15, 1, %v7785_v1  ;;  %vm1391_vm0 = vcmp.eq.s32.totalorder %v8153_v49, %v9045_v41  ;;  %vm1393_vm1 = vcmp.eq.s32.totalorder %v8153_v49, %v9048_v30 }
 0x18e   : > { %v1546_v10 = vadd.s32 %v1538_v45, %v1522_v4  ;;  %v1399_v0 = vsel %vm1391_vm0, 1, %v7785_v1  ;;  %v1401_v52 = vsel %vm1393_vm1, 1, %v7785_v1  ;;  %vm1407_vm2 = vcmp.eq.s32.totalorder %v8155_v50, %v9045_v41 }
 0x18f   : > { %v1568_v57 = vadd.s32 %v1560_v53, %v1544_v31  ;;  %vm1409_vm3 = vcmp.eq.s32.totalorder %v8155_v50, %v9048_v30  ;;  %v1415_v5 = vsel %vm1407_vm2, 1, %v7785_v1  ;;  %vm1431_vm5 = vcmp.eq.s32.totalorder %v8173_v61, %v9045_v41 }
 0x190   : > { %v1570_v51 = vadd.s32 %v1562_v16, %v1546_v10  ;;  %v1417_v32 = vsel %vm1409_vm3, 1, %v7785_v1  ;;  %v1423_v46 = vadd.s32 %v1415_v5, %v1399_v0  ;;  %vm1433_vm4 = vcmp.eq.s32.totalorder %v8173_v61, %v9048_v30 }
 0x191   : > { %v1576_v4 = vcvt.s32.f32 %v1568_v57  ;;  %v1425_v45 = vadd.s32 %v1417_v32, %v1401_v52  ;;  %v1439_v55 = vsel %vm1431_vm5, 1, %v7785_v1  ;;  %v1441_v53 = vsel %vm1433_vm4, 1, %v7785_v1 }
 0x192   : > { %v1578_v31 = vcvt.s32.f32 %v1570_v51  ;;  %v1447_v17 = vadd.s32 %v1439_v55, %v1423_v46  ;;  %vm1455_vm6 = vcmp.eq.s32.totalorder %v8177_v62, %v9045_v41  ;;  %vm1457_vm7 = vcmp.eq.s32.totalorder %v8177_v62, %v9048_v30 }
 0x193   : > { %v2405_v16 = vand.u32 4294901760, %v1576_v4  ;;  %v1449_v10 = vadd.s32 %v1441_v53, %v1425_v45  ;;  %v1463_v0 = vsel %vm1455_vm6, 1, %v7785_v1  ;;  %v1465_v5 = vsel %vm1457_vm7, 1, %v7785_v1 }
 0x194   : > { %v2409_v57 = vand.u32 4294901760, %v1578_v31  ;;  %v1471_v52 = vadd.s32 %v1463_v0, %v1447_v17  ;;  %vm1479_vm8 = vcmp.eq.s32.totalorder %v8193_v33, %v9045_v41  ;;  %vm1481_vm9 = vcmp.eq.s32.totalorder %v8193_v33, %v9048_v30 }
 0x195   : > { %v9246_v55 = vsub.f32 %v1576_v4, %v2405_v16  ;;  %v1473_v51 = vadd.s32 %v1465_v5, %v1449_v10  ;;  %v1487_v32 = vsel %vm1479_vm8, 1, %v7785_v1  ;;  %v1489_v46 = vsel %vm1481_vm9, 1, %v7785_v1 }
 0x196   : > { %v9250_v45 = vpack.c.bf16 %v2409_v57, %v2405_v16  ;;  %v9252_v53 = vsub.f32 %v1578_v31, %v2409_v57  ;;  %v1495_v29 = vadd.s32 %v1487_v32, %v1471_v52  ;;  %vm1503_vm10 = vcmp.eq.s32.totalorder %v8197_v34, %v9045_v41 }
 0x197   : > { %12632 = vst [vmem:[#allocation69_spill] sm:$0xff] %v9246_v55  ;;  %v1497_v17 = vadd.s32 %v1489_v46, %v1473_v51  ;;  %vm1505_vm11 = vcmp.eq.s32.totalorder %v8197_v34, %v9048_v30  ;;  %v1511_v4 = vsel %vm1503_vm10, 1, %v7785_v1  ;;  %vm1527_vm12 = vcmp.eq.s32.totalorder %v8201_v37, %v9045_v41 }
 0x198   : > { %12633 = vst [vmem:[#allocation70_spill] sm:$0xff] %v9250_v45  ;;  %12634 = vst [vmem:[#allocation71_spill] sm:$0xff] %v9252_v53  ;;  %6631 = vmatprep.subr.bf16.mxu0 %v9250_v45  ;;  %v1513_v16 = vsel %vm1505_vm11, 1, %v7785_v1  ;;  %v1519_v10 = vadd.s32 %v1511_v4, %v1495_v29  ;;  %vm1529_vm13 = vcmp.eq.s32.totalorder %v8201_v37, %v9048_v30  ;;  %v1535_v31 = vsel %vm1527_vm12, 1, %v7785_v1 }
 0x199   : > { %v1521_v0 = vadd.s32 %v1513_v16, %v1497_v17  ;;  %v1537_v5 = vsel %vm1529_vm13, 1, %v7785_v1  ;;  %vm1551_vm14 = vcmp.eq.s32.totalorder %v8205_v38, %v9045_v41  ;;  %vm1553_vm15 = vcmp.eq.s32.totalorder %v8205_v38, %v9048_v30 }
 0x19a   : > { %v1543_v57 = vadd.s32 %v1535_v31, %v1519_v10  ;;  %v1559_v52 = vsel %vm1551_vm14, 1, %v7785_v1  ;;  %v1561_v51 = vsel %vm1553_vm15, 1, %v7785_v1  ;;  %v9274_v29 = vadd.s32 160, %v8050_v3 }
 0x19b   : > { %v1545_v32 = vadd.s32 %v1537_v5, %v1521_v0  ;;  %vm1594_vm0 = vcmp.eq.s32.totalorder %v8078_v18, %v9051_v39  ;;  %vm1610_vm1 = vcmp.eq.s32.totalorder %v8080_v19, %v9051_v39  ;;  %vm1634_vm2 = vcmp.eq.s32.totalorder %v8084_v20, %v9051_v39 }
 0x19c   : > { %v1567_v41 = vadd.s32 %v1559_v52, %v1543_v57  ;;  %vm1596_vm3 = vcmp.eq.s32.totalorder %v8078_v18, %v9274_v29  ;;  %v1602_v30 = vsel %vm1594_vm0, 1, %v7785_v1  ;;  %vm1612_vm5 = vcmp.eq.s32.totalorder %v8080_v19, %v9274_v29 }
 0x19d   : > { %v1569_v46 = vadd.s32 %v1561_v51, %v1545_v32  ;;  %v1604_v17 = vsel %vm1596_vm3, 1, %v7785_v1  ;;  %v1618_v4 = vsel %vm1610_vm1, 1, %v7785_v1  ;;  %v1620_v16 = vsel %vm1612_vm5, 1, %v7785_v1 }
 0x19e   : > { %v1575_v10 = vcvt.s32.f32 %v1567_v41  ;;  %v1626_v31 = vadd.s32 %v1618_v4, %v1602_v30  ;;  %v1628_v0 = vadd.s32 %v1620_v16, %v1604_v17  ;;  %vm1636_vm4 = vcmp.eq.s32.totalorder %v8084_v20, %v9274_v29 }
 0x19f   : > { %v1577_v5 = vcvt.s32.f32 %v1569_v46  ;;  %v1642_v57 = vsel %vm1634_vm2, 1, %v7785_v1  ;;  %v1644_v52 = vsel %vm1636_vm4, 1, %v7785_v1  ;;  %vm1658_vm6 = vcmp.eq.s32.totalorder %v8088_v21, %v9051_v39 }
 0x1a0   : > { %v2407_v51 = vand.u32 4294901760, %v1575_v10  ;;  %v1650_v32 = vadd.s32 %v1642_v57, %v1626_v31  ;;  %v1652_v45 = vadd.s32 %v1644_v52, %v1628_v0  ;;  %vm1660_vm7 = vcmp.eq.s32.totalorder %v8088_v21, %v9274_v29 }
 0x1a1   : > { %v2411_v41 = vand.u32 4294901760, %v1577_v5  ;;  %v1666_v30 = vsel %vm1658_vm6, 1, %v7785_v1  ;;  %v1668_v17 = vsel %vm1660_vm7, 1, %v7785_v1  ;;  %vm1682_vm8 = vcmp.eq.s32.totalorder %v8092_v22, %v9051_v39 }
 0x1a2   : > { %v9302_v46 = vsub.f32 %v1575_v10, %v2407_v51  ;;  %v1674_v4 = vadd.s32 %v1666_v30, %v1650_v32  ;;  %v1676_v16 = vadd.s32 %v1668_v17, %v1652_v45  ;;  %vm1684_vm9 = vcmp.eq.s32.totalorder %v8092_v22, %v9274_v29 }
 0x1a3   : > { %v9306_v31 = vpack.c.bf16 %v2411_v41, %v2407_v51  ;;  %v9308_v0 = vsub.f32 %v1577_v5, %v2411_v41  ;;  %v1690_v57 = vsel %vm1682_vm8, 1, %v7785_v1  ;;  %v1692_v52 = vsel %vm1684_vm9, 1, %v7785_v1 }
 0x1a4   : > { %12635 = vst [vmem:[#allocation72_spill] sm:$0xff] %v9302_v46  ;;  %v1698_v53 = vadd.s32 %v1690_v57, %v1674_v4  ;;  %v1700_v55 = vadd.s32 %v1692_v52, %v1676_v16  ;;  %vm1706_vm10 = vcmp.eq.s32.totalorder %v8096_v23, %v9051_v39  ;;  %vm1708_vm11 = vcmp.eq.s32.totalorder %v8096_v23, %v9274_v29 }
 0x1a5   : > { %12636 = vst [vmem:[#allocation73_spill] sm:$0xff] %v9306_v31  ;;  %12637 = vst [vmem:[#allocation74_spill] sm:$0xff] %v9308_v0  ;;  %6633 = vmatpush1.bf16.msra.mxu0 %v9306_v31  ;;  %v1714_v45 = vsel %vm1706_vm10, 1, %v7785_v1  ;;  %v1716_v10 = vsel %vm1708_vm11, 1, %v7785_v1  ;;  %vm1730_vm12 = vcmp.eq.s32.totalorder %v8100_v24, %v9051_v39  ;;  %vm1732_vm13 = vcmp.eq.s32.totalorder %v8100_v24, %v9274_v29 }
 0x1a6   : > { %v1722_v5 = vadd.s32 %v1714_v45, %v1698_v53  ;;  %v1724_v51 = vadd.s32 %v1716_v10, %v1700_v55  ;;  %v1738_v32 = vsel %vm1730_vm12, 1, %v7785_v1  ;;  %v1740_v41 = vsel %vm1732_vm13, 1, %v7785_v1 }
 0x1a7   : > { %vm1754_vm14 = vcmp.eq.s32.totalorder %v8104_v25, %v9051_v39  ;;  %vm1756_vm15 = vcmp.eq.s32.totalorder %v8104_v25, %v9274_v29  ;;  %vm1593_vm0 = vcmp.eq.s32.totalorder %v8153_v49, %v9051_v39  ;;  %vm1595_vm1 = vcmp.eq.s32.totalorder %v8153_v49, %v9274_v29 }
 0x1a8   : > { %v1746_v30 = vadd.s32 %v1738_v32, %v1722_v5  ;;  %v1748_v17 = vadd.s32 %v1740_v41, %v1724_v51  ;;  %v1762_v55 = vsel %vm1754_vm14, 1, %v7785_v1  ;;  %v1764_v53 = vsel %vm1756_vm15, 1, %v7785_v1 }
 0x1a9   : > { %v1601_v4 = vsel %vm1593_vm0, 1, %v7785_v1  ;;  %v1603_v16 = vsel %vm1595_vm1, 1, %v7785_v1  ;;  %vm1609_vm2 = vcmp.eq.s32.totalorder %v8155_v50, %v9051_v39  ;;  %vm1611_vm3 = vcmp.eq.s32.totalorder %v8155_v50, %v9274_v29 }
 0x1aa   : > { %v1770_v57 = vadd.s32 %v1762_v55, %v1746_v30  ;;  %v1772_v52 = vadd.s32 %v1764_v53, %v1748_v17  ;;  %v1617_v45 = vsel %vm1609_vm2, 1, %v7785_v1  ;;  %v1619_v10 = vsel %vm1611_vm3, 1, %v7785_v1 }
 0x1ab   : > { %v1625_v5 = vadd.s32 %v1617_v45, %v1601_v4  ;;  %v1627_v51 = vadd.s32 %v1619_v10, %v1603_v16  ;;  %vm1633_vm5 = vcmp.eq.s32.totalorder %v8173_v61, %v9051_v39  ;;  %vm1635_vm4 = vcmp.eq.s32.totalorder %v8173_v61, %v9274_v29 }
 0x1ac   : > { %v1778_v32 = vcvt.s32.f32 %v1770_v57  ;;  %v1780_v41 = vcvt.s32.f32 %v1772_v52  ;;  %v1641_v31 = vsel %vm1633_vm5, 1, %v7785_v1  ;;  %v1643_v0 = vsel %vm1635_vm4, 1, %v7785_v1 }
 0x1ad   : > { %v1649_v30 = vadd.s32 %v1641_v31, %v1625_v5  ;;  %v1651_v17 = vadd.s32 %v1643_v0, %v1627_v51  ;;  %vm1657_vm6 = vcmp.eq.s32.totalorder %v8177_v62, %v9051_v39  ;;  %vm1659_vm7 = vcmp.eq.s32.totalorder %v8177_v62, %v9274_v29 }
 0x1ae   : > { %v2413_v55 = vand.u32 4294901760, %v1778_v32  ;;  %v2417_v53 = vand.u32 4294901760, %v1780_v41  ;;  %v1665_v4 = vsel %vm1657_vm6, 1, %v7785_v1  ;;  %v1667_v16 = vsel %vm1659_vm7, 1, %v7785_v1 }
 0x1af   : > { %v1673_v57 = vadd.s32 %v1665_v4, %v1649_v30  ;;  %v1675_v52 = vadd.s32 %v1667_v16, %v1651_v17  ;;  %vm1681_vm8 = vcmp.eq.s32.totalorder %v8193_v33, %v9051_v39  ;;  %vm1683_vm9 = vcmp.eq.s32.totalorder %v8193_v33, %v9274_v29 }
 0x1b0   : > { %v9359_v31 = vpack.c.bf16 %v2417_v53, %v2413_v55  ;;  %v9361_v0 = vsub.f32 %v1778_v32, %v2413_v55  ;;  %v9363_v45 = vsub.f32 %v1780_v41, %v2417_v53  ;;  %v1689_v10 = vsel %vm1681_vm8, 1, %v7785_v1 }
 0x1b1   : > { %v1691_v5 = vsel %vm1683_vm9, 1, %v7785_v1  ;;  %v1697_v51 = vadd.s32 %v1689_v10, %v1673_v57  ;;  %vm1705_vm10 = vcmp.eq.s32.totalorder %v8197_v34, %v9051_v39  ;;  %vm1707_vm11 = vcmp.eq.s32.totalorder %v8197_v34, %v9274_v29 }
 0x1b2   : > { %12638 = vst [vmem:[#allocation75_spill] sm:$0xff] %v9359_v31  ;;  %12639 = vst [vmem:[#allocation76_spill] sm:$0xff] %v9361_v0  ;;  %6635 = vmatprep.subr.bf16.mxu0 %v9359_v31  ;;  %v1699_v30 = vadd.s32 %v1691_v5, %v1675_v52  ;;  %v1713_v17 = vsel %vm1705_vm10, 1, %v7785_v1  ;;  %v1715_v32 = vsel %vm1707_vm11, 1, %v7785_v1  ;;  %vm1729_vm12 = vcmp.eq.s32.totalorder %v8201_v37, %v9051_v39 }
 0x1b3   : > { %12640 = vst [vmem:[#allocation77_spill] sm:$0xff] %v9363_v45  ;;  %v1721_v41 = vadd.s32 %v1713_v17, %v1697_v51  ;;  %vm1731_vm13 = vcmp.eq.s32.totalorder %v8201_v37, %v9274_v29  ;;  %v1737_v55 = vsel %vm1729_vm12, 1, %v7785_v1  ;;  %vm1753_vm14 = vcmp.eq.s32.totalorder %v8205_v38, %v9051_v39 }
 0x1b4   : > { %v1723_v53 = vadd.s32 %v1715_v32, %v1699_v30  ;;  %v1739_v4 = vsel %vm1731_vm13, 1, %v7785_v1  ;;  %vm1755_vm15 = vcmp.eq.s32.totalorder %v8205_v38, %v9274_v29  ;;  %v1761_v16 = vsel %vm1753_vm14, 1, %v7785_v1 }
 0x1b5   : > { %v1745_v57 = vadd.s32 %v1737_v55, %v1721_v41  ;;  %v1763_v52 = vsel %vm1755_vm15, 1, %v7785_v1  ;;  %v9387_v10 = vadd.s32 160, %v8061_v12  ;;  %v9390_v5 = vadd.s32 160, %v8067_v14 }
 0x1b6   : > { %v1747_v51 = vadd.s32 %v1739_v4, %v1723_v53  ;;  %v9393_v39 = vadd.s32 192, %v8047_v2  ;;  %v9396_v30 = vadd.s32 192, %v8050_v3  ;;  %v9399_v29 = vadd.s32 192, %v8061_v12 }
 0x1b7   : > { %v1769_v17 = vadd.s32 %v1761_v16, %v1745_v57  ;;  %vm1598_vm0 = vcmp.eq.s32.totalorder %v8078_v18, %v9387_v10  ;;  %vm1600_vm1 = vcmp.eq.s32.totalorder %v8078_v18, %v9390_v5  ;;  %vm1614_vm2 = vcmp.eq.s32.totalorder %v8080_v19, %v9387_v10 }
 0x1b8   : > { %v1771_v32 = vadd.s32 %v1763_v52, %v1747_v51  ;;  %v1606_v41 = vsel %vm1598_vm0, 1, %v7785_v1  ;;  %v1608_v55 = vsel %vm1600_vm1, 1, %v7785_v1  ;;  %vm1616_vm3 = vcmp.eq.s32.totalorder %v8080_v19, %v9390_v5 }
 0x1b9   : > { %v1777_v53 = vcvt.s32.f32 %v1769_v17  ;;  %v1622_v4 = vsel %vm1614_vm2, 1, %v7785_v1  ;;  %v1624_v16 = vsel %vm1616_vm3, 1, %v7785_v1  ;;  %vm1638_vm5 = vcmp.eq.s32.totalorder %v8084_v20, %v9387_v10 }
 0x1ba   : > { %v1779_v57 = vcvt.s32.f32 %v1771_v32  ;;  %v1630_v31 = vadd.s32 %v1622_v4, %v1606_v41  ;;  %v1632_v45 = vadd.s32 %v1624_v16, %v1608_v55  ;;  %vm1640_vm4 = vcmp.eq.s32.totalorder %v8084_v20, %v9390_v5 }
 0x1bb   : > { %v2415_v52 = vand.u32 4294901760, %v1777_v53  ;;  %v1646_v51 = vsel %vm1638_vm5, 1, %v7785_v1  ;;  %v1648_v0 = vsel %vm1640_vm4, 1, %v7785_v1  ;;  %vm1662_vm6 = vcmp.eq.s32.totalorder %v8088_v21, %v9387_v10 }
 0x1bc   : > { %v2419_v17 = vand.u32 4294901760, %v1779_v57  ;;  %v1654_v46 = vadd.s32 %v1646_v51, %v1630_v31  ;;  %v1656_v60 = vadd.s32 %v1648_v0, %v1632_v45  ;;  %vm1664_vm7 = vcmp.eq.s32.totalorder %v8088_v21, %v9390_v5 }
 0x1bd   : > { %v9423_v32 = vsub.f32 %v1777_v53, %v2415_v52  ;;  %v1670_v41 = vsel %vm1662_vm6, 1, %v7785_v1  ;;  %v1672_v55 = vsel %vm1664_vm7, 1, %v7785_v1  ;;  %vm1686_vm8 = vcmp.eq.s32.totalorder %v8092_v22, %v9387_v10 }
 0x1be   : > { %v9429_v4 = vpack.c.bf16 %v2419_v17, %v2415_v52  ;;  %v9431_v16 = vsub.f32 %v1779_v57, %v2419_v17  ;;  %v1678_v13 = vadd.s32 %v1670_v41, %v1654_v46  ;;  %v1680_v47 = vadd.s32 %v1672_v55, %v1656_v60 }
 0x1bf   : > { %12641 = vst [vmem:[#allocation78_spill] sm:$0xff] %v9423_v32  ;;  %vm1688_vm9 = vcmp.eq.s32.totalorder %v8092_v22, %v9390_v5  ;;  %v1694_v31 = vsel %vm1686_vm8, 1, %v7785_v1  ;;  %vm1710_vm10 = vcmp.eq.s32.totalorder %v8096_v23, %v9387_v10  ;;  %vm1712_vm11 = vcmp.eq.s32.totalorder %v8096_v23, %v9390_v5 }
 0x1c0   : > { %12642 = vst [vmem:[#allocation79_spill] sm:$0xff] %v9429_v4  ;;  %12643 = vst [vmem:[#allocation80_spill] sm:$0xff] %v9431_v16  ;;  %6637 = vmatpush1.bf16.msra.mxu0 %v9429_v4  ;;  %v1696_v0 = vsel %vm1688_vm9, 1, %v7785_v1  ;;  %v1702_v45 = vadd.s32 %v1694_v31, %v1678_v13  ;;  %v1718_v53 = vsel %vm1710_vm10, 1, %v7785_v1  ;;  %v1720_v60 = vsel %vm1712_vm11, 1, %v7785_v1 }
 0x1c1   : > { %v1704_v46 = vadd.s32 %v1696_v0, %v1680_v47  ;;  %vm1734_vm12 = vcmp.eq.s32.totalorder %v8100_v24, %v9387_v10  ;;  %vm1736_vm13 = vcmp.eq.s32.totalorder %v8100_v24, %v9390_v5  ;;  %vm1758_vm14 = vcmp.eq.s32.totalorder %v8104_v25, %v9387_v10 }
 0x1c2   : > { %v1726_v57 = vadd.s32 %v1718_v53, %v1702_v45  ;;  %v1742_v52 = vsel %vm1734_vm12, 1, %v7785_v1  ;;  %v1744_v51 = vsel %vm1736_vm13, 1, %v7785_v1  ;;  %vm1760_vm15 = vcmp.eq.s32.totalorder %v8104_v25, %v9390_v5 }
 0x1c3   : > { %v1728_v13 = vadd.s32 %v1720_v60, %v1704_v46  ;;  %v1766_v47 = vsel %vm1758_vm14, 1, %v7785_v1  ;;  %v1768_v17 = vsel %vm1760_vm15, 1, %v7785_v1  ;;  %vm1597_vm0 = vcmp.eq.s32.totalorder %v8153_v49, %v9387_v10 }
 0x1c4   : > { %v1750_v41 = vadd.s32 %v1742_v52, %v1726_v57  ;;  %vm1599_vm1 = vcmp.eq.s32.totalorder %v8153_v49, %v9390_v5  ;;  %v1605_v55 = vsel %vm1597_vm0, 1, %v7785_v1  ;;  %vm1613_vm2 = vcmp.eq.s32.totalorder %v8155_v50, %v9387_v10 }
 0x1c5   : > { %v1752_v31 = vadd.s32 %v1744_v51, %v1728_v13  ;;  %v1607_v0 = vsel %vm1599_vm1, 1, %v7785_v1  ;;  %vm1615_vm3 = vcmp.eq.s32.totalorder %v8155_v50, %v9390_v5  ;;  %v1621_v45 = vsel %vm1613_vm2, 1, %v7785_v1 }
 0x1c6   : > { %v1774_v53 = vadd.s32 %v1766_v47, %v1750_v41  ;;  %v1623_v60 = vsel %vm1615_vm3, 1, %v7785_v1  ;;  %v1629_v46 = vadd.s32 %v1621_v45, %v1605_v55  ;;  %vm1637_vm5 = vcmp.eq.s32.totalorder %v8173_v61, %v9387_v10 }
 0x1c7   : > { %v1776_v57 = vadd.s32 %v1768_v17, %v1752_v31  ;;  %v1631_v52 = vadd.s32 %v1623_v60, %v1607_v0  ;;  %vm1639_vm4 = vcmp.eq.s32.totalorder %v8173_v61, %v9390_v5  ;;  %v1645_v51 = vsel %vm1637_vm5, 1, %v7785_v1 }
 0x1c8   : > { %v1782_v13 = vcvt.s32.f32 %v1774_v53  ;;  %v1647_v4 = vsel %vm1639_vm4, 1, %v7785_v1  ;;  %v1653_v16 = vadd.s32 %v1645_v51, %v1629_v46  ;;  %vm1661_vm6 = vcmp.eq.s32.totalorder %v8177_v62, %v9387_v10 }
 0x1c9   : > { %v1784_v47 = vcvt.s32.f32 %v1776_v57  ;;  %v1655_v41 = vadd.s32 %v1647_v4, %v1631_v52  ;;  %vm1663_vm7 = vcmp.eq.s32.totalorder %v8177_v62, %v9390_v5  ;;  %v1669_v17 = vsel %vm1661_vm6, 1, %v7785_v1 }
 0x1ca   : > { %v2421_v55 = vand.u32 4294901760, %v1782_v13  ;;  %v1671_v31 = vsel %vm1663_vm7, 1, %v7785_v1  ;;  %v1677_v0 = vadd.s32 %v1669_v17, %v1653_v16  ;;  %vm1685_vm8 = vcmp.eq.s32.totalorder %v8193_v33, %v9387_v10 }
 0x1cb   : > { %v2425_v45 = vand.u32 4294901760, %v1784_v47  ;;  %v1679_v53 = vadd.s32 %v1671_v31, %v1655_v41  ;;  %vm1687_vm9 = vcmp.eq.s32.totalorder %v8193_v33, %v9390_v5  ;;  %v1693_v60 = vsel %vm1685_vm8, 1, %v7785_v1 }
 0x1cc   : > { %v9485_v4 = vsub.f32 %v1782_v13, %v2421_v55  ;;  %v1695_v46 = vsel %vm1687_vm9, 1, %v7785_v1  ;;  %v1701_v57 = vadd.s32 %v1693_v60, %v1677_v0  ;;  %vm1709_vm10 = vcmp.eq.s32.totalorder %v8197_v34, %v9387_v10 }
 0x1cd   : > { %v9490_v52 = vpack.c.bf16 %v2425_v45, %v2421_v55  ;;  %v9492_v16 = vsub.f32 %v1784_v47, %v2425_v45  ;;  %v1703_v51 = vadd.s32 %v1695_v46, %v1679_v53  ;;  %vm1711_vm11 = vcmp.eq.s32.totalorder %v8197_v34, %v9390_v5 }
 0x1ce   : > { %12644 = vst [vmem:[#allocation81_spill] sm:$0xff] %v9485_v4  ;;  %v1717_v41 = vsel %vm1709_vm10, 1, %v7785_v1  ;;  %v1719_v17 = vsel %vm1711_vm11, 1, %v7785_v1  ;;  %vm1733_vm12 = vcmp.eq.s32.totalorder %v8201_v37, %v9387_v10  ;;  %vm1735_vm13 = vcmp.eq.s32.totalorder %v8201_v37, %v9390_v5 }
 0x1cf   : > { %12645 = vst [vmem:[#allocation82_spill] sm:$0xff] %v9490_v52  ;;  %12646 = vst [vmem:[#allocation83_spill] sm:$0xff] %v9492_v16  ;;  %6639 = vmatprep.subr.bf16.mxu0 %v9490_v52  ;;  %v1725_v13 = vadd.s32 %v1717_v41, %v1701_v57  ;;  %v1727_v55 = vadd.s32 %v1719_v17, %v1703_v51  ;;  %v1741_v47 = vsel %vm1733_vm12, 1, %v7785_v1  ;;  %v1743_v31 = vsel %vm1735_vm13, 1, %v7785_v1 }
 0x1d0   : > { %vm1757_vm14 = vcmp.eq.s32.totalorder %v8205_v38, %v9387_v10  ;;  %vm1759_vm15 = vcmp.eq.s32.totalorder %v8205_v38, %v9390_v5  ;;  %vm1800_vm0 = vcmp.eq.s32.totalorder %v8078_v18, %v9393_v39  ;;  %vm1802_vm1 = vcmp.eq.s32.totalorder %v8078_v18, %v9396_v30 }
 0x1d1   : > { %v1749_v0 = vadd.s32 %v1741_v47, %v1725_v13  ;;  %v1751_v45 = vadd.s32 %v1743_v31, %v1727_v55  ;;  %v1765_v53 = vsel %vm1757_vm14, 1, %v7785_v1  ;;  %v1767_v60 = vsel %vm1759_vm15, 1, %v7785_v1 }
 0x1d2   : > { %v1808_v46 = vsel %vm1800_vm0, 1, %v7785_v1  ;;  %v1810_v57 = vsel %vm1802_vm1, 1, %v7785_v1  ;;  %vm1816_vm2 = vcmp.eq.s32.totalorder %v8080_v19, %v9393_v39  ;;  %vm1818_vm3 = vcmp.eq.s32.totalorder %v8080_v19, %v9396_v30 }
 0x1d3   : > { %v1773_v10 = vadd.s32 %v1765_v53, %v1749_v0  ;;  %v1775_v5 = vadd.s32 %v1767_v60, %v1751_v45  ;;  %v1824_v51 = vsel %vm1816_vm2, 1, %v7785_v1  ;;  %v1826_v41 = vsel %vm1818_vm3, 1, %v7785_v1 }
 0x1d4   : > { %v1832_v17 = vadd.s32 %v1824_v51, %v1808_v46  ;;  %v1834_v13 = vadd.s32 %v1826_v41, %v1810_v57  ;;  %vm1840_vm5 = vcmp.eq.s32.totalorder %v8084_v20, %v9393_v39  ;;  %vm1842_vm4 = vcmp.eq.s32.totalorder %v8084_v20, %v9396_v30 }
 0x1d5   : > { %v1781_v55 = vcvt.s32.f32 %v1773_v10  ;;  %v1783_v47 = vcvt.s32.f32 %v1775_v5  ;;  %v1848_v31 = vsel %vm1840_vm5, 1, %v7785_v1  ;;  %v1850_v52 = vsel %vm1842_vm4, 1, %v7785_v1 }
 0x1d6   : > { %v1856_v0 = vadd.s32 %v1848_v31, %v1832_v17  ;;  %v1858_v45 = vadd.s32 %v1850_v52, %v1834_v13  ;;  %vm1864_vm6 = vcmp.eq.s32.totalorder %v8088_v21, %v9393_v39  ;;  %vm1866_vm7 = vcmp.eq.s32.totalorder %v8088_v21, %v9396_v30 }
 0x1d7   : > { %v2423_v53 = vand.u32 4294901760, %v1781_v55  ;;  %v2427_v60 = vand.u32 4294901760, %v1783_v47  ;;  %v1872_v46 = vsel %vm1864_vm6, 1, %v7785_v1  ;;  %v1874_v57 = vsel %vm1866_vm7, 1, %v7785_v1 }
 0x1d8   : > { %v1880_v10 = vadd.s32 %v1872_v46, %v1856_v0  ;;  %v1882_v5 = vadd.s32 %v1874_v57, %v1858_v45  ;;  %vm1888_vm8 = vcmp.eq.s32.totalorder %v8092_v22, %v9393_v39  ;;  %vm1890_vm9 = vcmp.eq.s32.totalorder %v8092_v22, %v9396_v30 }
 0x1d9   : > { %v9539_v52 = vpack.c.bf16 %v2427_v60, %v2423_v53  ;;  %v9541_v51 = vsub.f32 %v1781_v55, %v2423_v53  ;;  %v9543_v41 = vsub.f32 %v1783_v47, %v2427_v60  ;;  %v1896_v17 = vsel %vm1888_vm8, 1, %v7785_v1 }
 0x1da   : > { %v1898_v13 = vsel %vm1890_vm9, 1, %v7785_v1  ;;  %v1904_v31 = vadd.s32 %v1896_v17, %v1880_v10  ;;  %vm1912_vm10 = vcmp.eq.s32.totalorder %v8096_v23, %v9393_v39  ;;  %vm1914_vm11 = vcmp.eq.s32.totalorder %v8096_v23, %v9396_v30 }
 0x1db   : > { %12647 = vst [vmem:[#allocation84_spill] sm:$0xff] %v9539_v52  ;;  %12648 = vst [vmem:[#allocation85_spill] sm:$0xff] %v9541_v51  ;;  %6641 = vmatpush1.bf16.msra.mxu0 %v9539_v52  ;;  %v1906_v0 = vadd.s32 %v1898_v13, %v1882_v5  ;;  %v1920_v45 = vsel %vm1912_vm10, 1, %v7785_v1  ;;  %v1922_v55 = vsel %vm1914_vm11, 1, %v7785_v1  ;;  %vm1936_vm12 = vcmp.eq.s32.totalorder %v8100_v24, %v9393_v39 }
 0x1dc   : > { %12649 = vst [vmem:[#allocation86_spill] sm:$0xff] %v9543_v41  ;;  %v1928_v47 = vadd.s32 %v1920_v45, %v1904_v31  ;;  %vm1938_vm13 = vcmp.eq.s32.totalorder %v8100_v24, %v9396_v30  ;;  %v1944_v53 = vsel %vm1936_vm12, 1, %v7785_v1  ;;  %vm1960_vm14 = vcmp.eq.s32.totalorder %v8104_v25, %v9393_v39 }
 0x1dd   : > { %v1930_v60 = vadd.s32 %v1922_v55, %v1906_v0  ;;  %v1946_v46 = vsel %vm1938_vm13, 1, %v7785_v1  ;;  %vm1962_vm15 = vcmp.eq.s32.totalorder %v8104_v25, %v9396_v30  ;;  %v1968_v57 = vsel %vm1960_vm14, 1, %v7785_v1 }
 0x1de   : > { %v1952_v10 = vadd.s32 %v1944_v53, %v1928_v47  ;;  %v1970_v5 = vsel %vm1962_vm15, 1, %v7785_v1  ;;  %vm1799_vm0 = vcmp.eq.s32.totalorder %v8153_v49, %v9393_v39  ;;  %vm1801_vm1 = vcmp.eq.s32.totalorder %v8153_v49, %v9396_v30 }
 0x1df   : > { %v1954_v17 = vadd.s32 %v1946_v46, %v1930_v60  ;;  %v1807_v13 = vsel %vm1799_vm0, 1, %v7785_v1  ;;  %v1809_v31 = vsel %vm1801_vm1, 1, %v7785_v1  ;;  %vm1815_vm2 = vcmp.eq.s32.totalorder %v8155_v50, %v9393_v39 }
 0x1e0   : > { %v1976_v0 = vadd.s32 %v1968_v57, %v1952_v10  ;;  %vm1817_vm3 = vcmp.eq.s32.totalorder %v8155_v50, %v9396_v30  ;;  %v1823_v45 = vsel %vm1815_vm2, 1, %v7785_v1  ;;  %vm1839_vm5 = vcmp.eq.s32.totalorder %v8173_v61, %v9393_v39 }
 0x1e1   : > { %v1978_v55 = vadd.s32 %v1970_v5, %v1954_v17  ;;  %v1825_v47 = vsel %vm1817_vm3, 1, %v7785_v1  ;;  %v1831_v53 = vadd.s32 %v1823_v45, %v1807_v13  ;;  %vm1841_vm4 = vcmp.eq.s32.totalorder %v8173_v61, %v9396_v30 }
 0x1e2   : > { %v1984_v60 = vcvt.s32.f32 %v1976_v0  ;;  %v1833_v46 = vadd.s32 %v1825_v47, %v1809_v31  ;;  %v1847_v52 = vsel %vm1839_vm5, 1, %v7785_v1  ;;  %v1849_v57 = vsel %vm1841_vm4, 1, %v7785_v1 }
 0x1e3   : > { %v1986_v10 = vcvt.s32.f32 %v1978_v55  ;;  %v1855_v41 = vadd.s32 %v1847_v52, %v1831_v53  ;;  %vm1863_vm6 = vcmp.eq.s32.totalorder %v8177_v62, %v9393_v39  ;;  %vm1865_vm7 = vcmp.eq.s32.totalorder %v8177_v62, %v9396_v30 }
 0x1e4   : > { %v2429_v5 = vand.u32 4294901760, %v1984_v60  ;;  %v1857_v17 = vadd.s32 %v1849_v57, %v1833_v46  ;;  %v1871_v13 = vsel %vm1863_vm6, 1, %v7785_v1  ;;  %v1873_v45 = vsel %vm1865_vm7, 1, %v7785_v1 }
 0x1e5   : > { %v2433_v0 = vand.u32 4294901760, %v1986_v10  ;;  %v1879_v31 = vadd.s32 %v1871_v13, %v1855_v41  ;;  %vm1887_vm8 = vcmp.eq.s32.totalorder %v8193_v33, %v9393_v39  ;;  %vm1889_vm9 = vcmp.eq.s32.totalorder %v8193_v33, %v9396_v30 }
 0x1e6   : > { %v9594_v52 = vsub.f32 %v1984_v60, %v2429_v5  ;;  %v1881_v55 = vadd.s32 %v1873_v45, %v1857_v17  ;;  %v1895_v47 = vsel %vm1887_vm8, 1, %v7785_v1  ;;  %v1897_v53 = vsel %vm1889_vm9, 1, %v7785_v1 }
 0x1e7   : > { %v9598_v46 = vpack.c.bf16 %v2433_v0, %v2429_v5  ;;  %v9600_v57 = vsub.f32 %v1986_v10, %v2433_v0  ;;  %v1903_v51 = vadd.s32 %v1895_v47, %v1879_v31  ;;  %vm1911_vm10 = vcmp.eq.s32.totalorder %v8197_v34, %v9393_v39 }
 0x1e8   : > { %12650 = vst [vmem:[#allocation87_spill] sm:$0xff] %v9594_v52  ;;  %v1905_v41 = vadd.s32 %v1897_v53, %v1881_v55  ;;  %vm1913_vm11 = vcmp.eq.s32.totalorder %v8197_v34, %v9396_v30  ;;  %v1919_v60 = vsel %vm1911_vm10, 1, %v7785_v1  ;;  %vm1935_vm12 = vcmp.eq.s32.totalorder %v8201_v37, %v9393_v39 }
 0x1e9   : > { %12651 = vst [vmem:[#allocation88_spill] sm:$0xff] %v9598_v46  ;;  %12652 = vst [vmem:[#allocation89_spill] sm:$0xff] %v9600_v57  ;;  %6643 = vmatprep.subr.bf16.mxu0 %v9598_v46  ;;  %v1921_v5 = vsel %vm1913_vm11, 1, %v7785_v1  ;;  %v1927_v17 = vadd.s32 %v1919_v60, %v1903_v51  ;;  %vm1937_vm13 = vcmp.eq.s32.totalorder %v8201_v37, %v9396_v30  ;;  %v1943_v10 = vsel %vm1935_vm12, 1, %v7785_v1 }
 0x1ea   : > { %v1929_v13 = vadd.s32 %v1921_v5, %v1905_v41  ;;  %v1945_v45 = vsel %vm1937_vm13, 1, %v7785_v1  ;;  %vm1959_vm14 = vcmp.eq.s32.totalorder %v8205_v38, %v9393_v39  ;;  %vm1961_vm15 = vcmp.eq.s32.totalorder %v8205_v38, %v9396_v30 }
 0x1eb   : > { %v1951_v0 = vadd.s32 %v1943_v10, %v1927_v17  ;;  %v1967_v31 = vsel %vm1959_vm14, 1, %v7785_v1  ;;  %v1969_v55 = vsel %vm1961_vm15, 1, %v7785_v1  ;;  %v9622_v51 = vadd.s32 192, %v8067_v14 }
 0x1ec   : > { %v1953_v47 = vadd.s32 %v1945_v45, %v1929_v13  ;;  %vm1804_vm0 = vcmp.eq.s32.totalorder %v8078_v18, %v9399_v29  ;;  %vm1820_vm1 = vcmp.eq.s32.totalorder %v8080_v19, %v9399_v29  ;;  %vm1844_vm2 = vcmp.eq.s32.totalorder %v8084_v20, %v9399_v29 }
 0x1ed   : > { %v1975_v39 = vadd.s32 %v1967_v31, %v1951_v0  ;;  %vm1806_vm3 = vcmp.eq.s32.totalorder %v8078_v18, %v9622_v51  ;;  %v1812_v30 = vsel %vm1804_vm0, 1, %v7785_v1  ;;  %vm1822_vm5 = vcmp.eq.s32.totalorder %v8080_v19, %v9622_v51 }
 0x1ee   : > { %v1977_v53 = vadd.s32 %v1969_v55, %v1953_v47  ;;  %v1814_v41 = vsel %vm1806_vm3, 1, %v7785_v1  ;;  %v1828_v60 = vsel %vm1820_vm1, 1, %v7785_v1  ;;  %v1830_v5 = vsel %vm1822_vm5, 1, %v7785_v1 }
 0x1ef   : > { %v1983_v17 = vcvt.s32.f32 %v1975_v39  ;;  %v1836_v10 = vadd.s32 %v1828_v60, %v1812_v30  ;;  %v1838_v13 = vadd.s32 %v1830_v5, %v1814_v41  ;;  %vm1846_vm4 = vcmp.eq.s32.totalorder %v8084_v20, %v9622_v51 }
 0x1f0   : > { %v1985_v45 = vcvt.s32.f32 %v1977_v53  ;;  %v1852_v0 = vsel %vm1844_vm2, 1, %v7785_v1  ;;  %v1854_v31 = vsel %vm1846_vm4, 1, %v7785_v1  ;;  %vm1868_vm6 = vcmp.eq.s32.totalorder %v8088_v21, %v9399_v29 }
 0x1f1   : > { %v2431_v55 = vand.u32 4294901760, %v1983_v17  ;;  %v1860_v47 = vadd.s32 %v1852_v0, %v1836_v10  ;;  %v1862_v46 = vadd.s32 %v1854_v31, %v1838_v13  ;;  %vm1870_vm7 = vcmp.eq.s32.totalorder %v8088_v21, %v9622_v51 }
 0x1f2   : > { %v2435_v39 = vand.u32 4294901760, %v1985_v45  ;;  %v1876_v30 = vsel %vm1868_vm6, 1, %v7785_v1  ;;  %v1878_v41 = vsel %vm1870_vm7, 1, %v7785_v1  ;;  %vm1892_vm8 = vcmp.eq.s32.totalorder %v8092_v22, %v9399_v29 }
 0x1f3   : > { %v9650_v53 = vsub.f32 %v1983_v17, %v2431_v55  ;;  %v1884_v60 = vadd.s32 %v1876_v30, %v1860_v47  ;;  %v1886_v5 = vadd.s32 %v1878_v41, %v1862_v46  ;;  %vm1894_vm9 = vcmp.eq.s32.totalorder %v8092_v22, %v9622_v51 }
 0x1f4   : > { %v9654_v10 = vpack.c.bf16 %v2435_v39, %v2431_v55  ;;  %v9656_v13 = vsub.f32 %v1985_v45, %v2435_v39  ;;  %v1900_v0 = vsel %vm1892_vm8, 1, %v7785_v1  ;;  %v1902_v31 = vsel %vm1894_vm9, 1, %v7785_v1 }
 0x1f5   : > { %12653 = vst [vmem:[#allocation90_spill] sm:$0xff] %v9650_v53  ;;  %v1908_v57 = vadd.s32 %v1900_v0, %v1884_v60  ;;  %v1910_v52 = vadd.s32 %v1902_v31, %v1886_v5  ;;  %vm1916_vm10 = vcmp.eq.s32.totalorder %v8096_v23, %v9399_v29  ;;  %vm1918_vm11 = vcmp.eq.s32.totalorder %v8096_v23, %v9622_v51 }
 0x1f6   : > { %12654 = vst [vmem:[#allocation91_spill] sm:$0xff] %v9654_v10  ;;  %12655 = vst [vmem:[#allocation92_spill] sm:$0xff] %v9656_v13  ;;  %6645 = vmatpush1.bf16.msra.mxu0 %v9654_v10  ;;  %v1924_v46 = vsel %vm1916_vm10, 1, %v7785_v1  ;;  %v1926_v17 = vsel %vm1918_vm11, 1, %v7785_v1  ;;  %vm1940_vm12 = vcmp.eq.s32.totalorder %v8100_v24, %v9399_v29  ;;  %vm1942_vm13 = vcmp.eq.s32.totalorder %v8100_v24, %v9622_v51 }
 0x1f7   : > { %v1932_v45 = vadd.s32 %v1924_v46, %v1908_v57  ;;  %v1934_v55 = vadd.s32 %v1926_v17, %v1910_v52  ;;  %v1948_v47 = vsel %vm1940_vm12, 1, %v7785_v1  ;;  %v1950_v39 = vsel %vm1942_vm13, 1, %v7785_v1 }
 0x1f8   : > { %vm1964_vm14 = vcmp.eq.s32.totalorder %v8104_v25, %v9399_v29  ;;  %vm1966_vm15 = vcmp.eq.s32.totalorder %v8104_v25, %v9622_v51  ;;  %vm1803_vm0 = vcmp.eq.s32.totalorder %v8153_v49, %v9399_v29  ;;  %vm1805_vm1 = vcmp.eq.s32.totalorder %v8153_v49, %v9622_v51 }
 0x1f9   : > { %v1956_v30 = vadd.s32 %v1948_v47, %v1932_v45  ;;  %v1958_v41 = vadd.s32 %v1950_v39, %v1934_v55  ;;  %v1972_v52 = vsel %vm1964_vm14, 1, %v7785_v1  ;;  %v1974_v57 = vsel %vm1966_vm15, 1, %v7785_v1 }
 0x1fa   : > { %v1811_v60 = vsel %vm1803_vm0, 1, %v7785_v1  ;;  %v1813_v5 = vsel %vm1805_vm1, 1, %v7785_v1  ;;  %vm1819_vm2 = vcmp.eq.s32.totalorder %v8155_v50, %v9399_v29  ;;  %vm1821_vm3 = vcmp.eq.s32.totalorder %v8155_v50, %v9622_v51 }
 0x1fb   : > { %v1980_v0 = vadd.s32 %v1972_v52, %v1956_v30  ;;  %v1982_v31 = vadd.s32 %v1974_v57, %v1958_v41  ;;  %v1827_v46 = vsel %vm1819_vm2, 1, %v7785_v1  ;;  %v1829_v17 = vsel %vm1821_vm3, 1, %v7785_v1 }
 0x1fc   : > { %v1835_v45 = vadd.s32 %v1827_v46, %v1811_v60  ;;  %v1837_v55 = vadd.s32 %v1829_v17, %v1813_v5  ;;  %vm1843_vm5 = vcmp.eq.s32.totalorder %v8173_v61, %v9399_v29  ;;  %vm1845_vm4 = vcmp.eq.s32.totalorder %v8173_v61, %v9622_v51 }
 0x1fd   : > { %v1988_v47 = vcvt.s32.f32 %v1980_v0  ;;  %v1990_v39 = vcvt.s32.f32 %v1982_v31  ;;  %v1851_v10 = vsel %vm1843_vm5, 1, %v7785_v1  ;;  %v1853_v13 = vsel %vm1845_vm4, 1, %v7785_v1 }
 0x1fe   : > { %v1859_v30 = vadd.s32 %v1851_v10, %v1835_v45  ;;  %v1861_v41 = vadd.s32 %v1853_v13, %v1837_v55  ;;  %vm1867_vm6 = vcmp.eq.s32.totalorder %v8177_v62, %v9399_v29  ;;  %vm1869_vm7 = vcmp.eq.s32.totalorder %v8177_v62, %v9622_v51 }
 0x1ff   : > { %v2437_v52 = vand.u32 4294901760, %v1988_v47  ;;  %v2441_v57 = vand.u32 4294901760, %v1990_v39  ;;  %v1875_v60 = vsel %vm1867_vm6, 1, %v7785_v1  ;;  %v1877_v5 = vsel %vm1869_vm7, 1, %v7785_v1 }
 0x200   : > { %v1883_v0 = vadd.s32 %v1875_v60, %v1859_v30  ;;  %v1885_v31 = vadd.s32 %v1877_v5, %v1861_v41  ;;  %vm1891_vm8 = vcmp.eq.s32.totalorder %v8193_v33, %v9399_v29  ;;  %vm1893_vm9 = vcmp.eq.s32.totalorder %v8193_v33, %v9622_v51 }
 0x201   : > { %v9707_v10 = vpack.c.bf16 %v2441_v57, %v2437_v52  ;;  %v9709_v13 = vsub.f32 %v1988_v47, %v2437_v52  ;;  %v9711_v46 = vsub.f32 %v1990_v39, %v2441_v57  ;;  %v1899_v17 = vsel %vm1891_vm8, 1, %v7785_v1  ;;  %v9730_v57 = vld [vmem:[%s8030_s13 + $0x8] sm:$0xff] }
 0x202   : > { %v1901_v45 = vsel %vm1893_vm9, 1, %v7785_v1  ;;  %v1907_v55 = vadd.s32 %v1899_v17, %v1883_v0  ;;  %vm1915_vm10 = vcmp.eq.s32.totalorder %v8197_v34, %v9399_v29  ;;  %vm1917_vm11 = vcmp.eq.s32.totalorder %v8197_v34, %v9622_v51 }
 0x203   : > { %12656 = vst [vmem:[#allocation93_spill] sm:$0xff] %v9707_v10  ;;  %12657 = vst [vmem:[#allocation94_spill] sm:$0xff] %v9709_v13  ;;  %6647 = vmatprep.subr.bf16.mxu0 %v9707_v10  ;;  %v1909_v30 = vadd.s32 %v1901_v45, %v1885_v31  ;;  %v1923_v47 = vsel %vm1915_vm10, 1, %v7785_v1  ;;  %v1925_v41 = vsel %vm1917_vm11, 1, %v7785_v1  ;;  %vm1939_vm12 = vcmp.eq.s32.totalorder %v8201_v37, %v9399_v29 }
 0x204   : > { %12658 = vst [vmem:[#allocation95_spill] sm:$0xff] %v9711_v46  ;;  %v1931_v39 = vadd.s32 %v1923_v47, %v1907_v55  ;;  %vm1941_vm13 = vcmp.eq.s32.totalorder %v8201_v37, %v9622_v51  ;;  %v1947_v52 = vsel %vm1939_vm12, 1, %v7785_v1  ;;  %vm1963_vm14 = vcmp.eq.s32.totalorder %v8205_v38, %v9399_v29 }
 0x205   : > { %v1933_v60 = vadd.s32 %v1925_v41, %v1909_v30  ;;  %v1949_v5 = vsel %vm1941_vm13, 1, %v7785_v1  ;;  %vm1965_vm15 = vcmp.eq.s32.totalorder %v8205_v38, %v9622_v51  ;;  %v1971_v0 = vsel %vm1963_vm14, 1, %v7785_v1 }
 0x206   : > { %v1955_v31 = vadd.s32 %v1947_v52, %v1931_v39  ;;  %v1973_v17 = vsel %vm1965_vm15, 1, %v7785_v1  ;;  %v9738_v45 = vadd.s32 224, %v8047_v2  ;;  %v9741_v55 = vadd.s32 224, %v8050_v3 }
 0x207   : > { %v1957_v29 = vadd.s32 %v1949_v5, %v1933_v60  ;;  %v9744_v47 = vadd.s32 224, %v8061_v12  ;;  %v9747_v30 = vadd.s32 224, %v8067_v14  ;;  %v9750_v51 = vand.u32 4294901760, %v9730_v57 }
 0x208   : > { %v1979_v41 = vadd.s32 %v1971_v0, %v1955_v31  ;;  %vm2006_vm0 = vcmp.eq.s32.totalorder %v8078_v18, %v9738_v45  ;;  %vm2008_vm1 = vcmp.eq.s32.totalorder %v8078_v18, %v9741_v55  ;;  %vm2022_vm2 = vcmp.eq.s32.totalorder %v8080_v19, %v9738_v45 }
 0x209   : > { %12659 = vst [vmem:[#allocation96_spill] sm:$0xff] %v9750_v51  ;;  %v1981_v2 = vadd.s32 %v1973_v17, %v1957_v29  ;;  %v2014_v3 = vsel %vm2006_vm0, 1, %v7785_v1  ;;  %v2016_v12 = vsel %vm2008_vm1, 1, %v7785_v1  ;;  %vm2024_vm3 = vcmp.eq.s32.totalorder %v8080_v19, %v9741_v55 }
 0x20a   : > { %v1987_v14 = vcvt.s32.f32 %v1979_v41  ;;  %v2030_v39 = vsel %vm2022_vm2, 1, %v7785_v1  ;;  %v2032_v52 = vsel %vm2024_vm3, 1, %v7785_v1  ;;  %vm2046_vm5 = vcmp.eq.s32.totalorder %v8084_v20, %v9738_v45 }
 0x20b   : > { %v1989_v60 = vcvt.s32.f32 %v1981_v2  ;;  %v2038_v5 = vadd.s32 %v2030_v39, %v2014_v3  ;;  %v2040_v0 = vadd.s32 %v2032_v52, %v2016_v12  ;;  %vm2048_vm4 = vcmp.eq.s32.totalorder %v8084_v20, %v9741_v55 }
 0x20c   : > { %v2439_v31 = vand.u32 4294901760, %v1987_v14  ;;  %v2054_v17 = vsel %vm2046_vm5, 1, %v7785_v1  ;;  %v2056_v29 = vsel %vm2048_vm4, 1, %v7785_v1  ;;  %vm2070_vm6 = vcmp.eq.s32.totalorder %v8088_v21, %v9738_v45 }
 0x20d   : > { %v2443_v41 = vand.u32 4294901760, %v1989_v60  ;;  %v2062_v10 = vadd.s32 %v2054_v17, %v2038_v5  ;;  %v2064_v46 = vadd.s32 %v2056_v29, %v2040_v0  ;;  %vm2072_vm7 = vcmp.eq.s32.totalorder %v8088_v21, %v9741_v55 }
 0x20e   : > { %v9774_v2 = vsub.f32 %v1987_v14, %v2439_v31  ;;  %v2078_v3 = vsel %vm2070_vm6, 1, %v7785_v1  ;;  %v2080_v12 = vsel %vm2072_vm7, 1, %v7785_v1  ;;  %vm2094_vm8 = vcmp.eq.s32.totalorder %v8092_v22, %v9738_v45 }
 0x20f   : > { %v9780_v39 = vpack.c.bf16 %v2443_v41, %v2439_v31  ;;  %v9782_v52 = vsub.f32 %v1989_v60, %v2443_v41  ;;  %v2086_v13 = vadd.s32 %v2078_v3, %v2062_v10  ;;  %v2088_v53 = vadd.s32 %v2080_v12, %v2064_v46 }
 0x210   : > { %12660 = vst [vmem:[#allocation97_spill] sm:$0xff] %v9774_v2  ;;  %vm2096_vm9 = vcmp.eq.s32.totalorder %v8092_v22, %v9741_v55  ;;  %v2102_v5 = vsel %vm2094_vm8, 1, %v7785_v1  ;;  %vm2118_vm10 = vcmp.eq.s32.totalorder %v8096_v23, %v9738_v45  ;;  %vm2120_vm11 = vcmp.eq.s32.totalorder %v8096_v23, %v9741_v55 }
 0x211   : > { %12661 = vst [vmem:[#allocation98_spill] sm:$0xff] %v9780_v39  ;;  %12662 = vst [vmem:[#allocation99_spill] sm:$0xff] %v9782_v52  ;;  %6649 = vmatpush1.bf16.msra.mxu0 %v9780_v39  ;;  %v2104_v14 = vsel %vm2096_vm9, 1, %v7785_v1  ;;  %v2110_v0 = vadd.s32 %v2102_v5, %v2086_v13  ;;  %v2126_v60 = vsel %vm2118_vm10, 1, %v7785_v1  ;;  %v2128_v10 = vsel %vm2120_vm11, 1, %v7785_v1 }
 0x212   : > { %v2112_v46 = vadd.s32 %v2104_v14, %v2088_v53  ;;  %vm2142_vm12 = vcmp.eq.s32.totalorder %v8100_v24, %v9738_v45  ;;  %vm2144_vm13 = vcmp.eq.s32.totalorder %v8100_v24, %v9741_v55  ;;  %vm2166_vm14 = vcmp.eq.s32.totalorder %v8104_v25, %v9738_v45 }
 0x213   : > { %v2134_v31 = vadd.s32 %v2126_v60, %v2110_v0  ;;  %v2150_v17 = vsel %vm2142_vm12, 1, %v7785_v1  ;;  %v2152_v29 = vsel %vm2144_vm13, 1, %v7785_v1  ;;  %vm2168_vm15 = vcmp.eq.s32.totalorder %v8104_v25, %v9741_v55 }
 0x214   : > { %v2136_v13 = vadd.s32 %v2128_v10, %v2112_v46  ;;  %v2174_v53 = vsel %vm2166_vm14, 1, %v7785_v1  ;;  %v2176_v41 = vsel %vm2168_vm15, 1, %v7785_v1  ;;  %vm2005_vm0 = vcmp.eq.s32.totalorder %v8153_v49, %v9738_v45 }
 0x215   : > { %v2158_v3 = vadd.s32 %v2150_v17, %v2134_v31  ;;  %vm2007_vm1 = vcmp.eq.s32.totalorder %v8153_v49, %v9741_v55  ;;  %v2013_v12 = vsel %vm2005_vm0, 1, %v7785_v1  ;;  %vm2021_vm2 = vcmp.eq.s32.totalorder %v8155_v50, %v9738_v45 }
 0x216   : > { %v2160_v5 = vadd.s32 %v2152_v29, %v2136_v13  ;;  %v2015_v14 = vsel %vm2007_vm1, 1, %v7785_v1  ;;  %vm2023_vm3 = vcmp.eq.s32.totalorder %v8155_v50, %v9741_v55  ;;  %v2029_v0 = vsel %vm2021_vm2, 1, %v7785_v1 }
 0x217   : > { %v2182_v60 = vadd.s32 %v2174_v53, %v2158_v3  ;;  %v2031_v10 = vsel %vm2023_vm3, 1, %v7785_v1  ;;  %v2037_v46 = vadd.s32 %v2029_v0, %v2013_v12  ;;  %vm2045_vm5 = vcmp.eq.s32.totalorder %v8173_v61, %v9738_v45 }
 0x218   : > { %v2184_v31 = vadd.s32 %v2176_v41, %v2160_v5  ;;  %v2039_v17 = vadd.s32 %v2031_v10, %v2015_v14  ;;  %vm2047_vm4 = vcmp.eq.s32.totalorder %v8173_v61, %v9741_v55  ;;  %v2053_v29 = vsel %vm2045_vm5, 1, %v7785_v1 }
 0x219   : > { %v2190_v13 = vcvt.s32.f32 %v2182_v60  ;;  %v2055_v39 = vsel %vm2047_vm4, 1, %v7785_v1  ;;  %v2061_v52 = vadd.s32 %v2053_v29, %v2037_v46  ;;  %vm2069_vm6 = vcmp.eq.s32.totalorder %v8177_v62, %v9738_v45 }
 0x21a   : > { %v2192_v53 = vcvt.s32.f32 %v2184_v31  ;;  %v2063_v3 = vadd.s32 %v2055_v39, %v2039_v17  ;;  %vm2071_vm7 = vcmp.eq.s32.totalorder %v8177_v62, %v9741_v55  ;;  %v2077_v41 = vsel %vm2069_vm6, 1, %v7785_v1 }
 0x21b   : > { %v2445_v12 = vand.u32 4294901760, %v2190_v13  ;;  %v2079_v5 = vsel %vm2071_vm7, 1, %v7785_v1  ;;  %v2085_v14 = vadd.s32 %v2077_v41, %v2061_v52  ;;  %vm2093_vm8 = vcmp.eq.s32.totalorder %v8193_v33, %v9738_v45 }
 0x21c   : > { %v2449_v0 = vand.u32 4294901760, %v2192_v53  ;;  %v2087_v60 = vadd.s32 %v2079_v5, %v2063_v3  ;;  %vm2095_vm9 = vcmp.eq.s32.totalorder %v8193_v33, %v9741_v55  ;;  %v2101_v10 = vsel %vm2093_vm8, 1, %v7785_v1 }
 0x21d   : > { %v9836_v39 = vsub.f32 %v2190_v13, %v2445_v12  ;;  %v2103_v46 = vsel %vm2095_vm9, 1, %v7785_v1  ;;  %v2109_v31 = vadd.s32 %v2101_v10, %v2085_v14  ;;  %vm2117_vm10 = vcmp.eq.s32.totalorder %v8197_v34, %v9738_v45 }
 0x21e   : > { %v9841_v17 = vpack.c.bf16 %v2449_v0, %v2445_v12  ;;  %v9843_v52 = vsub.f32 %v2192_v53, %v2449_v0  ;;  %v2111_v29 = vadd.s32 %v2103_v46, %v2087_v60  ;;  %vm2119_vm11 = vcmp.eq.s32.totalorder %v8197_v34, %v9741_v55 }
 0x21f   : > { %12663 = vst [vmem:[#allocation100_spill] sm:$0xff] %v9836_v39  ;;  %v2125_v3 = vsel %vm2117_vm10, 1, %v7785_v1  ;;  %v2127_v41 = vsel %vm2119_vm11, 1, %v7785_v1  ;;  %vm2141_vm12 = vcmp.eq.s32.totalorder %v8201_v37, %v9738_v45  ;;  %vm2143_vm13 = vcmp.eq.s32.totalorder %v8201_v37, %v9741_v55 }
 0x220   : > { %12664 = vst [vmem:[#allocation101_spill] sm:$0xff] %v9841_v17  ;;  %12665 = vst [vmem:[#allocation102_spill] sm:$0xff] %v9843_v52  ;;  %6651 = vmatprep.subr.bf16.mxu0 %v9841_v17  ;;  %v2133_v13 = vadd.s32 %v2125_v3, %v2109_v31  ;;  %v2135_v12 = vadd.s32 %v2127_v41, %v2111_v29  ;;  %v2149_v53 = vsel %vm2141_vm12, 1, %v7785_v1  ;;  %v2151_v5 = vsel %vm2143_vm13, 1, %v7785_v1 }
 0x221   : > { %vm2165_vm14 = vcmp.eq.s32.totalorder %v8205_v38, %v9738_v45  ;;  %vm2167_vm15 = vcmp.eq.s32.totalorder %v8205_v38, %v9741_v55  ;;  %vm2010_vm0 = vcmp.eq.s32.totalorder %v8078_v18, %v9744_v47  ;;  %vm2012_vm1 = vcmp.eq.s32.totalorder %v8078_v18, %v9747_v30 }
 0x222   : > { %v2157_v14 = vadd.s32 %v2149_v53, %v2133_v13  ;;  %v2159_v0 = vadd.s32 %v2151_v5, %v2135_v12  ;;  %v2173_v60 = vsel %vm2165_vm14, 1, %v7785_v1  ;;  %v2175_v10 = vsel %vm2167_vm15, 1, %v7785_v1 }
 0x223   : > { %v2018_v46 = vsel %vm2010_vm0, 1, %v7785_v1  ;;  %v2020_v31 = vsel %vm2012_vm1, 1, %v7785_v1  ;;  %vm2026_vm2 = vcmp.eq.s32.totalorder %v8080_v19, %v9744_v47  ;;  %vm2028_vm3 = vcmp.eq.s32.totalorder %v8080_v19, %v9747_v30 }
 0x224   : > { %v2181_v45 = vadd.s32 %v2173_v60, %v2157_v14  ;;  %v2183_v55 = vadd.s32 %v2175_v10, %v2159_v0  ;;  %v2034_v18 = vsel %vm2026_vm2, 1, %v7785_v1  ;;  %v2036_v29 = vsel %vm2028_vm3, 1, %v7785_v1 }
 0x225   : > { %v2042_v3 = vadd.s32 %v2034_v18, %v2018_v46  ;;  %v2044_v41 = vadd.s32 %v2036_v29, %v2020_v31  ;;  %vm2050_vm5 = vcmp.eq.s32.totalorder %v8084_v20, %v9744_v47  ;;  %vm2052_vm4 = vcmp.eq.s32.totalorder %v8084_v20, %v9747_v30 }
 0x226   : > { %v2189_v13 = vcvt.s32.f32 %v2181_v45  ;;  %v2191_v12 = vcvt.s32.f32 %v2183_v55  ;;  %v2058_v53 = vsel %vm2050_vm5, 1, %v7785_v1  ;;  %v2060_v19 = vsel %vm2052_vm4, 1, %v7785_v1 }
 0x227   : > { %v2066_v5 = vadd.s32 %v2058_v53, %v2042_v3  ;;  %v2068_v14 = vadd.s32 %v2060_v19, %v2044_v41  ;;  %vm2074_vm6 = vcmp.eq.s32.totalorder %v8088_v21, %v9744_v47  ;;  %vm2076_vm7 = vcmp.eq.s32.totalorder %v8088_v21, %v9747_v30 }
 0x228   : > { %v2447_v0 = vand.u32 4294901760, %v2189_v13  ;;  %v2451_v60 = vand.u32 4294901760, %v2191_v12  ;;  %v2082_v10 = vsel %vm2074_vm6, 1, %v7785_v1  ;;  %v2084_v20 = vsel %vm2076_vm7, 1, %v7785_v1 }
 0x229   : > { %v2090_v46 = vadd.s32 %v2082_v10, %v2066_v5  ;;  %v2092_v31 = vadd.s32 %v2084_v20, %v2068_v14  ;;  %vm2098_vm8 = vcmp.eq.s32.totalorder %v8092_v22, %v9744_v47  ;;  %vm2100_vm9 = vcmp.eq.s32.totalorder %v8092_v22, %v9747_v30 }
 0x22a   : > { %v9890_v45 = vpack.c.bf16 %v2451_v60, %v2447_v0  ;;  %v9892_v55 = vsub.f32 %v2189_v13, %v2447_v0  ;;  %v9894_v18 = vsub.f32 %v2191_v12, %v2451_v60  ;;  %v2106_v21 = vsel %vm2098_vm8, 1, %v7785_v1 }
 0x22b   : > { %v2108_v29 = vsel %vm2100_vm9, 1, %v7785_v1  ;;  %v2114_v3 = vadd.s32 %v2106_v21, %v2090_v46  ;;  %vm2122_vm10 = vcmp.eq.s32.totalorder %v8096_v23, %v9744_v47  ;;  %vm2124_vm11 = vcmp.eq.s32.totalorder %v8096_v23, %v9747_v30 }
 0x22c   : > { %12666 = vst [vmem:[#allocation103_spill] sm:$0xff] %v9890_v45  ;;  %12667 = vst [vmem:[#allocation104_spill] sm:$0xff] %v9892_v55  ;;  %6653 = vmatpush1.bf16.msra.mxu0 %v9890_v45  ;;  %v2116_v22 = vadd.s32 %v2108_v29, %v2092_v31  ;;  %v2130_v41 = vsel %vm2122_vm10, 1, %v7785_v1  ;;  %v2132_v13 = vsel %vm2124_vm11, 1, %v7785_v1  ;;  %vm2146_vm12 = vcmp.eq.s32.totalorder %v8100_v24, %v9744_v47  ;;  %v2244_v45 = vld [vmem:[%s8030_s13 + $0x38] sm:$0xff] }
 0x22d   : > { %12668 = vst [vmem:[#allocation105_spill] sm:$0xff] %v9894_v18  ;;  %v2138_v12 = vadd.s32 %v2130_v41, %v2114_v3  ;;  %vm2148_vm13 = vcmp.eq.s32.totalorder %v8100_v24, %v9747_v30  ;;  %v2154_v53 = vsel %vm2146_vm12, 1, %v7785_v1  ;;  %vm2170_vm14 = vcmp.eq.s32.totalorder %v8104_v25, %v9744_v47 }
 0x22e   : > { %v2140_v23 = vadd.s32 %v2132_v13, %v2116_v22  ;;  %v2156_v19 = vsel %vm2148_vm13, 1, %v7785_v1  ;;  %vm2172_vm15 = vcmp.eq.s32.totalorder %v8104_v25, %v9747_v30  ;;  %v2178_v5 = vsel %vm2170_vm14, 1, %v7785_v1 }
 0x22f   : > { %v2162_v14 = vadd.s32 %v2154_v53, %v2138_v12  ;;  %v2180_v0 = vsel %vm2172_vm15, 1, %v7785_v1  ;;  %vm2009_vm0 = vcmp.eq.s32.totalorder %v8153_v49, %v9744_v47  ;;  %vm2011_vm1 = vcmp.eq.s32.totalorder %v8153_v49, %v9747_v30 }
 0x230   : > { %v2164_v24 = vadd.s32 %v2156_v19, %v2140_v23  ;;  %v2017_v60 = vsel %vm2009_vm0, 1, %v7785_v1  ;;  %v2019_v10 = vsel %vm2011_vm1, 1, %v7785_v1  ;;  %vm2025_vm2 = vcmp.eq.s32.totalorder %v8155_v50, %v9744_v47 }
 0x231   : > { %v2186_v25 = vadd.s32 %v2178_v5, %v2162_v14  ;;  %vm2027_vm3 = vcmp.eq.s32.totalorder %v8155_v50, %v9747_v30  ;;  %v2033_v20 = vsel %vm2025_vm2, 1, %v7785_v1  ;;  %vm2049_vm5 = vcmp.eq.s32.totalorder %v8173_v61, %v9744_v47 }
 0x232   : > { %v2188_v46 = vadd.s32 %v2180_v0, %v2164_v24  ;;  %v2035_v49 = vsel %vm2027_vm3, 1, %v7785_v1  ;;  %v2041_v31 = vadd.s32 %v2033_v20, %v2017_v60  ;;  %vm2051_vm4 = vcmp.eq.s32.totalorder %v8173_v61, %v9747_v30 }
 0x233   : > { %v2194_v21 = vcvt.s32.f32 %v2186_v25  ;;  %v2043_v29 = vadd.s32 %v2035_v49, %v2019_v10  ;;  %v2057_v3 = vsel %vm2049_vm5, 1, %v7785_v1  ;;  %v2059_v22 = vsel %vm2051_vm4, 1, %v7785_v1 }
 0x234   : > { %v2196_v41 = vcvt.s32.f32 %v2188_v46  ;;  %v2065_v50 = vadd.s32 %v2057_v3, %v2041_v31  ;;  %vm2073_vm6 = vcmp.eq.s32.totalorder %v8177_v62, %v9744_v47  ;;  %vm2075_vm7 = vcmp.eq.s32.totalorder %v8177_v62, %v9747_v30  ;;  %v2237_v31 = vld [vmem:[%s8030_s13] sm:$0xff] }
 0x235   : > { %v2453_v13 = vand.u32 4294901760, %v2194_v21  ;;  %v2067_v12 = vadd.s32 %v2059_v22, %v2043_v29  ;;  %v2081_v53 = vsel %vm2073_vm6, 1, %v7785_v1  ;;  %v2083_v61 = vsel %vm2075_vm7, 1, %v7785_v1 }
 0x236   : > { %v2457_v23 = vand.u32 4294901760, %v2196_v41  ;;  %v2089_v19 = vadd.s32 %v2081_v53, %v2065_v50  ;;  %vm2097_vm8 = vcmp.eq.s32.totalorder %v8193_v33, %v9744_v47  ;;  %vm2099_vm9 = vcmp.eq.s32.totalorder %v8193_v33, %v9747_v30 }
 0x237   : > { %v9945_v5 = vsub.f32 %v2194_v21, %v2453_v13  ;;  %v2091_v14 = vadd.s32 %v2083_v61, %v2067_v12  ;;  %v2105_v62 = vsel %vm2097_vm8, 1, %v7785_v1  ;;  %v2107_v0 = vsel %vm2099_vm9, 1, %v7785_v1 }
 0x238   : > { %v9949_v24 = vpack.c.bf16 %v2457_v23, %v2453_v13  ;;  %v9951_v60 = vsub.f32 %v2196_v41, %v2457_v23  ;;  %v2113_v10 = vadd.s32 %v2105_v62, %v2089_v19  ;;  %vm2121_vm10 = vcmp.eq.s32.totalorder %v8197_v34, %v9744_v47 }
 0x239   : > { %12669 = vst [vmem:[#allocation106_spill] sm:$0xff] %v9945_v5  ;;  %v2115_v25 = vadd.s32 %v2107_v0, %v2091_v14  ;;  %vm2123_vm11 = vcmp.eq.s32.totalorder %v8197_v34, %v9747_v30  ;;  %v2129_v33 = vsel %vm2121_vm10, 1, %v7785_v1  ;;  %vm2145_vm12 = vcmp.eq.s32.totalorder %v8201_v37, %v9744_v47 }
 0x23a   : > { %12670 = vst [vmem:[#allocation107_spill] sm:$0xff] %v9949_v24  ;;  %12671 = vst [vmem:[#allocation108_spill] sm:$0xff] %v9951_v60  ;;  %6655 = vmatprep.subr.bf16.mxu0 %v9949_v24  ;;  %v2131_v20 = vsel %vm2123_vm11, 1, %v7785_v1  ;;  %v2137_v46 = vadd.s32 %v2129_v33, %v2113_v10  ;;  %vm2147_vm13 = vcmp.eq.s32.totalorder %v8201_v37, %v9747_v30  ;;  %v2153_v49 = vsel %vm2145_vm12, 1, %v7785_v1  ;;  %v2240_v10 = vld [vmem:[%s8030_s13 + $0x18] sm:$0xff] }
 0x23b   : > { %v2139_v21 = vadd.s32 %v2131_v20, %v2115_v25  ;;  %v2155_v29 = vsel %vm2147_vm13, 1, %v7785_v1  ;;  %vm2169_vm14 = vcmp.eq.s32.totalorder %v8205_v38, %v9744_v47  ;;  %vm2171_vm15 = vcmp.eq.s32.totalorder %v8205_v38, %v9747_v30 }
 0x23c   : > { %v2161_v34 = vadd.s32 %v2153_v49, %v2137_v46  ;;  %v2177_v3 = vsel %vm2169_vm14, 1, %v7785_v1  ;;  %v2179_v22 = vsel %vm2171_vm15, 1, %v7785_v1  ;;  %v9975_v37 = vsub.f32 %v9730_v57, %v9750_v51  ;;  %v2239_v49 = vld [vmem:[%s8030_s13 + $0x10] sm:$0xff] }
 0x23d   : > { %v2163_v41 = vadd.s32 %v2155_v29, %v2139_v21  ;;  %v9977_v50 = vand.u32 4294901760, %v2237_v31  ;;  %v12204_v13 = vand.u32 4294901760, %v8209_v40  ;;  %v12201_v47 = vand.u32 4294901760, %v8211_v8 }
 0x23e   : > { %12672 = vst [vmem:[#allocation109_spill] sm:$0xff] %v9975_v37  ;;  %v2185_v12 = vadd.s32 %v2177_v3, %v2161_v34  ;;  %v12198_v38 = vand.u32 4294901760, %v9975_v37  ;;  %v12197_v30 = vand.u32 4294901760, %v8267_v35  ;;  %v12196_v1 = vand.u32 4294901760, %v8274_v11 }
 0x23f   : > { %12673 = vst [vmem:[#allocation110_spill] sm:$0xff] %v9977_v50  ;;  %v2187_v53 = vadd.s32 %v2179_v22, %v2163_v41  ;;  %v9985_v57 = vsub.f32 %v2237_v31, %v9977_v50  ;;  %v2721_v61 = vsub.f32 %v8209_v40, %v12204_v13  ;;  %v2733_v23 = vsub.f32 %v8211_v8, %v12201_v47 }
 0x240   : > { %v2193_v19 = vcvt.s32.f32 %v2185_v12  ;;  %v2464_v14 = vsub.f32 %v9975_v37, %v12198_v38  ;;  %v2727_v62 = vsub.f32 %v8267_v35, %v12197_v30  ;;  %v2739_v0 = vsub.f32 %v8274_v11, %v12196_v1  ;;  %v2242_v30 = vld [vmem:[%s8030_s13 + $0x28] sm:$0xff] }
 0x241   : > { %12674 = vst [vmem:[#allocation111_spill] sm:$0xff] %v9985_v57  ;;  %v2195_v25 = vcvt.s32.f32 %v2187_v53  ;;  %v12199_v33 = vand.u32 4294901760, %v9985_v57  ;;  %v2722_v20 = vand.u32 4294901760, %v2721_v61  ;;  %v2734_v46 = vand.u32 4294901760, %v2733_v23 }
 0x242   : > { %v2455_v31 = vand.u32 4294901760, %v2193_v19  ;;  %v2465_v21 = vand.u32 4294901760, %v2464_v14  ;;  %v2728_v29 = vand.u32 4294901760, %v2727_v62  ;;  %v2740_v34 = vand.u32 4294901760, %v2739_v0  ;;  %v2241_v14 = vld [vmem:[%s8030_s13 + $0x20] sm:$0xff] }
 0x243   : > { %v2459_v3 = vand.u32 4294901760, %v2195_v25  ;;  %v2470_v22 = vsub.f32 %v9985_v57, %v12199_v33  ;;  %v6658_v41 = vpack.c.bf16 %v2734_v46, %v2722_v20  ;;  %v10008_v12 = vand.u32 4294901760, %v2240_v10 }
 0x244   : > { %v10010_v53 = vsub.f32 %v2193_v19, %v2455_v31  ;;  %2466 = vmatprep.mubr.f32.mxu0 %v2465_v21  ;;  %v6660_v61 = vpack.c.bf16 %v2740_v34, %v2728_v29  ;;  %v10012_v1 = vand.u32 4294901760, %v2239_v49  ;;  %v12200_v23 = vand.u32 4294901760, %v8323_v36 }
 0x245   : > { %12675 = vst [vmem:[#allocation112_spill] sm:$0xff] %v10008_v12  ;;  %v10017_v62 = vpack.c.bf16 %v2459_v3, %v2455_v31  ;;  %v10019_v0 = vsub.f32 %v2195_v25, %v2459_v3  ;;  %v2471_v38 = vand.u32 4294901760, %v2470_v22  ;;  %v10022_v33 = vsub.f32 %v2240_v10, %v10008_v12 }
 0x246   : > { %12676 = vst [vmem:[#allocation113_spill] sm:$0xff] %v10010_v53  ;;  %12677 = vst [vmem:[#allocation114_spill] sm:$0xff] %v10012_v1  ;;  %v10025_v20 = vsub.f32 %v2239_v49, %v10012_v1  ;;  %v2745_v19 = vsub.f32 %v8323_v36, %v12200_v23  ;;  %v12203_v46 = vand.u32 4294901760, %v8325_v9  ;;  %v12202_v21 = vand.u32 4294901760, %v8376_v43 }
 0x247   : > { %12678 = vst [vmem:[#allocation115_spill] sm:$0xff] %v10017_v62  ;;  %12679 = vst [vmem:[#allocation116_spill] sm:$0xff] %v10019_v0  ;;  %6657 = vmatpush1.bf16.msra.mxu0 %v10017_v62  ;;  %v12205_v25 = vand.u32 4294901760, %v10022_v33  ;;  %v12210_v31 = vand.u32 4294901760, %v8382_v48  ;;  %v10035_v29 = vand.u32 4294901760, %v2242_v30  ;;  %v10037_v10 = vand.u32 4294901760, %v2241_v14 }
 0x248   : > { %12680 = vst [vmem:[#allocation117_spill] sm:$0xff] %v10022_v33  ;;  %12681 = vst [vmem:[#allocation118_spill] sm:$0xff] %v10025_v20  ;;  %6659 = vmatprep.subr.bf16.mxu0 %v6658_v41  ;;  %v12215_v49 = vand.u32 4294901760, %v10025_v20  ;;  %v2746_v34 = vand.u32 4294901760, %v2745_v19  ;;  %v2757_v3 = vsub.f32 %v8325_v9, %v12203_v46  ;;  %v2751_v22 = vsub.f32 %v8376_v43, %v12202_v21  ;;  %v2264_v43 = vld [vmem:[%s8030_s13 + $0xd8] sm:$0xff] }
 0x249   : > { %12682 = vst [vmem:[#allocation119_spill] sm:$0xff] %v10035_v29  ;;  %12683 = vst [vmem:[#allocation120_spill] sm:$0xff] %v10037_v10  ;;  %v2480_v23 = vsub.f32 %v10022_v33, %v12205_v25  ;;  %v2763_v41 = vsub.f32 %v8382_v48, %v12210_v31  ;;  %v10053_v47 = vsub.f32 %v2242_v30, %v10035_v29  ;;  %v12220_v25 = vand.u32 4294901760, %v8429_v54 }
 0x24a   : > { %v10056_v19 = vsub.f32 %v2241_v14, %v10037_v10  ;;  %2472 = vmatmul.mubr.f32.vlgmr.msra.gmra.mrb[0].mxu0 %v2471_v38  ;;  %v2486_v21 = vsub.f32 %v10025_v20, %v12215_v49  ;;  %v2758_v46 = vand.u32 4294901760, %v2757_v3  ;;  %v2752_v13 = vand.u32 4294901760, %v2751_v22  ;;  %v2243_v3 = vld [vmem:[%s8030_s13 + $0x30] sm:$0xff] }
 0x24b   : > { %12684 = vst [vmem:[#allocation121_spill] sm:$0xff] %v10053_v47  ;;  %6661 = vmatpush1.bf16.msra.mxu0 %v6660_v61  ;;  %v2481_v62 = vand.u32 4294901760, %v2480_v23  ;;  %v2764_v24 = vand.u32 4294901760, %v2763_v41  ;;  %v12217_v31 = vand.u32 4294901760, %v10053_v47  ;;  %v2769_v38 = vsub.f32 %v8429_v54, %v12220_v25 }
 0x24c   : > { %12685 = vst [vmem:[#allocation122_spill] sm:$0xff] %v10056_v19  ;;  %v12216_v30 = vand.u32 4294901760, %v10056_v19  ;;  %v2487_v14 = vand.u32 4294901760, %v2486_v21  ;;  %v6662_v17 = vpack.c.bf16 %v2758_v46, %v2746_v34  ;;  %v12218_v49 = vand.u32 4294901760, %v8436_v58 }
 0x24d   : > { %2482 = vmatprep.mubr.f32.mxu0 %v2481_v62  ;;  %v6664_v22 = vpack.c.bf16 %v2764_v24, %v2752_v13  ;;  %v2496_v61 = vsub.f32 %v10053_v47, %v12217_v31  ;;  %v12219_v21 = vand.u32 4294901760, %v8497_v7  ;;  %v2770_v46 = vand.u32 4294901760, %v2769_v38 }
 0x24e   : > { %v2502_v23 = vsub.f32 %v10056_v19, %v12216_v30  ;;  %2488 = vmatmul.mubr.f32.gmra.mrb[2].mxu0 %v2487_v14  ;;  %6663 = vmatprep.subr.bf16.mxu0 %v6662_v17  ;;  %v2781_v34 = vsub.f32 %v8436_v58, %v12218_v49  ;;  %v12223_v62 = vand.u32 4294901760, %v8499_v26  ;;  %v10081_v24 = vand.u32 4294901760, %v2244_v45 }
 0x24f   : > { %6665 = vmatpush1.bf16.msra.mxu0 %v6664_v22  ;;  %v2497_v13 = vand.u32 4294901760, %v2496_v61  ;;  %v2775_v30 = vsub.f32 %v8497_v7, %v12219_v21  ;;  %v10086_v31 = vand.u32 4294901760, %v2243_v3  ;;  %v12224_v49 = vand.u32 4294901760, %v8553_v63 }
 0x250   : > { %12686 = vst [vmem:[#allocation123_spill] sm:$0xff] %v10081_v24  ;;  %v2503_v41 = vand.u32 4294901760, %v2502_v23  ;;  %v2782_v17 = vand.u32 4294901760, %v2781_v34  ;;  %v2787_v14 = vsub.f32 %v8499_v26, %v12223_v62  ;;  %v10092_v38 = vsub.f32 %v2244_v45, %v10081_v24  ;;  %v2246_v34 = vld [vmem:[%s8030_s13 + $0x48] sm:$0xff] }
 0x251   : > { %12687 = vst [vmem:[#allocation124_spill] sm:$0xff] %v10086_v31  ;;  %2498 = vmatprep.mubr.f32.mxu0 %v2497_v13  ;;  %v2776_v22 = vand.u32 4294901760, %v2775_v30  ;;  %v10096_v61 = vsub.f32 %v2243_v3, %v10086_v31  ;;  %v12227_v23 = vand.u32 4294901760, %v8560_v6  ;;  %v12232_v21 = vand.u32 4294901760, %v8611_v27 }
 0x252   : > { %12688 = vst [vmem:[#allocation125_spill] sm:$0xff] %v10092_v38  ;;  %2504 = vmatmul.mubr.f32.gmra.mrb[4].mxu0 %v2503_v41  ;;  %v6666_v25 = vpack.c.bf16 %v2782_v17, %v2770_v46  ;;  %v2788_v19 = vand.u32 4294901760, %v2787_v14  ;;  %v12233_v62 = vand.u32 4294901760, %v10092_v38  ;;  %v2793_v45 = vsub.f32 %v8553_v63, %v12224_v49  ;;  %v2245_v46 = vld [vmem:[%s8030_s13 + $0x40] sm:$0xff] }
 0x253   : > { %12689 = vst [vmem:[#allocation126_spill] sm:$0xff] %v10096_v61  ;;  %v2805_v30 = vsub.f32 %v8560_v6, %v12227_v23  ;;  %v2799_v3 = vsub.f32 %v8611_v27, %v12232_v21  ;;  %v12238_v41 = vand.u32 4294901760, %v8613_v28  ;;  %v10117_v13 = vand.u32 4294901760, %v2246_v34  ;;  %v2255_v27 = vld [vmem:[%s8030_s13 + $0x90] sm:$0xff]  ;;  %v2258_v6 = vld [vmem:[%s8030_s13 + $0xa8] sm:$0xff] }
 0x254   : > { %6667 = vmatprep.subr.bf16.mxu0 %v6666_v25  ;;  %v6668_v17 = vpack.c.bf16 %v2788_v19, %v2776_v22  ;;  %v2512_v14 = vsub.f32 %v10092_v38, %v12233_v62  ;;  %v2794_v49 = vand.u32 4294901760, %v2793_v45  ;;  %v12691_v47 = vand.u32 4294901760, %v10096_v61  ;;  %v2248_v62 = vld [vmem:[%s8030_s13 + $0x58] sm:$0xff] }
 0x255   : > { %12690 = vst [vmem:[#allocation127_spill] sm:$0xff] %v10117_v13  ;;  %v2806_v20 = vand.u32 4294901760, %v2805_v30  ;;  %v2800_v33 = vand.u32 4294901760, %v2799_v3  ;;  %v2811_v21 = vsub.f32 %v8613_v28, %v12238_v41  ;;  %v10126_v19 = vsub.f32 %v2246_v34, %v10117_v13 }
 0x256   : > { %v2518_v23 = vsub.f32 %v10096_v61, %v12691_v47  ;;  %6669 = vmatpush1.bf16.msra.mxu0 %v6668_v17  ;;  %v2513_v25 = vand.u32 4294901760, %v2512_v14  ;;  %v10128_v22 = vand.u32 4294901760, %v2245_v46  ;;  %v12239_v45 = vand.u32 4294901760, %v8665_v56  ;;  %v2247_v14 = vld [vmem:[%s8030_s13 + $0x50] sm:$0xff] }
 0x257   : > { %12692 = vst [vmem:[#allocation128_spill] sm:$0xff] %v10126_v19  ;;  %v6670_v57 = vpack.c.bf16 %v2806_v20, %v2794_v49  ;;  %v2812_v47 = vand.u32 4294901760, %v2811_v21  ;;  %v12240_v30 = vand.u32 4294901760, %v8667_v59  ;;  %v12241_v3 = vand.u32 4294901760, %v10126_v19 }
 0x258   : > { %12693 = vst [vmem:[#allocation129_spill] sm:$0xff] %v10128_v22  ;;  %v2519_v38 = vand.u32 4294901760, %v2518_v23  ;;  %2514 = vmatprep.mubr.f32.mxu0 %v2513_v25  ;;  %v10135_v41 = vsub.f32 %v2245_v46, %v10128_v22  ;;  %v2817_v34 = vsub.f32 %v8665_v56, %v12239_v45  ;;  %v12244_v17 = vand.u32 4294901760, %v8727_v15 }
 0x259   : > { %6671 = vmatprep.subr.bf16.mxu0 %v6670_v57  ;;  %v6672_v23 = vpack.c.bf16 %v2812_v47, %v2800_v33  ;;  %v2829_v20 = vsub.f32 %v8667_v59, %v12240_v30  ;;  %v12247_v49 = vand.u32 4294901760, %v8735_v44  ;;  %v10146_v21 = vand.u32 4294901760, %v2248_v62  ;;  %v12721_v59 = vld [vmem:[#allocation63_spill] sm:$0xff] }
 0x25a   : > { %12694 = vst [vmem:[#allocation130_spill] sm:$0xff] %v10135_v41  ;;  %2520 = vmatmul.mubr.f32.gmra.mrb[6].mxu0 %v2519_v38  ;;  %v2528_v46 = vsub.f32 %v10126_v19, %v12241_v3  ;;  %v12254_v25 = vand.u32 4294901760, %v10135_v41  ;;  %v2818_v45 = vand.u32 4294901760, %v2817_v34  ;;  %v2823_v57 = vsub.f32 %v8727_v15, %v12244_v17 }
 0x25b   : > { %12695 = vst [vmem:[#allocation131_spill] sm:$0xff] %v10146_v21  ;;  %6673 = vmatpush1.bf16.msra.mxu0 %v6672_v23  ;;  %v2830_v33 = vand.u32 4294901760, %v2829_v20  ;;  %v2835_v38 = vsub.f32 %v8735_v44, %v12247_v49  ;;  %v10159_v47 = vsub.f32 %v2248_v62, %v10146_v21  ;;  %v10161_v30 = vand.u32 4294901760, %v2247_v14  ;;  %v2250_v62 = vld [vmem:[%s8030_s13 + $0x68] sm:$0xff]  ;;  %v12699_v21 = vld [vmem:[#allocation47_spill] sm:$0xff] }
 0x25c   : > { %v2529_v3 = vand.u32 4294901760, %v2528_v46  ;;  %v2534_v34 = vsub.f32 %v10135_v41, %v12254_v25  ;;  %v2824_v19 = vand.u32 4294901760, %v2823_v57  ;;  %v12257_v17 = vand.u32 4294901760, %v8789_v42  ;;  %v12700_v25 = vld [vmem:[#allocation49_spill] sm:$0xff] }
 0x25d   : > { %12696 = vst [vmem:[#allocation132_spill] sm:$0xff] %v10159_v47  ;;  %12697 = vst [vmem:[#allocation133_spill] sm:$0xff] %v10161_v30  ;;  %v6674_v23 = vpack.c.bf16 %v2830_v33, %v2818_v45  ;;  %v2836_v20 = vand.u32 4294901760, %v2835_v38  ;;  %v12260_v61 = vand.u32 4294901760, %v10159_v47  ;;  %v10169_v49 = vsub.f32 %v2247_v14, %v10161_v30  ;;  %v2249_v41 = vld [vmem:[%s8030_s13 + $0x60] sm:$0xff]  ;;  %v12701_v38 = vld [vmem:[#allocation50_spill] sm:$0xff] }
 0x25e   : > { %2530 = vmatprep.mubr.f32.mxu0 %v2529_v3  ;;  %v2535_v37 = vand.u32 4294901760, %v2534_v34  ;;  %v2841_v46 = vsub.f32 %v8789_v42, %v12257_v17  ;;  %v12261_v22 = vand.u32 4294901760, %v12699_v21  ;;  %v12262_v57 = vand.u32 4294901760, %v12700_v25  ;;  %v2252_v42 = vld [vmem:[%s8030_s13 + $0x78] sm:$0xff] }
 0x25f   : > { %12698 = vst [vmem:[#allocation134_spill] sm:$0xff] %v10169_v49  ;;  %6675 = vmatprep.subr.bf16.mxu0 %v6674_v23  ;;  %v6676_v45 = vpack.c.bf16 %v2836_v20, %v2824_v19  ;;  %v2544_v33 = vsub.f32 %v10159_v47, %v12260_v61  ;;  %v12267_v14 = vand.u32 4294901760, %v10169_v49  ;;  %v12272_v3 = vand.u32 4294901760, %v12701_v38  ;;  %v12705_v47 = vld [vmem:[#allocation51_spill] sm:$0xff] }
 0x260   : > { %2536 = vmatmul.mubr.f32.gmra.mrb[8].mxu0 %v2535_v37  ;;  %v2842_v34 = vand.u32 4294901760, %v2841_v46  ;;  %v2853_v17 = vsub.f32 %v12699_v21, %v12261_v22  ;;  %v2847_v30 = vsub.f32 %v12700_v25, %v12262_v57  ;;  %v10189_v19 = vand.u32 4294901760, %v2250_v62 }
 0x261   : > { %6677 = vmatpush1.bf16.msra.mxu0 %v6676_v45  ;;  %v2545_v23 = vand.u32 4294901760, %v2544_v33  ;;  %v2550_v20 = vsub.f32 %v10169_v49, %v12267_v14  ;;  %v2859_v37 = vsub.f32 %v12701_v38, %v12272_v3  ;;  %v10197_v46 = vand.u32 4294901760, %v2249_v41  ;;  %v12707_v14 = vld [vmem:[#allocation53_spill] sm:$0xff] }
 0x262   : > { %12702 = vst [vmem:[#allocation135_spill] sm:$0xff] %v10189_v19  ;;  %v2854_v61 = vand.u32 4294901760, %v2853_v17  ;;  %v2848_v22 = vand.u32 4294901760, %v2847_v30  ;;  %v10200_v57 = vsub.f32 %v2250_v62, %v10189_v19  ;;  %v12276_v25 = vand.u32 4294901760, %v12705_v47  ;;  %v12708_v17 = vld [vmem:[#allocation54_spill] sm:$0xff]  ;;  %v2251_v19 = vld [vmem:[%s8030_s13 + $0x70] sm:$0xff] }
 0x263   : > { %12703 = vst [vmem:[#allocation136_spill] sm:$0xff] %v10197_v46  ;;  %2546 = vmatprep.mubr.f32.mxu0 %v2545_v23  ;;  %v2551_v45 = vand.u32 4294901760, %v2550_v20  ;;  %v2860_v33 = vand.u32 4294901760, %v2859_v37  ;;  %v10204_v21 = vsub.f32 %v2249_v41, %v10197_v46  ;;  %v12277_v49 = vand.u32 4294901760, %v12707_v14  ;;  %v12709_v37 = vld [vmem:[#allocation56_spill] sm:$0xff] }
 0x264   : > { %12704 = vst [vmem:[#allocation137_spill] sm:$0xff] %v10200_v57  ;;  %v6678_v3 = vpack.c.bf16 %v2854_v61, %v2842_v34  ;;  %v12280_v38 = vand.u32 4294901760, %v10200_v57  ;;  %v2865_v30 = vsub.f32 %v12705_v47, %v12276_v25  ;;  %v12283_v62 = vand.u32 4294901760, %v12708_v17 }
 0x265   : > { %12706 = vst [vmem:[#allocation138_spill] sm:$0xff] %v10204_v21  ;;  %2552 = vmatmul.mubr.f32.gmra.mrb[10].mxu0 %v2551_v45  ;;  %v6680_v23 = vpack.c.bf16 %v2860_v33, %v2848_v22  ;;  %v12292_v20 = vand.u32 4294901760, %v10204_v21  ;;  %v2877_v41 = vsub.f32 %v12707_v14, %v12277_v49  ;;  %v12293_v61 = vand.u32 4294901760, %v12709_v37 }
 0x266   : > { %6679 = vmatprep.subr.bf16.mxu0 %v6678_v3  ;;  %v2560_v34 = vsub.f32 %v10200_v57, %v12280_v38  ;;  %v2866_v25 = vand.u32 4294901760, %v2865_v30  ;;  %v2871_v45 = vsub.f32 %v12708_v17, %v12283_v62  ;;  %v10225_v22 = vand.u32 4294901760, %v2252_v42  ;;  %v12713_v62 = vld [vmem:[#allocation58_spill] sm:$0xff] }
 0x267   : > { %6681 = vmatpush1.bf16.msra.mxu0 %v6680_v23  ;;  %v2566_v33 = vsub.f32 %v10204_v21, %v12292_v20  ;;  %v2878_v49 = vand.u32 4294901760, %v2877_v41  ;;  %v2883_v3 = vsub.f32 %v12709_v37, %v12293_v61  ;;  %v10233_v46 = vand.u32 4294901760, %v2251_v19  ;;  %v2254_v23 = vld [vmem:[%s8030_s13 + $0x88] sm:$0xff] }
 0x268   : > { %12710 = vst [vmem:[#allocation139_spill] sm:$0xff] %v10225_v22  ;;  %v2561_v30 = vand.u32 4294901760, %v2560_v34  ;;  %v2872_v38 = vand.u32 4294901760, %v2871_v45  ;;  %v10236_v57 = vsub.f32 %v2252_v42, %v10225_v22  ;;  %v12300_v44 = vand.u32 4294901760, %v12713_v62  ;;  %v12715_v45 = vld [vmem:[#allocation59_spill] sm:$0xff]  ;;  %v12716_v42 = vld [vmem:[#allocation60_spill] sm:$0xff] }
 0x269   : > { %12711 = vst [vmem:[#allocation140_spill] sm:$0xff] %v10233_v46  ;;  %v2567_v15 = vand.u32 4294901760, %v2566_v33  ;;  %v6682_v13 = vpack.c.bf16 %v2878_v49, %v2866_v25  ;;  %v2884_v31 = vand.u32 4294901760, %v2883_v3  ;;  %v10241_v41 = vsub.f32 %v2251_v19, %v10233_v46  ;;  %v2253_v22 = vld [vmem:[%s8030_s13 + $0x80] sm:$0xff]  ;;  %v12717_v25 = vld [vmem:[#allocation62_spill] sm:$0xff] }
 0x26a   : > { %12712 = vst [vmem:[#allocation141_spill] sm:$0xff] %v10236_v57  ;;  %2562 = vmatprep.mubr.f32.mxu0 %v2561_v30  ;;  %v12301_v20 = vand.u32 4294901760, %v10236_v57  ;;  %v2889_v34 = vsub.f32 %v12713_v62, %v12300_v44  ;;  %v12302_v61 = vand.u32 4294901760, %v12715_v45  ;;  %v12307_v21 = vand.u32 4294901760, %v12716_v42 }
 0x26b   : > { %12714 = vst [vmem:[#allocation142_spill] sm:$0xff] %v10241_v41  ;;  %2568 = vmatmul.mubr.f32.gmra.mrb[12].mxu0 %v2567_v15  ;;  %6683 = vmatprep.subr.bf16.mxu0 %v6682_v13  ;;  %v6684_v33 = vpack.c.bf16 %v2884_v31, %v2872_v38  ;;  %v12312_v49 = vand.u32 4294901760, %v10241_v41  ;;  %v12315_v19 = vand.u32 4294901760, %v12717_v25  ;;  %v10252_v3 = vand.u32 4294901760, %v2254_v23 }
 0x26c   : > { %v2576_v30 = vsub.f32 %v10236_v57, %v12301_v20  ;;  %v2890_v46 = vand.u32 4294901760, %v2889_v34  ;;  %v2901_v44 = vsub.f32 %v12715_v45, %v12302_v61  ;;  %v2895_v15 = vsub.f32 %v12716_v42, %v12307_v21 }
 0x26d   : > { %12718 = vst [vmem:[#allocation143_spill] sm:$0xff] %v10252_v3  ;;  %6685 = vmatpush1.bf16.msra.mxu0 %v6684_v33  ;;  %v2582_v31 = vsub.f32 %v10241_v41, %v12312_v49  ;;  %v2907_v13 = vsub.f32 %v12717_v25, %v12315_v19  ;;  %v10270_v38 = vsub.f32 %v2254_v23, %v10252_v3  ;;  %v10272_v34 = vand.u32 4294901760, %v2253_v22  ;;  %v2256_v41 = vld [vmem:[%s8030_s13 + $0x98] sm:$0xff]  ;;  %v12723_v3 = vld [vmem:[#allocation65_spill] sm:$0xff] }
 0x26e   : > { %v2577_v20 = vand.u32 4294901760, %v2576_v30  ;;  %v2902_v61 = vand.u32 4294901760, %v2901_v44  ;;  %v2896_v57 = vand.u32 4294901760, %v2895_v15  ;;  %v12322_v21 = vand.u32 4294901760, %v12721_v59  ;;  %v12724_v44 = vld [vmem:[#allocation67_spill] sm:$0xff] }
 0x26f   : > { %12719 = vst [vmem:[#allocation144_spill] sm:$0xff] %v10270_v38  ;;  %12720 = vst [vmem:[#allocation145_spill] sm:$0xff] %v10272_v34  ;;  %v2583_v33 = vand.u32 4294901760, %v2582_v31  ;;  %v2908_v56 = vand.u32 4294901760, %v2907_v13  ;;  %v12323_v28 = vand.u32 4294901760, %v10270_v38  ;;  %v10277_v49 = vsub.f32 %v2253_v22, %v10272_v34  ;;  %v12725_v34 = vld [vmem:[#allocation68_spill] sm:$0xff] }
 0x270   : > { %2578 = vmatprep.mubr.f32.mxu0 %v2577_v20  ;;  %v6686_v19 = vpack.c.bf16 %v2902_v61, %v2890_v46  ;;  %v2913_v23 = vsub.f32 %v12721_v59, %v12322_v21  ;;  %v12324_v30 = vand.u32 4294901760, %v12723_v3  ;;  %v12325_v15 = vand.u32 4294901760, %v12724_v44 }
 0x271   : > { %12722 = vst [vmem:[#allocation146_spill] sm:$0xff] %v10277_v49  ;;  %2584 = vmatmul.mubr.f32.gmra.mrb[14].mxu0 %v2583_v33  ;;  %v6688_v31 = vpack.c.bf16 %v2908_v56, %v2896_v57  ;;  %v2592_v13 = vsub.f32 %v10270_v38, %v12323_v28  ;;  %v12332_v22 = vand.u32 4294901760, %v10277_v49  ;;  %v12337_v20 = vand.u32 4294901760, %v12725_v34  ;;  %v12729_v38 = vld [vmem:[#allocation69_spill] sm:$0xff] }
 0x272   : > { %6687 = vmatprep.subr.bf16.mxu0 %v6686_v19  ;;  %v2914_v46 = vand.u32 4294901760, %v2913_v23  ;;  %v2925_v61 = vsub.f32 %v12723_v3, %v12324_v30  ;;  %v2919_v21 = vsub.f32 %v12724_v44, %v12325_v15  ;;  %v10297_v56 = vand.u32 4294901760, %v2256_v41 }
 0x273   : > { %6689 = vmatpush1.bf16.msra.mxu0 %v6688_v31  ;;  %v2593_v57 = vand.u32 4294901760, %v2592_v13  ;;  %v2598_v33 = vsub.f32 %v10277_v49, %v12332_v22  ;;  %v2931_v19 = vsub.f32 %v12725_v34, %v12337_v20  ;;  %v10305_v23 = vand.u32 4294901760, %v2255_v27  ;;  %v12731_v22 = vld [vmem:[#allocation71_spill] sm:$0xff] }
 0x274   : > { %12726 = vst [vmem:[#allocation147_spill] sm:$0xff] %v10297_v56  ;;  %v2926_v28 = vand.u32 4294901760, %v2925_v61  ;;  %v2920_v30 = vand.u32 4294901760, %v2919_v21  ;;  %v10308_v15 = vsub.f32 %v2256_v41, %v10297_v56  ;;  %v12342_v24 = vand.u32 4294901760, %v12729_v38  ;;  %v12732_v41 = vld [vmem:[#allocation72_spill] sm:$0xff]  ;;  %v2257_v56 = vld [vmem:[%s8030_s13 + $0xa0] sm:$0xff] }
 0x275   : > { %12727 = vst [vmem:[#allocation148_spill] sm:$0xff] %v10305_v23  ;;  %2594 = vmatprep.mubr.f32.mxu0 %v2593_v57  ;;  %v2599_v31 = vand.u32 4294901760, %v2598_v33  ;;  %v2932_v13 = vand.u32 4294901760, %v2931_v19  ;;  %v10312_v10 = vsub.f32 %v2255_v27, %v10305_v23  ;;  %v12343_v49 = vand.u32 4294901760, %v12731_v22  ;;  %v12733_v19 = vld [vmem:[#allocation74_spill] sm:$0xff] }
 0x276   : > { %12728 = vst [vmem:[#allocation149_spill] sm:$0xff] %v10308_v15  ;;  %v6690_v20 = vpack.c.bf16 %v2926_v28, %v2914_v46  ;;  %v12346_v63 = vand.u32 4294901760, %v10308_v15  ;;  %v2937_v21 = vsub.f32 %v12729_v38, %v12342_v24  ;;  %v12349_v61 = vand.u32 4294901760, %v12732_v41 }
 0x277   : > { %12730 = vst [vmem:[#allocation150_spill] sm:$0xff] %v10312_v10  ;;  %2600 = vmatmul.mubr.f32.gmra.mrb[16].mxu0 %v2599_v31  ;;  %v6692_v57 = vpack.c.bf16 %v2932_v13, %v2920_v30  ;;  %v12358_v33 = vand.u32 4294901760, %v10312_v10  ;;  %v2949_v27 = vsub.f32 %v12731_v22, %v12343_v49  ;;  %v12359_v28 = vand.u32 4294901760, %v12733_v19 }
 0x278   : > { %6691 = vmatprep.subr.bf16.mxu0 %v6690_v20  ;;  %v2608_v46 = vsub.f32 %v10308_v15, %v12346_v63  ;;  %v2938_v24 = vand.u32 4294901760, %v2937_v21  ;;  %v2943_v31 = vsub.f32 %v12732_v41, %v12349_v61  ;;  %v10333_v30 = vand.u32 4294901760, %v2258_v6  ;;  %v12737_v61 = vld [vmem:[#allocation76_spill] sm:$0xff] }
 0x279   : > { %6693 = vmatpush1.bf16.msra.mxu0 %v6692_v57  ;;  %v2614_v13 = vsub.f32 %v10312_v10, %v12358_v33  ;;  %v2950_v49 = vand.u32 4294901760, %v2949_v27  ;;  %v2955_v20 = vsub.f32 %v12733_v19, %v12359_v28  ;;  %v10341_v23 = vand.u32 4294901760, %v2257_v56  ;;  %v2260_v57 = vld [vmem:[%s8030_s13 + $0xb8] sm:$0xff]  ;;  %v2259_v10 = vld [vmem:[%s8030_s13 + $0xb0] sm:$0xff] }
 0x27a   : > { %12734 = vst [vmem:[#allocation151_spill] sm:$0xff] %v10333_v30  ;;  %v2609_v21 = vand.u32 4294901760, %v2608_v46  ;;  %v2944_v63 = vand.u32 4294901760, %v2943_v31  ;;  %v10344_v15 = vsub.f32 %v2258_v6, %v10333_v30  ;;  %v12364_v26 = vand.u32 4294901760, %v12737_v61  ;;  %v12739_v31 = vld [vmem:[#allocation77_spill] sm:$0xff] }
 0x27b   : > { %12735 = vst [vmem:[#allocation152_spill] sm:$0xff] %v10341_v23  ;;  %v2615_v7 = vand.u32 4294901760, %v2614_v13  ;;  %v6694_v29 = vpack.c.bf16 %v2950_v49, %v2938_v24  ;;  %v2956_v1 = vand.u32 4294901760, %v2955_v20  ;;  %v10349_v27 = vsub.f32 %v2257_v56, %v10341_v23  ;;  %v12740_v49 = vld [vmem:[#allocation80_spill] sm:$0xff] }
 0x27c   : > { %12736 = vst [vmem:[#allocation153_spill] sm:$0xff] %v10344_v15  ;;  %2610 = vmatprep.mubr.f32.mxu0 %v2609_v21  ;;  %v12365_v33 = vand.u32 4294901760, %v10344_v15  ;;  %v2961_v46 = vsub.f32 %v12737_v61, %v12364_v26  ;;  %v12366_v28 = vand.u32 4294901760, %v12739_v31  ;;  %v12369_v6 = vand.u32 4294901760, %v9423_v32 }
 0x27d   : > { %12738 = vst [vmem:[#allocation154_spill] sm:$0xff] %v10349_v27  ;;  %2616 = vmatmul.mubr.f32.gmra.mrb[18].mxu0 %v2615_v7  ;;  %6695 = vmatprep.subr.bf16.mxu0 %v6694_v29  ;;  %v6696_v13 = vpack.c.bf16 %v2956_v1, %v2944_v63  ;;  %v12374_v24 = vand.u32 4294901760, %v10349_v27  ;;  %v12377_v56 = vand.u32 4294901760, %v12740_v49  ;;  %v10360_v20 = vand.u32 4294901760, %v2260_v57 }
 0x27e   : > { %v2624_v21 = vsub.f32 %v10344_v15, %v12365_v33  ;;  %v2962_v23 = vand.u32 4294901760, %v2961_v46  ;;  %v2973_v26 = vsub.f32 %v12739_v31, %v12366_v28  ;;  %v2967_v7 = vsub.f32 %v9423_v32, %v12369_v6 }
 0x27f   : > { %12741 = vst [vmem:[#allocation155_spill] sm:$0xff] %v10360_v20  ;;  %6697 = vmatpush1.bf16.msra.mxu0 %v6696_v13  ;;  %v2630_v63 = vsub.f32 %v10349_v27, %v12374_v24  ;;  %v2979_v1 = vsub.f32 %v12740_v49, %v12377_v56  ;;  %v10378_v29 = vsub.f32 %v2260_v57, %v10360_v20  ;;  %v10380_v46 = vand.u32 4294901760, %v2259_v10  ;;  %v2262_v27 = vld [vmem:[%s8030_s13 + $0xc8] sm:$0xff]  ;;  %v2261_v20 = vld [vmem:[%s8030_s13 + $0xc0] sm:$0xff] }
 0x280   : > { %v2625_v33 = vand.u32 4294901760, %v2624_v21  ;;  %v2974_v28 = vand.u32 4294901760, %v2973_v26  ;;  %v2968_v15 = vand.u32 4294901760, %v2967_v7  ;;  %v12382_v6 = vand.u32 4294901760, %v9485_v4  ;;  %v12745_v26 = vld [vmem:[#allocation85_spill] sm:$0xff] }
 0x281   : > { %12742 = vst [vmem:[#allocation156_spill] sm:$0xff] %v10378_v29  ;;  %12743 = vst [vmem:[#allocation157_spill] sm:$0xff] %v10380_v46  ;;  %v2631_v13 = vand.u32 4294901760, %v2630_v63  ;;  %v2980_v30 = vand.u32 4294901760, %v2979_v1  ;;  %v12383_v58 = vand.u32 4294901760, %v10378_v29  ;;  %v10385_v24 = vsub.f32 %v2259_v10, %v10380_v46  ;;  %v12746_v46 = vld [vmem:[#allocation86_spill] sm:$0xff] }
 0x282   : > { %2626 = vmatprep.mubr.f32.mxu0 %v2625_v33  ;;  %v6698_v56 = vpack.c.bf16 %v2974_v28, %v2962_v23  ;;  %v2985_v57 = vsub.f32 %v9485_v4, %v12382_v6  ;;  %v12384_v21 = vand.u32 4294901760, %v9492_v16  ;;  %v12385_v7 = vand.u32 4294901760, %v12745_v26 }
 0x283   : > { %12744 = vst [vmem:[#allocation158_spill] sm:$0xff] %v10385_v24  ;;  %2632 = vmatmul.mubr.f32.gmra.mrb[20].mxu0 %v2631_v13  ;;  %v6700_v63 = vpack.c.bf16 %v2980_v30, %v2968_v15  ;;  %v2640_v1 = vsub.f32 %v10378_v29, %v12383_v58  ;;  %v12392_v10 = vand.u32 4294901760, %v10385_v24  ;;  %v12397_v33 = vand.u32 4294901760, %v12746_v46  ;;  %v12750_v29 = vld [vmem:[#allocation87_spill] sm:$0xff] }
 0x284   : > { %6699 = vmatprep.subr.bf16.mxu0 %v6698_v56  ;;  %v2986_v23 = vand.u32 4294901760, %v2985_v57  ;;  %v2997_v28 = vsub.f32 %v9492_v16, %v12384_v21  ;;  %v2991_v6 = vsub.f32 %v12745_v26, %v12385_v7  ;;  %v10405_v15 = vand.u32 4294901760, %v2262_v27 }
 0x285   : > { %6701 = vmatpush1.bf16.msra.mxu0 %v6700_v63  ;;  %v2641_v30 = vand.u32 4294901760, %v2640_v1  ;;  %v2646_v13 = vsub.f32 %v10385_v24, %v12392_v10  ;;  %v3003_v56 = vsub.f32 %v12746_v46, %v12397_v33  ;;  %v10413_v57 = vand.u32 4294901760, %v2261_v20  ;;  %v12752_v10 = vld [vmem:[#allocation89_spill] sm:$0xff] }
 0x286   : > { %12747 = vst [vmem:[#allocation159_spill] sm:$0xff] %v10405_v15  ;;  %v2998_v58 = vand.u32 4294901760, %v2997_v28  ;;  %v2992_v21 = vand.u32 4294901760, %v2991_v6  ;;  %v10416_v7 = vsub.f32 %v2262_v27, %v10405_v15  ;;  %v12402_v54 = vand.u32 4294901760, %v12750_v29  ;;  %v12753_v27 = vld [vmem:[#allocation90_spill] sm:$0xff]  ;;  %v2263_v15 = vld [vmem:[%s8030_s13 + $0xd0] sm:$0xff] }
 0x287   : > { %12748 = vst [vmem:[#allocation160_spill] sm:$0xff] %v10413_v57  ;;  %2642 = vmatprep.mubr.f32.mxu0 %v2641_v30  ;;  %v2647_v63 = vand.u32 4294901760, %v2646_v13  ;;  %v3004_v1 = vand.u32 4294901760, %v3003_v56  ;;  %v10420_v48 = vsub.f32 %v2261_v20, %v10413_v57  ;;  %v12403_v24 = vand.u32 4294901760, %v12752_v10  ;;  %v12754_v56 = vld [vmem:[#allocation92_spill] sm:$0xff] }
 0x288   : > { %12749 = vst [vmem:[#allocation161_spill] sm:$0xff] %v10416_v7  ;;  %v6702_v33 = vpack.c.bf16 %v2998_v58, %v2986_v23  ;;  %v12406_v12 = vand.u32 4294901760, %v10416_v7  ;;  %v3009_v6 = vsub.f32 %v12750_v29, %v12402_v54  ;;  %v12409_v28 = vand.u32 4294901760, %v12753_v27 }
 0x289   : > { %12751 = vst [vmem:[#allocation162_spill] sm:$0xff] %v10420_v48  ;;  %2648 = vmatmul.mubr.f32.gmra.mrb[22].mxu0 %v2647_v63  ;;  %v6704_v30 = vpack.c.bf16 %v3004_v1, %v2992_v21  ;;  %v12415_v13 = vand.u32 4294901760, %v10420_v48  ;;  %v3021_v20 = vsub.f32 %v12752_v10, %v12403_v24  ;;  %v12416_v58 = vand.u32 4294901760, %v12754_v56 }
 0x28a   : > { %6703 = vmatprep.subr.bf16.mxu0 %v6702_v33  ;;  %v2656_v23 = vsub.f32 %v10416_v7, %v12406_v12  ;;  %v3010_v54 = vand.u32 4294901760, %v3009_v6  ;;  %v3015_v63 = vsub.f32 %v12753_v27, %v12409_v28  ;;  %v10441_v21 = vand.u32 4294901760, %v2264_v43  ;;  %v12758_v28 = vld [vmem:[#allocation94_spill] sm:$0xff] }
 0x28b   : > { %6705 = vmatpush1.bf16.msra.mxu0 %v6704_v30  ;;  %v2662_v1 = vsub.f32 %v10420_v48, %v12415_v13  ;;  %v3022_v24 = vand.u32 4294901760, %v3021_v20  ;;  %v3027_v33 = vsub.f32 %v12754_v56, %v12416_v58  ;;  %v10449_v57 = vand.u32 4294901760, %v2263_v15  ;;  %v2266_v30 = vld [vmem:[%s8030_s13 + $0xe8] sm:$0xff]  ;;  %v2265_v48 = vld [vmem:[%s8030_s13 + $0xe0] sm:$0xff] }
 0x28c   : > { %12755 = vst [vmem:[#allocation163_spill] sm:$0xff] %v10441_v21  ;;  %v2657_v6 = vand.u32 4294901760, %v2656_v23  ;;  %v3016_v12 = vand.u32 4294901760, %v3015_v63  ;;  %v10452_v7 = vsub.f32 %v2264_v43, %v10441_v21  ;;  %v12421_v50 = vand.u32 4294901760, %v12758_v28  ;;  %v12760_v63 = vld [vmem:[#allocation95_spill] sm:$0xff] }
 0x28d   : > { %12756 = vst [vmem:[#allocation164_spill] sm:$0xff] %v10449_v57  ;;  %v2663_v27 = vand.u32 4294901760, %v2662_v1  ;;  %v6706_v10 = vpack.c.bf16 %v3022_v24, %v3010_v54  ;;  %v3028_v29 = vand.u32 4294901760, %v3027_v33  ;;  %v10457_v20 = vsub.f32 %v2263_v15, %v10449_v57  ;;  %v12761_v24 = vld [vmem:[#allocation99_spill] sm:$0xff] }
 0x28e   : > { %12757 = vst [vmem:[#allocation165_spill] sm:$0xff] %v10452_v7  ;;  %2658 = vmatprep.mubr.f32.mxu0 %v2657_v6  ;;  %v12422_v13 = vand.u32 4294901760, %v10452_v7  ;;  %v3033_v23 = vsub.f32 %v12758_v28, %v12421_v50  ;;  %v12423_v58 = vand.u32 4294901760, %v12760_v63  ;;  %v12426_v43 = vand.u32 4294901760, %v9774_v2 }
 0x28f   : > { %12759 = vst [vmem:[#allocation166_spill] sm:$0xff] %v10457_v20  ;;  %2664 = vmatmul.mubr.f32.gmra.mrb[24].mxu0 %v2663_v27  ;;  %6707 = vmatprep.subr.bf16.mxu0 %v6706_v10  ;;  %v6708_v1 = vpack.c.bf16 %v3028_v29, %v3016_v12  ;;  %v12431_v54 = vand.u32 4294901760, %v10457_v20  ;;  %v12434_v15 = vand.u32 4294901760, %v12761_v24  ;;  %v10468_v33 = vand.u32 4294901760, %v2266_v30 }
 0x290   : > { %v2672_v6 = vsub.f32 %v10452_v7, %v12422_v13  ;;  %v3034_v57 = vand.u32 4294901760, %v3033_v23  ;;  %v3045_v50 = vsub.f32 %v12760_v63, %v12423_v58  ;;  %v3039_v12 = vsub.f32 %v9774_v2, %v12426_v43 }
 0x291   : > { %12762 = vst [vmem:[#allocation167_spill] sm:$0xff] %v10468_v33  ;;  %6709 = vmatpush1.bf16.msra.mxu0 %v6708_v1  ;;  %v2678_v29 = vsub.f32 %v10457_v20, %v12431_v54  ;;  %v3051_v10 = vsub.f32 %v12761_v24, %v12434_v15  ;;  %v10486_v27 = vsub.f32 %v2266_v30, %v10468_v33  ;;  %v10488_v23 = vand.u32 4294901760, %v2265_v48  ;;  %v2268_v20 = vld [vmem:[%s8030_s13 + $0xf8] sm:$0xff] }
 0x292   : > { %v2673_v13 = vand.u32 4294901760, %v2672_v6  ;;  %v3046_v58 = vand.u32 4294901760, %v3045_v50  ;;  %v3040_v7 = vand.u32 4294901760, %v3039_v12  ;;  %v12435_v43 = vand.u32 4294901760, %v9836_v39  ;;  %v2267_v12 = vld [vmem:[%s8030_s13 + $0xf0] sm:$0xff] }
 0x293   : > { %12763 = vst [vmem:[#allocation168_spill] sm:$0xff] %v10486_v27  ;;  %12764 = vst [vmem:[#allocation169_spill] sm:$0xff] %v10488_v23  ;;  %v2679_v1 = vand.u32 4294901760, %v2678_v29  ;;  %v3052_v21 = vand.u32 4294901760, %v3051_v10  ;;  %v12436_v2 = vand.u32 4294901760, %v10486_v27  ;;  %v10493_v54 = vsub.f32 %v2265_v48, %v10488_v23 }
 0x294   : > { %2674 = vmatprep.mubr.f32.mxu0 %v2673_v13  ;;  %v6710_v15 = vpack.c.bf16 %v3046_v58, %v3034_v57  ;;  %v3057_v30 = vsub.f32 %v9836_v39, %v12435_v43  ;;  %v12437_v6 = vand.u32 4294901760, %v9843_v52  ;;  %v12440_v50 = vand.u32 4294901760, %v9892_v55 }
 0x295   : > { %12765 = vst [vmem:[#allocation170_spill] sm:$0xff] %v10493_v54  ;;  %2680 = vmatmul.mubr.f32.gmra.mrb[26].mxu0 %v2679_v1  ;;  %v6712_v29 = vpack.c.bf16 %v3052_v21, %v3040_v7  ;;  %v2688_v10 = vsub.f32 %v10486_v27, %v12436_v2  ;;  %v12443_v48 = vand.u32 4294901760, %v10493_v54  ;;  %v12446_v13 = vand.u32 4294901760, %v9894_v18 }
 0x296   : > { %6711 = vmatprep.subr.bf16.mxu0 %v6710_v15  ;;  %v3058_v57 = vand.u32 4294901760, %v3057_v30  ;;  %v3069_v58 = vsub.f32 %v9843_v52, %v12437_v6  ;;  %v3063_v43 = vsub.f32 %v9892_v55, %v12440_v50  ;;  %v10513_v1 = vand.u32 4294901760, %v2268_v20 }
 0x297   : > { %6713 = vmatpush1.bf16.msra.mxu0 %v6712_v29  ;;  %v2689_v7 = vand.u32 4294901760, %v2688_v10  ;;  %v2694_v21 = vsub.f32 %v10493_v54, %v12443_v48  ;;  %v3075_v15 = vsub.f32 %v9894_v18, %v12446_v13  ;;  %v10521_v30 = vand.u32 4294901760, %v2267_v12 }
 0x298   : > { %12766 = vst [vmem:[#allocation171_spill] sm:$0xff] %v10513_v1  ;;  %v3070_v2 = vand.u32 4294901760, %v3069_v58  ;;  %v3064_v6 = vand.u32 4294901760, %v3063_v43  ;;  %v10524_v27 = vsub.f32 %v2268_v20, %v10513_v1  ;;  %v12448_v50 = vand.u32 4294901760, %v9945_v5 }
 0x299   : > { %12767 = vst [vmem:[#allocation172_spill] sm:$0xff] %v10521_v30  ;;  %2690 = vmatprep.mubr.f32.mxu0 %v2689_v7  ;;  %v2695_v29 = vand.u32 4294901760, %v2694_v21  ;;  %v3076_v10 = vand.u32 4294901760, %v3075_v15  ;;  %v10528_v23 = vsub.f32 %v2267_v12, %v10521_v30  ;;  %v12447_v48 = vand.u32 4294901760, %v9951_v60 }
 0x29a   : > { %12768 = vst [vmem:[#allocation173_spill] sm:$0xff] %v10524_v27  ;;  %v6714_v54 = vpack.c.bf16 %v3070_v2, %v3058_v57  ;;  %v12451_v13 = vand.u32 4294901760, %v10524_v27  ;;  %v3081_v43 = vsub.f32 %v9945_v5, %v12448_v50  ;;  %v12454_v20 = vand.u32 4294901760, %v10010_v53 }
 0x29b   : > { %2696 = vmatmul.mubr.f32.gmra.mrb[28].mxu0 %v2695_v29  ;;  %v6716_v58 = vpack.c.bf16 %v3076_v10, %v3064_v6  ;;  %v12452_v7 = vand.u32 4294901760, %v10528_v23  ;;  %v3093_v12 = vsub.f32 %v9951_v60, %v12447_v48  ;;  %v12453_v21 = vand.u32 4294901760, %v10019_v0 }
 0x29c   : > { %6715 = vmatprep.subr.bf16.mxu0 %v6714_v54  ;;  %v2704_v2 = vsub.f32 %v10524_v27, %v12451_v13  ;;  %v3082_v57 = vand.u32 4294901760, %v3081_v43  ;;  %v3087_v15 = vsub.f32 %v10010_v53, %v12454_v20  ;;  %v6722_v43 = vpack.c.bf16 %v8211_v8, %v8209_v40  ;;  %v12770_v20 = vld [vmem:[#allocation89_spill] sm:$0xff] }
 0x29d   : > { %6717 = vmatpush1.bf16.msra.mxu0 %v6716_v58  ;;  %v2710_v6 = vsub.f32 %v10528_v23, %v12452_v7  ;;  %v3094_v29 = vand.u32 4294901760, %v3093_v12  ;;  %v3099_v10 = vsub.f32 %v10019_v0, %v12453_v21  ;;  %v6724_v7 = vpack.c.bf16 %v8274_v11, %v8267_v35  ;;  %v12769_v21 = vld [vmem:[#allocation87_spill] sm:$0xff] }
 0x29e   : > { %v2705_v54 = vand.u32 4294901760, %v2704_v2  ;;  %v3088_v48 = vand.u32 4294901760, %v3087_v15  ;;  %v6726_v12 = vpack.c.bf16 %v8325_v9, %v8323_v36  ;;  %v6746_v2 = vpack.c.bf16 %v12707_v14, %v12705_v47  ;;  %v12798_v14 = vld [vmem:[#allocation131_spill] sm:$0xff]  ;;  %v12800_v47 = vld [vmem:[#allocation50_spill] sm:$0xff] }
 0x29f   : > { %v2711_v50 = vand.u32 4294901760, %v2710_v6  ;;  %v6718_v30 = vpack.c.bf16 %v3094_v29, %v3082_v57  ;;  %v3100_v13 = vand.u32 4294901760, %v3099_v10  ;;  %v6748_v57 = vpack.c.bf16 %v12709_v37, %v12708_v17 }
 0x2a0   : > { %2706 = vmatprep.mubr.f32.mxu0 %v2705_v54  ;;  %v6750_v15 = vpack.c.bf16 %v12715_v45, %v12713_v62  ;;  %v6760_v6 = vpack.c.bf16 %v12733_v19, %v12732_v41  ;;  %v6762_v29 = vpack.c.bf16 %v12739_v31, %v12737_v61  ;;  %v6764_v10 = vpack.c.bf16 %v12740_v49, %v9423_v32  ;;  %v12772_v41 = vld [vmem:[#allocation110_spill] sm:$0xff]  ;;  %v12773_v31 = vld [vmem:[#allocation97_spill] sm:$0xff]  ;;  %v12777_v49 = vld [vmem:[#allocation27_spill] sm:$0xff] }
 0x2a1   : > { %2712 = vmatmul.mubr.f32.gmra.mrb[30].mxu0 %v2711_v50  ;;  %6719 = vmatprep.subr.bf16.mxu0 %v6718_v30  ;;  %v6720_v58 = vpack.c.bf16 %v3100_v13, %v3088_v48  ;;  %v6752_v50 = vpack.c.bf16 %v12717_v25, %v12716_v42  ;;  %v6754_v48 = vpack.c.bf16 %v12723_v3, %v12721_v59  ;;  %v12778_v32 = vld [vmem:[#allocation29_spill] sm:$0xff]  ;;  %v12785_v3 = vld [vmem:[#allocation120_spill] sm:$0xff]  ;;  %v12788_v59 = vld [vmem:[#allocation38_spill] sm:$0xff] }
 0x2a2   : > { %3103 = vmatprep.mubr.f32.mxu0 %v9750_v51  ;;  %v6756_v13 = vpack.c.bf16 %v12725_v34, %v12724_v44  ;;  %v6758_v30 = vpack.c.bf16 %v12731_v22, %v12729_v38  ;;  %v6766_v54 = vpack.c.bf16 %v9492_v16, %v9485_v4  ;;  %v12771_v22 = vld [vmem:[#allocation90_spill] sm:$0xff]  ;;  %v6730_v61 = vpack.c.bf16 %v12778_v32, %v12777_v49  ;;  %v12781_v38 = vld [vmem:[#allocation31_spill] sm:$0xff]  ;;  %v12782_v51 = vld [vmem:[#allocation32_spill] sm:$0xff] }
 0x2a3   : > { %6721 = vmatpush1.bf16.msra.mxu0 %v6720_v58  ;;  %v6768_v58 = vpack.c.bf16 %v12746_v46, %v12745_v26  ;;  %v12774_v26 = vld [vmem:[#allocation112_spill] sm:$0xff]  ;;  %v12776_v4 = vld [vmem:[#allocation26_spill] sm:$0xff]  ;;  %v12780_v46 = vld [vmem:[#allocation119_spill] sm:$0xff] }
 0x2a4   : > { %6723 = vmatprep.subr.bf16.mxu0 %v6722_v43  ;;  %v12775_v43 = vld [vmem:[#allocation24_spill] sm:$0xff]  ;;  %v12779_v16 = vld [vmem:[#allocation114_spill] sm:$0xff]  ;;  %v12784_v34 = vld [vmem:[#allocation35_spill] sm:$0xff] }
 0x2a5   : > { %v6728_v19 = vpack.c.bf16 %v12776_v4, %v12775_v43  ;;  %v12792_v45 = vld [vmem:[#allocation127_spill] sm:$0xff]  ;;  %v12794_v62 = vld [vmem:[#allocation44_spill] sm:$0xff] }
 0x2a6   : > { %3105 = vmatmul.mubr.f32.vlgmr.msra.gmra.mrb[0].mxu0 %v12772_v41  ;;  %v12786_v41 = vld [vmem:[#allocation123_spill] sm:$0xff] }
 0x2a7   : > { %6725 = vmatpush1.bf16.msra.mxu0 %v6724_v7  ;;  %3111 = vmatprep.mubr.f32.mxu0 %v12774_v26  ;;  %v6732_v7 = vpack.c.bf16 %v12782_v51, %v12781_v38  ;;  %v12783_v26 = vld [vmem:[#allocation33_spill] sm:$0xff] }
 0x2a8   : > { %6727 = vmatprep.subr.bf16.mxu0 %v6726_v12  ;;  %v6734_v44 = vpack.c.bf16 %v12784_v34, %v12783_v26  ;;  %v12787_v12 = vld [vmem:[#allocation37_spill] sm:$0xff] }
 0x2a9   : > { %v6736_v25 = vpack.c.bf16 %v12788_v59, %v12787_v12 }
 0x2aa   : > { %3113 = vmatmul.mubr.f32.gmra.mrb[2].mxu0 %v12779_v16  ;;  %v12789_v16 = vld [vmem:[#allocation40_spill] sm:$0xff] }
 0x2ab   : > { %6729 = vmatpush1.bf16.msra.mxu0 %v6728_v19  ;;  %3119 = vmatprep.mubr.f32.mxu0 %v12780_v46  ;;  %v12790_v19 = vld [vmem:[#allocation41_spill] sm:$0xff]  ;;  %v12791_v46 = vld [vmem:[#allocation124_spill] sm:$0xff] }
 0x2ac   : > { %6731 = vmatprep.subr.bf16.mxu0 %v6730_v61  ;;  %v6738_v42 = vpack.c.bf16 %v12790_v19, %v12789_v16  ;;  %v12793_v61 = vld [vmem:[#allocation42_spill] sm:$0xff] }
 0x2ad   : > { %v6740_v37 = vpack.c.bf16 %v12794_v62, %v12793_v61 }
 0x2ae   : > { %3121 = vmatmul.mubr.f32.gmra.mrb[4].mxu0 %v12785_v3  ;;  %v12795_v3 = vld [vmem:[#allocation45_spill] sm:$0xff] }
 0x2af   : > { %6733 = vmatpush1.bf16.msra.mxu0 %v6732_v7  ;;  %3127 = vmatprep.mubr.f32.mxu0 %v12786_v41  ;;  %v12796_v7 = vld [vmem:[#allocation47_spill] sm:$0xff]  ;;  %v12797_v41 = vld [vmem:[#allocation129_spill] sm:$0xff] }
 0x2b0   : > { %6735 = vmatprep.subr.bf16.mxu0 %v6734_v44  ;;  %v6742_v17 = vpack.c.bf16 %v12796_v7, %v12795_v3  ;;  %v12799_v44 = vld [vmem:[#allocation49_spill] sm:$0xff] }
 0x2b1   : > { %v6744_v19 = vpack.c.bf16 %v12800_v47, %v12799_v44 }
 0x2b2   : > { %3129 = vmatmul.mubr.f32.gmra.mrb[6].mxu0 %v12791_v46  ;;  %v12801_v46 = vld [vmem:[#allocation133_spill] sm:$0xff] }
 0x2b3   : > { %6737 = vmatpush1.bf16.msra.mxu0 %v6736_v25  ;;  %3135 = vmatprep.mubr.f32.mxu0 %v12792_v45  ;;  %v12802_v25 = vld [vmem:[#allocation135_spill] sm:$0xff]  ;;  %v12803_v45 = vld [vmem:[#allocation136_spill] sm:$0xff] }
 0x2b4   : > { %6739 = vmatprep.subr.bf16.mxu0 %v6738_v42  ;;  %v12804_v42 = vld [vmem:[#allocation139_spill] sm:$0xff] }
 0x2b6   : > { %3137 = vmatmul.mubr.f32.gmra.mrb[8].mxu0 %v12797_v41  ;;  %v12805_v41 = vld [vmem:[#allocation140_spill] sm:$0xff] }
 0x2b7   : > { %6741 = vmatpush1.bf16.msra.mxu0 %v6740_v37  ;;  %3143 = vmatprep.mubr.f32.mxu0 %v12798_v14  ;;  %v12806_v37 = vld [vmem:[#allocation143_spill] sm:$0xff]  ;;  %v12807_v14 = vld [vmem:[#allocation145_spill] sm:$0xff] }
 0x2b8   : > { %6743 = vmatprep.subr.bf16.mxu0 %v6742_v17  ;;  %v12808_v17 = vld [vmem:[#allocation147_spill] sm:$0xff] }
 0x2ba   : > { %3145 = vmatmul.mubr.f32.gmra.mrb[10].mxu0 %v12801_v46  ;;  %v12850_v46 = vld [vmem:[#allocation134_spill] sm:$0xff] }
 0x2bb   : > { %6745 = vmatpush1.bf16.msra.mxu0 %v6744_v19  ;;  %3151 = vmatprep.mubr.f32.mxu0 %v12802_v25  ;;  %v12809_v19 = vld [vmem:[#allocation148_spill] sm:$0xff]  ;;  %v12849_v25 = vld [vmem:[#allocation46_spill] sm:$0xff] }
 0x2bc   : > { %6747 = vmatprep.subr.bf16.mxu0 %v6746_v2  ;;  %v12810_v2 = vld [vmem:[#allocation151_spill] sm:$0xff] }
 0x2be   : > { %3153 = vmatmul.mubr.f32.gmra.mrb[12].mxu0 %v12803_v45  ;;  %v12848_v45 = vld [vmem:[#allocation132_spill] sm:$0xff] }
 0x2bf   : > { %6749 = vmatpush1.bf16.msra.mxu0 %v6748_v57  ;;  %3159 = vmatprep.mubr.f32.mxu0 %v12804_v42  ;;  %v12811_v57 = vld [vmem:[#allocation152_spill] sm:$0xff]  ;;  %v12847_v42 = vld [vmem:[#allocation43_spill] sm:$0xff] }
 0x2c0   : > { %6751 = vmatprep.subr.bf16.mxu0 %v6750_v15  ;;  %v12812_v15 = vld [vmem:[#allocation155_spill] sm:$0xff] }
 0x2c2   : > { %3161 = vmatmul.mubr.f32.gmra.mrb[14].mxu0 %v12805_v41  ;;  %v12846_v41 = vld [vmem:[#allocation130_spill] sm:$0xff] }
 0x2c3   : > { %6753 = vmatpush1.bf16.msra.mxu0 %v6752_v50  ;;  %3167 = vmatprep.mubr.f32.mxu0 %v12806_v37  ;;  %v12813_v50 = vld [vmem:[#allocation157_spill] sm:$0xff]  ;;  %v12845_v37 = vld [vmem:[#allocation39_spill] sm:$0xff] }
 0x2c4   : > { %6755 = vmatprep.subr.bf16.mxu0 %v6754_v48  ;;  %v12814_v48 = vld [vmem:[#allocation159_spill] sm:$0xff] }
 0x2c6   : > { %3169 = vmatmul.mubr.f32.gmra.mrb[16].mxu0 %v12807_v14  ;;  %v12844_v14 = vld [vmem:[#allocation128_spill] sm:$0xff] }
 0x2c7   : > { %6757 = vmatpush1.bf16.msra.mxu0 %v6756_v13  ;;  %3175 = vmatprep.mubr.f32.mxu0 %v12808_v17  ;;  %v12815_v13 = vpack.c.bf16 %v12770_v20, %v12769_v21  ;;  %v12843_v17 = vld [vmem:[#allocation36_spill] sm:$0xff] }
 0x2c8   : > { %6759 = vmatprep.subr.bf16.mxu0 %v6758_v30  ;;  %v12816_v30 = vld [vmem:[#allocation160_spill] sm:$0xff] }
 0x2ca   : > { %3177 = vmatmul.mubr.f32.gmra.mrb[18].mxu0 %v12809_v19  ;;  %v12842_v19 = vld [vmem:[#allocation126_spill] sm:$0xff] }
 0x2cb   : > { %6761 = vmatpush1.bf16.msra.mxu0 %v6760_v6  ;;  %3183 = vmatprep.mubr.f32.mxu0 %v12810_v2  ;;  %v12817_v6 = vpack.c.bf16 %v12754_v56, %v12771_v22  ;;  %v12841_v2 = vld [vmem:[#allocation34_spill] sm:$0xff]  ;;  %v12887_v56 = vld [vmem:[#allocation103_spill] sm:$0xff] }
 0x2cc   : > { %6763 = vmatprep.subr.bf16.mxu0 %v6762_v29  ;;  %v12818_v29 = vld [vmem:[#allocation163_spill] sm:$0xff] }
 0x2ce   : > { %3185 = vmatmul.mubr.f32.gmra.mrb[20].mxu0 %v12811_v57  ;;  %v12840_v57 = vld [vmem:[#allocation125_spill] sm:$0xff] }
 0x2cf   : > { %6765 = vmatpush1.bf16.msra.mxu0 %v6764_v10  ;;  %3191 = vmatprep.mubr.f32.mxu0 %v12812_v15  ;;  %v12819_v10 = vpack.c.bf16 %v12760_v63, %v12758_v28  ;;  %v12839_v15 = vld [vmem:[#allocation30_spill] sm:$0xff]  ;;  %v12885_v28 = vld [vmem:[#allocation101_spill] sm:$0xff] }
 0x2d0   : > { %6767 = vmatprep.subr.bf16.mxu0 %v6766_v54  ;;  %v12820_v54 = vld [vmem:[#allocation164_spill] sm:$0xff]  ;;  %v12883_v63 = vld [vmem:[#allocation98_spill] sm:$0xff] }
 0x2d2   : > { %3193 = vmatmul.mubr.f32.gmra.mrb[22].mxu0 %v12813_v50  ;;  %v12837_v50 = vld [vmem:[#allocation28_spill] sm:$0xff] }
 0x2d3   : > { %6769 = vmatpush1.bf16.msra.mxu0 %v6768_v58  ;;  %3199 = vmatprep.mubr.f32.mxu0 %v12814_v48  ;;  %v12821_v58 = vpack.c.bf16 %v12761_v24, %v12773_v31  ;;  %v12834_v48 = vld [vmem:[#allocation118_spill] sm:$0xff]  ;;  %v12879_v24 = vld [vmem:[#allocation91_spill] sm:$0xff]  ;;  %v12881_v31 = vld [vmem:[#allocation93_spill] sm:$0xff] }
 0x2d4   : > { %6771 = vmatprep.subr.bf16.mxu0 %v12815_v13  ;;  %v12822_v13 = vpack.c.bf16 %v9843_v52, %v9836_v39  ;;  %v12875_v52 = vld [vmem:[#allocation84_spill] sm:$0xff] }
 0x2d5   : > { %v12877_v39 = vld [vmem:[#allocation88_spill] sm:$0xff] }
 0x2d6   : > { %3201 = vmatmul.mubr.f32.gmra.mrb[24].mxu0 %v12816_v30  ;;  %v12823_v30 = vld [vmem:[#allocation169_spill] sm:$0xff] }
 0x2d7   : > { %6773 = vmatpush1.bf16.msra.mxu0 %v12817_v6  ;;  %3207 = vmatprep.mubr.f32.mxu0 %v12818_v29  ;;  %v12824_v6 = vpack.c.bf16 %v9894_v18, %v9892_v55  ;;  %v12831_v29 = vld [vmem:[#allocation22_spill] sm:$0xff]  ;;  %v12871_v18 = vld [vmem:[#allocation79_spill] sm:$0xff] }
 0x2d8   : > { %6775 = vmatprep.subr.bf16.mxu0 %v12819_v10  ;;  %v12825_v10 = vpack.c.bf16 %v9951_v60, %v9945_v5  ;;  %v12867_v60 = vld [vmem:[#allocation73_spill] sm:$0xff]  ;;  %v12869_v5 = vld [vmem:[#allocation75_spill] sm:$0xff]  ;;  %v12873_v55 = vld [vmem:[#allocation82_spill] sm:$0xff] }
 0x2da   : > { %3209 = vmatmul.mubr.f32.gmra.mrb[26].mxu0 %v12820_v54  ;;  %v12826_v54 = vld [vmem:[#allocation172_spill] sm:$0xff] }
 0x2db   : > { %6777 = vmatpush1.bf16.msra.mxu0 %v12821_v58  ;;  %3215 = vmatprep.mubr.f32.mxu0 %v10468_v33  ;;  %v12827_v58 = vpack.c.bf16 %v10019_v0, %v10010_v53  ;;  %v12828_v33 = vld [vmem:[#allocation109_spill] sm:$0xff]  ;;  %v12863_v0 = vld [vmem:[#allocation66_spill] sm:$0xff] }
 0x2dc   : > { %6779 = vmatprep.subr.bf16.mxu0 %v12822_v13  ;;  %v12829_v13 = vld [vmem:[#allocation21_spill] sm:$0xff]  ;;  %v12865_v53 = vld [vmem:[#allocation70_spill] sm:$0xff] }
 0x2de   : > { %3217 = vmatmul.mubr.f32.gmra.mrb[28].mxu0 %v12823_v30  ;;  %v12830_v30 = vld [vmem:[#allocation111_spill] sm:$0xff] }
 0x2df   : > { %6781 = vmatpush1.bf16.msra.mxu0 %v12824_v6  ;;  %3223 = vmatprep.mubr.f32.mxu0 %v10513_v1  ;;  %v12832_v6 = vld [vmem:[#allocation117_spill] sm:$0xff]  ;;  %v12833_v1 = vld [vmem:[#allocation23_spill] sm:$0xff] }
 0x2e0   : > { %6783 = vmatprep.subr.bf16.mxu0 %v12825_v10  ;;  %v12835_v10 = vld [vmem:[#allocation25_spill] sm:$0xff] }
 0x2e2   : > { %3225 = vmatmul.mubr.f32.gmra.mrb[30].mxu0 %v12826_v54  ;;  %v12836_v54 = vld [vmem:[#allocation121_spill] sm:$0xff] }
 0x2e3   : > { %6785 = vmatpush1.bf16.msra.mxu0 %v12827_v58  ;;  %3425 = vmatprep.mubr.f32.mxu0 %v12828_v33  ;;  %v12838_v58 = vld [vmem:[#allocation122_spill] sm:$0xff] }
 0x2e4   : > { %6787 = vmatprep.subr.bf16.mxu0 %v12829_v13  ;;  %v12861_v13 = vld [vmem:[#allocation64_spill] sm:$0xff] }
 0x2e6   : > { %3428 = vmatmul.mubr.f32.vlgmr.msra.gmra.mrb[0].mxu0 %v12830_v30 }
 0x2e7   : > { %6789 = vmatpush1.bf16.msra.mxu0 %v12831_v29  ;;  %3435 = vmatprep.mubr.f32.mxu0 %v12832_v6  ;;  %v12859_v29 = vld [vmem:[#allocation61_spill] sm:$0xff] }
 0x2e8   : > { %6791 = vmatprep.subr.bf16.mxu0 %v12833_v1  ;;  %v12857_v1 = vld [vmem:[#allocation57_spill] sm:$0xff] }
 0x2ea   : > { %3438 = vmatmul.mubr.f32.gmra.mrb[2].mxu0 %v12834_v48 }
 0x2eb   : > { %6793 = vmatpush1.bf16.msra.mxu0 %v12835_v10  ;;  %3445 = vmatprep.mubr.f32.mxu0 %v12836_v54  ;;  %v12855_v10 = vld [vmem:[#allocation55_spill] sm:$0xff] }
 0x2ec   : > { %6795 = vmatprep.subr.bf16.mxu0 %v12837_v50  ;;  %v12853_v50 = vld [vmem:[#allocation52_spill] sm:$0xff] }
 0x2ee   : > { %3448 = vmatmul.mubr.f32.gmra.mrb[4].mxu0 %v12838_v58 }
 0x2ef   : > { %6797 = vmatpush1.bf16.msra.mxu0 %v12839_v15  ;;  %3455 = vmatprep.mubr.f32.mxu0 %v12840_v57  ;;  %v12851_v15 = vld [vmem:[#allocation48_spill] sm:$0xff] }
 0x2f0   : > { %6799 = vmatprep.subr.bf16.mxu0 %v12841_v2  ;;  %v12852_v2 = vld [vmem:[#allocation137_spill] sm:$0xff] }
 0x2f2   : > { %3458 = vmatmul.mubr.f32.gmra.mrb[6].mxu0 %v12842_v19 }
 0x2f3   : > { %6801 = vmatpush1.bf16.msra.mxu0 %v12843_v17  ;;  %3465 = vmatprep.mubr.f32.mxu0 %v12844_v14  ;;  %v12854_v17 = vld [vmem:[#allocation138_spill] sm:$0xff] }
 0x2f4   : > { %6803 = vmatprep.subr.bf16.mxu0 %v12845_v37  ;;  %v12856_v37 = vld [vmem:[#allocation141_spill] sm:$0xff] }
 0x2f6   : > { %3468 = vmatmul.mubr.f32.gmra.mrb[8].mxu0 %v12846_v41 }
 0x2f7   : > { %6805 = vmatpush1.bf16.msra.mxu0 %v12847_v42  ;;  %3475 = vmatprep.mubr.f32.mxu0 %v12848_v45  ;;  %v12858_v42 = vld [vmem:[#allocation142_spill] sm:$0xff] }
 0x2f8   : > { %6807 = vmatprep.subr.bf16.mxu0 %v12849_v25  ;;  %v12860_v25 = vld [vmem:[#allocation144_spill] sm:$0xff] }
 0x2fa   : > { %3478 = vmatmul.mubr.f32.gmra.mrb[10].mxu0 %v12850_v46 }
 0x2fb   : > { %6809 = vmatpush1.bf16.msra.mxu0 %v12851_v15  ;;  %3485 = vmatprep.mubr.f32.mxu0 %v12852_v2  ;;  %v12862_v15 = vld [vmem:[#allocation146_spill] sm:$0xff] }
 0x2fc   : > { %6811 = vmatprep.subr.bf16.mxu0 %v12853_v50  ;;  %v12864_v50 = vld [vmem:[#allocation149_spill] sm:$0xff] }
 0x2fe   : > { %3488 = vmatmul.mubr.f32.gmra.mrb[12].mxu0 %v12854_v17 }
 0x2ff   : > { %6813 = vmatpush1.bf16.msra.mxu0 %v12855_v10  ;;  %3495 = vmatprep.mubr.f32.mxu0 %v12856_v37  ;;  %v12866_v10 = vld [vmem:[#allocation150_spill] sm:$0xff] }
 0x300   : > { %6815 = vmatprep.subr.bf16.mxu0 %v12857_v1  ;;  %v12868_v1 = vld [vmem:[#allocation153_spill] sm:$0xff] }
 0x302   : > { %3498 = vmatmul.mubr.f32.gmra.mrb[14].mxu0 %v12858_v42 }
 0x303   : > { %6817 = vmatpush1.bf16.msra.mxu0 %v12859_v29  ;;  %3505 = vmatprep.mubr.f32.mxu0 %v12860_v25  ;;  %v12870_v29 = vld [vmem:[#allocation154_spill] sm:$0xff] }
 0x304   : > { %6819 = vmatprep.subr.bf16.mxu0 %v12861_v13  ;;  %v12872_v13 = vld [vmem:[#allocation156_spill] sm:$0xff] }
 0x306   : > { %3508 = vmatmul.mubr.f32.gmra.mrb[16].mxu0 %v12862_v15 }
 0x307   : > { %6821 = vmatpush1.bf16.msra.mxu0 %v12863_v0  ;;  %3515 = vmatprep.mubr.f32.mxu0 %v12864_v50  ;;  %v12874_v0 = vld [vmem:[#allocation158_spill] sm:$0xff] }
 0x308   : > { %6823 = vmatprep.subr.bf16.mxu0 %v12865_v53  ;;  %v12876_v53 = vld [vmem:[#allocation161_spill] sm:$0xff] }
 0x30a   : > { %3518 = vmatmul.mubr.f32.gmra.mrb[18].mxu0 %v12866_v10 }
 0x30b   : > { %6825 = vmatpush1.bf16.msra.mxu0 %v12867_v60  ;;  %3525 = vmatprep.mubr.f32.mxu0 %v12868_v1  ;;  %v12878_v60 = vld [vmem:[#allocation162_spill] sm:$0xff] }
 0x30c   : > { %6827 = vmatprep.subr.bf16.mxu0 %v12869_v5  ;;  %v12880_v5 = vld [vmem:[#allocation165_spill] sm:$0xff] }
 0x30e   : > { %3528 = vmatmul.mubr.f32.gmra.mrb[20].mxu0 %v12870_v29 }
 0x30f   : > { %6829 = vmatpush1.bf16.msra.mxu0 %v12871_v18  ;;  %3535 = vmatprep.mubr.f32.mxu0 %v12872_v13  ;;  %v12882_v18 = vld [vmem:[#allocation166_spill] sm:$0xff] }
 0x310   : > { %6831 = vmatprep.subr.bf16.mxu0 %v12873_v55  ;;  %v12884_v55 = vld [vmem:[#allocation168_spill] sm:$0xff] }
 0x312   : > { %3538 = vmatmul.mubr.f32.gmra.mrb[22].mxu0 %v12874_v0 }
 0x313   : > { %6833 = vmatpush1.bf16.msra.mxu0 %v12875_v52  ;;  %3545 = vmatprep.mubr.f32.mxu0 %v12876_v53  ;;  %v12886_v52 = vld [vmem:[#allocation170_spill] sm:$0xff] }
 0x314   : > { %6835 = vmatprep.subr.bf16.mxu0 %v12877_v39  ;;  %v12888_v39 = vld [vmem:[#allocation107_spill] sm:$0xff] }
 0x316   : > { %3548 = vmatmul.mubr.f32.gmra.mrb[24].mxu0 %v12878_v60 }
 0x317   : > { %6837 = vmatpush1.bf16.msra.mxu0 %v12879_v24  ;;  %3555 = vmatprep.mubr.f32.mxu0 %v12880_v5  ;;  %v12889_v24 = vand.u32 4294901760, %v8209_v40  ;;  %v12896_v40 = vand.u32 4294901760, %v8325_v9  ;;  %v12903_v9 = vand.u32 4294901760, %v12834_v48 }
 0x318   : > { %6839 = vmatprep.subr.bf16.mxu0 %v12881_v31  ;;  %v12890_v31 = vand.u32 4294901760, %v8211_v8  ;;  %v12897_v8 = vand.u32 4294901760, %v12830_v30  ;;  %v12914_v30 = vld [vmem:[#allocation41_spill] sm:$0xff] }
 0x31a   : > { %3558 = vmatmul.mubr.f32.gmra.mrb[26].mxu0 %v12882_v18  ;;  %v6850_v5 = vpack.c.bf16 %v12890_v31, %v12889_v24  ;;  %v12898_v31 = vand.u32 4294901760, %v12832_v6  ;;  %v12917_v6 = vand.u32 4294901760, %v12844_v14  ;;  %v12924_v14 = vand.u32 4294901760, %v12799_v44 }
 0x31b   : > { %6841 = vmatpush1.bf16.msra.mxu0 %v12883_v63  ;;  %3565 = vmatprep.mubr.f32.mxu0 %v12884_v55  ;;  %v12891_v63 = vld [vmem:[#allocation115_spill] sm:$0xff]  ;;  %v12892_v55 = vand.u32 4294901760, %v12828_v33 }
 0x31c   : > { %6843 = vmatprep.subr.bf16.mxu0 %v12885_v28  ;;  %v12893_v28 = vand.u32 4294901760, %v8267_v35  ;;  %v12900_v35 = vand.u32 4294901760, %v12776_v4  ;;  %v12907_v4 = vand.u32 4294901760, %v12783_v26  ;;  %v12915_v26 = vand.u32 4294901760, %v12914_v30 }
 0x31d   : > { %v12950_v30 = vand.u32 4294901760, %v12858_v42  ;;  %v12961_v42 = vand.u32 4294901760, %v12864_v50  ;;  %v12972_v50 = vld [vmem:[#allocation78_spill] sm:$0xff] }
 0x31e   : > { %3568 = vmatmul.mubr.f32.gmra.mrb[28].mxu0 %v12886_v52 }
 0x31f   : > { %6845 = vmatpush1.bf16.msra.mxu0 %v12887_v56  ;;  %3575 = vmatprep.mubr.f32.mxu0 %v10524_v27  ;;  %v12894_v56 = vand.u32 4294901760, %v8274_v11  ;;  %v12901_v11 = vand.u32 4294901760, %v12777_v49  ;;  %v12908_v49 = vand.u32 4294901760, %v12784_v34  ;;  %v12916_v34 = vand.u32 4294901760, %v12842_v19 }
 0x320   : > { %6847 = vmatprep.subr.bf16.mxu0 %v12888_v39  ;;  %v12895_v39 = vand.u32 4294901760, %v8323_v36  ;;  %v12902_v36 = vand.u32 4294901760, %v12778_v32  ;;  %v12909_v32 = vand.u32 4294901760, %v12838_v58  ;;  %v12923_v19 = vand.u32 4294901760, %v12848_v45  ;;  %v12932_v45 = vld [vmem:[#allocation54_spill] sm:$0xff] }
 0x321   : > { %v6852_v52 = vpack.c.bf16 %v12894_v56, %v12893_v28  ;;  %v12906_v28 = vand.u32 4294901760, %v12782_v51  ;;  %v6862_v33 = vpack.c.bf16 %v12908_v49, %v12907_v4  ;;  %v12913_v51 = vand.u32 4294901760, %v12789_v16  ;;  %v12944_v49 = vld [vmem:[#allocation62_spill] sm:$0xff] }
 0x322   : > { %3578 = vmatmul.mubr.f32.gmra.mrb[30].mxu0 %v10528_v23  ;;  %v6854_v27 = vpack.c.bf16 %v12896_v40, %v12895_v39  ;;  %v12904_v39 = vand.u32 4294901760, %v12836_v54  ;;  %v12921_v16 = vand.u32 4294901760, %v12796_v7  ;;  %v12930_v7 = vand.u32 4294901760, %v12850_v46 }
 0x323   : > { %6849 = vmatpush1.bf16.msra.mxu0 %v12891_v63  ;;  %3715 = vmatprep.mubr.f32.mxu0 %v12892_v55  ;;  %v12899_v55 = vand.u32 4294901760, %v12775_v43  ;;  %v12911_v43 = vand.u32 4294901760, %v12787_v12  ;;  %v6866_v54 = vpack.c.bf16 %v12915_v26, %v12913_v51  ;;  %v12919_v12 = vand.u32 4294901760, %v12794_v62  ;;  %v12926_v62 = vld [vmem:[#allocation51_spill] sm:$0xff] }
 0x324   : > { %6851 = vmatprep.subr.bf16.mxu0 %v6850_v5  ;;  %v6858_v5 = vpack.c.bf16 %v12902_v36, %v12901_v11  ;;  %v12933_v11 = vand.u32 4294901760, %v12932_v45  ;;  %v12934_v36 = vld [vmem:[#allocation56_spill] sm:$0xff]  ;;  %v12941_v46 = vand.u32 4294901760, %v12856_v37  ;;  %v12952_v37 = vld [vmem:[#allocation67_spill] sm:$0xff] }
 0x325   : > { %v6856_v24 = vpack.c.bf16 %v12900_v35, %v12899_v55  ;;  %v12927_v55 = vand.u32 4294901760, %v12926_v62  ;;  %v12928_v35 = vld [vmem:[#allocation53_spill] sm:$0xff]  ;;  %v12935_v44 = vand.u32 4294901760, %v12934_v36  ;;  %v12953_v26 = vand.u32 4294901760, %v12952_v37 }
 0x326   : > { %3719 = vmatmul.mubr.f32.vlgmr.msra.gmra.mrb[0].mxu0 %v12897_v8  ;;  %v12922_v8 = vand.u32 4294901760, %v12846_v41  ;;  %v12931_v41 = vand.u32 4294901760, %v12852_v2  ;;  %v12942_v2 = vld [vmem:[#allocation60_spill] sm:$0xff]  ;;  %v12976_v36 = vld [vmem:[#allocation81_spill] sm:$0xff] }
 0x327   : > { %6853 = vmatpush1.bf16.msra.mxu0 %v6852_v52  ;;  %3727 = vmatprep.mubr.f32.mxu0 %v12898_v31  ;;  %v12905_v52 = vand.u32 4294901760, %v12781_v38  ;;  %v12912_v38 = vand.u32 4294901760, %v12788_v59  ;;  %v12920_v59 = vand.u32 4294901760, %v12795_v3  ;;  %v12929_v3 = vand.u32 4294901760, %v12928_v35 }
 0x328   : > { %6855 = vmatprep.subr.bf16.mxu0 %v6854_v27  ;;  %v12910_v27 = vand.u32 4294901760, %v12840_v57  ;;  %v12918_v57 = vand.u32 4294901760, %v12793_v61  ;;  %v12925_v61 = vand.u32 4294901760, %v12800_v47  ;;  %v12936_v47 = vld [vmem:[#allocation58_spill] sm:$0xff]  ;;  %v12943_v4 = vand.u32 4294901760, %v12942_v2 }
 0x329   : > { %v6860_v56 = vpack.c.bf16 %v12906_v28, %v12905_v52  ;;  %v6864_v48 = vpack.c.bf16 %v12912_v38, %v12911_v43  ;;  %v6870_v40 = vpack.c.bf16 %v12921_v16, %v12920_v59  ;;  %v12948_v38 = vld [vmem:[#allocation65_spill] sm:$0xff]  ;;  %v12986_v2 = vand.u32 4294901760, %v12769_v21 }
 0x32a   : > { %3731 = vmatmul.mubr.f32.gmra.mrb[2].mxu0 %v12903_v9  ;;  %v6868_v58 = vpack.c.bf16 %v12919_v12, %v12918_v57  ;;  %v6872_v31 = vpack.c.bf16 %v12925_v61, %v12924_v14  ;;  %v12937_v9 = vand.u32 4294901760, %v12936_v47  ;;  %v12956_v57 = vld [vmem:[#allocation69_spill] sm:$0xff] }
 0x32b   : > { %6857 = vmatpush1.bf16.msra.mxu0 %v6856_v24  ;;  %3739 = vmatprep.mubr.f32.mxu0 %v12904_v39  ;;  %v6874_v24 = vpack.c.bf16 %v12929_v3, %v12927_v55  ;;  %v12938_v39 = vld [vmem:[#allocation59_spill] sm:$0xff]  ;;  %v12957_v12 = vand.u32 4294901760, %v12956_v57  ;;  %v12968_v55 = vld [vmem:[#allocation77_spill] sm:$0xff]  ;;  %v13006_v57 = vld [vmem:[#allocation102_spill] sm:$0xff] }
 0x32c   : > { %6859 = vmatprep.subr.bf16.mxu0 %v6858_v5  ;;  %v6876_v5 = vpack.c.bf16 %v12935_v44, %v12933_v11  ;;  %v12939_v52 = vand.u32 4294901760, %v12938_v39  ;;  %v12969_v35 = vand.u32 4294901760, %v12968_v55  ;;  %v12977_v44 = vand.u32 4294901760, %v12976_v36  ;;  %v13028_v36 = vld [vmem:[#allocation96_spill] sm:$0xff] }
 0x32d   : > { %v12980_v39 = vand.u32 4294901760, %v12870_v29  ;;  %v12989_v29 = vand.u32 4294901760, %v12876_v53  ;;  %v13000_v53 = vld [vmem:[#allocation97_spill] sm:$0xff] }
 0x32e   : > { %3743 = vmatmul.mubr.f32.gmra.mrb[4].mxu0 %v12909_v32  ;;  %v6878_v28 = vpack.c.bf16 %v12939_v52, %v12937_v9  ;;  %v13001_v37 = vand.u32 4294901760, %v13000_v53  ;;  %v13058_v53 = vld [vmem:[#allocation140_spill] sm:$0xff] }
 0x32f   : > { %6861 = vmatpush1.bf16.msra.mxu0 %v6860_v56  ;;  %3751 = vmatprep.mubr.f32.mxu0 %v12910_v27  ;;  %v12940_v56 = vand.u32 4294901760, %v12854_v17  ;;  %v12946_v27 = vld [vmem:[#allocation63_spill] sm:$0xff]  ;;  %v12951_v17 = vand.u32 4294901760, %v12860_v25  ;;  %v12962_v25 = vld [vmem:[#allocation72_spill] sm:$0xff] }
 0x330   : > { %6863 = vmatprep.subr.bf16.mxu0 %v6862_v33  ;;  %v12945_v33 = vand.u32 4294901760, %v12944_v49  ;;  %v12947_v43 = vand.u32 4294901760, %v12946_v27 }
 0x332   : > { %3755 = vmatmul.mubr.f32.gmra.mrb[6].mxu0 %v12916_v34  ;;  %v6880_v32 = vpack.c.bf16 %v12945_v33, %v12943_v4  ;;  %v12987_v4 = vand.u32 4294901760, %v12770_v20  ;;  %v12988_v33 = vand.u32 4294901760, %v12874_v0  ;;  %v12997_v20 = vand.u32 4294901760, %v12878_v60  ;;  %v12998_v0 = vld [vmem:[#allocation165_spill] sm:$0xff]  ;;  %v13009_v60 = vld [vmem:[#allocation168_spill] sm:$0xff] }
 0x333   : > { %6865 = vmatpush1.bf16.msra.mxu0 %v6864_v48  ;;  %3763 = vmatprep.mubr.f32.mxu0 %v12917_v6  ;;  %v12949_v48 = vand.u32 4294901760, %v12948_v38  ;;  %v12993_v38 = vld [vmem:[#allocation94_spill] sm:$0xff] }
 0x334   : > { %6867 = vmatprep.subr.bf16.mxu0 %v6866_v54  ;;  %v12954_v54 = vld [vmem:[#allocation68_spill] sm:$0xff]  ;;  %v6898_v49 = vpack.c.bf16 %v12987_v4, %v12986_v2  ;;  %v13041_v2 = vld [vmem:[#allocation34_spill] sm:$0xff] }
 0x335   : > { %v6882_v51 = vpack.c.bf16 %v12949_v48, %v12947_v43  ;;  %v12955_v34 = vand.u32 4294901760, %v12954_v54  ;;  %v12994_v48 = vand.u32 4294901760, %v12993_v38  ;;  %v13042_v4 = vld [vmem:[#allocation124_spill] sm:$0xff]  ;;  %v13050_v38 = vld [vmem:[#allocation133_spill] sm:$0xff] }
 0x336   : > { %3767 = vmatmul.mubr.f32.gmra.mrb[8].mxu0 %v12922_v8  ;;  %v12963_v8 = vand.u32 4294901760, %v12962_v25  ;;  %v13013_v25 = vld [vmem:[#allocation105_spill] sm:$0xff] }
 0x337   : > { %6869 = vmatpush1.bf16.msra.mxu0 %v6868_v58  ;;  %3775 = vmatprep.mubr.f32.mxu0 %v12923_v19  ;;  %v6884_v6 = vpack.c.bf16 %v12955_v34, %v12953_v26  ;;  %v12958_v58 = vld [vmem:[#allocation71_spill] sm:$0xff]  ;;  %v12964_v19 = vld [vmem:[#allocation74_spill] sm:$0xff]  ;;  %v13004_v34 = vld [vmem:[#allocation100_spill] sm:$0xff] }
 0x338   : > { %6871 = vmatprep.subr.bf16.mxu0 %v6870_v40  ;;  %v12959_v59 = vand.u32 4294901760, %v12958_v58  ;;  %v12960_v40 = vand.u32 4294901760, %v12862_v15  ;;  %v12965_v14 = vand.u32 4294901760, %v12964_v19  ;;  %v12971_v15 = vand.u32 4294901760, %v12868_v1  ;;  %v12982_v1 = vld [vmem:[#allocation85_spill] sm:$0xff]  ;;  %v13002_v26 = vld [vmem:[#allocation99_spill] sm:$0xff] }
 0x339   : > { %v12983_v52 = vand.u32 4294901760, %v12982_v1  ;;  %v13035_v1 = vld [vmem:[#allocation25_spill] sm:$0xff] }
 0x33a   : > { %3779 = vmatmul.mubr.f32.gmra.mrb[10].mxu0 %v12930_v7  ;;  %v6886_v16 = vpack.c.bf16 %v12959_v59, %v12957_v12  ;;  %v6888_v61 = vpack.c.bf16 %v12965_v14, %v12963_v8  ;;  %v12973_v7 = vand.u32 4294901760, %v12972_v50  ;;  %v13007_v12 = vand.u32 4294901760, %v13006_v57  ;;  %v13015_v14 = vld [vmem:[#allocation106_spill] sm:$0xff] }
 0x33b   : > { %6873 = vmatpush1.bf16.msra.mxu0 %v6872_v31  ;;  %3787 = vmatprep.mubr.f32.mxu0 %v12931_v41  ;;  %v12966_v31 = vld [vmem:[#allocation76_spill] sm:$0xff]  ;;  %v13008_v59 = vand.u32 4294901760, %v12882_v18  ;;  %v13014_v8 = vand.u32 4294901760, %v13013_v25  ;;  %v13021_v18 = vld [vmem:[#allocation173_spill] sm:$0xff]  ;;  %v13065_v57 = vld [vmem:[#allocation70_spill] sm:$0xff] }
 0x33c   : > { %6875 = vmatprep.subr.bf16.mxu0 %v6874_v24  ;;  %v12967_v62 = vand.u32 4294901760, %v12966_v31  ;;  %v12970_v24 = vand.u32 4294901760, %v12866_v10  ;;  %v12974_v41 = vld [vmem:[#allocation80_spill] sm:$0xff]  ;;  %v12981_v10 = vand.u32 4294901760, %v12872_v13  ;;  %v12990_v13 = vand.u32 4294901760, %v12771_v22  ;;  %v13073_v25 = vld [vmem:[#allocation82_spill] sm:$0xff] }
 0x33d   : > { %v12975_v45 = vand.u32 4294901760, %v12974_v41  ;;  %v13003_v22 = vand.u32 4294901760, %v13002_v26  ;;  %v13017_v31 = vld [vmem:[#allocation108_spill] sm:$0xff]  ;;  %v13060_v26 = vld [vmem:[#allocation143_spill] sm:$0xff] }
 0x33e   : > { %3791 = vmatmul.mubr.f32.gmra.mrb[12].mxu0 %v12940_v56  ;;  %v6890_v3 = vpack.c.bf16 %v12969_v35, %v12967_v62  ;;  %v13018_v62 = vand.u32 4294901760, %v13017_v31  ;;  %v13019_v35 = vld [vmem:[#allocation170_spill] sm:$0xff]  ;;  %v13078_v31 = vld [vmem:[#allocation160_spill] sm:$0xff] }
 0x33f   : > { %6877 = vmatpush1.bf16.msra.mxu0 %v6876_v5  ;;  %3799 = vmatprep.mubr.f32.mxu0 %v12941_v46  ;;  %v6892_v11 = vpack.c.bf16 %v12975_v45, %v12973_v7  ;;  %v12978_v5 = vld [vmem:[#allocation83_spill] sm:$0xff]  ;;  %v6904_v54 = vpack.c.bf16 %v13003_v22, %v13001_v37  ;;  %v13025_v7 = vld [vmem:[#allocation116_spill] sm:$0xff]  ;;  %v13059_v37 = vld [vmem:[#allocation61_spill] sm:$0xff] }
 0x340   : > { %6879 = vmatprep.subr.bf16.mxu0 %v6878_v28  ;;  %v12979_v47 = vand.u32 4294901760, %v12978_v5  ;;  %v12984_v28 = vld [vmem:[#allocation86_spill] sm:$0xff]  ;;  %v13026_v41 = vand.u32 4294901760, %v13025_v7  ;;  %v13061_v22 = vld [vmem:[#allocation64_spill] sm:$0xff]  ;;  %v13087_v7 = vld [vmem:[#allocation103_spill] sm:$0xff] }
 0x341   : > { %v12985_v56 = vand.u32 4294901760, %v12984_v28  ;;  %v13030_v5 = vld [vmem:[#allocation110_spill] sm:$0xff]  ;;  %v13038_v28 = vld [vmem:[#allocation120_spill] sm:$0xff] }
 0x342   : > { %3803 = vmatmul.mubr.f32.gmra.mrb[14].mxu0 %v12950_v30  ;;  %v6894_v9 = vpack.c.bf16 %v12979_v47, %v12977_v44  ;;  %v13029_v44 = vld [vmem:[#allocation21_spill] sm:$0xff]  ;;  %v13031_v47 = vld [vmem:[#allocation22_spill] sm:$0xff] }
 0x343   : > { %6881 = vmatpush1.bf16.msra.mxu0 %v6880_v32  ;;  %3811 = vmatprep.mubr.f32.mxu0 %v12951_v17  ;;  %v6896_v46 = vpack.c.bf16 %v12985_v56, %v12983_v52  ;;  %v12991_v32 = vld [vmem:[#allocation92_spill] sm:$0xff]  ;;  %v12999_v17 = vand.u32 4294901760, %v12998_v0  ;;  %v13036_v52 = vld [vmem:[#allocation119_spill] sm:$0xff]  ;;  %v13039_v56 = vld [vmem:[#allocation30_spill] sm:$0xff] }
 0x344   : > { %6883 = vmatprep.subr.bf16.mxu0 %v6882_v51  ;;  %v12992_v27 = vand.u32 4294901760, %v12991_v32  ;;  %v12995_v51 = vld [vmem:[#allocation95_spill] sm:$0xff] }
 0x345   : > { %v12996_v21 = vand.u32 4294901760, %v12995_v51  ;;  %v13047_v32 = vld [vmem:[#allocation43_spill] sm:$0xff] }
 0x346   : > { %3815 = vmatmul.mubr.f32.gmra.mrb[16].mxu0 %v12960_v40  ;;  %v6900_v43 = vpack.c.bf16 %v12992_v27, %v12990_v13  ;;  %v13011_v40 = vld [vmem:[#allocation104_spill] sm:$0xff]  ;;  %v13046_v13 = vld [vmem:[#allocation129_spill] sm:$0xff]  ;;  %v13048_v27 = vld [vmem:[#allocation131_spill] sm:$0xff] }
 0x347   : > { %6885 = vmatpush1.bf16.msra.mxu0 %v6884_v6  ;;  %3823 = vmatprep.mubr.f32.mxu0 %v12961_v42  ;;  %v6902_v30 = vpack.c.bf16 %v12996_v21, %v12994_v48  ;;  %v13005_v6 = vand.u32 4294901760, %v13004_v34  ;;  %v13012_v42 = vand.u32 4294901760, %v13011_v40  ;;  %v13051_v48 = vld [vmem:[#allocation48_spill] sm:$0xff]  ;;  %v13052_v51 = vld [vmem:[#allocation135_spill] sm:$0xff]  ;;  %v13063_v34 = vld [vmem:[#allocation66_spill] sm:$0xff] }
 0x348   : > { %6887 = vmatprep.subr.bf16.mxu0 %v6886_v16  ;;  %v13010_v16 = vand.u32 4294901760, %v13009_v60  ;;  %v13053_v21 = vld [vmem:[#allocation52_spill] sm:$0xff]  ;;  %v13056_v0 = vld [vmem:[#allocation139_spill] sm:$0xff] }
 0x349   : > { %v6906_v58 = vpack.c.bf16 %v13007_v12, %v13005_v6  ;;  %v6908_v19 = vpack.c.bf16 %v13014_v8, %v13012_v42  ;;  %v13064_v6 = vld [vmem:[#allocation147_spill] sm:$0xff]  ;;  %v13066_v12 = vld [vmem:[#allocation148_spill] sm:$0xff]  ;;  %v13074_v8 = vld [vmem:[#allocation157_spill] sm:$0xff] }
 0x34a   : > { %3827 = vmatmul.mubr.f32.gmra.mrb[18].mxu0 %v12970_v24  ;;  %v13022_v24 = vand.u32 4294901760, %v13021_v18  ;;  %v13069_v60 = vld [vmem:[#allocation75_spill] sm:$0xff]  ;;  %v13083_v18 = vld [vmem:[#allocation98_spill] sm:$0xff] }
 0x34b   : > { %6889 = vmatpush1.bf16.msra.mxu0 %v6888_v61  ;;  %3835 = vmatprep.mubr.f32.mxu0 %v12971_v15  ;;  %v13016_v61 = vand.u32 4294901760, %v13015_v14  ;;  %v13023_v15 = vld [vmem:[#allocation113_spill] sm:$0xff]  ;;  %v13071_v40 = vld [vmem:[#allocation79_spill] sm:$0xff] }
 0x34c   : > { %6891 = vmatprep.subr.bf16.mxu0 %v6890_v3  ;;  %v13020_v3 = vand.u32 4294901760, %v13019_v35  ;;  %v13024_v50 = vand.u32 4294901760, %v13023_v15  ;;  %v13072_v42 = vld [vmem:[#allocation155_spill] sm:$0xff]  ;;  %v13081_v35 = vld [vmem:[#allocation93_spill] sm:$0xff] }
 0x34d   : > { %v6910_v55 = vpack.c.bf16 %v13018_v62, %v13016_v61  ;;  %v13076_v14 = vld [vmem:[#allocation159_spill] sm:$0xff]  ;;  %v13077_v61 = vld [vmem:[#allocation88_spill] sm:$0xff]  ;;  %v13085_v15 = vld [vmem:[#allocation101_spill] sm:$0xff] }
 0x34e   : > { %3839 = vmatmul.mubr.f32.gmra.mrb[20].mxu0 %v12980_v39  ;;  %v6912_v45 = vpack.c.bf16 %v13026_v41, %v13024_v50  ;;  %v13033_v39 = vld [vmem:[#allocation23_spill] sm:$0xff]  ;;  %v13086_v50 = vld [vmem:[#allocation169_spill] sm:$0xff] }
 0x34f   : > { %6893 = vmatpush1.bf16.msra.mxu0 %v6892_v11  ;;  %3847 = vmatprep.mubr.f32.mxu0 %v12981_v10  ;;  %v13027_v11 = vand.u32 4294901760, %v10528_v23  ;;  %v13034_v10 = vld [vmem:[#allocation114_spill] sm:$0xff]  ;;  %v13037_v23 = vld [vmem:[#allocation28_spill] sm:$0xff]  ;;  %v13079_v62 = vld [vmem:[#allocation91_spill] sm:$0xff] }
 0x350   : > { %6895 = vmatprep.subr.bf16.mxu0 %v6894_v9  ;;  %v13032_v9 = vld [vmem:[#allocation112_spill] sm:$0xff]  ;;  %v13088_v41 = vld [vmem:[#allocation171_spill] sm:$0xff] }
 0x352   : > { %3851 = vmatmul.mubr.f32.gmra.mrb[22].mxu0 %v12988_v33  ;;  %v13044_v33 = vld [vmem:[#allocation127_spill] sm:$0xff] }
 0x353   : > { %6897 = vmatpush1.bf16.msra.mxu0 %v6896_v46  ;;  %3859 = vmatprep.mubr.f32.mxu0 %v12989_v29  ;;  %v13040_v46 = vld [vmem:[#allocation123_spill] sm:$0xff] }
 0x354   : > { %6899 = vmatprep.subr.bf16.mxu0 %v6898_v49  ;;  %v13043_v49 = vld [vmem:[#allocation36_spill] sm:$0xff]  ;;  %v13045_v29 = vld [vmem:[#allocation39_spill] sm:$0xff] }
 0x356   : > { %3863 = vmatmul.mubr.f32.gmra.mrb[24].mxu0 %v12997_v20  ;;  %v13055_v20 = vld [vmem:[#allocation55_spill] sm:$0xff] }
 0x357   : > { %6901 = vmatpush1.bf16.msra.mxu0 %v6900_v43  ;;  %3871 = vmatprep.mubr.f32.mxu0 %v12999_v17  ;;  %v13049_v43 = vld [vmem:[#allocation46_spill] sm:$0xff]  ;;  %v13057_v17 = vld [vmem:[#allocation57_spill] sm:$0xff] }
 0x358   : > { %6903 = vmatprep.subr.bf16.mxu0 %v6902_v30  ;;  %v13054_v30 = vld [vmem:[#allocation136_spill] sm:$0xff] }
 0x35a   : > { %3875 = vmatmul.mubr.f32.gmra.mrb[26].mxu0 %v13008_v59  ;;  %v13068_v59 = vld [vmem:[#allocation151_spill] sm:$0xff] }
 0x35b   : > { %6905 = vmatpush1.bf16.msra.mxu0 %v6904_v54  ;;  %3883 = vmatprep.mubr.f32.mxu0 %v13010_v16  ;;  %v13062_v54 = vld [vmem:[#allocation145_spill] sm:$0xff]  ;;  %v13070_v16 = vld [vmem:[#allocation152_spill] sm:$0xff] }
 0x35c   : > { %6907 = vmatprep.subr.bf16.mxu0 %v6906_v58  ;;  %v13067_v58 = vld [vmem:[#allocation73_spill] sm:$0xff] }
 0x35e   : > { %3887 = vmatmul.mubr.f32.gmra.mrb[28].mxu0 %v13020_v3  ;;  %v13082_v3 = vld [vmem:[#allocation164_spill] sm:$0xff] }
 0x35f   : > { %6909 = vmatpush1.bf16.msra.mxu0 %v6908_v19  ;;  %3895 = vmatprep.mubr.f32.mxu0 %v13022_v24  ;;  %v13075_v19 = vld [vmem:[#allocation84_spill] sm:$0xff]  ;;  %v13084_v24 = vld [vmem:[#allocation167_spill] sm:$0xff] }
 0x360   : > { %6911 = vmatprep.subr.bf16.mxu0 %v6910_v55  ;;  %v13080_v55 = vld [vmem:[#allocation163_spill] sm:$0xff] }
 0x362   : > { %3899 = vmatmul.mubr.f32.gmra.mrb[30].mxu0 %v13027_v11  ;;  %v13090_v11 = vld [vmem:[#allocation172_spill] sm:$0xff] }
 0x363   : > { %6913 = vmatpush1.bf16.msra.mxu0 %v6912_v45  ;;  %4162 = vmatprep.mubr.f32.mxu0 %v13028_v36  ;;  %v13089_v45 = vld [vmem:[#allocation107_spill] sm:$0xff] }
 0x364   : > { %6915 = vmatprep.subr.bf16.mxu0 %v13029_v44  ;;  %v389_v44 = vld [vmem:[%s8038_s9] sm:$0xff] }
 0x366   : > { %4164 = vmatmul.mubr.f32.vlgmr.msra.gmra.mrb[0].mxu0 %v13030_v5 }
 0x367   : > { %6917 = vmatpush1.bf16.msra.mxu0 %v13031_v47  ;;  %4170 = vmatprep.mubr.f32.mxu0 %v13032_v9  ;;  %v391_v47 = vld [vmem:[%s8038_s9 + $0x10] sm:$0xff] }
 0x368   : > { %6919 = vmatprep.subr.bf16.mxu0 %v13033_v39  ;;  %v11034_v39 = vstv %s388_s29  ;;  %s6428_s29 = sshll.u32 %s11998_s10, 4  ;;  %s12037_s29 = int_to_ptr.vmem [resolvable:$true] %s6428_s29 }
 0x369   : > { %s7692_s1 = scalar_lea.vmem %s12037_s29, 4096  ;;  %p7699_p12 = scmp.lt.s32.totalorder %s12037_s29, %s7697_s8 }
 0x36a   : > { %4172 = vmatmul.mubr.f32.gmra.mrb[2].mxu0 %v13034_v10  ;;  %p7693_p4 = scmp.ne.s32.totalorder %s12037_s29, %s7692_s1  ;;  %p7700_p1 = scmp.lt.s32.totalorder %s7698_s25, %s7692_s1 }
 0x36b   : > { %6921 = vmatpush1.bf16.msra.mxu0 %v13035_v1  ;;  %4178 = vmatprep.mubr.f32.mxu0 %v13036_v52  ;;  %v393_v1 = vld [vmem:[%s8038_s9 + $0x20] sm:$0xff] }
 0x36c   : > { %6923 = vmatprep.subr.bf16.mxu0 %v13037_v23  ;;  %v395_v23 = vld [vmem:[%s8038_s9 + $0x30] sm:$0xff]  ;;  %p7694_p8 = pnand %p7693_p4, %p13208_p10  ;;  %p7701_p6 = por %p7700_p1, %p7699_p12 }
 0x36e   : > { %4180 = vmatmul.mubr.f32.gmra.mrb[4].mxu0 %v13038_v28  ;;  %p7695_p9 = pneg %p7694_p8 }
 0x36f   : > { %6925 = vmatpush1.bf16.msra.mxu0 %v13039_v56  ;;  %4186 = vmatprep.mubr.f32.mxu0 %v13040_v46  ;;  %v397_v56 = vld [vmem:[%s8038_s9 + $0x40] sm:$0xff] }
 0x370   : > { %6927 = vmatprep.subr.bf16.mxu0 %v13041_v2  ;;  %v399_v2 = vld [vmem:[%s8038_s9 + $0x50] sm:$0xff]  ;;  %p7702_p13 = pnand %p7701_p6, %p7695_p9 }
 0x372   : > { %4188 = vmatmul.mubr.f32.gmra.mrb[6].mxu0 %v13042_v4 }
 0x373   : > { %6929 = vmatpush1.bf16.msra.mxu0 %v13043_v49  ;;  %4194 = vmatprep.mubr.f32.mxu0 %v13044_v33  ;;  %v422_v49 = vmul.f32 %v11034_v39, %v389_v44 }
 0x374   : > { %6931 = vmatprep.subr.bf16.mxu0 %v13045_v29  ;;  %v424_v29 = vmul.f32 %v11034_v39, %v391_v47 }
 0x376   : > { %4196 = vmatmul.mubr.f32.gmra.mrb[8].mxu0 %v13046_v13 }
 0x377   : > { %6933 = vmatpush1.bf16.msra.mxu0 %v13047_v32  ;;  %4202 = vmatprep.mubr.f32.mxu0 %v13048_v27  ;;  %v402_v32 = vld [vmem:[%s8038_s9 + $0x68] sm:$0xff] }
 0x378   : > { %6935 = vmatprep.subr.bf16.mxu0 %v13049_v43 }
 0x37a   : > { %4204 = vmatmul.mubr.f32.gmra.mrb[10].mxu0 %v13050_v38 }
 0x37b   : > { %6937 = vmatpush1.bf16.msra.mxu0 %v13051_v48  ;;  %4210 = vmatprep.mubr.f32.mxu0 %v13052_v51  ;;  %v11056_v48 = vmul.f32 %v11034_v39, %v393_v1  ;;  %v418_v1 = vld [vmem:[%s8038_s9 + $0xe8] sm:$0xff] }
 0x37c   : > { %6939 = vmatprep.subr.bf16.mxu0 %v13053_v21  ;;  %v11062_v21 = vmul.f32 %v11034_v39, %v395_v23 }
 0x37e   : > { %4212 = vmatmul.mubr.f32.gmra.mrb[12].mxu0 %v13054_v30 }
 0x37f   : > { %6941 = vmatpush1.bf16.msra.mxu0 %v13055_v20  ;;  %4218 = vmatprep.mubr.f32.mxu0 %v13056_v0  ;;  %v405_v20 = vld [vmem:[%s8038_s9 + $0x80] sm:$0xff] }
 0x380   : > { %6943 = vmatprep.subr.bf16.mxu0 %v13057_v17 }
 0x382   : > { %4220 = vmatmul.mubr.f32.gmra.mrb[14].mxu0 %v13058_v53 }
 0x383   : > { %6945 = vmatpush1.bf16.msra.mxu0 %v13059_v37  ;;  %4226 = vmatprep.mubr.f32.mxu0 %v13060_v26 }
 0x384   : > { %6947 = vmatprep.subr.bf16.mxu0 %v13061_v22  ;;  %v406_v22 = vld [vmem:[%s8038_s9 + $0x88] sm:$0xff] }
 0x386   : > { %4228 = vmatmul.mubr.f32.gmra.mrb[16].mxu0 %v13062_v54 }
 0x387   : > { %6949 = vmatpush1.bf16.msra.mxu0 %v13063_v34  ;;  %4234 = vmatprep.mubr.f32.mxu0 %v13064_v6  ;;  %v408_v34 = vld [vmem:[%s8038_s9 + $0x98] sm:$0xff] }
 0x388   : > { %6951 = vmatprep.subr.bf16.mxu0 %v13065_v57 }
 0x38a   : > { %4236 = vmatmul.mubr.f32.gmra.mrb[18].mxu0 %v13066_v12 }
 0x38b   : > { %6953 = vmatpush1.bf16.msra.mxu0 %v13067_v58  ;;  %4242 = vmatprep.mubr.f32.mxu0 %v13068_v59 }
 0x38c   : > { %6955 = vmatprep.subr.bf16.mxu0 %v13069_v60  ;;  %v410_v60 = vld [vmem:[%s8038_s9 + $0xa8] sm:$0xff] }
 0x38e   : > { %4244 = vmatmul.mubr.f32.gmra.mrb[20].mxu0 %v13070_v16 }
 0x38f   : > { %6957 = vmatpush1.bf16.msra.mxu0 %v13071_v40  ;;  %4250 = vmatprep.mubr.f32.mxu0 %v13072_v42 }
 0x390   : > { %6959 = vmatprep.subr.bf16.mxu0 %v13073_v25  ;;  %v11103_v25 = vmul.f32 %v11034_v39, %v405_v20 }
 0x392   : > { %4252 = vmatmul.mubr.f32.gmra.mrb[22].mxu0 %v13074_v8 }
 0x393   : > { %6961 = vmatpush1.bf16.msra.mxu0 %v13075_v19  ;;  %4258 = vmatprep.mubr.f32.mxu0 %v13076_v14  ;;  %v413_v19 = vld [vmem:[%s8038_s9 + $0xc0] sm:$0xff] }
 0x394   : > { %6963 = vmatprep.subr.bf16.mxu0 %v13077_v61 }
 0x396   : > { %4260 = vmatmul.mubr.f32.gmra.mrb[24].mxu0 %v13078_v31 }
 0x397   : > { %6965 = vmatpush1.bf16.msra.mxu0 %v13079_v62  ;;  %4266 = vmatprep.mubr.f32.mxu0 %v13080_v55 }
 0x398   : > { %6967 = vmatprep.subr.bf16.mxu0 %v13081_v35  ;;  %v11112_v35 = vmul.f32 %v11034_v39, %v406_v22 }
 0x39a   : > { %4268 = vmatmul.mubr.f32.gmra.mrb[26].mxu0 %v13082_v3 }
 0x39b   : > { %6969 = vmatpush1.bf16.msra.mxu0 %v13083_v18  ;;  %4274 = vmatprep.mubr.f32.mxu0 %v13084_v24  ;;  %v11118_v18 = vmul.f32 %v11034_v39, %v408_v34 }
 0x39c   : > { %6971 = vmatprep.subr.bf16.mxu0 %v13085_v15 }
 0x39e   : > { %4276 = vmatmul.mubr.f32.gmra.mrb[28].mxu0 %v13086_v50 }
 0x39f   : > { %6973 = vmatpush1.bf16.msra.mxu0 %v13087_v7  ;;  %4282 = vmatprep.mubr.f32.mxu0 %v13088_v41  ;;  %v11125_v7 = vmul.f32 %v11034_v39, %v410_v60 }
 0x3a0   : > { %6975 = vmatprep.subr.bf16.mxu0 %v13089_v45  ;;  %v416_v45 = vld [vmem:[%s8038_s9 + $0xd8] sm:$0xff] }
 0x3a2   : > { %4284 = vmatmul.mubr.f32.gmra.mrb[30].mxu0 %v13090_v11 }
 0x3a3   : > { %6977 = vmatpush1.bf16.msra.mxu0 %v12891_v63  ;;  %4419 = vmatprep.mubr.f32.mxu0 %v13028_v36  ;;  %v12500_v63 = vmov 0.0   ;;  %v4614_v36 = vld [vmem:[%s12091_s3] sm:$0xff] }
 0x3a4   : > { %4854 = vmatprep.mubr.f32.mxu1 %v12500_v63 }
 0x3a6   : > { %4421 = vmatmul.mubr.f32.vlgmr.msra.gmra.mrb[0].mxu0 %v13030_v5  ;;  %v390_v5 = vld [vmem:[%s8038_s9 + $0x8] sm:$0xff] }
 0x3a7   : > { %4427 = vmatprep.mubr.f32.mxu0 %v13032_v9  ;;  %v11032_v9 = vand.u32 4294901760, %v4614_v36 }
 0x3a9   : > { %v11052_v43 = vsub.f32 %v4614_v36, %v11032_v9 }
 0x3aa   : > { %4429 = vmatmul.mubr.f32.gmra.mrb[2].mxu0 %v13034_v10  ;;  %v392_v10 = vld [vmem:[%s8038_s9 + $0x18] sm:$0xff] }
 0x3ab   : > { %4435 = vmatprep.mubr.f32.mxu0 %v13036_v52  ;;  %v394_v52 = vld [vmem:[%s8038_s9 + $0x28] sm:$0xff]  ;;  %13091 = vst [vmem:[#allocation87_spill] sm:$0xff] %v11052_v43  ;;  %v12499_v61 = vand.u32 4294901760, %v11052_v43 }
 0x3ae   : > { %4437 = vmatmul.mubr.f32.gmra.mrb[4].mxu0 %v13038_v28  ;;  %v396_v28 = vld [vmem:[%s8038_s9 + $0x38] sm:$0xff] }
 0x3af   : > { %4443 = vmatprep.mubr.f32.mxu0 %v13040_v46  ;;  %v398_v46 = vld [vmem:[%s8038_s9 + $0x48] sm:$0xff]  ;;  %v11070_v17 = vmul.f32 %v11034_v39, %v396_v28 }
 0x3b0   : > { %v11076_v37 = vmul.f32 %v11034_v39, %v398_v46  ;;  %v420_v46 = vld [vmem:[%s8038_s9 + $0xf8] sm:$0xff] }
 0x3b2   : > { %4445 = vmatmul.mubr.f32.gmra.mrb[6].mxu0 %v13042_v4  ;;  %v400_v4 = vld [vmem:[%s8038_s9 + $0x58] sm:$0xff] }
 0x3b3   : > { %4451 = vmatprep.mubr.f32.mxu0 %v13044_v33  ;;  %v423_v33 = vmul.f32 %v11034_v39, %v390_v5  ;;  %v11138_v5 = vmul.f32 %v11034_v39, %v413_v19 }
 0x3b6   : > { %4453 = vmatmul.mubr.f32.gmra.mrb[8].mxu0 %v13046_v13  ;;  %v401_v13 = vld [vmem:[%s8038_s9 + $0x60] sm:$0xff] }
 0x3b7   : > { %4459 = vmatprep.mubr.f32.mxu0 %v13048_v27  ;;  %v403_v27 = vld [vmem:[%s8038_s9 + $0x70] sm:$0xff]  ;;  %v11088_v57 = vmul.f32 %v11034_v39, %v401_v13 }
 0x3b8   : > { %v11094_v58 = vmul.f32 %v11034_v39, %v403_v27 }
 0x3ba   : > { %4461 = vmatmul.mubr.f32.gmra.mrb[10].mxu0 %v13050_v38  ;;  %v425_v38 = vmul.f32 %v11034_v39, %v392_v10  ;;  %v417_v10 = vld [vmem:[%s8038_s9 + $0xe0] sm:$0xff] }
 0x3bb   : > { %4467 = vmatprep.mubr.f32.mxu0 %v13052_v51  ;;  %v11059_v51 = vmul.f32 %v11034_v39, %v394_v52  ;;  %v11168_v22 = vmul.f32 %v11034_v39, %v417_v10 }
 0x3be   : > { %4469 = vmatmul.mubr.f32.gmra.mrb[12].mxu0 %v13054_v30  ;;  %v404_v30 = vld [vmem:[%s8038_s9 + $0x78] sm:$0xff] }
 0x3bf   : > { %4475 = vmatprep.mubr.f32.mxu0 %v13056_v0  ;;  %v4615_v0 = vld [vmem:[%s12091_s3 + $0x8] sm:$0xff] }
 0x3c2   : > { %4477 = vmatmul.mubr.f32.gmra.mrb[14].mxu0 %v13058_v53  ;;  %v11073_v53 = vmul.f32 %v11034_v39, %v397_v56  ;;  %v419_v56 = vld [vmem:[%s8038_s9 + $0xf0] sm:$0xff] }
 0x3c3   : > { %4483 = vmatprep.mubr.f32.mxu0 %v13060_v26  ;;  %v11079_v26 = vmul.f32 %v11034_v39, %v399_v2  ;;  %v11153_v2 = vsub.f32 %v11052_v43, %v12499_v61 }
 0x3c6   : > { %4485 = vmatmul.mubr.f32.gmra.mrb[16].mxu0 %v13062_v54  ;;  %v407_v54 = vld [vmem:[%s8038_s9 + $0x90] sm:$0xff] }
 0x3c7   : > { %4491 = vmatprep.mubr.f32.mxu0 %v13064_v6  ;;  %v11085_v6 = vmul.f32 %v11034_v39, %v400_v4 }
 0x3ca   : > { %4493 = vmatmul.mubr.f32.gmra.mrb[18].mxu0 %v13066_v12  ;;  %v11091_v12 = vmul.f32 %v11034_v39, %v402_v32  ;;  %v11161_v32 = vmul.f32 %v11034_v39, %v416_v45 }
 0x3cb   : > { %4499 = vmatprep.mubr.f32.mxu0 %v13068_v59  ;;  %v409_v59 = vld [vmem:[%s8038_s9 + $0xa0] sm:$0xff] }
 0x3ce   : > { %4501 = vmatmul.mubr.f32.gmra.mrb[20].mxu0 %v13070_v16  ;;  %v411_v16 = vld [vmem:[%s8038_s9 + $0xb0] sm:$0xff] }
 0x3cf   : > { %4507 = vmatprep.mubr.f32.mxu0 %v13072_v42  ;;  %v11100_v42 = vmul.f32 %v11034_v39, %v404_v30 }
 0x3d2   : > { %4509 = vmatmul.mubr.f32.gmra.mrb[22].mxu0 %v13074_v8  ;;  %v412_v8 = vld [vmem:[%s8038_s9 + $0xb8] sm:$0xff] }
 0x3d3   : > { %4515 = vmatprep.mubr.f32.mxu0 %v13076_v14  ;;  %v414_v14 = vld [vmem:[%s8038_s9 + $0xc8] sm:$0xff]  ;;  %v11135_v44 = vmul.f32 %v11034_v39, %v412_v8 }
 0x3d4   : > { %v11141_v47 = vmul.f32 %v11034_v39, %v414_v14 }
 0x3d6   : > { %4517 = vmatmul.mubr.f32.gmra.mrb[24].mxu0 %v13078_v31  ;;  %v11109_v31 = vand.u32 4294901760, %v4615_v0 }
 0x3d7   : > { %4523 = vmatprep.mubr.f32.mxu0 %v13080_v55 }
 0x3d8   : > { %v11156_v4 = vsub.f32 %v4615_v0, %v11109_v31 }
 0x3da   : > { %4525 = vmatmul.mubr.f32.gmra.mrb[26].mxu0 %v13082_v3  ;;  %v11115_v3 = vmul.f32 %v11034_v39, %v407_v54  ;;  %v11171_v54 = vmul.f32 %v11034_v39, %v418_v1 }
 0x3db   : > { %4531 = vmatprep.mubr.f32.mxu0 %v13084_v24  ;;  %v415_v24 = vld [vmem:[%s8038_s9 + $0xd0] sm:$0xff] }
 0x3dc   : > { %v11146_v28 = vmul.f32 %v11034_v39, %v415_v24 }
 0x3de   : > { %4533 = vmatmul.mubr.f32.gmra.mrb[28].mxu0 %v13086_v50  ;;  %v11122_v50 = vmul.f32 %v11034_v39, %v409_v59  ;;  %v11178_v59 = vmul.f32 %v11034_v39, %v420_v46 }
 0x3df   : > { %4539 = vmatprep.mubr.f32.mxu0 %v13088_v41  ;;  %v11128_v41 = vmul.f32 %v11034_v39, %v411_v16 }
 0x3e2   : > { %4541 = vmatmul.mubr.f32.gmra.mrb[30].mxu0 %v13090_v11  ;;  %v4616_v11 = vld [vmem:[%s12091_s3 + $0x10] sm:$0xff] }
 0x3e3   : > { %v11163_v27 = vand.u32 4294901760, %v4616_v11 }
 0x3e5   : > { %13092 = vst [vmem:[#allocation89_spill] sm:$0xff] %v11163_v27  ;;  %v11189_v24 = vsub.f32 %v4616_v11, %v11163_v27 }
 0x479   : > { %v4422_v40 = vpop.f32.mrb[0].mxu0 }
 0x47a   : > { %v4547_v62 = vadd.f32 %v4422_v40, %v422_v49  ;;  %v4424_v55 = vpop.f32.mrb[1].mxu0 }
 0x47b   : > { %v4548_v15 = vadd.f32 %v4424_v55, %v423_v33 }
 0x47c   : > { %v4760_v36 = vand.u32 4294901760, %v4547_v62 }
 0x47d   : > { %v4758_v52 = vand.u32 4294901760, %v4548_v15  ;;  %v4430_v23 = vpop.f32.mrb[2].mxu0 }
 0x47e   : > { %v11158_v49 = vsub.f32 %v4547_v62, %v4760_v36  ;;  %v4549_v33 = vadd.f32 %v4430_v23, %v424_v29  ;;  %v4432_v13 = vpop.f32.mrb[3].mxu0  ;;  %v11175_v29 = vmul.f32 %v11034_v39, %v419_v56  ;;  %v11194_v39 = vld [vmem:[%s12091_s3 + $0x18] sm:$0xff] }
 0x47f   : > { %v11165_v30 = vsub.f32 %v4548_v15, %v4758_v52  ;;  %v4550_v20 = vadd.f32 %v4432_v13, %v425_v38  ;;  %v11209_v13 = vand.u32 4294901760, %v11194_v39 }
 0x480   : > { %v5039_v0 = vand.u32 4294901760, %v11158_v49  ;;  %v4764_v34 = vand.u32 4294901760, %v4549_v33 }
 0x481   : > { %v5033_v60 = vand.u32 4294901760, %v11165_v30  ;;  %v4762_v16 = vand.u32 4294901760, %v4550_v20  ;;  %v4438_v40 = vpop.f32.mrb[4].mxu0 }
 0x482   : > { %v11183_v19 = vsub.f32 %v4549_v33, %v4764_v34  ;;  %v4551_v14 = vadd.f32 %v4438_v40, %v11056_v48  ;;  %v4440_v62 = vpop.f32.mrb[5].mxu0  ;;  %v11186_v55 = vpack.c.bf16 %v4764_v34, %v4760_v36  ;;  %v5040_v15 = vsub.f32 %v11158_v49, %v5039_v0 }
 0x483   : > { %v11197_v45 = vsub.f32 %v4550_v20, %v4762_v16  ;;  %v4552_v10 = vadd.f32 %v4440_v62, %v11059_v51  ;;  %v11200_v1 = vpack.c.bf16 %v4762_v16, %v4758_v52  ;;  %v5034_v23 = vsub.f32 %v11165_v30, %v5033_v60 }
 0x484   : > { %13093 = vst [vmem:[#allocation90_spill] sm:$0xff] %v11186_v55  ;;  %v5051_v48 = vand.u32 4294901760, %v11183_v19  ;;  %v4768_v11 = vand.u32 4294901760, %v4551_v14  ;;  %v5041_v51 = vand.u32 4294901760, %v5040_v15 }
 0x485   : > { %13094 = vst [vmem:[#allocation24_spill] sm:$0xff] %v11200_v1  ;;  %v5045_v56 = vand.u32 4294901760, %v11197_v45  ;;  %v4766_v46 = vand.u32 4294901760, %v4552_v10  ;;  %v4446_v33 = vpop.f32.mrb[6].mxu0  ;;  %6979 = vmatprep.subr.bf16.mxu1 %v11200_v1  ;;  %v5035_v8 = vand.u32 4294901760, %v5034_v23 }
 0x486   : > { %v5052_v52 = vsub.f32 %v11183_v19, %v5051_v48  ;;  %v11214_v20 = vsub.f32 %v4551_v14, %v4768_v11  ;;  %v4553_v34 = vadd.f32 %v4446_v33, %v11062_v21  ;;  %v4448_v16 = vpop.f32.mrb[7].mxu0  ;;  %6981 = vmatpush1.bf16.msra.mxu1 %v11186_v55  ;;  %v11218_v40 = vpack.c.bf16 %v5051_v48, %v5039_v0 }
 0x487   : > { %v11220_v62 = vsub.f32 %v4552_v10, %v4766_v46  ;;  %v4554_v61 = vadd.f32 %v4448_v16, %v11070_v17  ;;  %v5046_v36 = vsub.f32 %v11197_v45, %v5045_v56  ;;  %v11224_v63 = vpack.c.bf16 %v5045_v56, %v5033_v60 }
 0x488   : > { %13095 = vst [vmem:[#allocation26_spill] sm:$0xff] %v11214_v20  ;;  %13096 = vst [vmem:[#allocation27_spill] sm:$0xff] %v11218_v40  ;;  %v5063_v38 = vand.u32 4294901760, %v11214_v20  ;;  %v4772_v14 = vand.u32 4294901760, %v4553_v34  ;;  %v5053_v43 = vand.u32 4294901760, %v5052_v52 }
 0x489   : > { %13097 = vst [vmem:[#allocation29_spill] sm:$0xff] %v11224_v63  ;;  %v5057_v21 = vand.u32 4294901760, %v11220_v62  ;;  %v4770_v33 = vand.u32 4294901760, %v4554_v61  ;;  %v4454_v55 = vpop.f32.mrb[8].mxu0  ;;  %v5047_v0 = vand.u32 4294901760, %v5046_v36 }
 0x48a   : > { %v5064_v10 = vsub.f32 %v11214_v20, %v5063_v38  ;;  %v11229_v48 = vsub.f32 %v4553_v34, %v4772_v14  ;;  %v4555_v17 = vadd.f32 %v4454_v55, %v11073_v53  ;;  %v4456_v16 = vpop.f32.mrb[9].mxu0  ;;  %v11232_v60 = vpack.c.bf16 %v4772_v14, %v4768_v11 }
 0x48b   : > { %v11234_v15 = vsub.f32 %v4554_v61, %v4770_v33  ;;  %v4556_v56 = vadd.f32 %v4456_v16, %v11076_v37  ;;  %v11237_v23 = vpack.c.bf16 %v4770_v33, %v4766_v46  ;;  %v11239_v52 = vpack.c.bf16 %v5047_v0, %v5035_v8 }
 0x48c   : > { %13098 = vst [vmem:[#allocation31_spill] sm:$0xff] %v11232_v60  ;;  %v5065_v40 = vand.u32 4294901760, %v5064_v10  ;;  %v5075_v36 = vand.u32 4294901760, %v11229_v48  ;;  %v4776_v63 = vand.u32 4294901760, %v4555_v17  ;;  %v11246_v61 = vpack.c.bf16 %v5053_v43, %v5041_v51 }
 0x48d   : > { %13099 = vst [vmem:[#allocation32_spill] sm:$0xff] %v11237_v23  ;;  %v5069_v53 = vand.u32 4294901760, %v11234_v15  ;;  %v4774_v55 = vand.u32 4294901760, %v4556_v56  ;;  %v4462_v11 = vpop.f32.mrb[10].mxu0  ;;  %6983 = vmatprep.subr.bf16.mxu1 %v11237_v23  ;;  %v5058_v37 = vsub.f32 %v11220_v62, %v5057_v21 }
 0x48e   : > { %v5076_v8 = vsub.f32 %v11229_v48, %v5075_v36  ;;  %v11250_v46 = vsub.f32 %v4555_v17, %v4776_v63  ;;  %v4557_v14 = vadd.f32 %v4462_v11, %v11079_v26  ;;  %v4464_v33 = vpop.f32.mrb[11].mxu0  ;;  %6985 = vmatpush1.bf16.msra.mxu1 %v11232_v60  ;;  %v11264_v20 = vpack.c.bf16 %v5075_v36, %v5063_v38 }
 0x48f   : > { %v11256_v10 = vsub.f32 %v4556_v56, %v4774_v55  ;;  %v4558_v16 = vadd.f32 %v4464_v33, %v11085_v6  ;;  %v5059_v43 = vand.u32 4294901760, %v5058_v37  ;;  %v5070_v51 = vsub.f32 %v11234_v15, %v5069_v53 }
 0x490   : > { %13100 = vst [vmem:[#allocation33_spill] sm:$0xff] %v11250_v46  ;;  %v5077_v34 = vand.u32 4294901760, %v5076_v8  ;;  %v5087_v23 = vand.u32 4294901760, %v11250_v46  ;;  %v4780_v17 = vand.u32 4294901760, %v4557_v14  ;;  %v11261_v1 = vpack.c.bf16 %v5069_v53, %v5057_v21  ;;  %13102 = vst [vmem:[#allocation37_spill] sm:$0xff] %v11264_v20 }
 0x491   : > { %v5081_v26 = vand.u32 4294901760, %v11256_v10  ;;  %v4778_v11 = vand.u32 4294901760, %v4558_v16  ;;  %v4470_v60 = vpop.f32.mrb[12].mxu0  ;;  %v5071_v27 = vand.u32 4294901760, %v5070_v51 }
 0x492   : > { %13101 = vst [vmem:[#allocation35_spill] sm:$0xff] %v11261_v1  ;;  %v5088_v56 = vsub.f32 %v11250_v46, %v5087_v23  ;;  %v11267_v0 = vsub.f32 %v4557_v14, %v4780_v17  ;;  %v4559_v6 = vadd.f32 %v4470_v60, %v11088_v57  ;;  %v4472_v37 = vpop.f32.mrb[13].mxu0  ;;  %v11270_v8 = vpack.c.bf16 %v4780_v17, %v4776_v63 }
 0x493   : > { %v11272_v33 = vsub.f32 %v4558_v16, %v4778_v11  ;;  %v4560_v21 = vadd.f32 %v4472_v37, %v11091_v12  ;;  %v11275_v53 = vpack.c.bf16 %v4778_v11, %v4774_v55  ;;  %v11277_v1 = vpack.c.bf16 %v5071_v27, %v5059_v43 }
 0x494   : > { %13103 = vst [vmem:[#allocation38_spill] sm:$0xff] %v11267_v0  ;;  %13104 = vst [vmem:[#allocation40_spill] sm:$0xff] %v11270_v8  ;;  %v5089_v51 = vand.u32 4294901760, %v5088_v56  ;;  %v5099_v38 = vand.u32 4294901760, %v11267_v0  ;;  %v4784_v14 = vand.u32 4294901760, %v4559_v6  ;;  %v11284_v16 = vpack.c.bf16 %v5077_v34, %v5065_v40 }
 0x495   : > { %13105 = vst [vmem:[#allocation42_spill] sm:$0xff] %v11275_v53  ;;  %v5093_v57 = vand.u32 4294901760, %v11272_v33  ;;  %v4782_v60 = vand.u32 4294901760, %v4560_v21  ;;  %v4478_v63 = vpop.f32.mrb[14].mxu0  ;;  %6987 = vmatprep.subr.bf16.mxu1 %v11275_v53  ;;  %v5082_v12 = vsub.f32 %v11256_v10, %v5081_v26 }
 0x496   : > { %v5100_v27 = vsub.f32 %v11267_v0, %v5099_v38  ;;  %v11288_v55 = vsub.f32 %v4559_v6, %v4784_v14  ;;  %v4561_v43 = vadd.f32 %v4478_v63, %v11094_v58  ;;  %v4480_v17 = vpop.f32.mrb[15].mxu0  ;;  %6989 = vmatpush1.bf16.msra.mxu1 %v11270_v8  ;;  %v11302_v0 = vpack.c.bf16 %v5099_v38, %v5087_v23 }
 0x497   : > { %v11294_v56 = vsub.f32 %v4560_v21, %v4782_v60  ;;  %v4562_v37 = vadd.f32 %v4480_v17, %v11100_v42  ;;  %v5083_v40 = vand.u32 4294901760, %v5082_v12  ;;  %v5094_v34 = vsub.f32 %v11272_v33, %v5093_v57 }
 0x498   : > { %13106 = vst [vmem:[#allocation44_spill] sm:$0xff] %v11288_v55  ;;  %v5101_v36 = vand.u32 4294901760, %v5100_v27  ;;  %v5111_v20 = vand.u32 4294901760, %v11288_v55  ;;  %v4788_v6 = vand.u32 4294901760, %v4561_v43  ;;  %v11299_v53 = vpack.c.bf16 %v5093_v57, %v5081_v26  ;;  %13108 = vst [vmem:[#allocation47_spill] sm:$0xff] %v11302_v0 }
 0x499   : > { %v5105_v58 = vand.u32 4294901760, %v11294_v56  ;;  %v4786_v63 = vand.u32 4294901760, %v4562_v37  ;;  %v4486_v8 = vpop.f32.mrb[16].mxu0  ;;  %v5095_v46 = vand.u32 4294901760, %v5094_v34 }
 0x49a   : > { %13107 = vst [vmem:[#allocation45_spill] sm:$0xff] %v11299_v53  ;;  %v5112_v21 = vsub.f32 %v11288_v55, %v5111_v20  ;;  %v11305_v11 = vsub.f32 %v4561_v43, %v4788_v6  ;;  %v4563_v42 = vadd.f32 %v4486_v8, %v11103_v25  ;;  %v4488_v12 = vpop.f32.mrb[17].mxu0  ;;  %v11308_v27 = vpack.c.bf16 %v4788_v6, %v4784_v14 }
 0x49b   : > { %v11310_v17 = vsub.f32 %v4562_v37, %v4786_v63  ;;  %v4564_v26 = vadd.f32 %v4488_v12, %v11112_v35  ;;  %v11313_v57 = vpack.c.bf16 %v4786_v63, %v4782_v60  ;;  %v11315_v53 = vpack.c.bf16 %v5095_v46, %v5083_v40 }
 0x49c   : > { %13109 = vst [vmem:[#allocation49_spill] sm:$0xff] %v11305_v11  ;;  %13110 = vst [vmem:[#allocation50_spill] sm:$0xff] %v11308_v27  ;;  %v5113_v34 = vand.u32 4294901760, %v5112_v21  ;;  %v5123_v23 = vand.u32 4294901760, %v11305_v11  ;;  %v4792_v43 = vand.u32 4294901760, %v4563_v42  ;;  %v11322_v37 = vpack.c.bf16 %v5101_v36, %v5089_v51 }
 0x49d   : > { %13111 = vst [vmem:[#allocation109_spill] sm:$0xff] %v11313_v57  ;;  %v5117_v25 = vand.u32 4294901760, %v11310_v17  ;;  %v4790_v8 = vand.u32 4294901760, %v4564_v26  ;;  %v4494_v14 = vpop.f32.mrb[18].mxu0  ;;  %6991 = vmatprep.subr.bf16.mxu1 %v11313_v57  ;;  %v5106_v35 = vsub.f32 %v11294_v56, %v5105_v58 }
 0x49e   : > { %v5124_v46 = vsub.f32 %v11305_v11, %v5123_v23  ;;  %v11326_v60 = vsub.f32 %v4563_v42, %v4792_v43  ;;  %v4565_v40 = vadd.f32 %v4494_v14, %v11115_v3  ;;  %v4496_v6 = vpop.f32.mrb[19].mxu0  ;;  %6993 = vmatpush1.bf16.msra.mxu1 %v11308_v27  ;;  %v11340_v11 = vpack.c.bf16 %v5123_v23, %v5111_v20 }
 0x49f   : > { %v11332_v21 = vsub.f32 %v4564_v26, %v4790_v8  ;;  %v4566_v12 = vadd.f32 %v4496_v6, %v11118_v18  ;;  %v5107_v51 = vand.u32 4294901760, %v5106_v35  ;;  %v5118_v36 = vsub.f32 %v11310_v17, %v5117_v25 }
 0x4a0   : > { %13112 = vst [vmem:[#allocation111_spill] sm:$0xff] %v11326_v60  ;;  %v5125_v38 = vand.u32 4294901760, %v5124_v46  ;;  %v5135_v0 = vand.u32 4294901760, %v11326_v60  ;;  %v4796_v42 = vand.u32 4294901760, %v4565_v40  ;;  %v11337_v57 = vpack.c.bf16 %v5117_v25, %v5105_v58  ;;  %13114 = vst [vmem:[#allocation118_spill] sm:$0xff] %v11340_v11 }
 0x4a1   : > { %v5129_v3 = vand.u32 4294901760, %v11332_v21  ;;  %v4794_v14 = vand.u32 4294901760, %v4566_v12  ;;  %v4502_v27 = vpop.f32.mrb[20].mxu0  ;;  %v5119_v55 = vand.u32 4294901760, %v5118_v36 }
 0x4a2   : > { %13113 = vst [vmem:[#allocation117_spill] sm:$0xff] %v11337_v57  ;;  %v5136_v26 = vsub.f32 %v11326_v60, %v5135_v0  ;;  %v11343_v63 = vsub.f32 %v4565_v40, %v4796_v42  ;;  %v4567_v18 = vadd.f32 %v4502_v27, %v11122_v50  ;;  %v4504_v35 = vpop.f32.mrb[21].mxu0  ;;  %v11346_v46 = vpack.c.bf16 %v4796_v42, %v4792_v43 }
 0x4a3   : > { %v11348_v6 = vsub.f32 %v4566_v12, %v4794_v14  ;;  %v4568_v58 = vadd.f32 %v4504_v35, %v11125_v7  ;;  %v11351_v25 = vpack.c.bf16 %v4794_v14, %v4790_v8  ;;  %v11353_v57 = vpack.c.bf16 %v5119_v55, %v5107_v51 }
 0x4a4   : > { %13115 = vst [vmem:[#allocation121_spill] sm:$0xff] %v11343_v63  ;;  %13116 = vst [vmem:[#allocation122_spill] sm:$0xff] %v11346_v46  ;;  %v5137_v36 = vand.u32 4294901760, %v5136_v26  ;;  %v5147_v20 = vand.u32 4294901760, %v11343_v63  ;;  %v4800_v40 = vand.u32 4294901760, %v4567_v18  ;;  %v11360_v12 = vpack.c.bf16 %v5125_v38, %v5113_v34 }
 0x4a5   : > { %13117 = vst [vmem:[#allocation125_spill] sm:$0xff] %v11351_v25  ;;  %v5141_v50 = vand.u32 4294901760, %v11348_v6  ;;  %v4798_v27 = vand.u32 4294901760, %v4568_v58  ;;  %v4510_v43 = vpop.f32.mrb[22].mxu0  ;;  %6995 = vmatprep.subr.bf16.mxu1 %v11351_v25  ;;  %v5130_v7 = vsub.f32 %v11332_v21, %v5129_v3 }
 0x4a6   : > { %v5148_v55 = vsub.f32 %v11343_v63, %v5147_v20  ;;  %v11364_v8 = vsub.f32 %v4567_v18, %v4800_v40  ;;  %v4569_v51 = vadd.f32 %v4510_v43, %v11128_v41  ;;  %v4512_v42 = vpop.f32.mrb[23].mxu0  ;;  %6997 = vmatpush1.bf16.msra.mxu1 %v11346_v46  ;;  %v11378_v63 = vpack.c.bf16 %v5147_v20, %v5135_v0 }
 0x4a7   : > { %v11370_v26 = vsub.f32 %v4568_v58, %v4798_v27  ;;  %v4570_v35 = vadd.f32 %v4512_v42, %v11135_v44  ;;  %v5131_v34 = vand.u32 4294901760, %v5130_v7  ;;  %v5142_v38 = vsub.f32 %v11348_v6, %v5141_v50 }
 0x4a8   : > { %13118 = vst [vmem:[#allocation126_spill] sm:$0xff] %v11364_v8  ;;  %v5149_v23 = vand.u32 4294901760, %v5148_v55  ;;  %v5159_v11 = vand.u32 4294901760, %v11364_v8  ;;  %v4804_v18 = vand.u32 4294901760, %v4569_v51  ;;  %v11375_v25 = vpack.c.bf16 %v5141_v50, %v5129_v3  ;;  %13120 = vst [vmem:[#allocation130_spill] sm:$0xff] %v11378_v63 }
 0x4a9   : > { %v5153_v41 = vand.u32 4294901760, %v11370_v26  ;;  %v4802_v43 = vand.u32 4294901760, %v4570_v35  ;;  %v4518_v46 = vpop.f32.mrb[24].mxu0  ;;  %v5143_v60 = vand.u32 4294901760, %v5142_v38 }
 0x4aa   : > { %13119 = vst [vmem:[#allocation128_spill] sm:$0xff] %v11375_v25  ;;  %v5160_v58 = vsub.f32 %v11364_v8, %v5159_v11  ;;  %v11381_v14 = vsub.f32 %v4569_v51, %v4804_v18  ;;  %v4571_v44 = vadd.f32 %v4518_v46, %v11138_v5  ;;  %v4520_v7 = vpop.f32.mrb[25].mxu0  ;;  %v11384_v55 = vpack.c.bf16 %v4804_v18, %v4800_v40 }
 0x4ab   : > { %v11386_v42 = vsub.f32 %v4570_v35, %v4802_v43  ;;  %v4572_v3 = vadd.f32 %v4520_v7, %v11141_v47  ;;  %v11389_v50 = vpack.c.bf16 %v4802_v43, %v4798_v27  ;;  %v11391_v25 = vpack.c.bf16 %v5143_v60, %v5131_v34 }
 0x4ac   : > { %13121 = vst [vmem:[#allocation132_spill] sm:$0xff] %v11381_v14  ;;  %13122 = vst [vmem:[#allocation134_spill] sm:$0xff] %v11384_v55  ;;  %v5161_v38 = vand.u32 4294901760, %v5160_v58  ;;  %v5171_v0 = vand.u32 4294901760, %v11381_v14  ;;  %v4808_v51 = vand.u32 4294901760, %v4571_v44  ;;  %v11398_v35 = vpack.c.bf16 %v5149_v23, %v5137_v36 }
 0x4ad   : > { %13123 = vst [vmem:[#allocation137_spill] sm:$0xff] %v11389_v50  ;;  %v5165_v5 = vand.u32 4294901760, %v11386_v42  ;;  %v4806_v46 = vand.u32 4294901760, %v4572_v3  ;;  %v4526_v40 = vpop.f32.mrb[26].mxu0  ;;  %6999 = vmatprep.subr.bf16.mxu1 %v11389_v50  ;;  %v5154_v47 = vsub.f32 %v11370_v26, %v5153_v41 }
 0x4ae   : > { %v5172_v60 = vsub.f32 %v11381_v14, %v5171_v0  ;;  %v11402_v27 = vsub.f32 %v4571_v44, %v4808_v51  ;;  %v4573_v34 = vadd.f32 %v4526_v40, %v11146_v28  ;;  %v4528_v18 = vpop.f32.mrb[27].mxu0  ;;  %7001 = vmatpush1.bf16.msra.mxu1 %v11384_v55  ;;  %v11416_v14 = vpack.c.bf16 %v5171_v0, %v5159_v11 }
 0x4af   : > { %v11408_v58 = vsub.f32 %v4572_v3, %v4806_v46  ;;  %v4574_v7 = vadd.f32 %v4528_v18, %v11161_v32  ;;  %v5155_v36 = vand.u32 4294901760, %v5154_v47  ;;  %v5166_v23 = vsub.f32 %v11386_v42, %v5165_v5 }
 0x4b0   : > { %13124 = vst [vmem:[#allocation138_spill] sm:$0xff] %v11402_v27  ;;  %v5173_v20 = vand.u32 4294901760, %v5172_v60  ;;  %v5183_v63 = vand.u32 4294901760, %v11402_v27  ;;  %v4812_v44 = vand.u32 4294901760, %v4573_v34  ;;  %v11413_v50 = vpack.c.bf16 %v5165_v5, %v5153_v41  ;;  %13126 = vst [vmem:[#allocation142_spill] sm:$0xff] %v11416_v14 }
 0x4b1   : > { %v5177_v28 = vand.u32 4294901760, %v11408_v58  ;;  %v4810_v40 = vand.u32 4294901760, %v4574_v7  ;;  %v4534_v55 = vpop.f32.mrb[28].mxu0  ;;  %v5167_v8 = vand.u32 4294901760, %v5166_v23 }
 0x4b2   : > { %13125 = vst [vmem:[#allocation141_spill] sm:$0xff] %v11413_v50  ;;  %v5184_v3 = vsub.f32 %v11402_v27, %v5183_v63  ;;  %v11419_v43 = vsub.f32 %v4573_v34, %v4812_v44  ;;  %v4575_v32 = vadd.f32 %v4534_v55, %v11168_v22  ;;  %v4536_v47 = vpop.f32.mrb[29].mxu0  ;;  %v11422_v60 = vpack.c.bf16 %v4812_v44, %v4808_v51 }
 0x4b3   : > { %v11424_v18 = vsub.f32 %v4574_v7, %v4810_v40  ;;  %v4576_v41 = vadd.f32 %v4536_v47, %v11171_v54  ;;  %v11427_v5 = vpack.c.bf16 %v4810_v40, %v4806_v46  ;;  %v11429_v50 = vpack.c.bf16 %v5167_v8, %v5155_v36 }
 0x4b4   : > { %13127 = vst [vmem:[#allocation144_spill] sm:$0xff] %v11422_v60  ;;  %v5185_v23 = vand.u32 4294901760, %v5184_v3  ;;  %v5195_v11 = vand.u32 4294901760, %v11419_v43  ;;  %v4816_v34 = vand.u32 4294901760, %v4575_v32  ;;  %v11436_v7 = vpack.c.bf16 %v5173_v20, %v5161_v38 }
 0x4b5   : > { %13128 = vst [vmem:[#allocation146_spill] sm:$0xff] %v11427_v5  ;;  %v5189_v22 = vand.u32 4294901760, %v11424_v18  ;;  %v4814_v55 = vand.u32 4294901760, %v4576_v41  ;;  %v4542_v51 = vpop.f32.mrb[30].mxu0  ;;  %7003 = vmatprep.subr.bf16.mxu1 %v11427_v5  ;;  %v5178_v54 = vsub.f32 %v11408_v58, %v5177_v28 }
 0x4b6   : > { %v5196_v8 = vsub.f32 %v11419_v43, %v5195_v11  ;;  %v11440_v46 = vsub.f32 %v4575_v32, %v4816_v34  ;;  %v4577_v36 = vadd.f32 %v4542_v51, %v11175_v29  ;;  %v4544_v44 = vpop.f32.mrb[31].mxu0  ;;  %7005 = vmatpush1.bf16.msra.mxu1 %v11422_v60  ;;  %v11454_v27 = vpack.c.bf16 %v5195_v11, %v5183_v63 }
 0x4b7   : > { %v11446_v3 = vsub.f32 %v4576_v41, %v4814_v55  ;;  %v4578_v47 = vadd.f32 %v4544_v44, %v11178_v59  ;;  %v5179_v38 = vand.u32 4294901760, %v5178_v54  ;;  %v5190_v20 = vsub.f32 %v11424_v18, %v5189_v22 }
 0x4b8   : > { %v5197_v0 = vand.u32 4294901760, %v5196_v8  ;;  %v5207_v14 = vand.u32 4294901760, %v11440_v46  ;;  %v4820_v32 = vand.u32 4294901760, %v4577_v36  ;;  %v11451_v5 = vpack.c.bf16 %v5189_v22, %v5177_v28  ;;  %13130 = vst [vmem:[#allocation150_spill] sm:$0xff] %v11454_v27  ;;  %v4618_v8 = vld [vmem:[%s12091_s3 + $0x20] sm:$0xff] }
 0x4b9   : > { %v5201_v29 = vand.u32 4294901760, %v11446_v3  ;;  %v4818_v51 = vand.u32 4294901760, %v4578_v47  ;;  %v5191_v60 = vand.u32 4294901760, %v5190_v20  ;;  %v13132_v59 = vand.u32 4294901760, %v11156_v4 }
 0x4ba   : > { %13129 = vst [vmem:[#allocation149_spill] sm:$0xff] %v11451_v5  ;;  %v11456_v40 = vsub.f32 %v4577_v36, %v4820_v32  ;;  %v11458_v41 = vpack.c.bf16 %v4820_v32, %v4816_v34  ;;  %v11466_v28 = vpack.c.bf16 %v5197_v0, %v5185_v23  ;;  %v5208_v34 = vsub.f32 %v11440_v46, %v5207_v14 }
 0x4bb   : > { %v4869_v54 = vsub.f32 %v11156_v4, %v13132_v59  ;;  %v11468_v22 = vsub.f32 %v4578_v47, %v4818_v51  ;;  %v11470_v44 = vpack.c.bf16 %v4818_v51, %v4814_v55  ;;  %v11473_v11 = vpack.c.bf16 %v5191_v60, %v5179_v38 }
 0x4bc   : > { %13131 = vst [vmem:[#allocation153_spill] sm:$0xff] %v11458_v41  ;;  %v5219_v36 = vand.u32 4294901760, %v11456_v40  ;;  %v11481_v32 = vsub.f32 %v11194_v39, %v11209_v13  ;;  %v11485_v0 = vand.u32 4294901760, %v4618_v8  ;;  %v5202_v60 = vsub.f32 %v11446_v3, %v5201_v29  ;;  %v4619_v39 = vld [vmem:[%s12091_s3 + $0x28] sm:$0xff] }
 0x4bd   : > { %13133 = vst [vmem:[#allocation154_spill] sm:$0xff] %v11470_v44  ;;  %v5213_v23 = vand.u32 4294901760, %v11468_v22  ;;  %7007 = vmatprep.subr.bf16.mxu1 %v11470_v44  ;;  %v4870_v51 = vand.u32 4294901760, %v4869_v54  ;;  %v5209_v63 = vand.u32 4294901760, %v5208_v34  ;;  %v13134_v55 = vand.u32 4294901760, %v11189_v24 }
 0x4be   : > { %v5220_v47 = vsub.f32 %v11456_v40, %v5219_v36  ;;  %7009 = vmatpush1.bf16.msra.mxu1 %v11458_v41  ;;  %v11495_v38 = vpack.c.bf16 %v5219_v36, %v5207_v14  ;;  %v4890_v41 = vand.u32 4294901760, %v11481_v32  ;;  %v13135_v44 = vand.u32 4294901760, %v11153_v2 }
 0x4bf   : > { %7011 = vmatprep.subr.bf16.mxu1 %v11239_v52  ;;  %v5214_v59 = vsub.f32 %v11468_v22, %v5213_v23  ;;  %v11499_v20 = vpack.c.bf16 %v5213_v23, %v5201_v29  ;;  %v4880_v5 = vsub.f32 %v11189_v24, %v13134_v55  ;;  %v11508_v14 = vsub.f32 %v4618_v8, %v11485_v0  ;;  %v4620_v29 = vld [vmem:[%s12091_s3 + $0x30] sm:$0xff] }
 0x4c0   : > { %v5221_v27 = vand.u32 4294901760, %v5220_v47  ;;  %v11510_v52 = vand.u32 4294901760, %v4619_v39  ;;  %v5203_v54 = vand.u32 4294901760, %v5202_v60  ;;  %v13136_v36 = vmov 0.0  }
 0x4c1   : > { %4860 = vmatmul.mubr.f32.vlgmr.msra.gmra.mrb[0].mxu1 %v13135_v44  ;;  %v5215_v34 = vand.u32 4294901760, %v5214_v59  ;;  %v11520_v44 = vand.u32 4294901760, %v4620_v29  ;;  %v4881_v8 = vand.u32 4294901760, %v4880_v5  ;;  %v4891_v55 = vsub.f32 %v11481_v32, %v4890_v41 }
 0x4c2   : > { %7013 = vmatpush1.bf16.msra.mxu1 %v11246_v61  ;;  %4865 = vmatprep.mubr.f32.mxu1 %v13136_v36  ;;  %v11517_v23 = vpack.c.bf16 %v5221_v27, %v5209_v63  ;;  %v4901_v60 = vand.u32 4294901760, %v11508_v14  ;;  %v11527_v47 = vsub.f32 %v4619_v39, %v11510_v52 }
 0x4c3   : > { %7015 = vmatprep.subr.bf16.mxu1 %v11277_v1  ;;  %v7038_v2 = vpack.c.bf16 %v5215_v34, %v5203_v54  ;;  %v4621_v1 = vld [vmem:[%s12091_s3 + $0x38] sm:$0xff]  ;;  %v11536_v61 = vsub.f32 %v4620_v29, %v11520_v44  ;;  %v4892_v27 = vand.u32 4294901760, %v4891_v55 }
 0x4c4   : > { %v4902_v5 = vsub.f32 %v11508_v14, %v4901_v60  ;;  %v12554_v63 = vand.u32 4294901760, %v11527_v47 }
 0x4c5   : > { %4871 = vmatmul.mubr.f32.gmra.mrb[2].mxu1 %v4870_v51  ;;  %v12553_v39 = vand.u32 4294901760, %v11536_v61 }
 0x4c6   : > { %7017 = vmatpush1.bf16.msra.mxu1 %v11284_v16  ;;  %4876 = vmatprep.mubr.f32.mxu1 %v13136_v36  ;;  %v11542_v16 = vand.u32 4294901760, %v4621_v1  ;;  %v4903_v51 = vand.u32 4294901760, %v4902_v5  ;;  %v4913_v59 = vsub.f32 %v11527_v47, %v12554_v63 }
 0x4c7   : > { %7019 = vmatprep.subr.bf16.mxu1 %v11315_v53  ;;  %v4622_v53 = vld [vmem:[%s12091_s3 + $0x40] sm:$0xff]  ;;  %v4924_v54 = vsub.f32 %v11536_v61, %v12553_v39 }
 0x4c8   : > { %v11555_v29 = vsub.f32 %v4621_v1, %v11542_v16  ;;  %v4914_v34 = vand.u32 4294901760, %v4913_v59 }
 0x4c9   : > { %4882 = vmatmul.mubr.f32.gmra.mrb[4].mxu1 %v4881_v8  ;;  %v4925_v1 = vand.u32 4294901760, %v4924_v54 }
 0x4ca   : > { %7021 = vmatpush1.bf16.msra.mxu1 %v11322_v37  ;;  %4887 = vmatprep.mubr.f32.mxu1 %v13136_v36  ;;  %v11557_v37 = vand.u32 4294901760, %v4622_v53  ;;  %v12551_v8 = vand.u32 4294901760, %v11555_v29 }
 0x4cb   : > { %7023 = vmatprep.subr.bf16.mxu1 %v11353_v57  ;;  %v4623_v57 = vld [vmem:[%s12091_s3 + $0x48] sm:$0xff] }
 0x4cc   : > { %v11570_v55 = vsub.f32 %v4622_v53, %v11557_v37 }
 0x4cd   : > { %4893 = vmatmul.mubr.f32.gmra.mrb[6].mxu1 %v4892_v27  ;;  %v4935_v27 = vsub.f32 %v11555_v29, %v12551_v8 }
 0x4ce   : > { %7025 = vmatpush1.bf16.msra.mxu1 %v11360_v12  ;;  %4898 = vmatprep.mubr.f32.mxu1 %v13136_v36  ;;  %v11572_v12 = vand.u32 4294901760, %v4623_v57  ;;  %v12548_v5 = vand.u32 4294901760, %v11570_v55 }
 0x4cf   : > { %7027 = vmatprep.subr.bf16.mxu1 %v11391_v25  ;;  %v4624_v25 = vld [vmem:[%s12091_s3 + $0x50] sm:$0xff]  ;;  %v4936_v59 = vand.u32 4294901760, %v4935_v27 }
 0x4d0   : > { %v11585_v53 = vsub.f32 %v4623_v57, %v11572_v12  ;;  %v4946_v57 = vsub.f32 %v11570_v55, %v12548_v5 }
 0x4d1   : > { %4904 = vmatmul.mubr.f32.gmra.mrb[8].mxu1 %v4903_v51  ;;  %v4625_v51 = vld [vmem:[%s12091_s3 + $0x58] sm:$0xff] }
 0x4d2   : > { %7029 = vmatpush1.bf16.msra.mxu1 %v11398_v35  ;;  %4909 = vmatprep.mubr.f32.mxu1 %v13136_v36  ;;  %v11587_v35 = vand.u32 4294901760, %v4624_v25  ;;  %v12549_v54 = vand.u32 4294901760, %v11585_v53 }
 0x4d3   : > { %7031 = vmatprep.subr.bf16.mxu1 %v11429_v50  ;;  %v11595_v50 = vand.u32 4294901760, %v4625_v51 }
 0x4d4   : > { %v4957_v27 = vsub.f32 %v11585_v53, %v12549_v54 }
 0x4d5   : > { %4915 = vmatmul.mubr.f32.gmra.mrb[10].mxu1 %v4914_v34  ;;  %v11602_v34 = vsub.f32 %v4624_v25, %v11587_v35 }
 0x4d6   : > { %7033 = vmatpush1.bf16.msra.mxu1 %v11436_v7  ;;  %4920 = vmatprep.mubr.f32.mxu1 %v13136_v36  ;;  %v4626_v7 = vld [vmem:[%s12091_s3 + $0x60] sm:$0xff] }
 0x4d7   : > { %7035 = vmatprep.subr.bf16.mxu1 %v11473_v11  ;;  %v11610_v11 = vsub.f32 %v4625_v51, %v11595_v50  ;;  %v12550_v25 = vand.u32 4294901760, %v11602_v34  ;;  %v11616_v5 = vand.u32 4294901760, %v4626_v7 }
 0x4d9   : > { %4926 = vmatmul.mubr.f32.gmra.mrb[12].mxu1 %v4925_v1  ;;  %v4947_v1 = vand.u32 4294901760, %v4946_v57  ;;  %v12552_v51 = vand.u32 4294901760, %v11610_v11  ;;  %v4968_v57 = vsub.f32 %v11602_v34, %v12550_v25  ;;  %v4629_v25 = vld [vmem:[%s12091_s3 + $0x78] sm:$0xff] }
 0x4da   : > { %7037 = vmatpush1.bf16.msra.mxu1 %v11466_v28  ;;  %4931 = vmatprep.mubr.f32.mxu1 %v13136_v36  ;;  %v4627_v28 = vld [vmem:[%s12091_s3 + $0x68] sm:$0xff] }
 0x4db   : > { %7039 = vmatprep.subr.bf16.mxu1 %v7038_v2  ;;  %v13137_v2 = vpack.c.bf16 %v11197_v45, %v11165_v30  ;;  %v11633_v54 = vand.u32 4294901760, %v4627_v28  ;;  %v4628_v30 = vld [vmem:[%s12091_s3 + $0x70] sm:$0xff]  ;;  %v4979_v45 = vsub.f32 %v11610_v11, %v12552_v51 }
 0x4dd   : > { %4937 = vmatmul.mubr.f32.gmra.mrb[14].mxu1 %v4936_v59  ;;  %v4958_v59 = vand.u32 4294901760, %v4957_v27  ;;  %v4980_v8 = vand.u32 4294901760, %v4979_v45 }
 0x4de   : > { %7041 = vmatpush1.bf16.msra.mxu1 %v11517_v23  ;;  %4942 = vmatprep.mubr.f32.mxu1 %v13136_v36  ;;  %v11631_v23 = vsub.f32 %v4626_v7, %v11616_v5  ;;  %v11646_v7 = vand.u32 4294901760, %v4628_v30 }
 0x4df   : > { %7043 = vmatprep.subr.bf16.mxu1 %v13137_v2  ;;  %v11644_v2 = vsub.f32 %v4627_v28, %v11633_v54  ;;  %v11659_v28 = vand.u32 4294901760, %v4629_v25 }
 0x4e0   : > { %v12555_v27 = vand.u32 4294901760, %v11631_v23  ;;  %v11657_v51 = vsub.f32 %v4628_v30, %v11646_v7 }
 0x4e1   : > { %4948 = vmatmul.mubr.f32.gmra.mrb[16].mxu1 %v4947_v1  ;;  %v4969_v1 = vand.u32 4294901760, %v4968_v57  ;;  %v12556_v57 = vand.u32 4294901760, %v11644_v2  ;;  %v11667_v63 = vsub.f32 %v4629_v25, %v11659_v28 }
 0x4e2   : > { %4953 = vmatprep.mubr.f32.mxu1 %v13136_v36 }
 0x4e3   : > { %v5001_v45 = vsub.f32 %v11644_v2, %v12556_v57 }
 0x4e5   : > { %4959 = vmatmul.mubr.f32.gmra.mrb[18].mxu1 %v4958_v59  ;;  %v4990_v59 = vsub.f32 %v11631_v23, %v12555_v27  ;;  %v5002_v30 = vand.u32 4294901760, %v5001_v45 }
 0x4e6   : > { %4964 = vmatprep.mubr.f32.mxu1 %v13136_v36 }
 0x4e7   : > { %v4991_v39 = vand.u32 4294901760, %v4990_v59 }
 0x4e9   : > { %4970 = vmatmul.mubr.f32.gmra.mrb[20].mxu1 %v4969_v1  ;;  %v5011_v1 = vand.u32 4294901760, %v11657_v51 }
 0x4ea   : > { %4975 = vmatprep.mubr.f32.mxu1 %v13136_v36 }
 0x4eb   : > { %v5012_v27 = vsub.f32 %v11657_v51, %v5011_v1 }
 0x4ed   : > { %4981 = vmatmul.mubr.f32.gmra.mrb[22].mxu1 %v4980_v8  ;;  %v5022_v8 = vand.u32 4294901760, %v11667_v63  ;;  %v5013_v59 = vand.u32 4294901760, %v5012_v27  ;;  %v13139_v27 = vpack.c.bf16 %v11234_v15, %v11220_v62  ;;  %v13147_v62 = vpack.c.bf16 %v11310_v17, %v11294_v56  ;;  %v13149_v15 = vld [vmem:[#allocation44_spill] sm:$0xff] }
 0x4ee   : > { %4986 = vmatprep.mubr.f32.mxu1 %v13136_v36  ;;  %v13155_v56 = vpack.c.bf16 %v11386_v42, %v11370_v26  ;;  %v13156_v17 = vld [vmem:[#allocation132_spill] sm:$0xff]  ;;  %v13162_v26 = vpack.c.bf16 %v11468_v22, %v11446_v3  ;;  %v13163_v42 = vpack.c.bf16 %v11456_v40, %v11440_v46  ;;  %v13168_v40 = vld [vmem:[#allocation31_spill] sm:$0xff]  ;;  %v13169_v3 = vld [vmem:[#allocation42_spill] sm:$0xff] }
 0x4ef   : > { %v5023_v57 = vsub.f32 %v11667_v63, %v5022_v8  ;;  %v13167_v46 = vld [vmem:[#allocation32_spill] sm:$0xff] }
 0x4f0   : > { %v13170_v22 = vld [vmem:[#allocation40_spill] sm:$0xff] }
 0x4f1   : > { %4992 = vmatmul.mubr.f32.gmra.mrb[24].mxu1 %v4991_v39  ;;  %v5024_v25 = vand.u32 4294901760, %v5023_v57  ;;  %v13138_v39 = vpack.c.bf16 %v11183_v19, %v11158_v49  ;;  %v13140_v57 = vld [vmem:[#allocation26_spill] sm:$0xff]  ;;  %v13143_v49 = vld [vmem:[#allocation89_spill] sm:$0xff] }
 0x4f2   : > { %4997 = vmatprep.mubr.f32.mxu1 %v13136_v36  ;;  %v13141_v45 = vpack.c.bf16 %v11229_v48, %v13140_v57  ;;  %v13144_v19 = vld [vmem:[#allocation38_spill] sm:$0xff]  ;;  %v13148_v48 = vld [vmem:[#allocation49_spill] sm:$0xff] }
 0x4f5   : > { %5003 = vmatmul.mubr.f32.gmra.mrb[26].mxu1 %v5002_v30  ;;  %v13142_v30 = vpack.c.bf16 %v11272_v33, %v11256_v10  ;;  %v13151_v10 = vpack.c.bf16 %v11348_v6, %v11332_v21  ;;  %v13152_v33 = vld [vmem:[#allocation121_spill] sm:$0xff]  ;;  %v13159_v21 = vpack.c.bf16 %v11424_v18, %v11408_v58  ;;  %v13160_v6 = vld [vmem:[#allocation138_spill] sm:$0xff]  ;;  %v13164_v58 = vld [vmem:[#allocation24_spill] sm:$0xff] }
 0x4f6   : > { %5008 = vmatprep.mubr.f32.mxu1 %v13136_v36  ;;  %v13166_v18 = vld [vmem:[#allocation90_spill] sm:$0xff] }
 0x4f9   : > { %5014 = vmatmul.mubr.f32.gmra.mrb[28].mxu1 %v5013_v59  ;;  %v13145_v59 = vld [vmem:[#allocation33_spill] sm:$0xff] }
 0x4fa   : > { %5019 = vmatprep.mubr.f32.mxu1 %v13136_v36 }
 0x4fd   : > { %5025 = vmatmul.mubr.f32.gmra.mrb[30].mxu1 %v5024_v25  ;;  %v13146_v25 = vpack.c.bf16 %v13144_v19, %v13145_v59  ;;  %v13161_v19 = vpack.c.bf16 %v11419_v43, %v13160_v6  ;;  %v13165_v43 = vld [vmem:[#allocation87_spill] sm:$0xff]  ;;  %v13171_v59 = vld [vmem:[#allocation109_spill] sm:$0xff] }
 0x4fe   : > { %5255 = vmatprep.mubr.f32.mxu1 %v13136_v36  ;;  %v13186_v6 = vld [vmem:[#allocation37_spill] sm:$0xff] }
 0x501   : > { %5257 = vmatmul.mubr.f32.vlgmr.msra.gmra.mrb[0].mxu1 %v11032_v9 }
 0x502   : > { %7045 = vmatpush1.bf16.msra.mxu1 %v13138_v39  ;;  %5262 = vmatprep.mubr.f32.mxu1 %v13136_v36  ;;  %v13150_v39 = vpack.c.bf16 %v13148_v48, %v13149_v15  ;;  %v13174_v48 = vld [vmem:[#allocation122_spill] sm:$0xff]  ;;  %v13175_v15 = vld [vmem:[#allocation137_spill] sm:$0xff] }
 0x503   : > { %7047 = vmatprep.subr.bf16.mxu1 %v13139_v27  ;;  %v13153_v27 = vld [vmem:[#allocation111_spill] sm:$0xff] }
 0x504   : > { %v13154_v57 = vpack.c.bf16 %v13152_v33, %v13153_v27  ;;  %v13178_v33 = vld [vmem:[#allocation144_spill] sm:$0xff]  ;;  %v13179_v27 = vld [vmem:[#allocation154_spill] sm:$0xff] }
 0x505   : > { %5264 = vmatmul.mubr.f32.gmra.mrb[2].mxu1 %v11109_v31 }
 0x506   : > { %7049 = vmatpush1.bf16.msra.mxu1 %v13141_v45  ;;  %5269 = vmatprep.mubr.f32.mxu1 %v13136_v36  ;;  %v13157_v45 = vld [vmem:[#allocation126_spill] sm:$0xff] }
 0x507   : > { %7051 = vmatprep.subr.bf16.mxu1 %v13142_v30  ;;  %v13158_v30 = vpack.c.bf16 %v13156_v17, %v13157_v45  ;;  %v13182_v17 = vand.u32 4294901760, %v13165_v43  ;;  %v13183_v45 = vld [vmem:[#allocation27_spill] sm:$0xff] }
 0x509   : > { %5271 = vmatmul.mubr.f32.gmra.mrb[4].mxu1 %v13143_v49 }
 0x50a   : > { %7053 = vmatpush1.bf16.msra.mxu1 %v13146_v25  ;;  %5276 = vmatprep.mubr.f32.mxu1 %v13136_v36  ;;  %v13172_v25 = vld [vmem:[#allocation50_spill] sm:$0xff] }
 0x50b   : > { %7055 = vmatprep.subr.bf16.mxu1 %v13147_v62  ;;  %v13173_v62 = vld [vmem:[#allocation125_spill] sm:$0xff] }
 0x50d   : > { %5278 = vmatmul.mubr.f32.gmra.mrb[6].mxu1 %v11209_v13 }
 0x50e   : > { %7057 = vmatpush1.bf16.msra.mxu1 %v13150_v39  ;;  %5283 = vmatprep.mubr.f32.mxu1 %v13136_v36  ;;  %v13176_v39 = vld [vmem:[#allocation134_spill] sm:$0xff] }
 0x50f   : > { %7059 = vmatprep.subr.bf16.mxu1 %v13151_v10  ;;  %v13177_v10 = vld [vmem:[#allocation146_spill] sm:$0xff] }
 0x511   : > { %5285 = vmatmul.mubr.f32.gmra.mrb[8].mxu1 %v11485_v0 }
 0x512   : > { %7061 = vmatpush1.bf16.msra.mxu1 %v13154_v57  ;;  %5290 = vmatprep.mubr.f32.mxu1 %v13136_v36  ;;  %v13180_v57 = vld [vmem:[#allocation153_spill] sm:$0xff] }
 0x513   : > { %7063 = vmatprep.subr.bf16.mxu1 %v13155_v56  ;;  %v13181_v56 = vld [vmem:[#allocation29_spill] sm:$0xff] }
 0x515   : > { %5292 = vmatmul.mubr.f32.gmra.mrb[10].mxu1 %v11510_v52 }
 0x516   : > { %7065 = vmatpush1.bf16.msra.mxu1 %v13158_v30  ;;  %5297 = vmatprep.mubr.f32.mxu1 %v13136_v36  ;;  %v13184_v30 = vld [vmem:[#allocation35_spill] sm:$0xff] }
 0x517   : > { %7067 = vmatprep.subr.bf16.mxu1 %v13159_v21  ;;  %v13185_v21 = vand.u32 4294901760, %v11156_v4 }
 0x519   : > { %5299 = vmatmul.mubr.f32.gmra.mrb[12].mxu1 %v11520_v44 }
 0x51a   : > { %7069 = vmatpush1.bf16.msra.mxu1 %v13161_v19  ;;  %5304 = vmatprep.mubr.f32.mxu1 %v13136_v36  ;;  %v13187_v19 = vld [vmem:[#allocation45_spill] sm:$0xff] }
 0x51b   : > { %7071 = vmatprep.subr.bf16.mxu1 %v13162_v26  ;;  %v13188_v26 = vand.u32 4294901760, %v11189_v24 }
 0x51d   : > { %5306 = vmatmul.mubr.f32.gmra.mrb[14].mxu1 %v11542_v16 }
 0x51e   : > { %7073 = vmatpush1.bf16.msra.mxu1 %v13163_v42  ;;  %5311 = vmatprep.mubr.f32.mxu1 %v13136_v36  ;;  %v13189_v42 = vld [vmem:[#allocation47_spill] sm:$0xff] }
 0x51f   : > { %7075 = vmatprep.subr.bf16.mxu1 %v13164_v58 }
 0x521   : > { %5313 = vmatmul.mubr.f32.gmra.mrb[16].mxu1 %v11557_v37 }
 0x522   : > { %5318 = vmatprep.mubr.f32.mxu1 %v13136_v36 }
 0x525   : > { %5320 = vmatmul.mubr.f32.gmra.mrb[18].mxu1 %v11572_v12 }
 0x526   : > { %5325 = vmatprep.mubr.f32.mxu1 %v13136_v36 }
 0x529   : > { %5327 = vmatmul.mubr.f32.gmra.mrb[20].mxu1 %v11587_v35 }
 0x52a   : > { %5332 = vmatprep.mubr.f32.mxu1 %v13136_v36 }
 0x52d   : > { %5334 = vmatmul.mubr.f32.gmra.mrb[22].mxu1 %v11595_v50 }
 0x52e   : > { %5339 = vmatprep.mubr.f32.mxu1 %v13136_v36 }
 0x531   : > { %5341 = vmatmul.mubr.f32.gmra.mrb[24].mxu1 %v11616_v5 }
 0x532   : > { %5346 = vmatprep.mubr.f32.mxu1 %v13136_v36 }
 0x535   : > { %5348 = vmatmul.mubr.f32.gmra.mrb[26].mxu1 %v11633_v54 }
 0x536   : > { %5353 = vmatprep.mubr.f32.mxu1 %v13136_v36 }
 0x539   : > { %5355 = vmatmul.mubr.f32.gmra.mrb[28].mxu1 %v11646_v7 }
 0x53a   : > { %5360 = vmatprep.mubr.f32.mxu1 %v13136_v36 }
 0x53d   : > { %5362 = vmatmul.mubr.f32.gmra.mrb[30].mxu1 %v11659_v28 }
 0x53e   : > { %5496 = vmatprep.mubr.f32.mxu1 %v13136_v36 }
 0x541   : > { %5499 = vmatmul.mubr.f32.vlgmr.msra.gmra.mrb[0].mxu1 %v13165_v43  ;;  %v13190_v43 = vld [vmem:[#allocation117_spill] sm:$0xff] }
 0x542   : > { %7077 = vmatpush1.bf16.msra.mxu1 %v13166_v18  ;;  %5504 = vmatprep.mubr.f32.mxu1 %v13136_v36 }
 0x543   : > { %7079 = vmatprep.subr.bf16.mxu1 %v13167_v46 }
 0x545   : > { %5507 = vmatmul.mubr.f32.gmra.mrb[2].mxu1 %v11156_v4  ;;  %v13191_v4 = vld [vmem:[#allocation118_spill] sm:$0xff] }
 0x546   : > { %7081 = vmatpush1.bf16.msra.mxu1 %v13168_v40  ;;  %5512 = vmatprep.mubr.f32.mxu1 %v13136_v36 }
 0x547   : > { %7083 = vmatprep.subr.bf16.mxu1 %v13169_v3 }
 0x549   : > { %5515 = vmatmul.mubr.f32.gmra.mrb[4].mxu1 %v11189_v24  ;;  %v13193_v24 = vld [vmem:[#allocation130_spill] sm:$0xff] }
 0x54a   : > { %7085 = vmatpush1.bf16.msra.mxu1 %v13170_v22  ;;  %5520 = vmatprep.mubr.f32.mxu1 %v13136_v36 }
 0x54b   : > { %7087 = vmatprep.subr.bf16.mxu1 %v13171_v59 }
 0x54d   : > { %5523 = vmatmul.mubr.f32.gmra.mrb[6].mxu1 %v11481_v32  ;;  %v13196_v32 = vld [vmem:[#allocation142_spill] sm:$0xff] }
 0x54e   : > { %7089 = vmatpush1.bf16.msra.mxu1 %v13172_v25  ;;  %5528 = vmatprep.mubr.f32.mxu1 %v13136_v36 }
 0x54f   : > { %7091 = vmatprep.subr.bf16.mxu1 %v13173_v62 }
 0x551   : > { %5531 = vmatmul.mubr.f32.gmra.mrb[8].mxu1 %v11508_v14  ;;  %v13199_v14 = vld [vmem:[#allocation150_spill] sm:$0xff] }
 0x552   : > { %7093 = vmatpush1.bf16.msra.mxu1 %v13174_v48  ;;  %5536 = vmatprep.mubr.f32.mxu1 %v13136_v36 }
 0x553   : > { %7095 = vmatprep.subr.bf16.mxu1 %v13175_v15 }
 0x555   : > { %5539 = vmatmul.mubr.f32.gmra.mrb[10].mxu1 %v11527_v47 }
 0x556   : > { %7097 = vmatpush1.bf16.msra.mxu1 %v13176_v39  ;;  %5544 = vmatprep.mubr.f32.mxu1 %v13136_v36 }
 0x557   : > { %7099 = vmatprep.subr.bf16.mxu1 %v13177_v10 }
 0x559   : > { %5547 = vmatmul.mubr.f32.gmra.mrb[12].mxu1 %v11536_v61 }
 0x55a   : > { %7101 = vmatpush1.bf16.msra.mxu1 %v13178_v33  ;;  %5552 = vmatprep.mubr.f32.mxu1 %v13136_v36 }
 0x55b   : > { %7103 = vmatprep.subr.bf16.mxu1 %v13179_v27 }
 0x55d   : > { %5555 = vmatmul.mubr.f32.gmra.mrb[14].mxu1 %v11555_v29 }
 0x55e   : > { %7105 = vmatpush1.bf16.msra.mxu1 %v13180_v57  ;;  %5560 = vmatprep.mubr.f32.mxu1 %v13136_v36 }
 0x55f   : > { %7107 = vmatprep.subr.bf16.mxu1 %v13181_v56  ;;  %v13192_v56 = vld [vmem:[#allocation128_spill] sm:$0xff] }
 0x561   : > { %5563 = vmatmul.mubr.f32.gmra.mrb[16].mxu1 %v11570_v55 }
 0x562   : > { %5568 = vmatprep.mubr.f32.mxu1 %v13136_v36 }
 0x565   : > { %5571 = vmatmul.mubr.f32.gmra.mrb[18].mxu1 %v11585_v53 }
 0x566   : > { %5576 = vmatprep.mubr.f32.mxu1 %v13136_v36 }
 0x569   : > { %5579 = vmatmul.mubr.f32.gmra.mrb[20].mxu1 %v11602_v34 }
 0x56a   : > { %5584 = vmatprep.mubr.f32.mxu1 %v13136_v36 }
 0x56d   : > { %5587 = vmatmul.mubr.f32.gmra.mrb[22].mxu1 %v11610_v11 }
 0x56e   : > { %5592 = vmatprep.mubr.f32.mxu1 %v13136_v36 }
 0x571   : > { %5595 = vmatmul.mubr.f32.gmra.mrb[24].mxu1 %v11631_v23 }
 0x572   : > { %5600 = vmatprep.mubr.f32.mxu1 %v13136_v36 }
 0x575   : > { %5603 = vmatmul.mubr.f32.gmra.mrb[26].mxu1 %v11644_v2 }
 0x576   : > { %5608 = vmatprep.mubr.f32.mxu1 %v13136_v36 }
 0x579   : > { %5611 = vmatmul.mubr.f32.gmra.mrb[28].mxu1 %v11657_v51  ;;  %v4666_v51 = vld [vmem:[%s12092_s4 + $0x20] sm:$0xff] }
 0x57a   : > { %5616 = vmatprep.mubr.f32.mxu1 %v13136_v36 }
 0x57d   : > { %5619 = vmatmul.mubr.f32.gmra.mrb[30].mxu1 %v11667_v63  ;;  %v4665_v63 = vld [vmem:[%s12092_s4 + $0x18] sm:$0xff] }
 0x57e   : > { %5721 = vmatprep.mubr.f32.mxu1 %v13136_v36 }
 0x581   : > { %5725 = vmatmul.mubr.f32.vlgmr.msra.gmra.mrb[0].mxu1 %v13182_v17  ;;  %v13194_v17 = vld [vmem:[#allocation141_spill] sm:$0xff] }
 0x582   : > { %7109 = vmatpush1.bf16.msra.mxu1 %v13183_v45  ;;  %5730 = vmatprep.mubr.f32.mxu1 %v13136_v36  ;;  %v13195_v45 = vand.u32 4294901760, %v11527_v47  ;;  %v13201_v47 = vand.u32 4294901760, %v11570_v55  ;;  %v13206_v55 = vand.u32 4294901760, %v11644_v2  ;;  %v4668_v2 = vld [vmem:[%s12092_s4 + $0x30] sm:$0xff] }
 0x583   : > { %7111 = vmatprep.subr.bf16.mxu1 %v13184_v30  ;;  %v13198_v30 = vand.u32 4294901760, %v11536_v61  ;;  %v13202_v61 = vand.u32 4294901760, %v11585_v53  ;;  %v4662_v53 = vld [vmem:[%s12092_s4] sm:$0xff] }
 0x584   : > { %4680 = vperm.xlu0 %7600, %v4662_v53  }
 0x585   : > { %5734 = vmatmul.mubr.f32.gmra.mrb[2].mxu1 %v13185_v21 }
 0x586   : > { %7113 = vmatpush1.bf16.msra.mxu1 %v13186_v6  ;;  %5739 = vmatprep.mubr.f32.mxu1 %v13136_v36 }
 0x587   : > { %7115 = vmatprep.subr.bf16.mxu1 %v13187_v19 }
 0x589   : > { %5743 = vmatmul.mubr.f32.gmra.mrb[4].mxu1 %v13188_v26 }
 0x58a   : > { %7117 = vmatpush1.bf16.msra.mxu1 %v13189_v42  ;;  %5748 = vmatprep.mubr.f32.mxu1 %v13136_v36 }
 0x58b   : > { %7119 = vmatprep.subr.bf16.mxu1 %v13190_v43 }
 0x58d   : > { %5752 = vmatmul.mubr.f32.gmra.mrb[6].mxu1 %v4890_v41  ;;  %v13197_v41 = vld [vmem:[#allocation149_spill] sm:$0xff] }
 0x58e   : > { %7121 = vmatpush1.bf16.msra.mxu1 %v13191_v4  ;;  %5757 = vmatprep.mubr.f32.mxu1 %v13136_v36 }
 0x58f   : > { %7123 = vmatprep.subr.bf16.mxu1 %v13192_v56 }
 0x591   : > { %5761 = vmatmul.mubr.f32.gmra.mrb[8].mxu1 %v4901_v60  ;;  %v13200_v60 = vand.u32 4294901760, %v11555_v29  ;;  %v13205_v29 = vand.u32 4294901760, %v11631_v23  ;;  %v4667_v23 = vld [vmem:[%s12092_s4 + $0x28] sm:$0xff] }
 0x592   : > { %7125 = vmatpush1.bf16.msra.mxu1 %v13193_v24  ;;  %5766 = vmatprep.mubr.f32.mxu1 %v13136_v36 }
 0x593   : > { %7127 = vmatprep.subr.bf16.mxu1 %v13194_v17 }
 0x595   : > { %5770 = vmatmul.mubr.f32.gmra.mrb[10].mxu1 %v13195_v45 }
 0x596   : > { %7129 = vmatpush1.bf16.msra.mxu1 %v13196_v32  ;;  %5775 = vmatprep.mubr.f32.mxu1 %v13136_v36 }
 0x597   : > { %7131 = vmatprep.subr.bf16.mxu1 %v13197_v41 }
 0x599   : > { %5779 = vmatmul.mubr.f32.gmra.mrb[12].mxu1 %v13198_v30 }
 0x59a   : > { %7133 = vmatpush1.bf16.msra.mxu1 %v13199_v14  ;;  %5784 = vmatprep.mubr.f32.mxu1 %v13136_v36 }
 0x59b   : > { %7135 = vmatprep.subr.bf16.mxu1 %v11499_v20  ;;  %v13203_v20 = vand.u32 4294901760, %v11602_v34  ;;  %v4664_v34 = vld [vmem:[%s12092_s4 + $0x10] sm:$0xff] }
 0x59c   : > { %4690 = vperm.xlu1 %7601, %v4664_v34  }
 0x59d   : > { %5788 = vmatmul.mubr.f32.gmra.mrb[14].mxu1 %v13200_v60 }
 0x59e   : > { %7137 = vmatpush1.bf16.msra.mxu1 %v11495_v38  ;;  %5793 = vmatprep.mubr.f32.mxu1 %v13136_v36  ;;  %v13204_v38 = vand.u32 4294901760, %v11610_v11  ;;  %v4663_v11 = vld [vmem:[%s12092_s4 + $0x8] sm:$0xff] }
 0x59f   : > { %7139 = vmatprep.subr.bf16.mxu1 %v13164_v58  ;;  %4685 = vperm.xlu0 %7600, %v4663_v11   ;;  %v4671_v58 = vld [vmem:[%s12092_s4 + $0x48] sm:$0xff] }
 0x5a0   : > { %4695 = vperm.xlu1 %7601, %v4665_v63  }
 0x5a1   : > { %5797 = vmatmul.mubr.f32.gmra.mrb[16].mxu1 %v13201_v47 }
 0x5a2   : > { %5802 = vmatprep.mubr.f32.mxu1 %v13136_v36 }
 0x5a3   : > { %4700 = vperm.xlu0 %7600, %v4666_v51  }
 0x5a4   : > { %4705 = vperm.xlu1 %7601, %v4667_v23  }
 0x5a5   : > { %5806 = vmatmul.mubr.f32.gmra.mrb[18].mxu1 %v13202_v61 }
 0x5a6   : > { %5811 = vmatprep.mubr.f32.mxu1 %v13136_v36 }
 0x5a7   : > { %4710 = vperm.xlu0 %7600, %v4668_v2  }
 0x5a9   : > { %5815 = vmatmul.mubr.f32.gmra.mrb[20].mxu1 %v13203_v20 }
 0x5aa   : > { %5820 = vmatprep.mubr.f32.mxu1 %v13136_v36 }
 0x5ad   : > { %5824 = vmatmul.mubr.f32.gmra.mrb[22].mxu1 %v13204_v38 }
 0x5ae   : > { %5829 = vmatprep.mubr.f32.mxu1 %v13136_v36 }
 0x5b1   : > { %5833 = vmatmul.mubr.f32.gmra.mrb[24].mxu1 %v13205_v29 }
 0x5b2   : > { %5838 = vmatprep.mubr.f32.mxu1 %v13136_v36 }
 0x5b5   : > { %5842 = vmatmul.mubr.f32.gmra.mrb[26].mxu1 %v13206_v55 }
 0x5b6   : > { %5847 = vmatprep.mubr.f32.mxu1 %v13136_v36 }
 0x5b9   : > { %5851 = vmatmul.mubr.f32.gmra.mrb[28].mxu1 %v5011_v1  ;;  %v4669_v1 = vld [vmem:[%s12092_s4 + $0x38] sm:$0xff] }
 0x5ba   : > { %5856 = vmatprep.mubr.f32.mxu1 %v13136_v36  ;;  %4715 = vperm.xlu1 %7601, %v4669_v1  }
 0x5bd   : > { %5860 = vmatmul.mubr.f32.gmra.mrb[30].mxu1 %v5022_v8  ;;  %v4670_v8 = vld [vmem:[%s12092_s4 + $0x40] sm:$0xff] }
 0x5be   : > { %6026 = vmatprep.mubr.f32.mxu1 %v13136_v36  ;;  %4720 = vperm.xlu0 %7600, %v4670_v8  }
 0x5bf   : > { %4725 = vperm.xlu1 %7601, %v4671_v58  }
 0x5c1   : > { %6028 = vmatmul.mubr.f32.vlgmr.msra.gmra.mrb[0].mxu1 %v11032_v9 }
 0x5c2   : > { %7141 = vmatpush1.bf16.msra.mxu1 %v13166_v18  ;;  %6033 = vmatprep.mubr.f32.mxu1 %v13136_v36  ;;  %v4672_v18 = vld [vmem:[%s12092_s4 + $0x50] sm:$0xff] }
 0x5c3   : > { %7143 = vmatprep.subr.bf16.mxu1 %v13167_v46  ;;  %v4673_v46 = vld [vmem:[%s12092_s4 + $0x58] sm:$0xff]  ;;  %4730 = vperm.xlu0 %7600, %v4672_v18  }
 0x5c4   : > { %4735 = vperm.xlu1 %7601, %v4673_v46  }
 0x5c5   : > { %6035 = vmatmul.mubr.f32.gmra.mrb[2].mxu1 %v11109_v31 }
 0x5c6   : > { %7145 = vmatpush1.bf16.msra.mxu1 %v13168_v40  ;;  %6040 = vmatprep.mubr.f32.mxu1 %v13136_v36  ;;  %v4674_v40 = vld [vmem:[%s12092_s4 + $0x60] sm:$0xff] }
 0x5c7   : > { %7147 = vmatprep.subr.bf16.mxu1 %v13169_v3  ;;  %v4675_v3 = vld [vmem:[%s12092_s4 + $0x68] sm:$0xff]  ;;  %4740 = vperm.xlu0 %7600, %v4674_v40  }
 0x5c8   : > { %4745 = vperm.xlu1 %7601, %v4675_v3  }
 0x5c9   : > { %6042 = vmatmul.mubr.f32.gmra.mrb[4].mxu1 %v13143_v49 }
 0x5ca   : > { %7149 = vmatpush1.bf16.msra.mxu1 %v13170_v22  ;;  %6047 = vmatprep.mubr.f32.mxu1 %v13136_v36  ;;  %v4676_v22 = vld [vmem:[%s12092_s4 + $0x70] sm:$0xff] }
 0x5cb   : > { %7151 = vmatprep.subr.bf16.mxu1 %v13171_v59  ;;  %v4677_v59 = vld [vmem:[%s12092_s4 + $0x78] sm:$0xff]  ;;  %4750 = vperm.xlu0 %7600, %v4676_v22  }
 0x5cc   : > { %4755 = vperm.xlu1 %7601, %v4677_v59  }
 0x5cd   : > { %6049 = vmatmul.mubr.f32.gmra.mrb[6].mxu1 %v11209_v13 }
 0x5ce   : > { %7153 = vmatpush1.bf16.msra.mxu1 %v13172_v25  ;;  %6054 = vmatprep.mubr.f32.mxu1 %v13136_v36 }
 0x5cf   : > { %7155 = vmatprep.subr.bf16.mxu1 %v13173_v62 }
 0x5d1   : > { %6056 = vmatmul.mubr.f32.gmra.mrb[8].mxu1 %v11485_v0 }
 0x5d2   : > { %7157 = vmatpush1.bf16.msra.mxu1 %v13174_v48  ;;  %6061 = vmatprep.mubr.f32.mxu1 %v13136_v36 }
 0x5d3   : > { %7159 = vmatprep.subr.bf16.mxu1 %v13175_v15 }
 0x5d5   : > { %6063 = vmatmul.mubr.f32.gmra.mrb[10].mxu1 %v11510_v52 }
 0x5d6   : > { %7161 = vmatpush1.bf16.msra.mxu1 %v13176_v39  ;;  %6068 = vmatprep.mubr.f32.mxu1 %v13136_v36 }
 0x5d7   : > { %7163 = vmatprep.subr.bf16.mxu1 %v13177_v10 }
 0x5d9   : > { %6070 = vmatmul.mubr.f32.gmra.mrb[12].mxu1 %v11520_v44 }
 0x5da   : > { %7165 = vmatpush1.bf16.msra.mxu1 %v13178_v33  ;;  %6075 = vmatprep.mubr.f32.mxu1 %v13136_v36 }
 0x5db   : > { %7167 = vmatprep.subr.bf16.mxu1 %v13179_v27 }
 0x5dd   : > { %6077 = vmatmul.mubr.f32.gmra.mrb[14].mxu1 %v11542_v16 }
 0x5de   : > { %7169 = vmatpush1.bf16.msra.mxu1 %v13180_v57  ;;  %6082 = vmatprep.mubr.f32.mxu1 %v13136_v36 }
 0x5e1   : > { %6084 = vmatmul.mubr.f32.gmra.mrb[16].mxu1 %v11557_v37 }
 0x5e2   : > { %6089 = vmatprep.mubr.f32.mxu1 %v13136_v36 }
 0x5e5   : > { %6091 = vmatmul.mubr.f32.gmra.mrb[18].mxu1 %v11572_v12 }
 0x5e6   : > { %6096 = vmatprep.mubr.f32.mxu1 %v13136_v36 }
 0x5e9   : > { %6098 = vmatmul.mubr.f32.gmra.mrb[20].mxu1 %v11587_v35 }
 0x5ea   : > { %6103 = vmatprep.mubr.f32.mxu1 %v13136_v36 }
 0x5ed   : > { %6105 = vmatmul.mubr.f32.gmra.mrb[22].mxu1 %v11595_v50 }
 0x5ee   : > { %6110 = vmatprep.mubr.f32.mxu1 %v13136_v36 }
 0x5f1   : > { %6112 = vmatmul.mubr.f32.gmra.mrb[24].mxu1 %v11616_v5 }
 0x5f2   : > { %6117 = vmatprep.mubr.f32.mxu1 %v13136_v36 }
 0x5f5   : > { %6119 = vmatmul.mubr.f32.gmra.mrb[26].mxu1 %v11633_v54 }
 0x5f6   : > { %6124 = vmatprep.mubr.f32.mxu1 %v13136_v36 }
 0x5f9   : > { %6126 = vmatmul.mubr.f32.gmra.mrb[28].mxu1 %v11646_v7 }
 0x5fa   : > { %6131 = vmatprep.mubr.f32.mxu1 %v13136_v36 }
 0x5fd   : > { %6133 = vmatmul.mubr.f32.gmra.mrb[30].mxu1 %v11659_v28 }
 0x5fe   : > { %6235 = vmatprep.mubr.f32.mxu1 %v13136_v36 }
 0x601   : > { %6237 = vmatmul.mubr.f32.vlgmr.msra.gmra.mrb[0].mxu1 %v11032_v9 }
 0x602   : > { %6242 = vmatprep.mubr.f32.mxu1 %v13136_v36 }
 0x603   : > { %v4681_v9 = vpop.permute.xlu0 %4680 }
 0x605   : > { %6244 = vmatmul.mubr.f32.gmra.mrb[2].mxu1 %v11109_v31 }
 0x606   : > { %6249 = vmatprep.mubr.f32.mxu1 %v13136_v36 }
 0x609   : > { %6251 = vmatmul.mubr.f32.gmra.mrb[4].mxu1 %v13143_v49 }
 0x60a   : > { %6256 = vmatprep.mubr.f32.mxu1 %v13136_v36 }
 0x60d   : > { %6258 = vmatmul.mubr.f32.gmra.mrb[6].mxu1 %v11209_v13 }
 0x60e   : > { %6263 = vmatprep.mubr.f32.mxu1 %v13136_v36 }
 0x611   : > { %6265 = vmatmul.mubr.f32.gmra.mrb[8].mxu1 %v11485_v0 }
 0x612   : > { %6270 = vmatprep.mubr.f32.mxu1 %v13136_v36 }
 0x615   : > { %6272 = vmatmul.mubr.f32.gmra.mrb[10].mxu1 %v11510_v52 }
 0x616   : > { %6277 = vmatprep.mubr.f32.mxu1 %v13136_v36 }
 0x619   : > { %6279 = vmatmul.mubr.f32.gmra.mrb[12].mxu1 %v11520_v44 }
 0x61a   : > { %6284 = vmatprep.mubr.f32.mxu1 %v13136_v36 }
 0x61d   : > { %6286 = vmatmul.mubr.f32.gmra.mrb[14].mxu1 %v11542_v16 }
 0x61e   : > { %6291 = vmatprep.mubr.f32.mxu1 %v13136_v36  ;;  %v4686_v44 = vpop.permute.xlu0 %4685 }
 0x621   : > { %6293 = vmatmul.mubr.f32.gmra.mrb[16].mxu1 %v11557_v37 }
 0x622   : > { %6298 = vmatprep.mubr.f32.mxu1 %v13136_v36  ;;  %v4701_v19 = vpop.permute.xlu0 %4700 }
 0x625   : > { %6300 = vmatmul.mubr.f32.gmra.mrb[18].mxu1 %v11572_v12 }
 0x626   : > { %6305 = vmatprep.mubr.f32.mxu1 %v13136_v36  ;;  %v4711_v60 = vpop.permute.xlu0 %4710 }
 0x629   : > { %6307 = vmatmul.mubr.f32.gmra.mrb[20].mxu1 %v11587_v35 }
 0x62a   : > { %6312 = vmatprep.mubr.f32.mxu1 %v13136_v36 }
 0x62d   : > { %6314 = vmatmul.mubr.f32.gmra.mrb[22].mxu1 %v11595_v50  ;;  %v4691_v50 = vpop.permute.xlu1 %4690 }
 0x62e   : > { %6319 = vmatprep.mubr.f32.mxu1 %v13136_v36 }
 0x631   : > { %6321 = vmatmul.mubr.f32.gmra.mrb[24].mxu1 %v11616_v5  ;;  %v4696_v39 = vpop.permute.xlu1 %4695 }
 0x632   : > { %6326 = vmatprep.mubr.f32.mxu1 %v13136_v36 }
 0x635   : > { %6328 = vmatmul.mubr.f32.gmra.mrb[26].mxu1 %v11633_v54  ;;  %v4706_v24 = vpop.permute.xlu1 %4705 }
 0x636   : > { %6333 = vmatprep.mubr.f32.mxu1 %v13136_v36 }
 0x639   : > { %6335 = vmatmul.mubr.f32.gmra.mrb[28].mxu1 %v11646_v7  ;;  %v4716_v53 = vpop.permute.xlu1 %4715 }
 0x63a   : > { %6340 = vmatprep.mubr.f32.mxu1 %v13136_v36 }
 0x63d   : > { %6342 = vmatmul.mubr.f32.gmra.mrb[30].mxu1 %v11659_v28  ;;  %v4721_v1 = vpop.permute.xlu0 %4720 }
 0x63e   : > { %v4726_v22 = vpop.permute.xlu1 %4725 }
 0x6d4   : > { %v6238_v31 = vpop.f32.mrb[0].mxu1 }
 0x6d5   : > { %v7170_v13 = vadd.f32 %v6238_v31, %v4681_v9  ;;  %v6240_v0 = vpop.f32.mrb[1].mxu1 }
 0x6d6   : > { %v7171_v52 = vadd.f32 %v6240_v0, %v4681_v9 }
 0x6d7   : > { %v6348_v16 = vmax.f32 %v7170_v13, 0.0 }
 0x6d8   : > { %v6349_v37 = vmax.f32 %v7171_v52, 0.0  ;;  %v6245_v12 = vpop.f32.mrb[2].mxu1 }
 0x6d9   : > { %6380 = vst [vmem:[%s11998_s10] sm:$0xff] %v6348_v16  ;;  %v7172_v5 = vadd.f32 %v6245_v12, %v4686_v44  ;;  %v6247_v36 = vpop.f32.mrb[3].mxu1 }
 0x6da   : > { %6381 = vst [vmem:[%s11998_s10 + $0x8] sm:$0xff] %v6349_v37  ;;  %v7173_v35 = vadd.f32 %v6247_v36, %v4686_v44  ;;  %v4731_v44 = vpop.permute.xlu0 %4730 }
 0x6db   : > { %v6350_v54 = vmax.f32 %v7172_v5, 0.0 }
 0x6dc   : > { %v6351_v7 = vmax.f32 %v7173_v35, 0.0  ;;  %v6252_v28 = vpop.f32.mrb[4].mxu1 }
 0x6dd   : > { %6382 = vst [vmem:[%s11998_s10 + $0x10] sm:$0xff] %v6350_v54  ;;  %v7174_v49 = vadd.f32 %v6252_v28, %v4691_v50  ;;  %v6254_v25 = vpop.f32.mrb[5].mxu1 }
 0x6de   : > { %6383 = vst [vmem:[%s11998_s10 + $0x18] sm:$0xff] %v6351_v7  ;;  %v7175_v62 = vadd.f32 %v6254_v25, %v4691_v50  ;;  %v4736_v50 = vpop.permute.xlu1 %4735 }
 0x6df   : > { %v6352_v48 = vmax.f32 %v7174_v49, 0.0 }
 0x6e0   : > { %v6353_v15 = vmax.f32 %v7175_v62, 0.0  ;;  %v6259_v10 = vpop.f32.mrb[6].mxu1 }
 0x6e1   : > { %6384 = vst [vmem:[%s11998_s10 + $0x20] sm:$0xff] %v6352_v48  ;;  %v7176_v33 = vadd.f32 %v6259_v10, %v4696_v39  ;;  %v6261_v27 = vpop.f32.mrb[7].mxu1  ;;  %v4741_v48 = vpop.permute.xlu0 %4740 }
 0x6e2   : > { %6385 = vst [vmem:[%s11998_s10 + $0x28] sm:$0xff] %v6353_v15  ;;  %v7177_v57 = vadd.f32 %v6261_v27, %v4696_v39 }
 0x6e3   : > { %v6354_v21 = vmax.f32 %v7176_v33, 0.0 }
 0x6e4   : > { %v6355_v6 = vmax.f32 %v7177_v57, 0.0  ;;  %v6266_v26 = vpop.f32.mrb[8].mxu1 }
 0x6e5   : > { %6386 = vst [vmem:[%s11998_s10 + $0x30] sm:$0xff] %v6354_v21  ;;  %v7178_v42 = vadd.f32 %v6266_v26, %v4701_v19  ;;  %v6268_v43 = vpop.f32.mrb[9].mxu1  ;;  %v4746_v21 = vpop.permute.xlu1 %4745 }
 0x6e6   : > { %6387 = vst [vmem:[%s11998_s10 + $0x38] sm:$0xff] %v6355_v6  ;;  %v7179_v4 = vadd.f32 %v6268_v43, %v4701_v19 }
 0x6e7   : > { %v6356_v56 = vmax.f32 %v7178_v42, 0.0 }
 0x6e8   : > { %v6357_v17 = vmax.f32 %v7179_v4, 0.0  ;;  %v6273_v45 = vpop.f32.mrb[10].mxu1 }
 0x6e9   : > { %6388 = vst [vmem:[%s11998_s10 + $0x40] sm:$0xff] %v6356_v56  ;;  %v7180_v32 = vadd.f32 %v6273_v45, %v4706_v24  ;;  %v6275_v41 = vpop.f32.mrb[11].mxu1  ;;  %v4751_v56 = vpop.permute.xlu0 %4750 }
 0x6ea   : > { %6389 = vst [vmem:[%s11998_s10 + $0x48] sm:$0xff] %v6357_v17  ;;  %v7181_v30 = vadd.f32 %v6275_v41, %v4706_v24 }
 0x6eb   : > { %v6358_v14 = vmax.f32 %v7180_v32, 0.0 }
 0x6ec   : > { %v6359_v47 = vmax.f32 %v7181_v30, 0.0  ;;  %v6280_v61 = vpop.f32.mrb[12].mxu1 }
 0x6ed   : > { %6390 = vst [vmem:[%s11998_s10 + $0x50] sm:$0xff] %v6358_v14  ;;  %v7182_v20 = vadd.f32 %v6280_v61, %v4711_v60  ;;  %v6282_v38 = vpop.f32.mrb[13].mxu1  ;;  %v4756_v14 = vpop.permute.xlu1 %4755 }
 0x6ee   : > { %6391 = vst [vmem:[%s11998_s10 + $0x58] sm:$0xff] %v6359_v47  ;;  %v7183_v29 = vadd.f32 %v6282_v38, %v4711_v60 }
 0x6ef   : > { %v6360_v55 = vmax.f32 %v7182_v20, 0.0 }
 0x6f0   : > { %v6361_v34 = vmax.f32 %v7183_v29, 0.0  ;;  %v6287_v11 = vpop.f32.mrb[14].mxu1 }
 0x6f1   : > { %6392 = vst [vmem:[%s11998_s10 + $0x60] sm:$0xff] %v6360_v55  ;;  %v7184_v63 = vadd.f32 %v6287_v11, %v4716_v53  ;;  %v6289_v51 = vpop.f32.mrb[15].mxu1 }
 0x6f2   : > { %6393 = vst [vmem:[%s11998_s10 + $0x68] sm:$0xff] %v6361_v34  ;;  %v7185_v23 = vadd.f32 %v6289_v51, %v4716_v53 }
 0x6f3   : > { %v6362_v2 = vmax.f32 %v7184_v63, 0.0 }
 0x6f4   : > { %v6363_v8 = vmax.f32 %v7185_v23, 0.0  ;;  %v6294_v58 = vpop.f32.mrb[16].mxu1 }
 0x6f5   : > { %6394 = vst [vmem:[%s11998_s10 + $0x70] sm:$0xff] %v6362_v2  ;;  %v7186_v18 = vadd.f32 %v6294_v58, %v4721_v1  ;;  %v6296_v46 = vpop.f32.mrb[17].mxu1 }
 0x6f6   : > { %6395 = vst [vmem:[%s11998_s10 + $0x78] sm:$0xff] %v6363_v8  ;;  %v7187_v40 = vadd.f32 %v6296_v46, %v4721_v1 }
 0x6f7   : > { %v6364_v3 = vmax.f32 %v7186_v18, 0.0 }
 0x6f8   : > { %v6365_v59 = vmax.f32 %v7187_v40, 0.0  ;;  %v6301_v9 = vpop.f32.mrb[18].mxu1 }
 0x6f9   : > { %6396 = vst [vmem:[%s11998_s10 + $0x80] sm:$0xff] %v6364_v3  ;;  %v7188_v31 = vadd.f32 %v6301_v9, %v4726_v22  ;;  %v6303_v13 = vpop.f32.mrb[19].mxu1 }
 0x6fa   : > { %6397 = vst [vmem:[%s11998_s10 + $0x88] sm:$0xff] %v6365_v59  ;;  %v7189_v0 = vadd.f32 %v6303_v13, %v4726_v22 }
 0x6fb   : > { %v6366_v52 = vmax.f32 %v7188_v31, 0.0 }
 0x6fc   : > { %v6367_v16 = vmax.f32 %v7189_v0, 0.0  ;;  %v6308_v37 = vpop.f32.mrb[20].mxu1 }
 0x6fd   : > { %6398 = vst [vmem:[%s11998_s10 + $0x90] sm:$0xff] %v6366_v52  ;;  %v7190_v12 = vadd.f32 %v6308_v37, %v4731_v44  ;;  %v6310_v5 = vpop.f32.mrb[21].mxu1 }
 0x6fe   : > { %6399 = vst [vmem:[%s11998_s10 + $0x98] sm:$0xff] %v6367_v16  ;;  %v7191_v36 = vadd.f32 %v6310_v5, %v4731_v44 }
 0x6ff   : > { %v6368_v35 = vmax.f32 %v7190_v12, 0.0 }
 0x700   : > { %v6369_v54 = vmax.f32 %v7191_v36, 0.0  ;;  %v6315_v7 = vpop.f32.mrb[22].mxu1 }
 0x701   : > { %6400 = vst [vmem:[%s11998_s10 + $0xa0] sm:$0xff] %v6368_v35  ;;  %v7192_v28 = vadd.f32 %v6315_v7, %v4736_v50  ;;  %v6317_v49 = vpop.f32.mrb[23].mxu1 }
 0x702   : > { %6401 = vst [vmem:[%s11998_s10 + $0xa8] sm:$0xff] %v6369_v54  ;;  %v7193_v25 = vadd.f32 %v6317_v49, %v4736_v50 }
 0x703   : > { %v6370_v62 = vmax.f32 %v7192_v28, 0.0 }
 0x704   : > { %v6371_v15 = vmax.f32 %v7193_v25, 0.0  ;;  %v6322_v39 = vpop.f32.mrb[24].mxu1 }
 0x705   : > { %6402 = vst [vmem:[%s11998_s10 + $0xb0] sm:$0xff] %v6370_v62  ;;  %v7194_v10 = vadd.f32 %v6322_v39, %v4741_v48  ;;  %v6324_v33 = vpop.f32.mrb[25].mxu1 }
 0x706   : > { %6403 = vst [vmem:[%s11998_s10 + $0xb8] sm:$0xff] %v6371_v15  ;;  %v7195_v27 = vadd.f32 %v6324_v33, %v4741_v48 }
 0x707   : > { %v6372_v57 = vmax.f32 %v7194_v10, 0.0 }
 0x708   : > { %v6373_v6 = vmax.f32 %v7195_v27, 0.0  ;;  %v6329_v19 = vpop.f32.mrb[26].mxu1 }
 0x709   : > { %6404 = vst [vmem:[%s11998_s10 + $0xc0] sm:$0xff] %v6372_v57  ;;  %v7196_v26 = vadd.f32 %v6329_v19, %v4746_v21  ;;  %v6331_v42 = vpop.f32.mrb[27].mxu1 }
 0x70a   : > { %6405 = vst [vmem:[%s11998_s10 + $0xc8] sm:$0xff] %v6373_v6  ;;  %v7197_v43 = vadd.f32 %v6331_v42, %v4746_v21 }
 0x70b   : > { %v6374_v4 = vmax.f32 %v7196_v26, 0.0 }
 0x70c   : > { %v6375_v24 = vmax.f32 %v7197_v43, 0.0  ;;  %v6336_v17 = vpop.f32.mrb[28].mxu1 }
 0x70d   : > { %6406 = vst [vmem:[%s11998_s10 + $0xd0] sm:$0xff] %v6374_v4  ;;  %v7198_v45 = vadd.f32 %v6336_v17, %v4751_v56  ;;  %v6338_v32 = vpop.f32.mrb[29].mxu1 }
 0x70e   : > { %6407 = vst [vmem:[%s11998_s10 + $0xd8] sm:$0xff] %v6375_v24  ;;  %v7199_v41 = vadd.f32 %v6338_v32, %v4751_v56 }
 0x70f   : > { %v6376_v30 = vmax.f32 %v7198_v45, 0.0 }
 0x710   : > { %v6377_v60 = vmax.f32 %v7199_v41, 0.0  ;;  %v6343_v47 = vpop.f32.mrb[30].mxu1 }
 0x711   : > { %6408 = vst [vmem:[%s11998_s10 + $0xe0] sm:$0xff] %v6376_v30  ;;  %v7200_v61 = vadd.f32 %v6343_v47, %v4756_v14  ;;  %v6345_v20 = vpop.f32.mrb[31].mxu1 }
 0x712   : > { %6409 = vst [vmem:[%s11998_s10 + $0xe8] sm:$0xff] %v6377_v60  ;;  %v7201_v38 = vadd.f32 %v6345_v20, %v4756_v14 }
 0x713   : > { %v6378_v29 = vmax.f32 %v7200_v61, 0.0 }
 0x714   : > { %v6379_v55 = vmax.f32 %v7201_v38, 0.0 }
 0x715   : > { %6410 = vst [vmem:[%s11998_s10 + $0xf0] sm:$0xff] %v6378_v29 }
 0x716   : > { %6411 = vst [vmem:[%s11998_s10 + $0xf8] sm:$0xff] %v6379_v55 }
 0x717   : > { %7705 = shalt.err (!%p7702_p13)
}
 0x718   : > { %s7706_s12 = scalar_lea.hbm %s12035_s20, 4096  ;;  %s7710_s21 = scalar_lea.hbm %s13207_s18, 8192 }
 0x719   : > { %p7707_p11 = scmp.ne.s32.totalorder %s12035_s20, %s7706_s12  ;;  %p7711_p7 = scmp.lt.u32.totalorder %s12035_s20, %s13207_s18 }
 0x71a   : > { %p7712_p3 = scmp.lt.u32.totalorder %s7710_s21, %s7706_s12  ;;  %p7714_p4 = scmp.lt.u32.totalorder %s7706_s12, %s12035_s20 }
 0x71b   : > { %p7708_p2 = pnand %p7707_p11, %p13208_p10 }
 0x71c   : > { %p7713_p0 = por %p7712_p3, %p7711_p7 }
 0x71d   : > { %p7709_p5 = pneg %p7708_p2 }
 0x71e   : > { %p7715_p8 = por %p7714_p4, %p7713_p0 }
 0x720   : > { %p7716_p9 = pnand %p7715_p8, %p7709_p5 }
 0x722   : > { %7719 = shalt.err (!%p7716_p9)
}
 0x723   : > { %s7788_s13 = smov 256   ;;  %s7789_s17 = smov 16  }
 0x724   : > { %7528 = dma.vmem_to_hbm [thread:$0]  (%p13208_p10), %s12037_s29, 4096, %s12035_s20, %s6413_s26, %s7788_s13, %s7788_s13, %s7789_s17  }
 0x725 PF: > { %s13209_s7 = sld [smem:[#allocation15_spill]]  ;;  %s13210_s9 = sld [smem:[#allocation20_spill]] }
 0x726   : > { %s13211_s22 = sld [smem:[#allocation17_spill]] }
 0x72b   : > { %s6443_s5 = sand.u32 1, %s13209_s7   ;;  %p13212_p12 = scmp.ne.s32.totalorder %s13210_s9, 0 }
 0x72c   : > { %p13213_p1 = scmp.ge.s32.totalorder %s13211_s22, 2  ;;  %s6444_s10 = scalar_lea.sflag [#allocation7], %s6443_s5 }
 0x72e   : > { %p7541_p6 = pnand %p13213_p1, %p13212_p12 }
 0x730   : > { %7753 = dma.done.wait (!%p7541_p6), %s6444_s10, 4096  }
 0x731   : > { %7755 = vsyncadd (!%p7541_p6), %s6444_s10, 4294963200  ;;  %s26_s28 = sadd.s32 1, %s13211_s22   ;;  %s13214_s6 = sld [smem:[#allocation16_spill]] }
 0x732   : > { %p23_p13 = scmp.ge.s32.totalorder %s26_s28, 4   ;;  %s13215_s25 = sld [smem:[#allocation19_spill]] }
 0x733   : > { %s13216_s11 = sld [smem:[#allocation18_spill]]  ;;  %s13217_s23 = smov %s7762_s24 }
 0x734   : > { %s13219_s26 = smov %s7774_s27  ;;  %25 = sbr.rel (!%p23_p13) target bundleno = 13 (0xd), region = 121 }
 0x737   : > { %s13218_s24 = smov %s13214_s6 }
 0x739   : > { %s13220_s27 = smov %s13216_s11 }
 0x73b   :  { %6449 = vsyncpa [#allocation6], 1 }
 0x73c   :  { %6451 = vsyncpa [#allocation6 + $0x1], 1 }
 0x73d   :  { %6452 = vsyncpa [#allocation9], 1 }
 0x73e   :  { %6454 = vsyncpa [#allocation9 + $0x1], 1 }
 0x73f   :  { %6455 = vsyncpa [#allocation7], 1 }
 0x740   :  { %6457 = vsyncpa [#allocation7 + $0x1], 1 }

</bundles_post_ra>
